<compile_context>
chip_gen: v7x
topology: tpu7x:2x2x1
jax: 0.10.0
libtpu: 0.0.40
codegen_flags: <defaults>
</compile_context>

<pallas_src>
import functools

import jax
import jax.numpy as jnp
from jax.experimental import pallas as pl
from jax.experimental.pallas import tpu as pltpu

# --- logical model dims (from the PyTorch module) ---
N_EMB = 100
BLOCK_LEN = 10
N_HEADS = 4
N_LAYERS = 4
HEAD_DIM = N_EMB // N_HEADS          # 25 (Head's "num_heads" ctor arg == head_size)
HIDDEN = 4 * N_EMB                   # 400
LN_EPS = 1e-5

# --- lane/sublane-padded dims used inside the kernel ---
C_PAD = 128                          # embedding channels 100 -> 128
D_PAD = 32                           # per-head dim        25 -> 32
HP_PAD = N_HEADS * D_PAD             # concat-heads width 100 -> 128
H_PAD = 512                          # FFN hidden         400 -> 512
BLOCK_PAD = 16                       # positional table rows 10 -> 16


def bigram_kernel(idx_ref, emb_ref, pos_ref,
                  wqkv_hbm, wproj_hbm, w1_hbm, w2_hbm,
                  bproj_ref, ln1g_ref, ln1b_ref, ln2g_ref, ln2b_ref,
                  b1_ref, b2_ref, lnfg_ref, lnfb_ref, wh_ref, bh_ref,
                  logits_ref,
                  wqkv_buf, wproj_buf, w1_buf, w2_buf, sems,
                  *, batch, seqlen):
    f32 = jnp.float32
    bf16 = jnp.bfloat16
    bt = batch * seqlen

    # ---- P4-style manual weight streaming: issue every per-layer DMA group up front ----
    # (layer 0 first so it lands first; each group is awaited right before its layer).
    copies = []
    for l in range(N_LAYERS):
        grp = [
            pltpu.make_async_copy(wqkv_hbm.at[l], wqkv_buf.at[l], sems.at[l, 0]),
            pltpu.make_async_copy(wproj_hbm.at[l], wproj_buf.at[l], sems.at[l, 1]),
            pltpu.make_async_copy(w1_hbm.at[l], w1_buf.at[l], sems.at[l, 2]),
            pltpu.make_async_copy(w2_hbm.at[l], w2_buf.at[l], sems.at[l, 3]),
        ]
        for c in grp:
            c.start()
        copies.append(grp)

    # ---- fused embedding lookup + positional add (overlaps the layer-0 weight DMA) ----
    vpad = emb_ref.shape[0]
    one_hot = (jax.lax.broadcasted_iota(jnp.int32, (bt, vpad), 1)
               == idx_ref[...]).astype(f32)
    tok = jnp.dot(one_hot, emb_ref[...], preferred_element_type=f32)      # (bt, C_PAD)
    x = (tok.reshape(batch, seqlen, C_PAD)
         + pos_ref[0:seqlen, :][None, :, :]).reshape(bt, C_PAD)

    # ---- constants hoisted out of the unrolled layer loop ----
    ch = jax.lax.broadcasted_iota(jnp.int32, (1, C_PAD), 1)
    cmask = (ch < N_EMB).astype(f32)
    inv_c = 1.0 / float(N_EMB)

    def layernorm(v, g, b):
        # v's padded channels are exactly zero, so sum/100 is the true mean.
        mu = jnp.sum(v, axis=-1, keepdims=True) * inv_c
        vc = (v - mu) * cmask                          # kill (0 - mu) in pad channels
        var = jnp.sum(vc * vc, axis=-1, keepdims=True) * inv_c
        return vc * jax.lax.rsqrt(var + LN_EPS) * g + b   # g,b zero-padded -> pad stays 0

    # Additive causal mask (finite -1e30, no -inf / vselect in the hot loop).
    row = jax.lax.broadcasted_iota(jnp.int32, (seqlen, seqlen), 0)
    col = jax.lax.broadcasted_iota(jnp.int32, (seqlen, seqlen), 1)
    att_mask = jnp.where(row >= col, 0.0, -1e30).astype(f32)[None, :, :]  # (1, T, T)

    scale = float(HEAD_DIM) ** -0.5          # PyTorch Head scales by head_size**-0.5

    def mm(a, w_bf16):                       # bf16 MXU inputs, f32 accumulation
        return jnp.dot(a.astype(bf16), w_bf16, preferred_element_type=f32)

    # Statically unrolled tiny layers (no grid -> no per-step overhead).
    for l in range(N_LAYERS):
        for c in copies[l]:
            c.wait()
        wqkv = wqkv_buf[l]                   # (C_PAD, 3*HP_PAD) bf16
        wproj = wproj_buf[l]                 # (HP_PAD, C_PAD)   bf16
        w1 = w1_buf[l]                       # (C_PAD, H_PAD)    bf16
        w2 = w2_buf[l]                       # (H_PAD, C_PAD)    bf16

        # ---- self-attention sublayer: x = x + Wproj(concat_heads(attn(LN1(x)))) ----
        h = layernorm(x, ln1g_ref[l], ln1b_ref[l])
        qkv = mm(h, wqkv)                                        # (bt, 3*HP_PAD)
        # 128-lane-aligned group slices (free), one reshape per group, bf16 operands.
        q_all = qkv[:, 0:HP_PAD].astype(bf16).reshape(batch, seqlen, HP_PAD)
        k_all = qkv[:, HP_PAD:2 * HP_PAD].astype(bf16).reshape(batch, seqlen, HP_PAD)
        v_all = qkv[:, 2 * HP_PAD:3 * HP_PAD].astype(bf16).reshape(batch, seqlen, HP_PAD)

        attn = jnp.zeros((bt, C_PAD), f32)
        for hi in range(N_HEADS):
            d0, d1 = hi * D_PAD, (hi + 1) * D_PAD
            q = q_all[:, :, d0:d1]                               # (B, T, D_PAD) bf16
            k = k_all[:, :, d0:d1]
            v = v_all[:, :, d0:d1]
            s = jnp.einsum('btd,bsd->bts', q, k,
                           preferred_element_type=f32) * scale + att_mask
            m = jnp.max(s, axis=-1, keepdims=True)
            p = jnp.exp(s - m)
            probs = p / jnp.sum(p, axis=-1, keepdims=True)       # exact softmax
            o = jnp.einsum('bts,bsd->btd', probs.astype(bf16), v,
                           preferred_element_type=f32)
            # Per-head output projection accumulation (replaces the lane concat).
            attn = attn + jnp.dot(o.reshape(bt, D_PAD).astype(bf16),
                                  wproj[d0:d1, :], preferred_element_type=f32)
        x = x + attn + bproj_ref[l]

        # ---- feed-forward sublayer: x = x + W2(relu(W1(LN2(x)))) ----
        h = layernorm(x, ln2g_ref[l], ln2b_ref[l])
        hdn = jnp.maximum(mm(h, w1) + b1_ref[l], 0.0)
        x = x + mm(hdn, w2) + b2_ref[l]

    # ---- final LayerNorm + LM head (lane-dense (bt, V_PAD) store) ----
    hf = layernorm(x, lnfg_ref[...], lnfb_ref[...])
    logits_ref[...] = mm(hf, wh_ref[...]) + bh_ref[...]


# ----------------------------------------------------------------------------
# Parameter construction (logical PyTorch-shaped params -> padded kernel params)
# ----------------------------------------------------------------------------
def init_params(key, vocab):
    ks = jax.random.split(key, 13)

    def nrm(k, shape, scale=0.1):
        return scale * jax.random.normal(k, shape, dtype=jnp.float32)

    L, H, C, D, Hid = N_LAYERS, N_HEADS, N_EMB, HEAD_DIM, HIDDEN
    return dict(
        emb=nrm(ks[0], (vocab, C)),
        pos=nrm(ks[1], (BLOCK_LEN, C)),
        wq=nrm(ks[2], (L, H, C, D)),
        wk=nrm(ks[3], (L, H, C, D)),
        wv=nrm(ks[4], (L, H, C, D)),
        wp=nrm(ks[5], (L, C, C)),          # proj on concat(heads): (in=C, out=C)
        bp=nrm(ks[6], (L, C), 0.02),
        ln1g=jnp.ones((L, C), jnp.float32),
        ln1b=jnp.zeros((L, C), jnp.float32),
        ln2g=jnp.ones((L, C), jnp.float32),
        ln2b=jnp.zeros((L, C), jnp.float32),
        w1=nrm(ks[7], (L, C, Hid)),
        b1=nrm(ks[8], (L, Hid), 0.02),
        w2=nrm(ks[9], (L, Hid, C)),
        b2=nrm(ks[10], (L, C), 0.02),
        lnfg=jnp.ones((C,), jnp.float32),
        lnfb=jnp.zeros((C,), jnp.float32),
        wh=nrm(ks[11], (C, vocab)),
        bh=nrm(ks[12], (vocab,), 0.02),
    )


def _pad_to(x, shape):
    pads = [(0, s - d) for d, s in zip(x.shape, shape)]
    return jnp.pad(x, pads)


def prepare_kernel_params(p):
    """Pad to lane-friendly sizes, stack/fuse per-layer weights, cast matmul weights to bf16."""
    V = p['wh'].shape[1]
    VP = ((V + 127) // 128) * 128
    L, H, C, D = N_LAYERS, N_HEADS, N_EMB, HEAD_DIM

    # Fused QKV: head hi occupies columns [hi*D_PAD, hi*D_PAD + D) of each q/k/v block.
    wqkv = jnp.zeros((L, C_PAD, 3 * HP_PAD), jnp.float32)
    for xi, w in enumerate((p['wq'], p['wk'], p['wv'])):        # each (L, H, C, D)
        for hi in range(H):
            c0 = xi * HP_PAD + hi * D_PAD
            wqkv = wqkv.at[:, :C, c0:c0 + D].set(w[:, hi])

    # Output projection rows laid out on the padded per-head layout.
    wproj = jnp.zeros((L, HP_PAD, C_PAD), jnp.float32)
    for hi in range(H):
        wproj = wproj.at[:, hi * D_PAD:hi * D_PAD + D, :C].set(
            p['wp'][:, hi * D:(hi + 1) * D, :])

    return dict(
        # f32 table: in-kernel one-hot gather is then exact row selection.
        emb=_pad_to(p['emb'], (VP, C_PAD)),
        pos=_pad_to(p['pos'], (BLOCK_PAD, C_PAD)),
        wqkv=wqkv.astype(jnp.bfloat16),
        wproj=wproj.astype(jnp.bfloat16),
        bproj=_pad_to(p['bp'], (L, C_PAD))[:, None, :],
        ln1g=_pad_to(p['ln1g'], (L, C_PAD))[:, None, :],
        ln1b=_pad_to(p['ln1b'], (L, C_PAD))[:, None, :],
        ln2g=_pad_to(p['ln2g'], (L, C_PAD))[:, None, :],
        ln2b=_pad_to(p['ln2b'], (L, C_PAD))[:, None, :],
        w1=_pad_to(p['w1'], (L, C_PAD, H_PAD)).astype(jnp.bfloat16),
        b1=_pad_to(p['b1'], (L, H_PAD))[:, None, :],
        w2=_pad_to(p['w2'], (L, H_PAD, C_PAD)).astype(jnp.bfloat16),
        b2=_pad_to(p['b2'], (L, C_PAD))[:, None, :],
        lnfg=_pad_to(p['lnfg'][None, :], (1, C_PAD)),
        lnfb=_pad_to(p['lnfb'][None, :], (1, C_PAD)),
        wh=_pad_to(p['wh'], (C_PAD, VP)).astype(jnp.bfloat16),
        bh=_pad_to(p['bh'][None, :], (1, VP)),
    )


# ----------------------------------------------------------------------------
# Forward wrapper
# ----------------------------------------------------------------------------
@functools.partial(jax.jit, static_argnames=('vocab',))
def bigram_forward(idx, kp, *, vocab):
    """Returns (logits, loss) with loss=None (targets not provided)."""
    B, T = idx.shape
    BT = B * T
    V_PAD = kp['wh'].shape[1]

    idx_col = idx.reshape(BT, 1).astype(jnp.int32)

    kern = functools.partial(bigram_kernel, batch=B, seqlen=T)
    vmem = pl.BlockSpec(memory_space=pltpu.MemorySpace.VMEM)
    hbm = pl.BlockSpec(memory_space=pl.ANY)      # big weight stacks: streamed manually

    # TODO(synk): if this is ever called with B*T >= 128 (v6e/v7x MXU fill, v7x dual-TC),
    #             add a leading row-block grid axis with dimension_semantics=("parallel",).
    logits = pl.pallas_call(
        kern,
        out_shape=jax.ShapeDtypeStruct((BT, V_PAD), jnp.float32),
        in_specs=[vmem, vmem, vmem,                 # idx, emb, pos
                  hbm, hbm, hbm, hbm,               # wqkv, wproj, w1, w2 (HBM, manual DMA)
                  vmem, vmem, vmem, vmem, vmem,     # bproj, ln1g, ln1b, ln2g, ln2b
                  vmem, vmem, vmem, vmem,           # b1, b2, lnfg, lnfb
                  vmem, vmem],                      # wh, bh
        out_specs=vmem,
        scratch_shapes=[
            pltpu.VMEM((N_LAYERS, C_PAD, 3 * HP_PAD), jnp.bfloat16),
            pltpu.VMEM((N_LAYERS, HP_PAD, C_PAD), jnp.bfloat16),
            pltpu.VMEM((N_LAYERS, C_PAD, H_PAD), jnp.bfloat16),
            pltpu.VMEM((N_LAYERS, H_PAD, C_PAD), jnp.bfloat16),
            pltpu.SemaphoreType.DMA((N_LAYERS, 4)),
        ],
    )(idx_col, kp['emb'], kp['pos'],
      kp['wqkv'], kp['wproj'], kp['w1'], kp['w2'],
      kp['bproj'], kp['ln1g'], kp['ln1b'], kp['ln2g'], kp['ln2b'],
      kp['b1'], kp['b2'], kp['lnfg'], kp['lnfb'], kp['wh'], kp['bh'])

    logits = logits.reshape(B, T, V_PAD)[:, :, :vocab]
    return logits, None


# ----------------------------------------------------------------------------
# Pure-JAX reference (PyTorch eval-mode semantics, bf16 weights / f32 accumulation
# on the unpadded logical weights; attention einsums kept in f32)
# ----------------------------------------------------------------------------
def _layernorm_ref(x, g, b):
    mu = jnp.mean(x, axis=-1, keepdims=True)
    xc = x - mu
    var = jnp.mean(xc * xc, axis=-1, keepdims=True)
    return xc * jax.lax.rsqrt(var + LN_EPS) * g + b


def bigram_reference(idx, params):
    B, T = idx.shape

    def mm(a, w):
        return jnp.dot(a.astype(jnp.bfloat16), w.astype(jnp.bfloat16),
                       preferred_element_type=jnp.float32)

    x = (params['emb'][idx] + params['pos'][:T][None]).astype(jnp.float32)
    causal = jnp.tril(jnp.ones((T, T), bool))[None]
    scale = float(HEAD_DIM) ** -0.5

    for l in range(N_LAYERS):
        h = _layernorm_ref(x, params['ln1g'][l], params['ln1b'][l])
        outs = []
        for hi in range(N_HEADS):
            q = mm(h, params['wq'][l, hi])
            k = mm(h, params['wk'][l, hi])
            v = mm(h, params['wv'][l, hi])
            wei = jnp.einsum('btd,bsd->bts', q, k) * scale
            wei = jnp.where(causal, wei, -jnp.inf)
            wei = jax.nn.softmax(wei, axis=-1)
            outs.append(jnp.einsum('bts,bsd->btd', wei, v))
        cat = jnp.concatenate(outs, axis=-1)
        x = x + mm(cat, params['wp'][l]) + params['bp'][l]
        h = _layernorm_ref(x, params['ln2g'][l], params['ln2b'][l])
        hdn = jnp.maximum(mm(h, params['w1'][l]) + params['b1'][l], 0.0)
        x = x + mm(hdn, params['w2'][l]) + params['b2'][l]

    x = _layernorm_ref(x, params['lnfg'], params['lnfb'])
    return mm(x, params['wh']) + params['bh']


if __name__ == "__main__":
    VOCAB = 65
    B, T = 2, 8                        # T <= block_length (10)

    key = jax.random.PRNGKey(0)
    pkey, ikey = jax.random.split(key)
    params = init_params(pkey, VOCAB)
    kparams = prepare_kernel_params(params)
    idx = jax.random.randint(ikey, (B, T), 0, VOCAB, dtype=jnp.int32)

    logits, loss = bigram_forward(idx, kparams, vocab=VOCAB)
    logits = jax.block_until_ready(logits)
    assert logits.shape == (B, T, VOCAB)
    assert loss is None

    ref = bigram_reference(idx, params)
    if not jnp.allclose(logits, ref, atol=5e-2, rtol=5e-2):
        max_err = float(jnp.max(jnp.abs(logits - ref)))
        raise AssertionError(
            f"Pallas kernel output mismatches JAX reference (max abs err {max_err:.4e})")

    print("KERNEL_OK")
</pallas_src>

<mosaic_0001>
module attributes {stable_mosaic.version = 11 : i64} {
  func.func @bigram_kernel(%arg0: memref<16x1xi32, #tpu.memory_space<vmem>>, %arg1: memref<128x128xf32, #tpu.memory_space<vmem>>, %arg2: memref<16x128xf32, #tpu.memory_space<vmem>>, %arg3: memref<4x128x384xbf16, #tpu.memory_space<any>>, %arg4: memref<4x128x128xbf16, #tpu.memory_space<any>>, %arg5: memref<4x128x512xbf16, #tpu.memory_space<any>>, %arg6: memref<4x512x128xbf16, #tpu.memory_space<any>>, %arg7: memref<4x1x128xf32, #tpu.memory_space<vmem>>, %arg8: memref<4x1x128xf32, #tpu.memory_space<vmem>>, %arg9: memref<4x1x128xf32, #tpu.memory_space<vmem>>, %arg10: memref<4x1x128xf32, #tpu.memory_space<vmem>>, %arg11: memref<4x1x128xf32, #tpu.memory_space<vmem>>, %arg12: memref<4x1x512xf32, #tpu.memory_space<vmem>>, %arg13: memref<4x1x128xf32, #tpu.memory_space<vmem>>, %arg14: memref<1x128xf32, #tpu.memory_space<vmem>>, %arg15: memref<1x128xf32, #tpu.memory_space<vmem>>, %arg16: memref<128x128xbf16, #tpu.memory_space<vmem>>, %arg17: memref<1x128xf32, #tpu.memory_space<vmem>>, %arg18: memref<16x128xf32, #tpu.memory_space<vmem>>, %arg19: memref<4x128x384xbf16, #tpu.memory_space<vmem>>, %arg20: memref<4x128x128xbf16, #tpu.memory_space<vmem>>, %arg21: memref<4x128x512xbf16, #tpu.memory_space<vmem>>, %arg22: memref<4x512x128xbf16, #tpu.memory_space<vmem>>, %arg23: memref<4x4x!tpu.dma_semaphore, #tpu.memory_space<semaphore_mem>>) attributes {dimension_semantics = [], scalar_prefetch = 0 : i64, scratch_operands = 5 : i64, tpu.core_type = #tpu.core_type<tc>} {
    %c0_i32 = arith.constant 0 : i32
    %c0_i32_0 = arith.constant 0 : i32
    %c0_i32_1 = arith.constant 0 : i32
    %c0_i32_2 = arith.constant 0 : i32
    %c0_i32_3 = arith.constant 0 : i32
    %c0_i32_4 = arith.constant 0 : i32
    %0 = tpu.memref_slice %arg3[%c0_i32, %c0_i32_3, %c0_i32_4] : memref<4x128x384xbf16, #tpu.memory_space<any>> -> memref<1x128x384xbf16, #tpu.memory_space<any>>
    %1 = tpu.memref_squeeze %0 : memref<1x128x384xbf16, #tpu.memory_space<any>> -> memref<128x384xbf16, #tpu.memory_space<any>>
    %c0_i32_5 = arith.constant 0 : i32
    %c0_i32_6 = arith.constant 0 : i32
    %2 = tpu.memref_slice %arg19[%c0_i32_0, %c0_i32_5, %c0_i32_6] : memref<4x128x384xbf16, #tpu.memory_space<vmem>> -> memref<1x128x384xbf16, #tpu.memory_space<vmem>>
    %3 = tpu.memref_squeeze %2 : memref<1x128x384xbf16, #tpu.memory_space<vmem>> -> memref<128x384xbf16, #tpu.memory_space<vmem>>
    %4 = tpu.memref_slice %arg23[%c0_i32_1, %c0_i32_2] : memref<4x4x!tpu.dma_semaphore, #tpu.memory_space<semaphore_mem>> -> memref<1x1x!tpu.dma_semaphore, #tpu.memory_space<semaphore_mem>>
    %5 = tpu.memref_squeeze %4 : memref<1x1x!tpu.dma_semaphore, #tpu.memory_space<semaphore_mem>> -> memref<!tpu.dma_semaphore, #tpu.memory_space<semaphore_mem>>
    tpu.enqueue_dma source(%1 : memref<128x384xbf16, #tpu.memory_space<any>>) target(%3 : memref<128x384xbf16, #tpu.memory_space<vmem>>) target_semaphore(%5 : memref<!tpu.dma_semaphore, #tpu.memory_space<semaphore_mem>>)
    %c0_i32_7 = arith.constant 0 : i32
    %c0_i32_8 = arith.constant 0 : i32
    %c0_i32_9 = arith.constant 0 : i32
    %c1_i32 = arith.constant 1 : i32
    %c0_i32_10 = arith.constant 0 : i32
    %c0_i32_11 = arith.constant 0 : i32
    %6 = tpu.memref_slice %arg4[%c0_i32_7, %c0_i32_10, %c0_i32_11] : memref<4x128x128xbf16, #tpu.memory_space<any>> -> memref<1x128x128xbf16, #tpu.memory_space<any>>
    %7 = tpu.memref_squeeze %6 : memref<1x128x128xbf16, #tpu.memory_space<any>> -> memref<128x128xbf16, #tpu.memory_space<any>>
    %c0_i32_12 = arith.constant 0 : i32
    %c0_i32_13 = arith.constant 0 : i32
    %8 = tpu.memref_slice %arg20[%c0_i32_8, %c0_i32_12, %c0_i32_13] : memref<4x128x128xbf16, #tpu.memory_space<vmem>> -> memref<1x128x128xbf16, #tpu.memory_space<vmem>>
    %9 = tpu.memref_squeeze %8 : memref<1x128x128xbf16, #tpu.memory_space<vmem>> -> memref<128x128xbf16, #tpu.memory_space<vmem>>
    %10 = tpu.memref_slice %arg23[%c0_i32_9, %c1_i32] : memref<4x4x!tpu.dma_semaphore, #tpu.memory_space<semaphore_mem>> -> memref<1x1x!tpu.dma_semaphore, #tpu.memory_space<semaphore_mem>>
    %11 = tpu.memref_squeeze %10 : memref<1x1x!tpu.dma_semaphore, #tpu.memory_space<semaphore_mem>> -> memref<!tpu.dma_semaphore, #tpu.memory_space<semaphore_mem>>
    tpu.enqueue_dma source(%7 : memref<128x128xbf16, #tpu.memory_space<any>>) target(%9 : memref<128x128xbf16, #tpu.memory_space<vmem>>) target_semaphore(%11 : memref<!tpu.dma_semaphore, #tpu.memory_space<semaphore_mem>>)
    %c0_i32_14 = arith.constant 0 : i32
    %c0_i32_15 = arith.constant 0 : i32
    %c0_i32_16 = arith.constant 0 : i32
    %c2_i32 = arith.constant 2 : i32
    %c0_i32_17 = arith.constant 0 : i32
    %c0_i32_18 = arith.constant 0 : i32
    %12 = tpu.memref_slice %arg5[%c0_i32_14, %c0_i32_17, %c0_i32_18] : memref<4x128x512xbf16, #tpu.memory_space<any>> -> memref<1x128x512xbf16, #tpu.memory_space<any>>
    %13 = tpu.memref_squeeze %12 : memref<1x128x512xbf16, #tpu.memory_space<any>> -> memref<128x512xbf16, #tpu.memory_space<any>>
    %c0_i32_19 = arith.constant 0 : i32
    %c0_i32_20 = arith.constant 0 : i32
    %14 = tpu.memref_slice %arg21[%c0_i32_15, %c0_i32_19, %c0_i32_20] : memref<4x128x512xbf16, #tpu.memory_space<vmem>> -> memref<1x128x512xbf16, #tpu.memory_space<vmem>>
    %15 = tpu.memref_squeeze %14 : memref<1x128x512xbf16, #tpu.memory_space<vmem>> -> memref<128x512xbf16, #tpu.memory_space<vmem>>
    %16 = tpu.memref_slice %arg23[%c0_i32_16, %c2_i32] : memref<4x4x!tpu.dma_semaphore, #tpu.memory_space<semaphore_mem>> -> memref<1x1x!tpu.dma_semaphore, #tpu.memory_space<semaphore_mem>>
    %17 = tpu.memref_squeeze %16 : memref<1x1x!tpu.dma_semaphore, #tpu.memory_space<semaphore_mem>> -> memref<!tpu.dma_semaphore, #tpu.memory_space<semaphore_mem>>
    tpu.enqueue_dma source(%13 : memref<128x512xbf16, #tpu.memory_space<any>>) target(%15 : memref<128x512xbf16, #tpu.memory_space<vmem>>) target_semaphore(%17 : memref<!tpu.dma_semaphore, #tpu.memory_space<semaphore_mem>>)
    %c0_i32_21 = arith.constant 0 : i32
    %c0_i32_22 = arith.constant 0 : i32
    %c0_i32_23 = arith.constant 0 : i32
    %c3_i32 = arith.constant 3 : i32
    %c0_i32_24 = arith.constant 0 : i32
    %c0_i32_25 = arith.constant 0 : i32
    %18 = tpu.memref_slice %arg6[%c0_i32_21, %c0_i32_24, %c0_i32_25] : memref<4x512x128xbf16, #tpu.memory_space<any>> -> memref<1x512x128xbf16, #tpu.memory_space<any>>
    %19 = tpu.memref_squeeze %18 : memref<1x512x128xbf16, #tpu.memory_space<any>> -> memref<512x128xbf16, #tpu.memory_space<any>>
    %c0_i32_26 = arith.constant 0 : i32
    %c0_i32_27 = arith.constant 0 : i32
    %20 = tpu.memref_slice %arg22[%c0_i32_22, %c0_i32_26, %c0_i32_27] : memref<4x512x128xbf16, #tpu.memory_space<vmem>> -> memref<1x512x128xbf16, #tpu.memory_space<vmem>>
    %21 = tpu.memref_squeeze %20 : memref<1x512x128xbf16, #tpu.memory_space<vmem>> -> memref<512x128xbf16, #tpu.memory_space<vmem>>
    %22 = tpu.memref_slice %arg23[%c0_i32_23, %c3_i32] : memref<4x4x!tpu.dma_semaphore, #tpu.memory_space<semaphore_mem>> -> memref<1x1x!tpu.dma_semaphore, #tpu.memory_space<semaphore_mem>>
    %23 = tpu.memref_squeeze %22 : memref<1x1x!tpu.dma_semaphore, #tpu.memory_space<semaphore_mem>> -> memref<!tpu.dma_semaphore, #tpu.memory_space<semaphore_mem>>
    tpu.enqueue_dma source(%19 : memref<512x128xbf16, #tpu.memory_space<any>>) target(%21 : memref<512x128xbf16, #tpu.memory_space<vmem>>) target_semaphore(%23 : memref<!tpu.dma_semaphore, #tpu.memory_space<semaphore_mem>>)
    %c1_i32_28 = arith.constant 1 : i32
    %c1_i32_29 = arith.constant 1 : i32
    %c1_i32_30 = arith.constant 1 : i32
    %c0_i32_31 = arith.constant 0 : i32
    %c0_i32_32 = arith.constant 0 : i32
    %c0_i32_33 = arith.constant 0 : i32
    %24 = tpu.memref_slice %arg3[%c1_i32_28, %c0_i32_32, %c0_i32_33] : memref<4x128x384xbf16, #tpu.memory_space<any>> -> memref<1x128x384xbf16, #tpu.memory_space<any>>
    %25 = tpu.memref_squeeze %24 : memref<1x128x384xbf16, #tpu.memory_space<any>> -> memref<128x384xbf16, #tpu.memory_space<any>>
    %c0_i32_34 = arith.constant 0 : i32
    %c0_i32_35 = arith.constant 0 : i32
    %26 = tpu.memref_slice %arg19[%c1_i32_29, %c0_i32_34, %c0_i32_35] : memref<4x128x384xbf16, #tpu.memory_space<vmem>> -> memref<1x128x384xbf16, #tpu.memory_space<vmem>>
    %27 = tpu.memref_squeeze %26 : memref<1x128x384xbf16, #tpu.memory_space<vmem>> -> memref<128x384xbf16, #tpu.memory_space<vmem>>
    %28 = tpu.memref_slice %arg23[%c1_i32_30, %c0_i32_31] : memref<4x4x!tpu.dma_semaphore, #tpu.memory_space<semaphore_mem>> -> memref<1x1x!tpu.dma_semaphore, #tpu.memory_space<semaphore_mem>>
    %29 = tpu.memref_squeeze %28 : memref<1x1x!tpu.dma_semaphore, #tpu.memory_space<semaphore_mem>> -> memref<!tpu.dma_semaphore, #tpu.memory_space<semaphore_mem>>
    tpu.enqueue_dma source(%25 : memref<128x384xbf16, #tpu.memory_space<any>>) target(%27 : memref<128x384xbf16, #tpu.memory_space<vmem>>) target_semaphore(%29 : memref<!tpu.dma_semaphore, #tpu.memory_space<semaphore_mem>>)
    %c1_i32_36 = arith.constant 1 : i32
    %c1_i32_37 = arith.constant 1 : i32
    %c1_i32_38 = arith.constant 1 : i32
    %c1_i32_39 = arith.constant 1 : i32
    %c0_i32_40 = arith.constant 0 : i32
    %c0_i32_41 = arith.constant 0 : i32
    %30 = tpu.memref_slice %arg4[%c1_i32_36, %c0_i32_40, %c0_i32_41] : memref<4x128x128xbf16, #tpu.memory_space<any>> -> memref<1x128x128xbf16, #tpu.memory_space<any>>
    %31 = tpu.memref_squeeze %30 : memref<1x128x128xbf16, #tpu.memory_space<any>> -> memref<128x128xbf16, #tpu.memory_space<any>>
    %c0_i32_42 = arith.constant 0 : i32
    %c0_i32_43 = arith.constant 0 : i32
    %32 = tpu.memref_slice %arg20[%c1_i32_37, %c0_i32_42, %c0_i32_43] : memref<4x128x128xbf16, #tpu.memory_space<vmem>> -> memref<1x128x128xbf16, #tpu.memory_space<vmem>>
    %33 = tpu.memref_squeeze %32 : memref<1x128x128xbf16, #tpu.memory_space<vmem>> -> memref<128x128xbf16, #tpu.memory_space<vmem>>
    %34 = tpu.memref_slice %arg23[%c1_i32_38, %c1_i32_39] : memref<4x4x!tpu.dma_semaphore, #tpu.memory_space<semaphore_mem>> -> memref<1x1x!tpu.dma_semaphore, #tpu.memory_space<semaphore_mem>>
    %35 = tpu.memref_squeeze %34 : memref<1x1x!tpu.dma_semaphore, #tpu.memory_space<semaphore_mem>> -> memref<!tpu.dma_semaphore, #tpu.memory_space<semaphore_mem>>
    tpu.enqueue_dma source(%31 : memref<128x128xbf16, #tpu.memory_space<any>>) target(%33 : memref<128x128xbf16, #tpu.memory_space<vmem>>) target_semaphore(%35 : memref<!tpu.dma_semaphore, #tpu.memory_space<semaphore_mem>>)
    %c1_i32_44 = arith.constant 1 : i32
    %c1_i32_45 = arith.constant 1 : i32
    %c1_i32_46 = arith.constant 1 : i32
    %c2_i32_47 = arith.constant 2 : i32
    %c0_i32_48 = arith.constant 0 : i32
    %c0_i32_49 = arith.constant 0 : i32
    %36 = tpu.memref_slice %arg5[%c1_i32_44, %c0_i32_48, %c0_i32_49] : memref<4x128x512xbf16, #tpu.memory_space<any>> -> memref<1x128x512xbf16, #tpu.memory_space<any>>
    %37 = tpu.memref_squeeze %36 : memref<1x128x512xbf16, #tpu.memory_space<any>> -> memref<128x512xbf16, #tpu.memory_space<any>>
    %c0_i32_50 = arith.constant 0 : i32
    %c0_i32_51 = arith.constant 0 : i32
    %38 = tpu.memref_slice %arg21[%c1_i32_45, %c0_i32_50, %c0_i32_51] : memref<4x128x512xbf16, #tpu.memory_space<vmem>> -> memref<1x128x512xbf16, #tpu.memory_space<vmem>>
    %39 = tpu.memref_squeeze %38 : memref<1x128x512xbf16, #tpu.memory_space<vmem>> -> memref<128x512xbf16, #tpu.memory_space<vmem>>
    %40 = tpu.memref_slice %arg23[%c1_i32_46, %c2_i32_47] : memref<4x4x!tpu.dma_semaphore, #tpu.memory_space<semaphore_mem>> -> memref<1x1x!tpu.dma_semaphore, #tpu.memory_space<semaphore_mem>>
    %41 = tpu.memref_squeeze %40 : memref<1x1x!tpu.dma_semaphore, #tpu.memory_space<semaphore_mem>> -> memref<!tpu.dma_semaphore, #tpu.memory_space<semaphore_mem>>
    tpu.enqueue_dma source(%37 : memref<128x512xbf16, #tpu.memory_space<any>>) target(%39 : memref<128x512xbf16, #tpu.memory_space<vmem>>) target_semaphore(%41 : memref<!tpu.dma_semaphore, #tpu.memory_space<semaphore_mem>>)
    %c1_i32_52 = arith.constant 1 : i32
    %c1_i32_53 = arith.constant 1 : i32
    %c1_i32_54 = arith.constant 1 : i32
    %c3_i32_55 = arith.constant 3 : i32
    %c0_i32_56 = arith.constant 0 : i32
    %c0_i32_57 = arith.constant 0 : i32
    %42 = tpu.memref_slice %arg6[%c1_i32_52, %c0_i32_56, %c0_i32_57] : memref<4x512x128xbf16, #tpu.memory_space<any>> -> memref<1x512x128xbf16, #tpu.memory_space<any>>
    %43 = tpu.memref_squeeze %42 : memref<1x512x128xbf16, #tpu.memory_space<any>> -> memref<512x128xbf16, #tpu.memory_space<any>>
    %c0_i32_58 = arith.constant 0 : i32
    %c0_i32_59 = arith.constant 0 : i32
    %44 = tpu.memref_slice %arg22[%c1_i32_53, %c0_i32_58, %c0_i32_59] : memref<4x512x128xbf16, #tpu.memory_space<vmem>> -> memref<1x512x128xbf16, #tpu.memory_space<vmem>>
    %45 = tpu.memref_squeeze %44 : memref<1x512x128xbf16, #tpu.memory_space<vmem>> -> memref<512x128xbf16, #tpu.memory_space<vmem>>
    %46 = tpu.memref_slice %arg23[%c1_i32_54, %c3_i32_55] : memref<4x4x!tpu.dma_semaphore, #tpu.memory_space<semaphore_mem>> -> memref<1x1x!tpu.dma_semaphore, #tpu.memory_space<semaphore_mem>>
    %47 = tpu.memref_squeeze %46 : memref<1x1x!tpu.dma_semaphore, #tpu.memory_space<semaphore_mem>> -> memref<!tpu.dma_semaphore, #tpu.memory_space<semaphore_mem>>
    tpu.enqueue_dma source(%43 : memref<512x128xbf16, #tpu.memory_space<any>>) target(%45 : memref<512x128xbf16, #tpu.memory_space<vmem>>) target_semaphore(%47 : memref<!tpu.dma_semaphore, #tpu.memory_space<semaphore_mem>>)
    %c2_i32_60 = arith.constant 2 : i32
    %c2_i32_61 = arith.constant 2 : i32
    %c2_i32_62 = arith.constant 2 : i32
    %c0_i32_63 = arith.constant 0 : i32
    %c0_i32_64 = arith.constant 0 : i32
    %c0_i32_65 = arith.constant 0 : i32
    %48 = tpu.memref_slice %arg3[%c2_i32_60, %c0_i32_64, %c0_i32_65] : memref<4x128x384xbf16, #tpu.memory_space<any>> -> memref<1x128x384xbf16, #tpu.memory_space<any>>
    %49 = tpu.memref_squeeze %48 : memref<1x128x384xbf16, #tpu.memory_space<any>> -> memref<128x384xbf16, #tpu.memory_space<any>>
    %c0_i32_66 = arith.constant 0 : i32
    %c0_i32_67 = arith.constant 0 : i32
    %50 = tpu.memref_slice %arg19[%c2_i32_61, %c0_i32_66, %c0_i32_67] : memref<4x128x384xbf16, #tpu.memory_space<vmem>> -> memref<1x128x384xbf16, #tpu.memory_space<vmem>>
    %51 = tpu.memref_squeeze %50 : memref<1x128x384xbf16, #tpu.memory_space<vmem>> -> memref<128x384xbf16, #tpu.memory_space<vmem>>
    %52 = tpu.memref_slice %arg23[%c2_i32_62, %c0_i32_63] : memref<4x4x!tpu.dma_semaphore, #tpu.memory_space<semaphore_mem>> -> memref<1x1x!tpu.dma_semaphore, #tpu.memory_space<semaphore_mem>>
    %53 = tpu.memref_squeeze %52 : memref<1x1x!tpu.dma_semaphore, #tpu.memory_space<semaphore_mem>> -> memref<!tpu.dma_semaphore, #tpu.memory_space<semaphore_mem>>
    tpu.enqueue_dma source(%49 : memref<128x384xbf16, #tpu.memory_space<any>>) target(%51 : memref<128x384xbf16, #tpu.memory_space<vmem>>) target_semaphore(%53 : memref<!tpu.dma_semaphore, #tpu.memory_space<semaphore_mem>>)
    %c2_i32_68 = arith.constant 2 : i32
    %c2_i32_69 = arith.constant 2 : i32
    %c2_i32_70 = arith.constant 2 : i32
    %c1_i32_71 = arith.constant 1 : i32
    %c0_i32_72 = arith.constant 0 : i32
    %c0_i32_73 = arith.constant 0 : i32
    %54 = tpu.memref_slice %arg4[%c2_i32_68, %c0_i32_72, %c0_i32_73] : memref<4x128x128xbf16, #tpu.memory_space<any>> -> memref<1x128x128xbf16, #tpu.memory_space<any>>
    %55 = tpu.memref_squeeze %54 : memref<1x128x128xbf16, #tpu.memory_space<any>> -> memref<128x128xbf16, #tpu.memory_space<any>>
    %c0_i32_74 = arith.constant 0 : i32
    %c0_i32_75 = arith.constant 0 : i32
    %56 = tpu.memref_slice %arg20[%c2_i32_69, %c0_i32_74, %c0_i32_75] : memref<4x128x128xbf16, #tpu.memory_space<vmem>> -> memref<1x128x128xbf16, #tpu.memory_space<vmem>>
    %57 = tpu.memref_squeeze %56 : memref<1x128x128xbf16, #tpu.memory_space<vmem>> -> memref<128x128xbf16, #tpu.memory_space<vmem>>
    %58 = tpu.memref_slice %arg23[%c2_i32_70, %c1_i32_71] : memref<4x4x!tpu.dma_semaphore, #tpu.memory_space<semaphore_mem>> -> memref<1x1x!tpu.dma_semaphore, #tpu.memory_space<semaphore_mem>>
    %59 = tpu.memref_squeeze %58 : memref<1x1x!tpu.dma_semaphore, #tpu.memory_space<semaphore_mem>> -> memref<!tpu.dma_semaphore, #tpu.memory_space<semaphore_mem>>
    tpu.enqueue_dma source(%55 : memref<128x128xbf16, #tpu.memory_space<any>>) target(%57 : memref<128x128xbf16, #tpu.memory_space<vmem>>) target_semaphore(%59 : memref<!tpu.dma_semaphore, #tpu.memory_space<semaphore_mem>>)
    %c2_i32_76 = arith.constant 2 : i32
    %c2_i32_77 = arith.constant 2 : i32
    %c2_i32_78 = arith.constant 2 : i32
    %c2_i32_79 = arith.constant 2 : i32
    %c0_i32_80 = arith.constant 0 : i32
    %c0_i32_81 = arith.constant 0 : i32
    %60 = tpu.memref_slice %arg5[%c2_i32_76, %c0_i32_80, %c0_i32_81] : memref<4x128x512xbf16, #tpu.memory_space<any>> -> memref<1x128x512xbf16, #tpu.memory_space<any>>
    %61 = tpu.memref_squeeze %60 : memref<1x128x512xbf16, #tpu.memory_space<any>> -> memref<128x512xbf16, #tpu.memory_space<any>>
    %c0_i32_82 = arith.constant 0 : i32
    %c0_i32_83 = arith.constant 0 : i32
    %62 = tpu.memref_slice %arg21[%c2_i32_77, %c0_i32_82, %c0_i32_83] : memref<4x128x512xbf16, #tpu.memory_space<vmem>> -> memref<1x128x512xbf16, #tpu.memory_space<vmem>>
    %63 = tpu.memref_squeeze %62 : memref<1x128x512xbf16, #tpu.memory_space<vmem>> -> memref<128x512xbf16, #tpu.memory_space<vmem>>
    %64 = tpu.memref_slice %arg23[%c2_i32_78, %c2_i32_79] : memref<4x4x!tpu.dma_semaphore, #tpu.memory_space<semaphore_mem>> -> memref<1x1x!tpu.dma_semaphore, #tpu.memory_space<semaphore_mem>>
    %65 = tpu.memref_squeeze %64 : memref<1x1x!tpu.dma_semaphore, #tpu.memory_space<semaphore_mem>> -> memref<!tpu.dma_semaphore, #tpu.memory_space<semaphore_mem>>
    tpu.enqueue_dma source(%61 : memref<128x512xbf16, #tpu.memory_space<any>>) target(%63 : memref<128x512xbf16, #tpu.memory_space<vmem>>) target_semaphore(%65 : memref<!tpu.dma_semaphore, #tpu.memory_space<semaphore_mem>>)
    %c2_i32_84 = arith.constant 2 : i32
    %c2_i32_85 = arith.constant 2 : i32
    %c2_i32_86 = arith.constant 2 : i32
    %c3_i32_87 = arith.constant 3 : i32
    %c0_i32_88 = arith.constant 0 : i32
    %c0_i32_89 = arith.constant 0 : i32
    %66 = tpu.memref_slice %arg6[%c2_i32_84, %c0_i32_88, %c0_i32_89] : memref<4x512x128xbf16, #tpu.memory_space<any>> -> memref<1x512x128xbf16, #tpu.memory_space<any>>
    %67 = tpu.memref_squeeze %66 : memref<1x512x128xbf16, #tpu.memory_space<any>> -> memref<512x128xbf16, #tpu.memory_space<any>>
    %c0_i32_90 = arith.constant 0 : i32
    %c0_i32_91 = arith.constant 0 : i32
    %68 = tpu.memref_slice %arg22[%c2_i32_85, %c0_i32_90, %c0_i32_91] : memref<4x512x128xbf16, #tpu.memory_space<vmem>> -> memref<1x512x128xbf16, #tpu.memory_space<vmem>>
    %69 = tpu.memref_squeeze %68 : memref<1x512x128xbf16, #tpu.memory_space<vmem>> -> memref<512x128xbf16, #tpu.memory_space<vmem>>
    %70 = tpu.memref_slice %arg23[%c2_i32_86, %c3_i32_87] : memref<4x4x!tpu.dma_semaphore, #tpu.memory_space<semaphore_mem>> -> memref<1x1x!tpu.dma_semaphore, #tpu.memory_space<semaphore_mem>>
    %71 = tpu.memref_squeeze %70 : memref<1x1x!tpu.dma_semaphore, #tpu.memory_space<semaphore_mem>> -> memref<!tpu.dma_semaphore, #tpu.memory_space<semaphore_mem>>
    tpu.enqueue_dma source(%67 : memref<512x128xbf16, #tpu.memory_space<any>>) target(%69 : memref<512x128xbf16, #tpu.memory_space<vmem>>) target_semaphore(%71 : memref<!tpu.dma_semaphore, #tpu.memory_space<semaphore_mem>>)
    %c3_i32_92 = arith.constant 3 : i32
    %c3_i32_93 = arith.constant 3 : i32
    %c3_i32_94 = arith.constant 3 : i32
    %c0_i32_95 = arith.constant 0 : i32
    %c0_i32_96 = arith.constant 0 : i32
    %c0_i32_97 = arith.constant 0 : i32
    %72 = tpu.memref_slice %arg3[%c3_i32_92, %c0_i32_96, %c0_i32_97] : memref<4x128x384xbf16, #tpu.memory_space<any>> -> memref<1x128x384xbf16, #tpu.memory_space<any>>
    %73 = tpu.memref_squeeze %72 : memref<1x128x384xbf16, #tpu.memory_space<any>> -> memref<128x384xbf16, #tpu.memory_space<any>>
    %c0_i32_98 = arith.constant 0 : i32
    %c0_i32_99 = arith.constant 0 : i32
    %74 = tpu.memref_slice %arg19[%c3_i32_93, %c0_i32_98, %c0_i32_99] : memref<4x128x384xbf16, #tpu.memory_space<vmem>> -> memref<1x128x384xbf16, #tpu.memory_space<vmem>>
    %75 = tpu.memref_squeeze %74 : memref<1x128x384xbf16, #tpu.memory_space<vmem>> -> memref<128x384xbf16, #tpu.memory_space<vmem>>
    %76 = tpu.memref_slice %arg23[%c3_i32_94, %c0_i32_95] : memref<4x4x!tpu.dma_semaphore, #tpu.memory_space<semaphore_mem>> -> memref<1x1x!tpu.dma_semaphore, #tpu.memory_space<semaphore_mem>>
    %77 = tpu.memref_squeeze %76 : memref<1x1x!tpu.dma_semaphore, #tpu.memory_space<semaphore_mem>> -> memref<!tpu.dma_semaphore, #tpu.memory_space<semaphore_mem>>
    tpu.enqueue_dma source(%73 : memref<128x384xbf16, #tpu.memory_space<any>>) target(%75 : memref<128x384xbf16, #tpu.memory_space<vmem>>) target_semaphore(%77 : memref<!tpu.dma_semaphore, #tpu.memory_space<semaphore_mem>>)
    %c3_i32_100 = arith.constant 3 : i32
    %c3_i32_101 = arith.constant 3 : i32
    %c3_i32_102 = arith.constant 3 : i32
    %c1_i32_103 = arith.constant 1 : i32
    %c0_i32_104 = arith.constant 0 : i32
    %c0_i32_105 = arith.constant 0 : i32
    %78 = tpu.memref_slice %arg4[%c3_i32_100, %c0_i32_104, %c0_i32_105] : memref<4x128x128xbf16, #tpu.memory_space<any>> -> memref<1x128x128xbf16, #tpu.memory_space<any>>
    %79 = tpu.memref_squeeze %78 : memref<1x128x128xbf16, #tpu.memory_space<any>> -> memref<128x128xbf16, #tpu.memory_space<any>>
    %c0_i32_106 = arith.constant 0 : i32
    %c0_i32_107 = arith.constant 0 : i32
    %80 = tpu.memref_slice %arg20[%c3_i32_101, %c0_i32_106, %c0_i32_107] : memref<4x128x128xbf16, #tpu.memory_space<vmem>> -> memref<1x128x128xbf16, #tpu.memory_space<vmem>>
    %81 = tpu.memref_squeeze %80 : memref<1x128x128xbf16, #tpu.memory_space<vmem>> -> memref<128x128xbf16, #tpu.memory_space<vmem>>
    %82 = tpu.memref_slice %arg23[%c3_i32_102, %c1_i32_103] : memref<4x4x!tpu.dma_semaphore, #tpu.memory_space<semaphore_mem>> -> memref<1x1x!tpu.dma_semaphore, #tpu.memory_space<semaphore_mem>>
    %83 = tpu.memref_squeeze %82 : memref<1x1x!tpu.dma_semaphore, #tpu.memory_space<semaphore_mem>> -> memref<!tpu.dma_semaphore, #tpu.memory_space<semaphore_mem>>
    tpu.enqueue_dma source(%79 : memref<128x128xbf16, #tpu.memory_space<any>>) target(%81 : memref<128x128xbf16, #tpu.memory_space<vmem>>) target_semaphore(%83 : memref<!tpu.dma_semaphore, #tpu.memory_space<semaphore_mem>>)
    %c3_i32_108 = arith.constant 3 : i32
    %c3_i32_109 = arith.constant 3 : i32
    %c3_i32_110 = arith.constant 3 : i32
    %c2_i32_111 = arith.constant 2 : i32
    %c0_i32_112 = arith.constant 0 : i32
    %c0_i32_113 = arith.constant 0 : i32
    %84 = tpu.memref_slice %arg5[%c3_i32_108, %c0_i32_112, %c0_i32_113] : memref<4x128x512xbf16, #tpu.memory_space<any>> -> memref<1x128x512xbf16, #tpu.memory_space<any>>
    %85 = tpu.memref_squeeze %84 : memref<1x128x512xbf16, #tpu.memory_space<any>> -> memref<128x512xbf16, #tpu.memory_space<any>>
    %c0_i32_114 = arith.constant 0 : i32
    %c0_i32_115 = arith.constant 0 : i32
    %86 = tpu.memref_slice %arg21[%c3_i32_109, %c0_i32_114, %c0_i32_115] : memref<4x128x512xbf16, #tpu.memory_space<vmem>> -> memref<1x128x512xbf16, #tpu.memory_space<vmem>>
    %87 = tpu.memref_squeeze %86 : memref<1x128x512xbf16, #tpu.memory_space<vmem>> -> memref<128x512xbf16, #tpu.memory_space<vmem>>
    %88 = tpu.memref_slice %arg23[%c3_i32_110, %c2_i32_111] : memref<4x4x!tpu.dma_semaphore, #tpu.memory_space<semaphore_mem>> -> memref<1x1x!tpu.dma_semaphore, #tpu.memory_space<semaphore_mem>>
    %89 = tpu.memref_squeeze %88 : memref<1x1x!tpu.dma_semaphore, #tpu.memory_space<semaphore_mem>> -> memref<!tpu.dma_semaphore, #tpu.memory_space<semaphore_mem>>
    tpu.enqueue_dma source(%85 : memref<128x512xbf16, #tpu.memory_space<any>>) target(%87 : memref<128x512xbf16, #tpu.memory_space<vmem>>) target_semaphore(%89 : memref<!tpu.dma_semaphore, #tpu.memory_space<semaphore_mem>>)
    %c3_i32_116 = arith.constant 3 : i32
    %c3_i32_117 = arith.constant 3 : i32
    %c3_i32_118 = arith.constant 3 : i32
    %c3_i32_119 = arith.constant 3 : i32
    %c0_i32_120 = arith.constant 0 : i32
    %c0_i32_121 = arith.constant 0 : i32
    %90 = tpu.memref_slice %arg6[%c3_i32_116, %c0_i32_120, %c0_i32_121] : memref<4x512x128xbf16, #tpu.memory_space<any>> -> memref<1x512x128xbf16, #tpu.memory_space<any>>
    %91 = tpu.memref_squeeze %90 : memref<1x512x128xbf16, #tpu.memory_space<any>> -> memref<512x128xbf16, #tpu.memory_space<any>>
    %c0_i32_122 = arith.constant 0 : i32
    %c0_i32_123 = arith.constant 0 : i32
    %92 = tpu.memref_slice %arg22[%c3_i32_117, %c0_i32_122, %c0_i32_123] : memref<4x512x128xbf16, #tpu.memory_space<vmem>> -> memref<1x512x128xbf16, #tpu.memory_space<vmem>>
    %93 = tpu.memref_squeeze %92 : memref<1x512x128xbf16, #tpu.memory_space<vmem>> -> memref<512x128xbf16, #tpu.memory_space<vmem>>
    %94 = tpu.memref_slice %arg23[%c3_i32_118, %c3_i32_119] : memref<4x4x!tpu.dma_semaphore, #tpu.memory_space<semaphore_mem>> -> memref<1x1x!tpu.dma_semaphore, #tpu.memory_space<semaphore_mem>>
    %95 = tpu.memref_squeeze %94 : memref<1x1x!tpu.dma_semaphore, #tpu.memory_space<semaphore_mem>> -> memref<!tpu.dma_semaphore, #tpu.memory_space<semaphore_mem>>
    tpu.enqueue_dma source(%91 : memref<512x128xbf16, #tpu.memory_space<any>>) target(%93 : memref<512x128xbf16, #tpu.memory_space<vmem>>) target_semaphore(%95 : memref<!tpu.dma_semaphore, #tpu.memory_space<semaphore_mem>>)
    %96 = tpu.iota {dimensions = array<i32: 1>} : vector<16x128xi32>
    %c0 = arith.constant 0 : index
    %c0_124 = arith.constant 0 : index
    %97 = vector.load %arg0[%c0, %c0_124] : memref<16x1xi32, #tpu.memory_space<vmem>>, vector<16x1xi32>
    %98 = vector.broadcast %97 : vector<16x1xi32> to vector<16x128xi32>
    %99 = arith.cmpi eq, %96, %98 : vector<16x128xi32>
    %100 = arith.extui %99 : vector<16x128xi1> to vector<16x128xi32>
    %101 = arith.sitofp %100 : vector<16x128xi32> to vector<16x128xf32>
    %c0_125 = arith.constant 0 : index
    %c0_126 = arith.constant 0 : index
    %102 = vector.load %arg1[%c0_125, %c0_126] : memref<128x128xf32, #tpu.memory_space<vmem>>, vector<128x128xf32>
    %cst = arith.constant dense<0.000000e+00> : vector<16x128xf32>
    %103 = tpu.matmul %101, %102, %cst {dimension_numbers = #tpu.dot_dimension_numbers<[1], [0], [0], [1], [0, 0, 1, 1], [], []>} : vector<16x128xf32>, vector<128x128xf32>, vector<16x128xf32> -> vector<16x128xf32>
    %104 = vector.shape_cast %103 : vector<16x128xf32> to vector<2x8x128xf32>
    %c0_127 = arith.constant 0 : index
    %c0_128 = arith.constant 0 : index
    %105 = vector.load %arg2[%c0_127, %c0_128] : memref<16x128xf32, #tpu.memory_space<vmem>>, vector<8x128xf32>
    %106 = vector.shape_cast %105 : vector<8x128xf32> to vector<1x8x128xf32>
    %107 = vector.broadcast %106 : vector<1x8x128xf32> to vector<2x8x128xf32>
    %108 = arith.addf %104, %107 : vector<2x8x128xf32>
    %109 = vector.shape_cast %108 : vector<2x8x128xf32> to vector<16x128xf32>
    %110 = tpu.iota {dimensions = array<i32: 1>} : vector<1x128xi32>
    %c100_i32 = arith.constant 100 : i32
    %111 = vector.broadcast %c100_i32 : i32 to vector<1x128xi32>
    %112 = arith.cmpi slt, %110, %111 : vector<1x128xi32>
    %113 = arith.extui %112 : vector<1x128xi1> to vector<1x128xi32>
    %114 = arith.sitofp %113 : vector<1x128xi32> to vector<1x128xf32>
    %115 = tpu.iota {dimensions = array<i32: 0>} : vector<8x8xi32>
    %116 = tpu.iota {dimensions = array<i32: 1>} : vector<8x8xi32>
    %117 = arith.cmpi sge, %115, %116 : vector<8x8xi32>
    %cst_129 = arith.constant 0.000000e+00 : f32
    %cst_130 = arith.constant -1.000000e+30 : f32
    %118 = vector.broadcast %cst_129 : f32 to vector<8x8xf32>
    %119 = vector.broadcast %cst_130 : f32 to vector<8x8xf32>
    %120 = arith.select %117, %118, %119 : vector<8x8xi1>, vector<8x8xf32>
    %121 = vector.shape_cast %120 : vector<8x8xf32> to vector<1x8x8xf32>
    %c0_i32_131 = arith.constant 0 : i32
    %c0_i32_132 = arith.constant 0 : i32
    %c0_i32_133 = arith.constant 0 : i32
    %c0_i32_134 = arith.constant 0 : i32
    %c0_i32_135 = arith.constant 0 : i32
    %c0_i32_136 = arith.constant 0 : i32
    %122 = tpu.memref_slice %arg3[%c0_i32_131, %c0_i32_135, %c0_i32_136] : memref<4x128x384xbf16, #tpu.memory_space<any>> -> memref<1x128x384xbf16, #tpu.memory_space<any>>
    %123 = tpu.memref_squeeze %122 : memref<1x128x384xbf16, #tpu.memory_space<any>> -> memref<128x384xbf16, #tpu.memory_space<any>>
    %c0_i32_137 = arith.constant 0 : i32
    %c0_i32_138 = arith.constant 0 : i32
    %124 = tpu.memref_slice %arg19[%c0_i32_132, %c0_i32_137, %c0_i32_138] : memref<4x128x384xbf16, #tpu.memory_space<vmem>> -> memref<1x128x384xbf16, #tpu.memory_space<vmem>>
    %125 = tpu.memref_squeeze %124 : memref<1x128x384xbf16, #tpu.memory_space<vmem>> -> memref<128x384xbf16, #tpu.memory_space<vmem>>
    %126 = tpu.memref_slice %arg23[%c0_i32_133, %c0_i32_134] : memref<4x4x!tpu.dma_semaphore, #tpu.memory_space<semaphore_mem>> -> memref<1x1x!tpu.dma_semaphore, #tpu.memory_space<semaphore_mem>>
    %127 = tpu.memref_squeeze %126 : memref<1x1x!tpu.dma_semaphore, #tpu.memory_space<semaphore_mem>> -> memref<!tpu.dma_semaphore, #tpu.memory_space<semaphore_mem>>
    tpu.wait_dma2 semaphore(%127 : memref<!tpu.dma_semaphore, #tpu.memory_space<semaphore_mem>>) src(%123 : memref<128x384xbf16, #tpu.memory_space<any>>) dst(%125 : memref<128x384xbf16, #tpu.memory_space<vmem>>)
    %c0_i32_139 = arith.constant 0 : i32
    %c0_i32_140 = arith.constant 0 : i32
    %c0_i32_141 = arith.constant 0 : i32
    %c1_i32_142 = arith.constant 1 : i32
    %c0_i32_143 = arith.constant 0 : i32
    %c0_i32_144 = arith.constant 0 : i32
    %128 = tpu.memref_slice %arg4[%c0_i32_139, %c0_i32_143, %c0_i32_144] : memref<4x128x128xbf16, #tpu.memory_space<any>> -> memref<1x128x128xbf16, #tpu.memory_space<any>>
    %129 = tpu.memref_squeeze %128 : memref<1x128x128xbf16, #tpu.memory_space<any>> -> memref<128x128xbf16, #tpu.memory_space<any>>
    %c0_i32_145 = arith.constant 0 : i32
    %c0_i32_146 = arith.constant 0 : i32
    %130 = tpu.memref_slice %arg20[%c0_i32_140, %c0_i32_145, %c0_i32_146] : memref<4x128x128xbf16, #tpu.memory_space<vmem>> -> memref<1x128x128xbf16, #tpu.memory_space<vmem>>
    %131 = tpu.memref_squeeze %130 : memref<1x128x128xbf16, #tpu.memory_space<vmem>> -> memref<128x128xbf16, #tpu.memory_space<vmem>>
    %132 = tpu.memref_slice %arg23[%c0_i32_141, %c1_i32_142] : memref<4x4x!tpu.dma_semaphore, #tpu.memory_space<semaphore_mem>> -> memref<1x1x!tpu.dma_semaphore, #tpu.memory_space<semaphore_mem>>
    %133 = tpu.memref_squeeze %132 : memref<1x1x!tpu.dma_semaphore, #tpu.memory_space<semaphore_mem>> -> memref<!tpu.dma_semaphore, #tpu.memory_space<semaphore_mem>>
    tpu.wait_dma2 semaphore(%133 : memref<!tpu.dma_semaphore, #tpu.memory_space<semaphore_mem>>) src(%129 : memref<128x128xbf16, #tpu.memory_space<any>>) dst(%131 : memref<128x128xbf16, #tpu.memory_space<vmem>>)
    %c0_i32_147 = arith.constant 0 : i32
    %c0_i32_148 = arith.constant 0 : i32
    %c0_i32_149 = arith.constant 0 : i32
    %c2_i32_150 = arith.constant 2 : i32
    %c0_i32_151 = arith.constant 0 : i32
    %c0_i32_152 = arith.constant 0 : i32
    %134 = tpu.memref_slice %arg5[%c0_i32_147, %c0_i32_151, %c0_i32_152] : memref<4x128x512xbf16, #tpu.memory_space<any>> -> memref<1x128x512xbf16, #tpu.memory_space<any>>
    %135 = tpu.memref_squeeze %134 : memref<1x128x512xbf16, #tpu.memory_space<any>> -> memref<128x512xbf16, #tpu.memory_space<any>>
    %c0_i32_153 = arith.constant 0 : i32
    %c0_i32_154 = arith.constant 0 : i32
    %136 = tpu.memref_slice %arg21[%c0_i32_148, %c0_i32_153, %c0_i32_154] : memref<4x128x512xbf16, #tpu.memory_space<vmem>> -> memref<1x128x512xbf16, #tpu.memory_space<vmem>>
    %137 = tpu.memref_squeeze %136 : memref<1x128x512xbf16, #tpu.memory_space<vmem>> -> memref<128x512xbf16, #tpu.memory_space<vmem>>
    %138 = tpu.memref_slice %arg23[%c0_i32_149, %c2_i32_150] : memref<4x4x!tpu.dma_semaphore, #tpu.memory_space<semaphore_mem>> -> memref<1x1x!tpu.dma_semaphore, #tpu.memory_space<semaphore_mem>>
    %139 = tpu.memref_squeeze %138 : memref<1x1x!tpu.dma_semaphore, #tpu.memory_space<semaphore_mem>> -> memref<!tpu.dma_semaphore, #tpu.memory_space<semaphore_mem>>
    tpu.wait_dma2 semaphore(%139 : memref<!tpu.dma_semaphore, #tpu.memory_space<semaphore_mem>>) src(%135 : memref<128x512xbf16, #tpu.memory_space<any>>) dst(%137 : memref<128x512xbf16, #tpu.memory_space<vmem>>)
    %c0_i32_155 = arith.constant 0 : i32
    %c0_i32_156 = arith.constant 0 : i32
    %c0_i32_157 = arith.constant 0 : i32
    %c3_i32_158 = arith.constant 3 : i32
    %c0_i32_159 = arith.constant 0 : i32
    %c0_i32_160 = arith.constant 0 : i32
    %140 = tpu.memref_slice %arg6[%c0_i32_155, %c0_i32_159, %c0_i32_160] : memref<4x512x128xbf16, #tpu.memory_space<any>> -> memref<1x512x128xbf16, #tpu.memory_space<any>>
    %141 = tpu.memref_squeeze %140 : memref<1x512x128xbf16, #tpu.memory_space<any>> -> memref<512x128xbf16, #tpu.memory_space<any>>
    %c0_i32_161 = arith.constant 0 : i32
    %c0_i32_162 = arith.constant 0 : i32
    %142 = tpu.memref_slice %arg22[%c0_i32_156, %c0_i32_161, %c0_i32_162] : memref<4x512x128xbf16, #tpu.memory_space<vmem>> -> memref<1x512x128xbf16, #tpu.memory_space<vmem>>
    %143 = tpu.memref_squeeze %142 : memref<1x512x128xbf16, #tpu.memory_space<vmem>> -> memref<512x128xbf16, #tpu.memory_space<vmem>>
    %144 = tpu.memref_slice %arg23[%c0_i32_157, %c3_i32_158] : memref<4x4x!tpu.dma_semaphore, #tpu.memory_space<semaphore_mem>> -> memref<1x1x!tpu.dma_semaphore, #tpu.memory_space<semaphore_mem>>
    %145 = tpu.memref_squeeze %144 : memref<1x1x!tpu.dma_semaphore, #tpu.memory_space<semaphore_mem>> -> memref<!tpu.dma_semaphore, #tpu.memory_space<semaphore_mem>>
    tpu.wait_dma2 semaphore(%145 : memref<!tpu.dma_semaphore, #tpu.memory_space<semaphore_mem>>) src(%141 : memref<512x128xbf16, #tpu.memory_space<any>>) dst(%143 : memref<512x128xbf16, #tpu.memory_space<vmem>>)
    %c0_163 = arith.constant 0 : index
    %c0_164 = arith.constant 0 : index
    %c0_165 = arith.constant 0 : index
    %146 = vector.load %arg19[%c0_163, %c0_164, %c0_165] : memref<4x128x384xbf16, #tpu.memory_space<vmem>>, vector<1x128x384xbf16>
    %147 = vector.shape_cast %146 : vector<1x128x384xbf16> to vector<128x384xbf16>
    %c0_166 = arith.constant 0 : index
    %c0_167 = arith.constant 0 : index
    %c0_168 = arith.constant 0 : index
    %148 = vector.load %arg20[%c0_166, %c0_167, %c0_168] : memref<4x128x128xbf16, #tpu.memory_space<vmem>>, vector<1x128x128xbf16>
    %149 = vector.shape_cast %148 : vector<1x128x128xbf16> to vector<128x128xbf16>
    %c0_169 = arith.constant 0 : index
    %c0_170 = arith.constant 0 : index
    %c0_171 = arith.constant 0 : index
    %150 = vector.load %arg21[%c0_169, %c0_170, %c0_171] : memref<4x128x512xbf16, #tpu.memory_space<vmem>>, vector<1x128x512xbf16>
    %151 = vector.shape_cast %150 : vector<1x128x512xbf16> to vector<128x512xbf16>
    %c0_172 = arith.constant 0 : index
    %c0_173 = arith.constant 0 : index
    %c0_174 = arith.constant 0 : index
    %152 = vector.load %arg22[%c0_172, %c0_173, %c0_174] : memref<4x512x128xbf16, #tpu.memory_space<vmem>>, vector<1x512x128xbf16>
    %153 = vector.shape_cast %152 : vector<1x512x128xbf16> to vector<512x128xbf16>
    %c0_175 = arith.constant 0 : index
    %c0_176 = arith.constant 0 : index
    %c0_177 = arith.constant 0 : index
    %154 = vector.load %arg8[%c0_175, %c0_176, %c0_177] : memref<4x1x128xf32, #tpu.memory_space<vmem>>, vector<1x1x128xf32>
    %155 = vector.shape_cast %154 : vector<1x1x128xf32> to vector<1x128xf32>
    %c0_178 = arith.constant 0 : index
    %c0_179 = arith.constant 0 : index
    %c0_180 = arith.constant 0 : index
    %156 = vector.load %arg9[%c0_178, %c0_179, %c0_180] : memref<4x1x128xf32, #tpu.memory_space<vmem>>, vector<1x1x128xf32>
    %157 = vector.shape_cast %156 : vector<1x1x128xf32> to vector<1x128xf32>
    %cst_181 = arith.constant dense<0.000000e+00> : vector<16xf32>
    %158 = vector.multi_reduction <add>, %109, %cst_181 [1] : vector<16x128xf32> to vector<16xf32>
    %159 = vector.shape_cast %158 : vector<16xf32> to vector<16x1xf32>
    %cst_182 = arith.constant 0.00999999977 : f32
    %160 = vector.broadcast %cst_182 : f32 to vector<16x1xf32>
    %161 = arith.mulf %159, %160 : vector<16x1xf32>
    %162 = vector.broadcast %161 : vector<16x1xf32> to vector<16x128xf32>
    %163 = arith.subf %109, %162 : vector<16x128xf32>
    %164 = vector.broadcast %114 : vector<1x128xf32> to vector<16x128xf32>
    %165 = arith.mulf %163, %164 : vector<16x128xf32>
    %166 = arith.mulf %165, %165 : vector<16x128xf32>
    %cst_183 = arith.constant dense<0.000000e+00> : vector<16xf32>
    %167 = vector.multi_reduction <add>, %166, %cst_183 [1] : vector<16x128xf32> to vector<16xf32>
    %168 = vector.shape_cast %167 : vector<16xf32> to vector<16x1xf32>
    %cst_184 = arith.constant 0.00999999977 : f32
    %169 = vector.broadcast %cst_184 : f32 to vector<16x1xf32>
    %170 = arith.mulf %168, %169 : vector<16x1xf32>
    %cst_185 = arith.constant 9.99999974E-6 : f32
    %171 = vector.broadcast %cst_185 : f32 to vector<16x1xf32>
    %172 = arith.addf %170, %171 : vector<16x1xf32>
    %173 = math.rsqrt %172 : vector<16x1xf32>
    %174 = vector.broadcast %173 : vector<16x1xf32> to vector<16x128xf32>
    %175 = arith.mulf %165, %174 : vector<16x128xf32>
    %176 = vector.broadcast %155 : vector<1x128xf32> to vector<16x128xf32>
    %177 = arith.mulf %175, %176 : vector<16x128xf32>
    %178 = vector.broadcast %157 : vector<1x128xf32> to vector<16x128xf32>
    %179 = arith.addf %177, %178 : vector<16x128xf32>
    %180 = arith.truncf %179 : vector<16x128xf32> to vector<16x128xbf16>
    %cst_186 = arith.constant dense<0.000000e+00> : vector<16x384xf32>
    %181 = tpu.matmul %180, %147, %cst_186 {dimension_numbers = #tpu.dot_dimension_numbers<[1], [0], [0], [1], [0, 0, 1, 1], [], []>} : vector<16x128xbf16>, vector<128x384xbf16>, vector<16x384xf32> -> vector<16x384xf32>
    %182 = vector.extract_strided_slice %181 {offsets = [0, 0], sizes = [16, 128], strides = [1, 1]} : vector<16x384xf32> to vector<16x128xf32>
    %183 = arith.truncf %182 : vector<16x128xf32> to vector<16x128xbf16>
    %184 = vector.shape_cast %183 : vector<16x128xbf16> to vector<2x8x128xbf16>
    %185 = vector.extract_strided_slice %181 {offsets = [0, 128], sizes = [16, 128], strides = [1, 1]} : vector<16x384xf32> to vector<16x128xf32>
    %186 = arith.truncf %185 : vector<16x128xf32> to vector<16x128xbf16>
    %187 = vector.shape_cast %186 : vector<16x128xbf16> to vector<2x8x128xbf16>
    %188 = vector.extract_strided_slice %181 {offsets = [0, 256], sizes = [16, 128], strides = [1, 1]} : vector<16x384xf32> to vector<16x128xf32>
    %189 = arith.truncf %188 : vector<16x128xf32> to vector<16x128xbf16>
    %190 = vector.shape_cast %189 : vector<16x128xbf16> to vector<2x8x128xbf16>
    %cst_187 = arith.constant 0.000000e+00 : f32
    %191 = vector.broadcast %cst_187 : f32 to vector<16x128xf32>
    %192 = vector.extract_strided_slice %184 {offsets = [0, 0, 0], sizes = [2, 8, 32], strides = [1, 1, 1]} : vector<2x8x128xbf16> to vector<2x8x32xbf16>
    %193 = vector.extract_strided_slice %187 {offsets = [0, 0, 0], sizes = [2, 8, 32], strides = [1, 1, 1]} : vector<2x8x128xbf16> to vector<2x8x32xbf16>
    %194 = vector.extract_strided_slice %190 {offsets = [0, 0, 0], sizes = [2, 8, 32], strides = [1, 1, 1]} : vector<2x8x128xbf16> to vector<2x8x32xbf16>
    "tpu.trace_start"() <{level = 10 : i32, message = "btd,bsd->bts"}> : () -> ()
    %cst_188 = arith.constant dense<0.000000e+00> : vector<2x8x8xf32>
    %195 = tpu.matmul %192, %193, %cst_188 {dimension_numbers = #tpu.dot_dimension_numbers<[2], [2], [1], [1], [0, 0, 0, 1, 1, 1], [0], [0]>} : vector<2x8x32xbf16>, vector<2x8x32xbf16>, vector<2x8x8xf32> -> vector<2x8x8xf32>
    "tpu.trace_stop"() : () -> ()
    %cst_189 = arith.constant 2.000000e-01 : f32
    %196 = vector.broadcast %cst_189 : f32 to vector<2x8x8xf32>
    %197 = arith.mulf %195, %196 : vector<2x8x8xf32>
    %198 = vector.broadcast %121 : vector<1x8x8xf32> to vector<2x8x8xf32>
    %199 = arith.addf %197, %198 : vector<2x8x8xf32>
    %cst_190 = arith.constant dense<0xFF800000> : vector<2x8xf32>
    %200 = vector.multi_reduction <maximumf>, %199, %cst_190 [2] : vector<2x8x8xf32> to vector<2x8xf32>
    %201 = vector.shape_cast %200 : vector<2x8xf32> to vector<2x8x1xf32>
    %202 = vector.broadcast %201 : vector<2x8x1xf32> to vector<2x8x8xf32>
    %203 = arith.subf %199, %202 : vector<2x8x8xf32>
    %204 = math.exp %203 : vector<2x8x8xf32>
    %cst_191 = arith.constant dense<0.000000e+00> : vector<2x8xf32>
    %205 = vector.multi_reduction <add>, %204, %cst_191 [2] : vector<2x8x8xf32> to vector<2x8xf32>
    %206 = vector.shape_cast %205 : vector<2x8xf32> to vector<2x8x1xf32>
    %207 = vector.broadcast %206 : vector<2x8x1xf32> to vector<2x8x8xf32>
    %208 = arith.divf %204, %207 : vector<2x8x8xf32>
    %209 = arith.truncf %208 : vector<2x8x8xf32> to vector<2x8x8xbf16>
    "tpu.trace_start"() <{level = 10 : i32, message = "bts,bsd->btd"}> : () -> ()
    %cst_192 = arith.constant dense<0.000000e+00> : vector<2x8x32xf32>
    %210 = tpu.matmul %209, %194, %cst_192 {dimension_numbers = #tpu.dot_dimension_numbers<[2], [1], [1], [2], [0, 0, 0, 1, 1, 2], [0], [0]>} : vector<2x8x8xbf16>, vector<2x8x32xbf16>, vector<2x8x32xf32> -> vector<2x8x32xf32>
    "tpu.trace_stop"() : () -> ()
    %211 = vector.shape_cast %210 : vector<2x8x32xf32> to vector<16x32xf32>
    %212 = arith.truncf %211 : vector<16x32xf32> to vector<16x32xbf16>
    %213 = vector.extract_strided_slice %149 {offsets = [0, 0], sizes = [32, 128], strides = [1, 1]} : vector<128x128xbf16> to vector<32x128xbf16>
    %cst_193 = arith.constant dense<0.000000e+00> : vector<16x128xf32>
    %214 = tpu.matmul %212, %213, %cst_193 {dimension_numbers = #tpu.dot_dimension_numbers<[1], [0], [0], [1], [0, 0, 1, 1], [], []>} : vector<16x32xbf16>, vector<32x128xbf16>, vector<16x128xf32> -> vector<16x128xf32>
    %215 = arith.addf %191, %214 : vector<16x128xf32>
    %216 = vector.extract_strided_slice %184 {offsets = [0, 0, 32], sizes = [2, 8, 32], strides = [1, 1, 1]} : vector<2x8x128xbf16> to vector<2x8x32xbf16>
    %217 = vector.extract_strided_slice %187 {offsets = [0, 0, 32], sizes = [2, 8, 32], strides = [1, 1, 1]} : vector<2x8x128xbf16> to vector<2x8x32xbf16>
    %218 = vector.extract_strided_slice %190 {offsets = [0, 0, 32], sizes = [2, 8, 32], strides = [1, 1, 1]} : vector<2x8x128xbf16> to vector<2x8x32xbf16>
    "tpu.trace_start"() <{level = 10 : i32, message = "btd,bsd->bts"}> : () -> ()
    %cst_194 = arith.constant dense<0.000000e+00> : vector<2x8x8xf32>
    %219 = tpu.matmul %216, %217, %cst_194 {dimension_numbers = #tpu.dot_dimension_numbers<[2], [2], [1], [1], [0, 0, 0, 1, 1, 1], [0], [0]>} : vector<2x8x32xbf16>, vector<2x8x32xbf16>, vector<2x8x8xf32> -> vector<2x8x8xf32>
    "tpu.trace_stop"() : () -> ()
    %cst_195 = arith.constant 2.000000e-01 : f32
    %220 = vector.broadcast %cst_195 : f32 to vector<2x8x8xf32>
    %221 = arith.mulf %219, %220 : vector<2x8x8xf32>
    %222 = vector.broadcast %121 : vector<1x8x8xf32> to vector<2x8x8xf32>
    %223 = arith.addf %221, %222 : vector<2x8x8xf32>
    %cst_196 = arith.constant dense<0xFF800000> : vector<2x8xf32>
    %224 = vector.multi_reduction <maximumf>, %223, %cst_196 [2] : vector<2x8x8xf32> to vector<2x8xf32>
    %225 = vector.shape_cast %224 : vector<2x8xf32> to vector<2x8x1xf32>
    %226 = vector.broadcast %225 : vector<2x8x1xf32> to vector<2x8x8xf32>
    %227 = arith.subf %223, %226 : vector<2x8x8xf32>
    %228 = math.exp %227 : vector<2x8x8xf32>
    %cst_197 = arith.constant dense<0.000000e+00> : vector<2x8xf32>
    %229 = vector.multi_reduction <add>, %228, %cst_197 [2] : vector<2x8x8xf32> to vector<2x8xf32>
    %230 = vector.shape_cast %229 : vector<2x8xf32> to vector<2x8x1xf32>
    %231 = vector.broadcast %230 : vector<2x8x1xf32> to vector<2x8x8xf32>
    %232 = arith.divf %228, %231 : vector<2x8x8xf32>
    %233 = arith.truncf %232 : vector<2x8x8xf32> to vector<2x8x8xbf16>
    "tpu.trace_start"() <{level = 10 : i32, message = "bts,bsd->btd"}> : () -> ()
    %cst_198 = arith.constant dense<0.000000e+00> : vector<2x8x32xf32>
    %234 = tpu.matmul %233, %218, %cst_198 {dimension_numbers = #tpu.dot_dimension_numbers<[2], [1], [1], [2], [0, 0, 0, 1, 1, 2], [0], [0]>} : vector<2x8x8xbf16>, vector<2x8x32xbf16>, vector<2x8x32xf32> -> vector<2x8x32xf32>
    "tpu.trace_stop"() : () -> ()
    %235 = vector.shape_cast %234 : vector<2x8x32xf32> to vector<16x32xf32>
    %236 = arith.truncf %235 : vector<16x32xf32> to vector<16x32xbf16>
    %237 = vector.extract_strided_slice %149 {offsets = [32, 0], sizes = [32, 128], strides = [1, 1]} : vector<128x128xbf16> to vector<32x128xbf16>
    %cst_199 = arith.constant dense<0.000000e+00> : vector<16x128xf32>
    %238 = tpu.matmul %236, %237, %cst_199 {dimension_numbers = #tpu.dot_dimension_numbers<[1], [0], [0], [1], [0, 0, 1, 1], [], []>} : vector<16x32xbf16>, vector<32x128xbf16>, vector<16x128xf32> -> vector<16x128xf32>
    %239 = arith.addf %215, %238 : vector<16x128xf32>
    %240 = vector.extract_strided_slice %184 {offsets = [0, 0, 64], sizes = [2, 8, 32], strides = [1, 1, 1]} : vector<2x8x128xbf16> to vector<2x8x32xbf16>
    %241 = vector.extract_strided_slice %187 {offsets = [0, 0, 64], sizes = [2, 8, 32], strides = [1, 1, 1]} : vector<2x8x128xbf16> to vector<2x8x32xbf16>
    %242 = vector.extract_strided_slice %190 {offsets = [0, 0, 64], sizes = [2, 8, 32], strides = [1, 1, 1]} : vector<2x8x128xbf16> to vector<2x8x32xbf16>
    "tpu.trace_start"() <{level = 10 : i32, message = "btd,bsd->bts"}> : () -> ()
    %cst_200 = arith.constant dense<0.000000e+00> : vector<2x8x8xf32>
    %243 = tpu.matmul %240, %241, %cst_200 {dimension_numbers = #tpu.dot_dimension_numbers<[2], [2], [1], [1], [0, 0, 0, 1, 1, 1], [0], [0]>} : vector<2x8x32xbf16>, vector<2x8x32xbf16>, vector<2x8x8xf32> -> vector<2x8x8xf32>
    "tpu.trace_stop"() : () -> ()
    %cst_201 = arith.constant 2.000000e-01 : f32
    %244 = vector.broadcast %cst_201 : f32 to vector<2x8x8xf32>
    %245 = arith.mulf %243, %244 : vector<2x8x8xf32>
    %246 = vector.broadcast %121 : vector<1x8x8xf32> to vector<2x8x8xf32>
    %247 = arith.addf %245, %246 : vector<2x8x8xf32>
    %cst_202 = arith.constant dense<0xFF800000> : vector<2x8xf32>
    %248 = vector.multi_reduction <maximumf>, %247, %cst_202 [2] : vector<2x8x8xf32> to vector<2x8xf32>
    %249 = vector.shape_cast %248 : vector<2x8xf32> to vector<2x8x1xf32>
    %250 = vector.broadcast %249 : vector<2x8x1xf32> to vector<2x8x8xf32>
    %251 = arith.subf %247, %250 : vector<2x8x8xf32>
    %252 = math.exp %251 : vector<2x8x8xf32>
    %cst_203 = arith.constant dense<0.000000e+00> : vector<2x8xf32>
    %253 = vector.multi_reduction <add>, %252, %cst_203 [2] : vector<2x8x8xf32> to vector<2x8xf32>
    %254 = vector.shape_cast %253 : vector<2x8xf32> to vector<2x8x1xf32>
    %255 = vector.broadcast %254 : vector<2x8x1xf32> to vector<2x8x8xf32>
    %256 = arith.divf %252, %255 : vector<2x8x8xf32>
    %257 = arith.truncf %256 : vector<2x8x8xf32> to vector<2x8x8xbf16>
    "tpu.trace_start"() <{level = 10 : i32, message = "bts,bsd->btd"}> : () -> ()
    %cst_204 = arith.constant dense<0.000000e+00> : vector<2x8x32xf32>
    %258 = tpu.matmul %257, %242, %cst_204 {dimension_numbers = #tpu.dot_dimension_numbers<[2], [1], [1], [2], [0, 0, 0, 1, 1, 2], [0], [0]>} : vector<2x8x8xbf16>, vector<2x8x32xbf16>, vector<2x8x32xf32> -> vector<2x8x32xf32>
    "tpu.trace_stop"() : () -> ()
    %259 = vector.shape_cast %258 : vector<2x8x32xf32> to vector<16x32xf32>
    %260 = arith.truncf %259 : vector<16x32xf32> to vector<16x32xbf16>
    %261 = vector.extract_strided_slice %149 {offsets = [64, 0], sizes = [32, 128], strides = [1, 1]} : vector<128x128xbf16> to vector<32x128xbf16>
    %cst_205 = arith.constant dense<0.000000e+00> : vector<16x128xf32>
    %262 = tpu.matmul %260, %261, %cst_205 {dimension_numbers = #tpu.dot_dimension_numbers<[1], [0], [0], [1], [0, 0, 1, 1], [], []>} : vector<16x32xbf16>, vector<32x128xbf16>, vector<16x128xf32> -> vector<16x128xf32>
    %263 = arith.addf %239, %262 : vector<16x128xf32>
    %264 = vector.extract_strided_slice %184 {offsets = [0, 0, 96], sizes = [2, 8, 32], strides = [1, 1, 1]} : vector<2x8x128xbf16> to vector<2x8x32xbf16>
    %265 = vector.extract_strided_slice %187 {offsets = [0, 0, 96], sizes = [2, 8, 32], strides = [1, 1, 1]} : vector<2x8x128xbf16> to vector<2x8x32xbf16>
    %266 = vector.extract_strided_slice %190 {offsets = [0, 0, 96], sizes = [2, 8, 32], strides = [1, 1, 1]} : vector<2x8x128xbf16> to vector<2x8x32xbf16>
    "tpu.trace_start"() <{level = 10 : i32, message = "btd,bsd->bts"}> : () -> ()
    %cst_206 = arith.constant dense<0.000000e+00> : vector<2x8x8xf32>
    %267 = tpu.matmul %264, %265, %cst_206 {dimension_numbers = #tpu.dot_dimension_numbers<[2], [2], [1], [1], [0, 0, 0, 1, 1, 1], [0], [0]>} : vector<2x8x32xbf16>, vector<2x8x32xbf16>, vector<2x8x8xf32> -> vector<2x8x8xf32>
    "tpu.trace_stop"() : () -> ()
    %cst_207 = arith.constant 2.000000e-01 : f32
    %268 = vector.broadcast %cst_207 : f32 to vector<2x8x8xf32>
    %269 = arith.mulf %267, %268 : vector<2x8x8xf32>
    %270 = vector.broadcast %121 : vector<1x8x8xf32> to vector<2x8x8xf32>
    %271 = arith.addf %269, %270 : vector<2x8x8xf32>
    %cst_208 = arith.constant dense<0xFF800000> : vector<2x8xf32>
    %272 = vector.multi_reduction <maximumf>, %271, %cst_208 [2] : vector<2x8x8xf32> to vector<2x8xf32>
    %273 = vector.shape_cast %272 : vector<2x8xf32> to vector<2x8x1xf32>
    %274 = vector.broadcast %273 : vector<2x8x1xf32> to vector<2x8x8xf32>
    %275 = arith.subf %271, %274 : vector<2x8x8xf32>
    %276 = math.exp %275 : vector<2x8x8xf32>
    %cst_209 = arith.constant dense<0.000000e+00> : vector<2x8xf32>
    %277 = vector.multi_reduction <add>, %276, %cst_209 [2] : vector<2x8x8xf32> to vector<2x8xf32>
    %278 = vector.shape_cast %277 : vector<2x8xf32> to vector<2x8x1xf32>
    %279 = vector.broadcast %278 : vector<2x8x1xf32> to vector<2x8x8xf32>
    %280 = arith.divf %276, %279 : vector<2x8x8xf32>
    %281 = arith.truncf %280 : vector<2x8x8xf32> to vector<2x8x8xbf16>
    "tpu.trace_start"() <{level = 10 : i32, message = "bts,bsd->btd"}> : () -> ()
    %cst_210 = arith.constant dense<0.000000e+00> : vector<2x8x32xf32>
    %282 = tpu.matmul %281, %266, %cst_210 {dimension_numbers = #tpu.dot_dimension_numbers<[2], [1], [1], [2], [0, 0, 0, 1, 1, 2], [0], [0]>} : vector<2x8x8xbf16>, vector<2x8x32xbf16>, vector<2x8x32xf32> -> vector<2x8x32xf32>
    "tpu.trace_stop"() : () -> ()
    %283 = vector.shape_cast %282 : vector<2x8x32xf32> to vector<16x32xf32>
    %284 = arith.truncf %283 : vector<16x32xf32> to vector<16x32xbf16>
    %285 = vector.extract_strided_slice %149 {offsets = [96, 0], sizes = [32, 128], strides = [1, 1]} : vector<128x128xbf16> to vector<32x128xbf16>
    %cst_211 = arith.constant dense<0.000000e+00> : vector<16x128xf32>
    %286 = tpu.matmul %284, %285, %cst_211 {dimension_numbers = #tpu.dot_dimension_numbers<[1], [0], [0], [1], [0, 0, 1, 1], [], []>} : vector<16x32xbf16>, vector<32x128xbf16>, vector<16x128xf32> -> vector<16x128xf32>
    %287 = arith.addf %263, %286 : vector<16x128xf32>
    %288 = arith.addf %109, %287 : vector<16x128xf32>
    %c0_212 = arith.constant 0 : index
    %c0_213 = arith.constant 0 : index
    %c0_214 = arith.constant 0 : index
    %289 = vector.load %arg7[%c0_212, %c0_213, %c0_214] : memref<4x1x128xf32, #tpu.memory_space<vmem>>, vector<1x1x128xf32>
    %290 = vector.shape_cast %289 : vector<1x1x128xf32> to vector<1x128xf32>
    %291 = vector.broadcast %290 : vector<1x128xf32> to vector<16x128xf32>
    %292 = arith.addf %288, %291 : vector<16x128xf32>
    %c0_215 = arith.constant 0 : index
    %c0_216 = arith.constant 0 : index
    %c0_217 = arith.constant 0 : index
    %293 = vector.load %arg10[%c0_215, %c0_216, %c0_217] : memref<4x1x128xf32, #tpu.memory_space<vmem>>, vector<1x1x128xf32>
    %294 = vector.shape_cast %293 : vector<1x1x128xf32> to vector<1x128xf32>
    %c0_218 = arith.constant 0 : index
    %c0_219 = arith.constant 0 : index
    %c0_220 = arith.constant 0 : index
    %295 = vector.load %arg11[%c0_218, %c0_219, %c0_220] : memref<4x1x128xf32, #tpu.memory_space<vmem>>, vector<1x1x128xf32>
    %296 = vector.shape_cast %295 : vector<1x1x128xf32> to vector<1x128xf32>
    %cst_221 = arith.constant dense<0.000000e+00> : vector<16xf32>
    %297 = vector.multi_reduction <add>, %292, %cst_221 [1] : vector<16x128xf32> to vector<16xf32>
    %298 = vector.shape_cast %297 : vector<16xf32> to vector<16x1xf32>
    %cst_222 = arith.constant 0.00999999977 : f32
    %299 = vector.broadcast %cst_222 : f32 to vector<16x1xf32>
    %300 = arith.mulf %298, %299 : vector<16x1xf32>
    %301 = vector.broadcast %300 : vector<16x1xf32> to vector<16x128xf32>
    %302 = arith.subf %292, %301 : vector<16x128xf32>
    %303 = vector.broadcast %114 : vector<1x128xf32> to vector<16x128xf32>
    %304 = arith.mulf %302, %303 : vector<16x128xf32>
    %305 = arith.mulf %304, %304 : vector<16x128xf32>
    %cst_223 = arith.constant dense<0.000000e+00> : vector<16xf32>
    %306 = vector.multi_reduction <add>, %305, %cst_223 [1] : vector<16x128xf32> to vector<16xf32>
    %307 = vector.shape_cast %306 : vector<16xf32> to vector<16x1xf32>
    %cst_224 = arith.constant 0.00999999977 : f32
    %308 = vector.broadcast %cst_224 : f32 to vector<16x1xf32>
    %309 = arith.mulf %307, %308 : vector<16x1xf32>
    %cst_225 = arith.constant 9.99999974E-6 : f32
    %310 = vector.broadcast %cst_225 : f32 to vector<16x1xf32>
    %311 = arith.addf %309, %310 : vector<16x1xf32>
    %312 = math.rsqrt %311 : vector<16x1xf32>
    %313 = vector.broadcast %312 : vector<16x1xf32> to vector<16x128xf32>
    %314 = arith.mulf %304, %313 : vector<16x128xf32>
    %315 = vector.broadcast %294 : vector<1x128xf32> to vector<16x128xf32>
    %316 = arith.mulf %314, %315 : vector<16x128xf32>
    %317 = vector.broadcast %296 : vector<1x128xf32> to vector<16x128xf32>
    %318 = arith.addf %316, %317 : vector<16x128xf32>
    %319 = arith.truncf %318 : vector<16x128xf32> to vector<16x128xbf16>
    %cst_226 = arith.constant dense<0.000000e+00> : vector<16x512xf32>
    %320 = tpu.matmul %319, %151, %cst_226 {dimension_numbers = #tpu.dot_dimension_numbers<[1], [0], [0], [1], [0, 0, 1, 1], [], []>} : vector<16x128xbf16>, vector<128x512xbf16>, vector<16x512xf32> -> vector<16x512xf32>
    %c0_227 = arith.constant 0 : index
    %c0_228 = arith.constant 0 : index
    %c0_229 = arith.constant 0 : index
    %321 = vector.load %arg12[%c0_227, %c0_228, %c0_229] : memref<4x1x512xf32, #tpu.memory_space<vmem>>, vector<1x1x512xf32>
    %322 = vector.shape_cast %321 : vector<1x1x512xf32> to vector<1x512xf32>
    %323 = vector.broadcast %322 : vector<1x512xf32> to vector<16x512xf32>
    %324 = arith.addf %320, %323 : vector<16x512xf32>
    %cst_230 = arith.constant 0.000000e+00 : f32
    %325 = vector.broadcast %cst_230 : f32 to vector<16x512xf32>
    %326 = arith.maximumf %324, %325 : vector<16x512xf32>
    %327 = arith.truncf %326 : vector<16x512xf32> to vector<16x512xbf16>
    %cst_231 = arith.constant dense<0.000000e+00> : vector<16x128xf32>
    %328 = tpu.matmul %327, %153, %cst_231 {dimension_numbers = #tpu.dot_dimension_numbers<[1], [0], [0], [1], [0, 0, 1, 1], [], []>} : vector<16x512xbf16>, vector<512x128xbf16>, vector<16x128xf32> -> vector<16x128xf32>
    %329 = arith.addf %292, %328 : vector<16x128xf32>
    %c0_232 = arith.constant 0 : index
    %c0_233 = arith.constant 0 : index
    %c0_234 = arith.constant 0 : index
    %330 = vector.load %arg13[%c0_232, %c0_233, %c0_234] : memref<4x1x128xf32, #tpu.memory_space<vmem>>, vector<1x1x128xf32>
    %331 = vector.shape_cast %330 : vector<1x1x128xf32> to vector<1x128xf32>
    %332 = vector.broadcast %331 : vector<1x128xf32> to vector<16x128xf32>
    %333 = arith.addf %329, %332 : vector<16x128xf32>
    %c1_i32_235 = arith.constant 1 : i32
    %c1_i32_236 = arith.constant 1 : i32
    %c1_i32_237 = arith.constant 1 : i32
    %c0_i32_238 = arith.constant 0 : i32
    %c0_i32_239 = arith.constant 0 : i32
    %c0_i32_240 = arith.constant 0 : i32
    %334 = tpu.memref_slice %arg3[%c1_i32_235, %c0_i32_239, %c0_i32_240] : memref<4x128x384xbf16, #tpu.memory_space<any>> -> memref<1x128x384xbf16, #tpu.memory_space<any>>
    %335 = tpu.memref_squeeze %334 : memref<1x128x384xbf16, #tpu.memory_space<any>> -> memref<128x384xbf16, #tpu.memory_space<any>>
    %c0_i32_241 = arith.constant 0 : i32
    %c0_i32_242 = arith.constant 0 : i32
    %336 = tpu.memref_slice %arg19[%c1_i32_236, %c0_i32_241, %c0_i32_242] : memref<4x128x384xbf16, #tpu.memory_space<vmem>> -> memref<1x128x384xbf16, #tpu.memory_space<vmem>>
    %337 = tpu.memref_squeeze %336 : memref<1x128x384xbf16, #tpu.memory_space<vmem>> -> memref<128x384xbf16, #tpu.memory_space<vmem>>
    %338 = tpu.memref_slice %arg23[%c1_i32_237, %c0_i32_238] : memref<4x4x!tpu.dma_semaphore, #tpu.memory_space<semaphore_mem>> -> memref<1x1x!tpu.dma_semaphore, #tpu.memory_space<semaphore_mem>>
    %339 = tpu.memref_squeeze %338 : memref<1x1x!tpu.dma_semaphore, #tpu.memory_space<semaphore_mem>> -> memref<!tpu.dma_semaphore, #tpu.memory_space<semaphore_mem>>
    tpu.wait_dma2 semaphore(%339 : memref<!tpu.dma_semaphore, #tpu.memory_space<semaphore_mem>>) src(%335 : memref<128x384xbf16, #tpu.memory_space<any>>) dst(%337 : memref<128x384xbf16, #tpu.memory_space<vmem>>)
    %c1_i32_243 = arith.constant 1 : i32
    %c1_i32_244 = arith.constant 1 : i32
    %c1_i32_245 = arith.constant 1 : i32
    %c1_i32_246 = arith.constant 1 : i32
    %c0_i32_247 = arith.constant 0 : i32
    %c0_i32_248 = arith.constant 0 : i32
    %340 = tpu.memref_slice %arg4[%c1_i32_243, %c0_i32_247, %c0_i32_248] : memref<4x128x128xbf16, #tpu.memory_space<any>> -> memref<1x128x128xbf16, #tpu.memory_space<any>>
    %341 = tpu.memref_squeeze %340 : memref<1x128x128xbf16, #tpu.memory_space<any>> -> memref<128x128xbf16, #tpu.memory_space<any>>
    %c0_i32_249 = arith.constant 0 : i32
    %c0_i32_250 = arith.constant 0 : i32
    %342 = tpu.memref_slice %arg20[%c1_i32_244, %c0_i32_249, %c0_i32_250] : memref<4x128x128xbf16, #tpu.memory_space<vmem>> -> memref<1x128x128xbf16, #tpu.memory_space<vmem>>
    %343 = tpu.memref_squeeze %342 : memref<1x128x128xbf16, #tpu.memory_space<vmem>> -> memref<128x128xbf16, #tpu.memory_space<vmem>>
    %344 = tpu.memref_slice %arg23[%c1_i32_245, %c1_i32_246] : memref<4x4x!tpu.dma_semaphore, #tpu.memory_space<semaphore_mem>> -> memref<1x1x!tpu.dma_semaphore, #tpu.memory_space<semaphore_mem>>
    %345 = tpu.memref_squeeze %344 : memref<1x1x!tpu.dma_semaphore, #tpu.memory_space<semaphore_mem>> -> memref<!tpu.dma_semaphore, #tpu.memory_space<semaphore_mem>>
    tpu.wait_dma2 semaphore(%345 : memref<!tpu.dma_semaphore, #tpu.memory_space<semaphore_mem>>) src(%341 : memref<128x128xbf16, #tpu.memory_space<any>>) dst(%343 : memref<128x128xbf16, #tpu.memory_space<vmem>>)
    %c1_i32_251 = arith.constant 1 : i32
    %c1_i32_252 = arith.constant 1 : i32
    %c1_i32_253 = arith.constant 1 : i32
    %c2_i32_254 = arith.constant 2 : i32
    %c0_i32_255 = arith.constant 0 : i32
    %c0_i32_256 = arith.constant 0 : i32
    %346 = tpu.memref_slice %arg5[%c1_i32_251, %c0_i32_255, %c0_i32_256] : memref<4x128x512xbf16, #tpu.memory_space<any>> -> memref<1x128x512xbf16, #tpu.memory_space<any>>
    %347 = tpu.memref_squeeze %346 : memref<1x128x512xbf16, #tpu.memory_space<any>> -> memref<128x512xbf16, #tpu.memory_space<any>>
    %c0_i32_257 = arith.constant 0 : i32
    %c0_i32_258 = arith.constant 0 : i32
    %348 = tpu.memref_slice %arg21[%c1_i32_252, %c0_i32_257, %c0_i32_258] : memref<4x128x512xbf16, #tpu.memory_space<vmem>> -> memref<1x128x512xbf16, #tpu.memory_space<vmem>>
    %349 = tpu.memref_squeeze %348 : memref<1x128x512xbf16, #tpu.memory_space<vmem>> -> memref<128x512xbf16, #tpu.memory_space<vmem>>
    %350 = tpu.memref_slice %arg23[%c1_i32_253, %c2_i32_254] : memref<4x4x!tpu.dma_semaphore, #tpu.memory_space<semaphore_mem>> -> memref<1x1x!tpu.dma_semaphore, #tpu.memory_space<semaphore_mem>>
    %351 = tpu.memref_squeeze %350 : memref<1x1x!tpu.dma_semaphore, #tpu.memory_space<semaphore_mem>> -> memref<!tpu.dma_semaphore, #tpu.memory_space<semaphore_mem>>
    tpu.wait_dma2 semaphore(%351 : memref<!tpu.dma_semaphore, #tpu.memory_space<semaphore_mem>>) src(%347 : memref<128x512xbf16, #tpu.memory_space<any>>) dst(%349 : memref<128x512xbf16, #tpu.memory_space<vmem>>)
    %c1_i32_259 = arith.constant 1 : i32
    %c1_i32_260 = arith.constant 1 : i32
    %c1_i32_261 = arith.constant 1 : i32
    %c3_i32_262 = arith.constant 3 : i32
    %c0_i32_263 = arith.constant 0 : i32
    %c0_i32_264 = arith.constant 0 : i32
    %352 = tpu.memref_slice %arg6[%c1_i32_259, %c0_i32_263, %c0_i32_264] : memref<4x512x128xbf16, #tpu.memory_space<any>> -> memref<1x512x128xbf16, #tpu.memory_space<any>>
    %353 = tpu.memref_squeeze %352 : memref<1x512x128xbf16, #tpu.memory_space<any>> -> memref<512x128xbf16, #tpu.memory_space<any>>
    %c0_i32_265 = arith.constant 0 : i32
    %c0_i32_266 = arith.constant 0 : i32
    %354 = tpu.memref_slice %arg22[%c1_i32_260, %c0_i32_265, %c0_i32_266] : memref<4x512x128xbf16, #tpu.memory_space<vmem>> -> memref<1x512x128xbf16, #tpu.memory_space<vmem>>
    %355 = tpu.memref_squeeze %354 : memref<1x512x128xbf16, #tpu.memory_space<vmem>> -> memref<512x128xbf16, #tpu.memory_space<vmem>>
    %356 = tpu.memref_slice %arg23[%c1_i32_261, %c3_i32_262] : memref<4x4x!tpu.dma_semaphore, #tpu.memory_space<semaphore_mem>> -> memref<1x1x!tpu.dma_semaphore, #tpu.memory_space<semaphore_mem>>
    %357 = tpu.memref_squeeze %356 : memref<1x1x!tpu.dma_semaphore, #tpu.memory_space<semaphore_mem>> -> memref<!tpu.dma_semaphore, #tpu.memory_space<semaphore_mem>>
    tpu.wait_dma2 semaphore(%357 : memref<!tpu.dma_semaphore, #tpu.memory_space<semaphore_mem>>) src(%353 : memref<512x128xbf16, #tpu.memory_space<any>>) dst(%355 : memref<512x128xbf16, #tpu.memory_space<vmem>>)
    %c1 = arith.constant 1 : index
    %c0_267 = arith.constant 0 : index
    %c0_268 = arith.constant 0 : index
    %358 = vector.load %arg19[%c1, %c0_267, %c0_268] : memref<4x128x384xbf16, #tpu.memory_space<vmem>>, vector<1x128x384xbf16>
    %359 = vector.shape_cast %358 : vector<1x128x384xbf16> to vector<128x384xbf16>
    %c1_269 = arith.constant 1 : index
    %c0_270 = arith.constant 0 : index
    %c0_271 = arith.constant 0 : index
    %360 = vector.load %arg20[%c1_269, %c0_270, %c0_271] : memref<4x128x128xbf16, #tpu.memory_space<vmem>>, vector<1x128x128xbf16>
    %361 = vector.shape_cast %360 : vector<1x128x128xbf16> to vector<128x128xbf16>
    %c1_272 = arith.constant 1 : index
    %c0_273 = arith.constant 0 : index
    %c0_274 = arith.constant 0 : index
    %362 = vector.load %arg21[%c1_272, %c0_273, %c0_274] : memref<4x128x512xbf16, #tpu.memory_space<vmem>>, vector<1x128x512xbf16>
    %363 = vector.shape_cast %362 : vector<1x128x512xbf16> to vector<128x512xbf16>
    %c1_275 = arith.constant 1 : index
    %c0_276 = arith.constant 0 : index
    %c0_277 = arith.constant 0 : index
    %364 = vector.load %arg22[%c1_275, %c0_276, %c0_277] : memref<4x512x128xbf16, #tpu.memory_space<vmem>>, vector<1x512x128xbf16>
    %365 = vector.shape_cast %364 : vector<1x512x128xbf16> to vector<512x128xbf16>
    %c1_278 = arith.constant 1 : index
    %c0_279 = arith.constant 0 : index
    %c0_280 = arith.constant 0 : index
    %366 = vector.load %arg8[%c1_278, %c0_279, %c0_280] : memref<4x1x128xf32, #tpu.memory_space<vmem>>, vector<1x1x128xf32>
    %367 = vector.shape_cast %366 : vector<1x1x128xf32> to vector<1x128xf32>
    %c1_281 = arith.constant 1 : index
    %c0_282 = arith.constant 0 : index
    %c0_283 = arith.constant 0 : index
    %368 = vector.load %arg9[%c1_281, %c0_282, %c0_283] : memref<4x1x128xf32, #tpu.memory_space<vmem>>, vector<1x1x128xf32>
    %369 = vector.shape_cast %368 : vector<1x1x128xf32> to vector<1x128xf32>
    %cst_284 = arith.constant dense<0.000000e+00> : vector<16xf32>
    %370 = vector.multi_reduction <add>, %333, %cst_284 [1] : vector<16x128xf32> to vector<16xf32>
    %371 = vector.shape_cast %370 : vector<16xf32> to vector<16x1xf32>
    %cst_285 = arith.constant 0.00999999977 : f32
    %372 = vector.broadcast %cst_285 : f32 to vector<16x1xf32>
    %373 = arith.mulf %371, %372 : vector<16x1xf32>
    %374 = vector.broadcast %373 : vector<16x1xf32> to vector<16x128xf32>
    %375 = arith.subf %333, %374 : vector<16x128xf32>
    %376 = vector.broadcast %114 : vector<1x128xf32> to vector<16x128xf32>
    %377 = arith.mulf %375, %376 : vector<16x128xf32>
    %378 = arith.mulf %377, %377 : vector<16x128xf32>
    %cst_286 = arith.constant dense<0.000000e+00> : vector<16xf32>
    %379 = vector.multi_reduction <add>, %378, %cst_286 [1] : vector<16x128xf32> to vector<16xf32>
    %380 = vector.shape_cast %379 : vector<16xf32> to vector<16x1xf32>
    %cst_287 = arith.constant 0.00999999977 : f32
    %381 = vector.broadcast %cst_287 : f32 to vector<16x1xf32>
    %382 = arith.mulf %380, %381 : vector<16x1xf32>
    %cst_288 = arith.constant 9.99999974E-6 : f32
    %383 = vector.broadcast %cst_288 : f32 to vector<16x1xf32>
    %384 = arith.addf %382, %383 : vector<16x1xf32>
    %385 = math.rsqrt %384 : vector<16x1xf32>
    %386 = vector.broadcast %385 : vector<16x1xf32> to vector<16x128xf32>
    %387 = arith.mulf %377, %386 : vector<16x128xf32>
    %388 = vector.broadcast %367 : vector<1x128xf32> to vector<16x128xf32>
    %389 = arith.mulf %387, %388 : vector<16x128xf32>
    %390 = vector.broadcast %369 : vector<1x128xf32> to vector<16x128xf32>
    %391 = arith.addf %389, %390 : vector<16x128xf32>
    %392 = arith.truncf %391 : vector<16x128xf32> to vector<16x128xbf16>
    %cst_289 = arith.constant dense<0.000000e+00> : vector<16x384xf32>
    %393 = tpu.matmul %392, %359, %cst_289 {dimension_numbers = #tpu.dot_dimension_numbers<[1], [0], [0], [1], [0, 0, 1, 1], [], []>} : vector<16x128xbf16>, vector<128x384xbf16>, vector<16x384xf32> -> vector<16x384xf32>
    %394 = vector.extract_strided_slice %393 {offsets = [0, 0], sizes = [16, 128], strides = [1, 1]} : vector<16x384xf32> to vector<16x128xf32>
    %395 = arith.truncf %394 : vector<16x128xf32> to vector<16x128xbf16>
    %396 = vector.shape_cast %395 : vector<16x128xbf16> to vector<2x8x128xbf16>
    %397 = vector.extract_strided_slice %393 {offsets = [0, 128], sizes = [16, 128], strides = [1, 1]} : vector<16x384xf32> to vector<16x128xf32>
    %398 = arith.truncf %397 : vector<16x128xf32> to vector<16x128xbf16>
    %399 = vector.shape_cast %398 : vector<16x128xbf16> to vector<2x8x128xbf16>
    %400 = vector.extract_strided_slice %393 {offsets = [0, 256], sizes = [16, 128], strides = [1, 1]} : vector<16x384xf32> to vector<16x128xf32>
    %401 = arith.truncf %400 : vector<16x128xf32> to vector<16x128xbf16>
    %402 = vector.shape_cast %401 : vector<16x128xbf16> to vector<2x8x128xbf16>
    %cst_290 = arith.constant 0.000000e+00 : f32
    %403 = vector.broadcast %cst_290 : f32 to vector<16x128xf32>
    %404 = vector.extract_strided_slice %396 {offsets = [0, 0, 0], sizes = [2, 8, 32], strides = [1, 1, 1]} : vector<2x8x128xbf16> to vector<2x8x32xbf16>
    %405 = vector.extract_strided_slice %399 {offsets = [0, 0, 0], sizes = [2, 8, 32], strides = [1, 1, 1]} : vector<2x8x128xbf16> to vector<2x8x32xbf16>
    %406 = vector.extract_strided_slice %402 {offsets = [0, 0, 0], sizes = [2, 8, 32], strides = [1, 1, 1]} : vector<2x8x128xbf16> to vector<2x8x32xbf16>
    "tpu.trace_start"() <{level = 10 : i32, message = "btd,bsd->bts"}> : () -> ()
    %cst_291 = arith.constant dense<0.000000e+00> : vector<2x8x8xf32>
    %407 = tpu.matmul %404, %405, %cst_291 {dimension_numbers = #tpu.dot_dimension_numbers<[2], [2], [1], [1], [0, 0, 0, 1, 1, 1], [0], [0]>} : vector<2x8x32xbf16>, vector<2x8x32xbf16>, vector<2x8x8xf32> -> vector<2x8x8xf32>
    "tpu.trace_stop"() : () -> ()
    %cst_292 = arith.constant 2.000000e-01 : f32
    %408 = vector.broadcast %cst_292 : f32 to vector<2x8x8xf32>
    %409 = arith.mulf %407, %408 : vector<2x8x8xf32>
    %410 = vector.broadcast %121 : vector<1x8x8xf32> to vector<2x8x8xf32>
    %411 = arith.addf %409, %410 : vector<2x8x8xf32>
    %cst_293 = arith.constant dense<0xFF800000> : vector<2x8xf32>
    %412 = vector.multi_reduction <maximumf>, %411, %cst_293 [2] : vector<2x8x8xf32> to vector<2x8xf32>
    %413 = vector.shape_cast %412 : vector<2x8xf32> to vector<2x8x1xf32>
    %414 = vector.broadcast %413 : vector<2x8x1xf32> to vector<2x8x8xf32>
    %415 = arith.subf %411, %414 : vector<2x8x8xf32>
    %416 = math.exp %415 : vector<2x8x8xf32>
    %cst_294 = arith.constant dense<0.000000e+00> : vector<2x8xf32>
    %417 = vector.multi_reduction <add>, %416, %cst_294 [2] : vector<2x8x8xf32> to vector<2x8xf32>
    %418 = vector.shape_cast %417 : vector<2x8xf32> to vector<2x8x1xf32>
    %419 = vector.broadcast %418 : vector<2x8x1xf32> to vector<2x8x8xf32>
    %420 = arith.divf %416, %419 : vector<2x8x8xf32>
    %421 = arith.truncf %420 : vector<2x8x8xf32> to vector<2x8x8xbf16>
    "tpu.trace_start"() <{level = 10 : i32, message = "bts,bsd->btd"}> : () -> ()
    %cst_295 = arith.constant dense<0.000000e+00> : vector<2x8x32xf32>
    %422 = tpu.matmul %421, %406, %cst_295 {dimension_numbers = #tpu.dot_dimension_numbers<[2], [1], [1], [2], [0, 0, 0, 1, 1, 2], [0], [0]>} : vector<2x8x8xbf16>, vector<2x8x32xbf16>, vector<2x8x32xf32> -> vector<2x8x32xf32>
    "tpu.trace_stop"() : () -> ()
    %423 = vector.shape_cast %422 : vector<2x8x32xf32> to vector<16x32xf32>
    %424 = arith.truncf %423 : vector<16x32xf32> to vector<16x32xbf16>
    %425 = vector.extract_strided_slice %361 {offsets = [0, 0], sizes = [32, 128], strides = [1, 1]} : vector<128x128xbf16> to vector<32x128xbf16>
    %cst_296 = arith.constant dense<0.000000e+00> : vector<16x128xf32>
    %426 = tpu.matmul %424, %425, %cst_296 {dimension_numbers = #tpu.dot_dimension_numbers<[1], [0], [0], [1], [0, 0, 1, 1], [], []>} : vector<16x32xbf16>, vector<32x128xbf16>, vector<16x128xf32> -> vector<16x128xf32>
    %427 = arith.addf %403, %426 : vector<16x128xf32>
    %428 = vector.extract_strided_slice %396 {offsets = [0, 0, 32], sizes = [2, 8, 32], strides = [1, 1, 1]} : vector<2x8x128xbf16> to vector<2x8x32xbf16>
    %429 = vector.extract_strided_slice %399 {offsets = [0, 0, 32], sizes = [2, 8, 32], strides = [1, 1, 1]} : vector<2x8x128xbf16> to vector<2x8x32xbf16>
    %430 = vector.extract_strided_slice %402 {offsets = [0, 0, 32], sizes = [2, 8, 32], strides = [1, 1, 1]} : vector<2x8x128xbf16> to vector<2x8x32xbf16>
    "tpu.trace_start"() <{level = 10 : i32, message = "btd,bsd->bts"}> : () -> ()
    %cst_297 = arith.constant dense<0.000000e+00> : vector<2x8x8xf32>
    %431 = tpu.matmul %428, %429, %cst_297 {dimension_numbers = #tpu.dot_dimension_numbers<[2], [2], [1], [1], [0, 0, 0, 1, 1, 1], [0], [0]>} : vector<2x8x32xbf16>, vector<2x8x32xbf16>, vector<2x8x8xf32> -> vector<2x8x8xf32>
    "tpu.trace_stop"() : () -> ()
    %cst_298 = arith.constant 2.000000e-01 : f32
    %432 = vector.broadcast %cst_298 : f32 to vector<2x8x8xf32>
    %433 = arith.mulf %431, %432 : vector<2x8x8xf32>
    %434 = vector.broadcast %121 : vector<1x8x8xf32> to vector<2x8x8xf32>
    %435 = arith.addf %433, %434 : vector<2x8x8xf32>
    %cst_299 = arith.constant dense<0xFF800000> : vector<2x8xf32>
    %436 = vector.multi_reduction <maximumf>, %435, %cst_299 [2] : vector<2x8x8xf32> to vector<2x8xf32>
    %437 = vector.shape_cast %436 : vector<2x8xf32> to vector<2x8x1xf32>
    %438 = vector.broadcast %437 : vector<2x8x1xf32> to vector<2x8x8xf32>
    %439 = arith.subf %435, %438 : vector<2x8x8xf32>
    %440 = math.exp %439 : vector<2x8x8xf32>
    %cst_300 = arith.constant dense<0.000000e+00> : vector<2x8xf32>
    %441 = vector.multi_reduction <add>, %440, %cst_300 [2] : vector<2x8x8xf32> to vector<2x8xf32>
    %442 = vector.shape_cast %441 : vector<2x8xf32> to vector<2x8x1xf32>
    %443 = vector.broadcast %442 : vector<2x8x1xf32> to vector<2x8x8xf32>
    %444 = arith.divf %440, %443 : vector<2x8x8xf32>
    %445 = arith.truncf %444 : vector<2x8x8xf32> to vector<2x8x8xbf16>
    "tpu.trace_start"() <{level = 10 : i32, message = "bts,bsd->btd"}> : () -> ()
    %cst_301 = arith.constant dense<0.000000e+00> : vector<2x8x32xf32>
    %446 = tpu.matmul %445, %430, %cst_301 {dimension_numbers = #tpu.dot_dimension_numbers<[2], [1], [1], [2], [0, 0, 0, 1, 1, 2], [0], [0]>} : vector<2x8x8xbf16>, vector<2x8x32xbf16>, vector<2x8x32xf32> -> vector<2x8x32xf32>
    "tpu.trace_stop"() : () -> ()
    %447 = vector.shape_cast %446 : vector<2x8x32xf32> to vector<16x32xf32>
    %448 = arith.truncf %447 : vector<16x32xf32> to vector<16x32xbf16>
    %449 = vector.extract_strided_slice %361 {offsets = [32, 0], sizes = [32, 128], strides = [1, 1]} : vector<128x128xbf16> to vector<32x128xbf16>
    %cst_302 = arith.constant dense<0.000000e+00> : vector<16x128xf32>
    %450 = tpu.matmul %448, %449, %cst_302 {dimension_numbers = #tpu.dot_dimension_numbers<[1], [0], [0], [1], [0, 0, 1, 1], [], []>} : vector<16x32xbf16>, vector<32x128xbf16>, vector<16x128xf32> -> vector<16x128xf32>
    %451 = arith.addf %427, %450 : vector<16x128xf32>
    %452 = vector.extract_strided_slice %396 {offsets = [0, 0, 64], sizes = [2, 8, 32], strides = [1, 1, 1]} : vector<2x8x128xbf16> to vector<2x8x32xbf16>
    %453 = vector.extract_strided_slice %399 {offsets = [0, 0, 64], sizes = [2, 8, 32], strides = [1, 1, 1]} : vector<2x8x128xbf16> to vector<2x8x32xbf16>
    %454 = vector.extract_strided_slice %402 {offsets = [0, 0, 64], sizes = [2, 8, 32], strides = [1, 1, 1]} : vector<2x8x128xbf16> to vector<2x8x32xbf16>
    "tpu.trace_start"() <{level = 10 : i32, message = "btd,bsd->bts"}> : () -> ()
    %cst_303 = arith.constant dense<0.000000e+00> : vector<2x8x8xf32>
    %455 = tpu.matmul %452, %453, %cst_303 {dimension_numbers = #tpu.dot_dimension_numbers<[2], [2], [1], [1], [0, 0, 0, 1, 1, 1], [0], [0]>} : vector<2x8x32xbf16>, vector<2x8x32xbf16>, vector<2x8x8xf32> -> vector<2x8x8xf32>
    "tpu.trace_stop"() : () -> ()
    %cst_304 = arith.constant 2.000000e-01 : f32
    %456 = vector.broadcast %cst_304 : f32 to vector<2x8x8xf32>
    %457 = arith.mulf %455, %456 : vector<2x8x8xf32>
    %458 = vector.broadcast %121 : vector<1x8x8xf32> to vector<2x8x8xf32>
    %459 = arith.addf %457, %458 : vector<2x8x8xf32>
    %cst_305 = arith.constant dense<0xFF800000> : vector<2x8xf32>
    %460 = vector.multi_reduction <maximumf>, %459, %cst_305 [2] : vector<2x8x8xf32> to vector<2x8xf32>
    %461 = vector.shape_cast %460 : vector<2x8xf32> to vector<2x8x1xf32>
    %462 = vector.broadcast %461 : vector<2x8x1xf32> to vector<2x8x8xf32>
    %463 = arith.subf %459, %462 : vector<2x8x8xf32>
    %464 = math.exp %463 : vector<2x8x8xf32>
    %cst_306 = arith.constant dense<0.000000e+00> : vector<2x8xf32>
    %465 = vector.multi_reduction <add>, %464, %cst_306 [2] : vector<2x8x8xf32> to vector<2x8xf32>
    %466 = vector.shape_cast %465 : vector<2x8xf32> to vector<2x8x1xf32>
    %467 = vector.broadcast %466 : vector<2x8x1xf32> to vector<2x8x8xf32>
    %468 = arith.divf %464, %467 : vector<2x8x8xf32>
    %469 = arith.truncf %468 : vector<2x8x8xf32> to vector<2x8x8xbf16>
    "tpu.trace_start"() <{level = 10 : i32, message = "bts,bsd->btd"}> : () -> ()
    %cst_307 = arith.constant dense<0.000000e+00> : vector<2x8x32xf32>
    %470 = tpu.matmul %469, %454, %cst_307 {dimension_numbers = #tpu.dot_dimension_numbers<[2], [1], [1], [2], [0, 0, 0, 1, 1, 2], [0], [0]>} : vector<2x8x8xbf16>, vector<2x8x32xbf16>, vector<2x8x32xf32> -> vector<2x8x32xf32>
    "tpu.trace_stop"() : () -> ()
    %471 = vector.shape_cast %470 : vector<2x8x32xf32> to vector<16x32xf32>
    %472 = arith.truncf %471 : vector<16x32xf32> to vector<16x32xbf16>
    %473 = vector.extract_strided_slice %361 {offsets = [64, 0], sizes = [32, 128], strides = [1, 1]} : vector<128x128xbf16> to vector<32x128xbf16>
    %cst_308 = arith.constant dense<0.000000e+00> : vector<16x128xf32>
    %474 = tpu.matmul %472, %473, %cst_308 {dimension_numbers = #tpu.dot_dimension_numbers<[1], [0], [0], [1], [0, 0, 1, 1], [], []>} : vector<16x32xbf16>, vector<32x128xbf16>, vector<16x128xf32> -> vector<16x128xf32>
    %475 = arith.addf %451, %474 : vector<16x128xf32>
    %476 = vector.extract_strided_slice %396 {offsets = [0, 0, 96], sizes = [2, 8, 32], strides = [1, 1, 1]} : vector<2x8x128xbf16> to vector<2x8x32xbf16>
    %477 = vector.extract_strided_slice %399 {offsets = [0, 0, 96], sizes = [2, 8, 32], strides = [1, 1, 1]} : vector<2x8x128xbf16> to vector<2x8x32xbf16>
    %478 = vector.extract_strided_slice %402 {offsets = [0, 0, 96], sizes = [2, 8, 32], strides = [1, 1, 1]} : vector<2x8x128xbf16> to vector<2x8x32xbf16>
    "tpu.trace_start"() <{level = 10 : i32, message = "btd,bsd->bts"}> : () -> ()
    %cst_309 = arith.constant dense<0.000000e+00> : vector<2x8x8xf32>
    %479 = tpu.matmul %476, %477, %cst_309 {dimension_numbers = #tpu.dot_dimension_numbers<[2], [2], [1], [1], [0, 0, 0, 1, 1, 1], [0], [0]>} : vector<2x8x32xbf16>, vector<2x8x32xbf16>, vector<2x8x8xf32> -> vector<2x8x8xf32>
    "tpu.trace_stop"() : () -> ()
    %cst_310 = arith.constant 2.000000e-01 : f32
    %480 = vector.broadcast %cst_310 : f32 to vector<2x8x8xf32>
    %481 = arith.mulf %479, %480 : vector<2x8x8xf32>
    %482 = vector.broadcast %121 : vector<1x8x8xf32> to vector<2x8x8xf32>
    %483 = arith.addf %481, %482 : vector<2x8x8xf32>
    %cst_311 = arith.constant dense<0xFF800000> : vector<2x8xf32>
    %484 = vector.multi_reduction <maximumf>, %483, %cst_311 [2] : vector<2x8x8xf32> to vector<2x8xf32>
    %485 = vector.shape_cast %484 : vector<2x8xf32> to vector<2x8x1xf32>
    %486 = vector.broadcast %485 : vector<2x8x1xf32> to vector<2x8x8xf32>
    %487 = arith.subf %483, %486 : vector<2x8x8xf32>
    %488 = math.exp %487 : vector<2x8x8xf32>
    %cst_312 = arith.constant dense<0.000000e+00> : vector<2x8xf32>
    %489 = vector.multi_reduction <add>, %488, %cst_312 [2] : vector<2x8x8xf32> to vector<2x8xf32>
    %490 = vector.shape_cast %489 : vector<2x8xf32> to vector<2x8x1xf32>
    %491 = vector.broadcast %490 : vector<2x8x1xf32> to vector<2x8x8xf32>
    %492 = arith.divf %488, %491 : vector<2x8x8xf32>
    %493 = arith.truncf %492 : vector<2x8x8xf32> to vector<2x8x8xbf16>
    "tpu.trace_start"() <{level = 10 : i32, message = "bts,bsd->btd"}> : () -> ()
    %cst_313 = arith.constant dense<0.000000e+00> : vector<2x8x32xf32>
    %494 = tpu.matmul %493, %478, %cst_313 {dimension_numbers = #tpu.dot_dimension_numbers<[2], [1], [1], [2], [0, 0, 0, 1, 1, 2], [0], [0]>} : vector<2x8x8xbf16>, vector<2x8x32xbf16>, vector<2x8x32xf32> -> vector<2x8x32xf32>
    "tpu.trace_stop"() : () -> ()
    %495 = vector.shape_cast %494 : vector<2x8x32xf32> to vector<16x32xf32>
    %496 = arith.truncf %495 : vector<16x32xf32> to vector<16x32xbf16>
    %497 = vector.extract_strided_slice %361 {offsets = [96, 0], sizes = [32, 128], strides = [1, 1]} : vector<128x128xbf16> to vector<32x128xbf16>
    %cst_314 = arith.constant dense<0.000000e+00> : vector<16x128xf32>
    %498 = tpu.matmul %496, %497, %cst_314 {dimension_numbers = #tpu.dot_dimension_numbers<[1], [0], [0], [1], [0, 0, 1, 1], [], []>} : vector<16x32xbf16>, vector<32x128xbf16>, vector<16x128xf32> -> vector<16x128xf32>
    %499 = arith.addf %475, %498 : vector<16x128xf32>
    %500 = arith.addf %333, %499 : vector<16x128xf32>
    %c1_315 = arith.constant 1 : index
    %c0_316 = arith.constant 0 : index
    %c0_317 = arith.constant 0 : index
    %501 = vector.load %arg7[%c1_315, %c0_316, %c0_317] : memref<4x1x128xf32, #tpu.memory_space<vmem>>, vector<1x1x128xf32>
    %502 = vector.shape_cast %501 : vector<1x1x128xf32> to vector<1x128xf32>
    %503 = vector.broadcast %502 : vector<1x128xf32> to vector<16x128xf32>
    %504 = arith.addf %500, %503 : vector<16x128xf32>
    %c1_318 = arith.constant 1 : index
    %c0_319 = arith.constant 0 : index
    %c0_320 = arith.constant 0 : index
    %505 = vector.load %arg10[%c1_318, %c0_319, %c0_320] : memref<4x1x128xf32, #tpu.memory_space<vmem>>, vector<1x1x128xf32>
    %506 = vector.shape_cast %505 : vector<1x1x128xf32> to vector<1x128xf32>
    %c1_321 = arith.constant 1 : index
    %c0_322 = arith.constant 0 : index
    %c0_323 = arith.constant 0 : index
    %507 = vector.load %arg11[%c1_321, %c0_322, %c0_323] : memref<4x1x128xf32, #tpu.memory_space<vmem>>, vector<1x1x128xf32>
    %508 = vector.shape_cast %507 : vector<1x1x128xf32> to vector<1x128xf32>
    %cst_324 = arith.constant dense<0.000000e+00> : vector<16xf32>
    %509 = vector.multi_reduction <add>, %504, %cst_324 [1] : vector<16x128xf32> to vector<16xf32>
    %510 = vector.shape_cast %509 : vector<16xf32> to vector<16x1xf32>
    %cst_325 = arith.constant 0.00999999977 : f32
    %511 = vector.broadcast %cst_325 : f32 to vector<16x1xf32>
    %512 = arith.mulf %510, %511 : vector<16x1xf32>
    %513 = vector.broadcast %512 : vector<16x1xf32> to vector<16x128xf32>
    %514 = arith.subf %504, %513 : vector<16x128xf32>
    %515 = vector.broadcast %114 : vector<1x128xf32> to vector<16x128xf32>
    %516 = arith.mulf %514, %515 : vector<16x128xf32>
    %517 = arith.mulf %516, %516 : vector<16x128xf32>
    %cst_326 = arith.constant dense<0.000000e+00> : vector<16xf32>
    %518 = vector.multi_reduction <add>, %517, %cst_326 [1] : vector<16x128xf32> to vector<16xf32>
    %519 = vector.shape_cast %518 : vector<16xf32> to vector<16x1xf32>
    %cst_327 = arith.constant 0.00999999977 : f32
    %520 = vector.broadcast %cst_327 : f32 to vector<16x1xf32>
    %521 = arith.mulf %519, %520 : vector<16x1xf32>
    %cst_328 = arith.constant 9.99999974E-6 : f32
    %522 = vector.broadcast %cst_328 : f32 to vector<16x1xf32>
    %523 = arith.addf %521, %522 : vector<16x1xf32>
    %524 = math.rsqrt %523 : vector<16x1xf32>
    %525 = vector.broadcast %524 : vector<16x1xf32> to vector<16x128xf32>
    %526 = arith.mulf %516, %525 : vector<16x128xf32>
    %527 = vector.broadcast %506 : vector<1x128xf32> to vector<16x128xf32>
    %528 = arith.mulf %526, %527 : vector<16x128xf32>
    %529 = vector.broadcast %508 : vector<1x128xf32> to vector<16x128xf32>
    %530 = arith.addf %528, %529 : vector<16x128xf32>
    %531 = arith.truncf %530 : vector<16x128xf32> to vector<16x128xbf16>
    %cst_329 = arith.constant dense<0.000000e+00> : vector<16x512xf32>
    %532 = tpu.matmul %531, %363, %cst_329 {dimension_numbers = #tpu.dot_dimension_numbers<[1], [0], [0], [1], [0, 0, 1, 1], [], []>} : vector<16x128xbf16>, vector<128x512xbf16>, vector<16x512xf32> -> vector<16x512xf32>
    %c1_330 = arith.constant 1 : index
    %c0_331 = arith.constant 0 : index
    %c0_332 = arith.constant 0 : index
    %533 = vector.load %arg12[%c1_330, %c0_331, %c0_332] : memref<4x1x512xf32, #tpu.memory_space<vmem>>, vector<1x1x512xf32>
    %534 = vector.shape_cast %533 : vector<1x1x512xf32> to vector<1x512xf32>
    %535 = vector.broadcast %534 : vector<1x512xf32> to vector<16x512xf32>
    %536 = arith.addf %532, %535 : vector<16x512xf32>
    %cst_333 = arith.constant 0.000000e+00 : f32
    %537 = vector.broadcast %cst_333 : f32 to vector<16x512xf32>
    %538 = arith.maximumf %536, %537 : vector<16x512xf32>
    %539 = arith.truncf %538 : vector<16x512xf32> to vector<16x512xbf16>
    %cst_334 = arith.constant dense<0.000000e+00> : vector<16x128xf32>
    %540 = tpu.matmul %539, %365, %cst_334 {dimension_numbers = #tpu.dot_dimension_numbers<[1], [0], [0], [1], [0, 0, 1, 1], [], []>} : vector<16x512xbf16>, vector<512x128xbf16>, vector<16x128xf32> -> vector<16x128xf32>
    %541 = arith.addf %504, %540 : vector<16x128xf32>
    %c1_335 = arith.constant 1 : index
    %c0_336 = arith.constant 0 : index
    %c0_337 = arith.constant 0 : index
    %542 = vector.load %arg13[%c1_335, %c0_336, %c0_337] : memref<4x1x128xf32, #tpu.memory_space<vmem>>, vector<1x1x128xf32>
    %543 = vector.shape_cast %542 : vector<1x1x128xf32> to vector<1x128xf32>
    %544 = vector.broadcast %543 : vector<1x128xf32> to vector<16x128xf32>
    %545 = arith.addf %541, %544 : vector<16x128xf32>
    %c2_i32_338 = arith.constant 2 : i32
    %c2_i32_339 = arith.constant 2 : i32
    %c2_i32_340 = arith.constant 2 : i32
    %c0_i32_341 = arith.constant 0 : i32
    %c0_i32_342 = arith.constant 0 : i32
    %c0_i32_343 = arith.constant 0 : i32
    %546 = tpu.memref_slice %arg3[%c2_i32_338, %c0_i32_342, %c0_i32_343] : memref<4x128x384xbf16, #tpu.memory_space<any>> -> memref<1x128x384xbf16, #tpu.memory_space<any>>
    %547 = tpu.memref_squeeze %546 : memref<1x128x384xbf16, #tpu.memory_space<any>> -> memref<128x384xbf16, #tpu.memory_space<any>>
    %c0_i32_344 = arith.constant 0 : i32
    %c0_i32_345 = arith.constant 0 : i32
    %548 = tpu.memref_slice %arg19[%c2_i32_339, %c0_i32_344, %c0_i32_345] : memref<4x128x384xbf16, #tpu.memory_space<vmem>> -> memref<1x128x384xbf16, #tpu.memory_space<vmem>>
    %549 = tpu.memref_squeeze %548 : memref<1x128x384xbf16, #tpu.memory_space<vmem>> -> memref<128x384xbf16, #tpu.memory_space<vmem>>
    %550 = tpu.memref_slice %arg23[%c2_i32_340, %c0_i32_341] : memref<4x4x!tpu.dma_semaphore, #tpu.memory_space<semaphore_mem>> -> memref<1x1x!tpu.dma_semaphore, #tpu.memory_space<semaphore_mem>>
    %551 = tpu.memref_squeeze %550 : memref<1x1x!tpu.dma_semaphore, #tpu.memory_space<semaphore_mem>> -> memref<!tpu.dma_semaphore, #tpu.memory_space<semaphore_mem>>
    tpu.wait_dma2 semaphore(%551 : memref<!tpu.dma_semaphore, #tpu.memory_space<semaphore_mem>>) src(%547 : memref<128x384xbf16, #tpu.memory_space<any>>) dst(%549 : memref<128x384xbf16, #tpu.memory_space<vmem>>)
    %c2_i32_346 = arith.constant 2 : i32
    %c2_i32_347 = arith.constant 2 : i32
    %c2_i32_348 = arith.constant 2 : i32
    %c1_i32_349 = arith.constant 1 : i32
    %c0_i32_350 = arith.constant 0 : i32
    %c0_i32_351 = arith.constant 0 : i32
    %552 = tpu.memref_slice %arg4[%c2_i32_346, %c0_i32_350, %c0_i32_351] : memref<4x128x128xbf16, #tpu.memory_space<any>> -> memref<1x128x128xbf16, #tpu.memory_space<any>>
    %553 = tpu.memref_squeeze %552 : memref<1x128x128xbf16, #tpu.memory_space<any>> -> memref<128x128xbf16, #tpu.memory_space<any>>
    %c0_i32_352 = arith.constant 0 : i32
    %c0_i32_353 = arith.constant 0 : i32
    %554 = tpu.memref_slice %arg20[%c2_i32_347, %c0_i32_352, %c0_i32_353] : memref<4x128x128xbf16, #tpu.memory_space<vmem>> -> memref<1x128x128xbf16, #tpu.memory_space<vmem>>
    %555 = tpu.memref_squeeze %554 : memref<1x128x128xbf16, #tpu.memory_space<vmem>> -> memref<128x128xbf16, #tpu.memory_space<vmem>>
    %556 = tpu.memref_slice %arg23[%c2_i32_348, %c1_i32_349] : memref<4x4x!tpu.dma_semaphore, #tpu.memory_space<semaphore_mem>> -> memref<1x1x!tpu.dma_semaphore, #tpu.memory_space<semaphore_mem>>
    %557 = tpu.memref_squeeze %556 : memref<1x1x!tpu.dma_semaphore, #tpu.memory_space<semaphore_mem>> -> memref<!tpu.dma_semaphore, #tpu.memory_space<semaphore_mem>>
    tpu.wait_dma2 semaphore(%557 : memref<!tpu.dma_semaphore, #tpu.memory_space<semaphore_mem>>) src(%553 : memref<128x128xbf16, #tpu.memory_space<any>>) dst(%555 : memref<128x128xbf16, #tpu.memory_space<vmem>>)
    %c2_i32_354 = arith.constant 2 : i32
    %c2_i32_355 = arith.constant 2 : i32
    %c2_i32_356 = arith.constant 2 : i32
    %c2_i32_357 = arith.constant 2 : i32
    %c0_i32_358 = arith.constant 0 : i32
    %c0_i32_359 = arith.constant 0 : i32
    %558 = tpu.memref_slice %arg5[%c2_i32_354, %c0_i32_358, %c0_i32_359] : memref<4x128x512xbf16, #tpu.memory_space<any>> -> memref<1x128x512xbf16, #tpu.memory_space<any>>
    %559 = tpu.memref_squeeze %558 : memref<1x128x512xbf16, #tpu.memory_space<any>> -> memref<128x512xbf16, #tpu.memory_space<any>>
    %c0_i32_360 = arith.constant 0 : i32
    %c0_i32_361 = arith.constant 0 : i32
    %560 = tpu.memref_slice %arg21[%c2_i32_355, %c0_i32_360, %c0_i32_361] : memref<4x128x512xbf16, #tpu.memory_space<vmem>> -> memref<1x128x512xbf16, #tpu.memory_space<vmem>>
    %561 = tpu.memref_squeeze %560 : memref<1x128x512xbf16, #tpu.memory_space<vmem>> -> memref<128x512xbf16, #tpu.memory_space<vmem>>
    %562 = tpu.memref_slice %arg23[%c2_i32_356, %c2_i32_357] : memref<4x4x!tpu.dma_semaphore, #tpu.memory_space<semaphore_mem>> -> memref<1x1x!tpu.dma_semaphore, #tpu.memory_space<semaphore_mem>>
    %563 = tpu.memref_squeeze %562 : memref<1x1x!tpu.dma_semaphore, #tpu.memory_space<semaphore_mem>> -> memref<!tpu.dma_semaphore, #tpu.memory_space<semaphore_mem>>
    tpu.wait_dma2 semaphore(%563 : memref<!tpu.dma_semaphore, #tpu.memory_space<semaphore_mem>>) src(%559 : memref<128x512xbf16, #tpu.memory_space<any>>) dst(%561 : memref<128x512xbf16, #tpu.memory_space<vmem>>)
    %c2_i32_362 = arith.constant 2 : i32
    %c2_i32_363 = arith.constant 2 : i32
    %c2_i32_364 = arith.constant 2 : i32
    %c3_i32_365 = arith.constant 3 : i32
    %c0_i32_366 = arith.constant 0 : i32
    %c0_i32_367 = arith.constant 0 : i32
    %564 = tpu.memref_slice %arg6[%c2_i32_362, %c0_i32_366, %c0_i32_367] : memref<4x512x128xbf16, #tpu.memory_space<any>> -> memref<1x512x128xbf16, #tpu.memory_space<any>>
    %565 = tpu.memref_squeeze %564 : memref<1x512x128xbf16, #tpu.memory_space<any>> -> memref<512x128xbf16, #tpu.memory_space<any>>
    %c0_i32_368 = arith.constant 0 : i32
    %c0_i32_369 = arith.constant 0 : i32
    %566 = tpu.memref_slice %arg22[%c2_i32_363, %c0_i32_368, %c0_i32_369] : memref<4x512x128xbf16, #tpu.memory_space<vmem>> -> memref<1x512x128xbf16, #tpu.memory_space<vmem>>
    %567 = tpu.memref_squeeze %566 : memref<1x512x128xbf16, #tpu.memory_space<vmem>> -> memref<512x128xbf16, #tpu.memory_space<vmem>>
    %568 = tpu.memref_slice %arg23[%c2_i32_364, %c3_i32_365] : memref<4x4x!tpu.dma_semaphore, #tpu.memory_space<semaphore_mem>> -> memref<1x1x!tpu.dma_semaphore, #tpu.memory_space<semaphore_mem>>
    %569 = tpu.memref_squeeze %568 : memref<1x1x!tpu.dma_semaphore, #tpu.memory_space<semaphore_mem>> -> memref<!tpu.dma_semaphore, #tpu.memory_space<semaphore_mem>>
    tpu.wait_dma2 semaphore(%569 : memref<!tpu.dma_semaphore, #tpu.memory_space<semaphore_mem>>) src(%565 : memref<512x128xbf16, #tpu.memory_space<any>>) dst(%567 : memref<512x128xbf16, #tpu.memory_space<vmem>>)
    %c2 = arith.constant 2 : index
    %c0_370 = arith.constant 0 : index
    %c0_371 = arith.constant 0 : index
    %570 = vector.load %arg19[%c2, %c0_370, %c0_371] : memref<4x128x384xbf16, #tpu.memory_space<vmem>>, vector<1x128x384xbf16>
    %571 = vector.shape_cast %570 : vector<1x128x384xbf16> to vector<128x384xbf16>
    %c2_372 = arith.constant 2 : index
    %c0_373 = arith.constant 0 : index
    %c0_374 = arith.constant 0 : index
    %572 = vector.load %arg20[%c2_372, %c0_373, %c0_374] : memref<4x128x128xbf16, #tpu.memory_space<vmem>>, vector<1x128x128xbf16>
    %573 = vector.shape_cast %572 : vector<1x128x128xbf16> to vector<128x128xbf16>
    %c2_375 = arith.constant 2 : index
    %c0_376 = arith.constant 0 : index
    %c0_377 = arith.constant 0 : index
    %574 = vector.load %arg21[%c2_375, %c0_376, %c0_377] : memref<4x128x512xbf16, #tpu.memory_space<vmem>>, vector<1x128x512xbf16>
    %575 = vector.shape_cast %574 : vector<1x128x512xbf16> to vector<128x512xbf16>
    %c2_378 = arith.constant 2 : index
    %c0_379 = arith.constant 0 : index
    %c0_380 = arith.constant 0 : index
    %576 = vector.load %arg22[%c2_378, %c0_379, %c0_380] : memref<4x512x128xbf16, #tpu.memory_space<vmem>>, vector<1x512x128xbf16>
    %577 = vector.shape_cast %576 : vector<1x512x128xbf16> to vector<512x128xbf16>
    %c2_381 = arith.constant 2 : index
    %c0_382 = arith.constant 0 : index
    %c0_383 = arith.constant 0 : index
    %578 = vector.load %arg8[%c2_381, %c0_382, %c0_383] : memref<4x1x128xf32, #tpu.memory_space<vmem>>, vector<1x1x128xf32>
    %579 = vector.shape_cast %578 : vector<1x1x128xf32> to vector<1x128xf32>
    %c2_384 = arith.constant 2 : index
    %c0_385 = arith.constant 0 : index
    %c0_386 = arith.constant 0 : index
    %580 = vector.load %arg9[%c2_384, %c0_385, %c0_386] : memref<4x1x128xf32, #tpu.memory_space<vmem>>, vector<1x1x128xf32>
    %581 = vector.shape_cast %580 : vector<1x1x128xf32> to vector<1x128xf32>
    %cst_387 = arith.constant dense<0.000000e+00> : vector<16xf32>
    %582 = vector.multi_reduction <add>, %545, %cst_387 [1] : vector<16x128xf32> to vector<16xf32>
    %583 = vector.shape_cast %582 : vector<16xf32> to vector<16x1xf32>
    %cst_388 = arith.constant 0.00999999977 : f32
    %584 = vector.broadcast %cst_388 : f32 to vector<16x1xf32>
    %585 = arith.mulf %583, %584 : vector<16x1xf32>
    %586 = vector.broadcast %585 : vector<16x1xf32> to vector<16x128xf32>
    %587 = arith.subf %545, %586 : vector<16x128xf32>
    %588 = vector.broadcast %114 : vector<1x128xf32> to vector<16x128xf32>
    %589 = arith.mulf %587, %588 : vector<16x128xf32>
    %590 = arith.mulf %589, %589 : vector<16x128xf32>
    %cst_389 = arith.constant dense<0.000000e+00> : vector<16xf32>
    %591 = vector.multi_reduction <add>, %590, %cst_389 [1] : vector<16x128xf32> to vector<16xf32>
    %592 = vector.shape_cast %591 : vector<16xf32> to vector<16x1xf32>
    %cst_390 = arith.constant 0.00999999977 : f32
    %593 = vector.broadcast %cst_390 : f32 to vector<16x1xf32>
    %594 = arith.mulf %592, %593 : vector<16x1xf32>
    %cst_391 = arith.constant 9.99999974E-6 : f32
    %595 = vector.broadcast %cst_391 : f32 to vector<16x1xf32>
    %596 = arith.addf %594, %595 : vector<16x1xf32>
    %597 = math.rsqrt %596 : vector<16x1xf32>
    %598 = vector.broadcast %597 : vector<16x1xf32> to vector<16x128xf32>
    %599 = arith.mulf %589, %598 : vector<16x128xf32>
    %600 = vector.broadcast %579 : vector<1x128xf32> to vector<16x128xf32>
    %601 = arith.mulf %599, %600 : vector<16x128xf32>
    %602 = vector.broadcast %581 : vector<1x128xf32> to vector<16x128xf32>
    %603 = arith.addf %601, %602 : vector<16x128xf32>
    %604 = arith.truncf %603 : vector<16x128xf32> to vector<16x128xbf16>
    %cst_392 = arith.constant dense<0.000000e+00> : vector<16x384xf32>
    %605 = tpu.matmul %604, %571, %cst_392 {dimension_numbers = #tpu.dot_dimension_numbers<[1], [0], [0], [1], [0, 0, 1, 1], [], []>} : vector<16x128xbf16>, vector<128x384xbf16>, vector<16x384xf32> -> vector<16x384xf32>
    %606 = vector.extract_strided_slice %605 {offsets = [0, 0], sizes = [16, 128], strides = [1, 1]} : vector<16x384xf32> to vector<16x128xf32>
    %607 = arith.truncf %606 : vector<16x128xf32> to vector<16x128xbf16>
    %608 = vector.shape_cast %607 : vector<16x128xbf16> to vector<2x8x128xbf16>
    %609 = vector.extract_strided_slice %605 {offsets = [0, 128], sizes = [16, 128], strides = [1, 1]} : vector<16x384xf32> to vector<16x128xf32>
    %610 = arith.truncf %609 : vector<16x128xf32> to vector<16x128xbf16>
    %611 = vector.shape_cast %610 : vector<16x128xbf16> to vector<2x8x128xbf16>
    %612 = vector.extract_strided_slice %605 {offsets = [0, 256], sizes = [16, 128], strides = [1, 1]} : vector<16x384xf32> to vector<16x128xf32>
    %613 = arith.truncf %612 : vector<16x128xf32> to vector<16x128xbf16>
    %614 = vector.shape_cast %613 : vector<16x128xbf16> to vector<2x8x128xbf16>
    %cst_393 = arith.constant 0.000000e+00 : f32
    %615 = vector.broadcast %cst_393 : f32 to vector<16x128xf32>
    %616 = vector.extract_strided_slice %608 {offsets = [0, 0, 0], sizes = [2, 8, 32], strides = [1, 1, 1]} : vector<2x8x128xbf16> to vector<2x8x32xbf16>
    %617 = vector.extract_strided_slice %611 {offsets = [0, 0, 0], sizes = [2, 8, 32], strides = [1, 1, 1]} : vector<2x8x128xbf16> to vector<2x8x32xbf16>
    %618 = vector.extract_strided_slice %614 {offsets = [0, 0, 0], sizes = [2, 8, 32], strides = [1, 1, 1]} : vector<2x8x128xbf16> to vector<2x8x32xbf16>
    "tpu.trace_start"() <{level = 10 : i32, message = "btd,bsd->bts"}> : () -> ()
    %cst_394 = arith.constant dense<0.000000e+00> : vector<2x8x8xf32>
    %619 = tpu.matmul %616, %617, %cst_394 {dimension_numbers = #tpu.dot_dimension_numbers<[2], [2], [1], [1], [0, 0, 0, 1, 1, 1], [0], [0]>} : vector<2x8x32xbf16>, vector<2x8x32xbf16>, vector<2x8x8xf32> -> vector<2x8x8xf32>
    "tpu.trace_stop"() : () -> ()
    %cst_395 = arith.constant 2.000000e-01 : f32
    %620 = vector.broadcast %cst_395 : f32 to vector<2x8x8xf32>
    %621 = arith.mulf %619, %620 : vector<2x8x8xf32>
    %622 = vector.broadcast %121 : vector<1x8x8xf32> to vector<2x8x8xf32>
    %623 = arith.addf %621, %622 : vector<2x8x8xf32>
    %cst_396 = arith.constant dense<0xFF800000> : vector<2x8xf32>
    %624 = vector.multi_reduction <maximumf>, %623, %cst_396 [2] : vector<2x8x8xf32> to vector<2x8xf32>
    %625 = vector.shape_cast %624 : vector<2x8xf32> to vector<2x8x1xf32>
    %626 = vector.broadcast %625 : vector<2x8x1xf32> to vector<2x8x8xf32>
    %627 = arith.subf %623, %626 : vector<2x8x8xf32>
    %628 = math.exp %627 : vector<2x8x8xf32>
    %cst_397 = arith.constant dense<0.000000e+00> : vector<2x8xf32>
    %629 = vector.multi_reduction <add>, %628, %cst_397 [2] : vector<2x8x8xf32> to vector<2x8xf32>
    %630 = vector.shape_cast %629 : vector<2x8xf32> to vector<2x8x1xf32>
    %631 = vector.broadcast %630 : vector<2x8x1xf32> to vector<2x8x8xf32>
    %632 = arith.divf %628, %631 : vector<2x8x8xf32>
    %633 = arith.truncf %632 : vector<2x8x8xf32> to vector<2x8x8xbf16>
    "tpu.trace_start"() <{level = 10 : i32, message = "bts,bsd->btd"}> : () -> ()
    %cst_398 = arith.constant dense<0.000000e+00> : vector<2x8x32xf32>
    %634 = tpu.matmul %633, %618, %cst_398 {dimension_numbers = #tpu.dot_dimension_numbers<[2], [1], [1], [2], [0, 0, 0, 1, 1, 2], [0], [0]>} : vector<2x8x8xbf16>, vector<2x8x32xbf16>, vector<2x8x32xf32> -> vector<2x8x32xf32>
    "tpu.trace_stop"() : () -> ()
    %635 = vector.shape_cast %634 : vector<2x8x32xf32> to vector<16x32xf32>
    %636 = arith.truncf %635 : vector<16x32xf32> to vector<16x32xbf16>
    %637 = vector.extract_strided_slice %573 {offsets = [0, 0], sizes = [32, 128], strides = [1, 1]} : vector<128x128xbf16> to vector<32x128xbf16>
    %cst_399 = arith.constant dense<0.000000e+00> : vector<16x128xf32>
    %638 = tpu.matmul %636, %637, %cst_399 {dimension_numbers = #tpu.dot_dimension_numbers<[1], [0], [0], [1], [0, 0, 1, 1], [], []>} : vector<16x32xbf16>, vector<32x128xbf16>, vector<16x128xf32> -> vector<16x128xf32>
    %639 = arith.addf %615, %638 : vector<16x128xf32>
    %640 = vector.extract_strided_slice %608 {offsets = [0, 0, 32], sizes = [2, 8, 32], strides = [1, 1, 1]} : vector<2x8x128xbf16> to vector<2x8x32xbf16>
    %641 = vector.extract_strided_slice %611 {offsets = [0, 0, 32], sizes = [2, 8, 32], strides = [1, 1, 1]} : vector<2x8x128xbf16> to vector<2x8x32xbf16>
    %642 = vector.extract_strided_slice %614 {offsets = [0, 0, 32], sizes = [2, 8, 32], strides = [1, 1, 1]} : vector<2x8x128xbf16> to vector<2x8x32xbf16>
    "tpu.trace_start"() <{level = 10 : i32, message = "btd,bsd->bts"}> : () -> ()
    %cst_400 = arith.constant dense<0.000000e+00> : vector<2x8x8xf32>
    %643 = tpu.matmul %640, %641, %cst_400 {dimension_numbers = #tpu.dot_dimension_numbers<[2], [2], [1], [1], [0, 0, 0, 1, 1, 1], [0], [0]>} : vector<2x8x32xbf16>, vector<2x8x32xbf16>, vector<2x8x8xf32> -> vector<2x8x8xf32>
    "tpu.trace_stop"() : () -> ()
    %cst_401 = arith.constant 2.000000e-01 : f32
    %644 = vector.broadcast %cst_401 : f32 to vector<2x8x8xf32>
    %645 = arith.mulf %643, %644 : vector<2x8x8xf32>
    %646 = vector.broadcast %121 : vector<1x8x8xf32> to vector<2x8x8xf32>
    %647 = arith.addf %645, %646 : vector<2x8x8xf32>
    %cst_402 = arith.constant dense<0xFF800000> : vector<2x8xf32>
    %648 = vector.multi_reduction <maximumf>, %647, %cst_402 [2] : vector<2x8x8xf32> to vector<2x8xf32>
    %649 = vector.shape_cast %648 : vector<2x8xf32> to vector<2x8x1xf32>
    %650 = vector.broadcast %649 : vector<2x8x1xf32> to vector<2x8x8xf32>
    %651 = arith.subf %647, %650 : vector<2x8x8xf32>
    %652 = math.exp %651 : vector<2x8x8xf32>
    %cst_403 = arith.constant dense<0.000000e+00> : vector<2x8xf32>
    %653 = vector.multi_reduction <add>, %652, %cst_403 [2] : vector<2x8x8xf32> to vector<2x8xf32>
    %654 = vector.shape_cast %653 : vector<2x8xf32> to vector<2x8x1xf32>
    %655 = vector.broadcast %654 : vector<2x8x1xf32> to vector<2x8x8xf32>
    %656 = arith.divf %652, %655 : vector<2x8x8xf32>
    %657 = arith.truncf %656 : vector<2x8x8xf32> to vector<2x8x8xbf16>
    "tpu.trace_start"() <{level = 10 : i32, message = "bts,bsd->btd"}> : () -> ()
    %cst_404 = arith.constant dense<0.000000e+00> : vector<2x8x32xf32>
    %658 = tpu.matmul %657, %642, %cst_404 {dimension_numbers = #tpu.dot_dimension_numbers<[2], [1], [1], [2], [0, 0, 0, 1, 1, 2], [0], [0]>} : vector<2x8x8xbf16>, vector<2x8x32xbf16>, vector<2x8x32xf32> -> vector<2x8x32xf32>
    "tpu.trace_stop"() : () -> ()
    %659 = vector.shape_cast %658 : vector<2x8x32xf32> to vector<16x32xf32>
    %660 = arith.truncf %659 : vector<16x32xf32> to vector<16x32xbf16>
    %661 = vector.extract_strided_slice %573 {offsets = [32, 0], sizes = [32, 128], strides = [1, 1]} : vector<128x128xbf16> to vector<32x128xbf16>
    %cst_405 = arith.constant dense<0.000000e+00> : vector<16x128xf32>
    %662 = tpu.matmul %660, %661, %cst_405 {dimension_numbers = #tpu.dot_dimension_numbers<[1], [0], [0], [1], [0, 0, 1, 1], [], []>} : vector<16x32xbf16>, vector<32x128xbf16>, vector<16x128xf32> -> vector<16x128xf32>
    %663 = arith.addf %639, %662 : vector<16x128xf32>
    %664 = vector.extract_strided_slice %608 {offsets = [0, 0, 64], sizes = [2, 8, 32], strides = [1, 1, 1]} : vector<2x8x128xbf16> to vector<2x8x32xbf16>
    %665 = vector.extract_strided_slice %611 {offsets = [0, 0, 64], sizes = [2, 8, 32], strides = [1, 1, 1]} : vector<2x8x128xbf16> to vector<2x8x32xbf16>
    %666 = vector.extract_strided_slice %614 {offsets = [0, 0, 64], sizes = [2, 8, 32], strides = [1, 1, 1]} : vector<2x8x128xbf16> to vector<2x8x32xbf16>
    "tpu.trace_start"() <{level = 10 : i32, message = "btd,bsd->bts"}> : () -> ()
    %cst_406 = arith.constant dense<0.000000e+00> : vector<2x8x8xf32>
    %667 = tpu.matmul %664, %665, %cst_406 {dimension_numbers = #tpu.dot_dimension_numbers<[2], [2], [1], [1], [0, 0, 0, 1, 1, 1], [0], [0]>} : vector<2x8x32xbf16>, vector<2x8x32xbf16>, vector<2x8x8xf32> -> vector<2x8x8xf32>
    "tpu.trace_stop"() : () -> ()
    %cst_407 = arith.constant 2.000000e-01 : f32
    %668 = vector.broadcast %cst_407 : f32 to vector<2x8x8xf32>
    %669 = arith.mulf %667, %668 : vector<2x8x8xf32>
    %670 = vector.broadcast %121 : vector<1x8x8xf32> to vector<2x8x8xf32>
    %671 = arith.addf %669, %670 : vector<2x8x8xf32>
    %cst_408 = arith.constant dense<0xFF800000> : vector<2x8xf32>
    %672 = vector.multi_reduction <maximumf>, %671, %cst_408 [2] : vector<2x8x8xf32> to vector<2x8xf32>
    %673 = vector.shape_cast %672 : vector<2x8xf32> to vector<2x8x1xf32>
    %674 = vector.broadcast %673 : vector<2x8x1xf32> to vector<2x8x8xf32>
    %675 = arith.subf %671, %674 : vector<2x8x8xf32>
    %676 = math.exp %675 : vector<2x8x8xf32>
    %cst_409 = arith.constant dense<0.000000e+00> : vector<2x8xf32>
    %677 = vector.multi_reduction <add>, %676, %cst_409 [2] : vector<2x8x8xf32> to vector<2x8xf32>
    %678 = vector.shape_cast %677 : vector<2x8xf32> to vector<2x8x1xf32>
    %679 = vector.broadcast %678 : vector<2x8x1xf32> to vector<2x8x8xf32>
    %680 = arith.divf %676, %679 : vector<2x8x8xf32>
    %681 = arith.truncf %680 : vector<2x8x8xf32> to vector<2x8x8xbf16>
    "tpu.trace_start"() <{level = 10 : i32, message = "bts,bsd->btd"}> : () -> ()
    %cst_410 = arith.constant dense<0.000000e+00> : vector<2x8x32xf32>
    %682 = tpu.matmul %681, %666, %cst_410 {dimension_numbers = #tpu.dot_dimension_numbers<[2], [1], [1], [2], [0, 0, 0, 1, 1, 2], [0], [0]>} : vector<2x8x8xbf16>, vector<2x8x32xbf16>, vector<2x8x32xf32> -> vector<2x8x32xf32>
    "tpu.trace_stop"() : () -> ()
    %683 = vector.shape_cast %682 : vector<2x8x32xf32> to vector<16x32xf32>
    %684 = arith.truncf %683 : vector<16x32xf32> to vector<16x32xbf16>
    %685 = vector.extract_strided_slice %573 {offsets = [64, 0], sizes = [32, 128], strides = [1, 1]} : vector<128x128xbf16> to vector<32x128xbf16>
    %cst_411 = arith.constant dense<0.000000e+00> : vector<16x128xf32>
    %686 = tpu.matmul %684, %685, %cst_411 {dimension_numbers = #tpu.dot_dimension_numbers<[1], [0], [0], [1], [0, 0, 1, 1], [], []>} : vector<16x32xbf16>, vector<32x128xbf16>, vector<16x128xf32> -> vector<16x128xf32>
    %687 = arith.addf %663, %686 : vector<16x128xf32>
    %688 = vector.extract_strided_slice %608 {offsets = [0, 0, 96], sizes = [2, 8, 32], strides = [1, 1, 1]} : vector<2x8x128xbf16> to vector<2x8x32xbf16>
    %689 = vector.extract_strided_slice %611 {offsets = [0, 0, 96], sizes = [2, 8, 32], strides = [1, 1, 1]} : vector<2x8x128xbf16> to vector<2x8x32xbf16>
    %690 = vector.extract_strided_slice %614 {offsets = [0, 0, 96], sizes = [2, 8, 32], strides = [1, 1, 1]} : vector<2x8x128xbf16> to vector<2x8x32xbf16>
    "tpu.trace_start"() <{level = 10 : i32, message = "btd,bsd->bts"}> : () -> ()
    %cst_412 = arith.constant dense<0.000000e+00> : vector<2x8x8xf32>
    %691 = tpu.matmul %688, %689, %cst_412 {dimension_numbers = #tpu.dot_dimension_numbers<[2], [2], [1], [1], [0, 0, 0, 1, 1, 1], [0], [0]>} : vector<2x8x32xbf16>, vector<2x8x32xbf16>, vector<2x8x8xf32> -> vector<2x8x8xf32>
    "tpu.trace_stop"() : () -> ()
    %cst_413 = arith.constant 2.000000e-01 : f32
    %692 = vector.broadcast %cst_413 : f32 to vector<2x8x8xf32>
    %693 = arith.mulf %691, %692 : vector<2x8x8xf32>
    %694 = vector.broadcast %121 : vector<1x8x8xf32> to vector<2x8x8xf32>
    %695 = arith.addf %693, %694 : vector<2x8x8xf32>
    %cst_414 = arith.constant dense<0xFF800000> : vector<2x8xf32>
    %696 = vector.multi_reduction <maximumf>, %695, %cst_414 [2] : vector<2x8x8xf32> to vector<2x8xf32>
    %697 = vector.shape_cast %696 : vector<2x8xf32> to vector<2x8x1xf32>
    %698 = vector.broadcast %697 : vector<2x8x1xf32> to vector<2x8x8xf32>
    %699 = arith.subf %695, %698 : vector<2x8x8xf32>
    %700 = math.exp %699 : vector<2x8x8xf32>
    %cst_415 = arith.constant dense<0.000000e+00> : vector<2x8xf32>
    %701 = vector.multi_reduction <add>, %700, %cst_415 [2] : vector<2x8x8xf32> to vector<2x8xf32>
    %702 = vector.shape_cast %701 : vector<2x8xf32> to vector<2x8x1xf32>
    %703 = vector.broadcast %702 : vector<2x8x1xf32> to vector<2x8x8xf32>
    %704 = arith.divf %700, %703 : vector<2x8x8xf32>
    %705 = arith.truncf %704 : vector<2x8x8xf32> to vector<2x8x8xbf16>
    "tpu.trace_start"() <{level = 10 : i32, message = "bts,bsd->btd"}> : () -> ()
    %cst_416 = arith.constant dense<0.000000e+00> : vector<2x8x32xf32>
    %706 = tpu.matmul %705, %690, %cst_416 {dimension_numbers = #tpu.dot_dimension_numbers<[2], [1], [1], [2], [0, 0, 0, 1, 1, 2], [0], [0]>} : vector<2x8x8xbf16>, vector<2x8x32xbf16>, vector<2x8x32xf32> -> vector<2x8x32xf32>
    "tpu.trace_stop"() : () -> ()
    %707 = vector.shape_cast %706 : vector<2x8x32xf32> to vector<16x32xf32>
    %708 = arith.truncf %707 : vector<16x32xf32> to vector<16x32xbf16>
    %709 = vector.extract_strided_slice %573 {offsets = [96, 0], sizes = [32, 128], strides = [1, 1]} : vector<128x128xbf16> to vector<32x128xbf16>
    %cst_417 = arith.constant dense<0.000000e+00> : vector<16x128xf32>
    %710 = tpu.matmul %708, %709, %cst_417 {dimension_numbers = #tpu.dot_dimension_numbers<[1], [0], [0], [1], [0, 0, 1, 1], [], []>} : vector<16x32xbf16>, vector<32x128xbf16>, vector<16x128xf32> -> vector<16x128xf32>
    %711 = arith.addf %687, %710 : vector<16x128xf32>
    %712 = arith.addf %545, %711 : vector<16x128xf32>
    %c2_418 = arith.constant 2 : index
    %c0_419 = arith.constant 0 : index
    %c0_420 = arith.constant 0 : index
    %713 = vector.load %arg7[%c2_418, %c0_419, %c0_420] : memref<4x1x128xf32, #tpu.memory_space<vmem>>, vector<1x1x128xf32>
    %714 = vector.shape_cast %713 : vector<1x1x128xf32> to vector<1x128xf32>
    %715 = vector.broadcast %714 : vector<1x128xf32> to vector<16x128xf32>
    %716 = arith.addf %712, %715 : vector<16x128xf32>
    %c2_421 = arith.constant 2 : index
    %c0_422 = arith.constant 0 : index
    %c0_423 = arith.constant 0 : index
    %717 = vector.load %arg10[%c2_421, %c0_422, %c0_423] : memref<4x1x128xf32, #tpu.memory_space<vmem>>, vector<1x1x128xf32>
    %718 = vector.shape_cast %717 : vector<1x1x128xf32> to vector<1x128xf32>
    %c2_424 = arith.constant 2 : index
    %c0_425 = arith.constant 0 : index
    %c0_426 = arith.constant 0 : index
    %719 = vector.load %arg11[%c2_424, %c0_425, %c0_426] : memref<4x1x128xf32, #tpu.memory_space<vmem>>, vector<1x1x128xf32>
    %720 = vector.shape_cast %719 : vector<1x1x128xf32> to vector<1x128xf32>
    %cst_427 = arith.constant dense<0.000000e+00> : vector<16xf32>
    %721 = vector.multi_reduction <add>, %716, %cst_427 [1] : vector<16x128xf32> to vector<16xf32>
    %722 = vector.shape_cast %721 : vector<16xf32> to vector<16x1xf32>
    %cst_428 = arith.constant 0.00999999977 : f32
    %723 = vector.broadcast %cst_428 : f32 to vector<16x1xf32>
    %724 = arith.mulf %722, %723 : vector<16x1xf32>
    %725 = vector.broadcast %724 : vector<16x1xf32> to vector<16x128xf32>
    %726 = arith.subf %716, %725 : vector<16x128xf32>
    %727 = vector.broadcast %114 : vector<1x128xf32> to vector<16x128xf32>
    %728 = arith.mulf %726, %727 : vector<16x128xf32>
    %729 = arith.mulf %728, %728 : vector<16x128xf32>
    %cst_429 = arith.constant dense<0.000000e+00> : vector<16xf32>
    %730 = vector.multi_reduction <add>, %729, %cst_429 [1] : vector<16x128xf32> to vector<16xf32>
    %731 = vector.shape_cast %730 : vector<16xf32> to vector<16x1xf32>
    %cst_430 = arith.constant 0.00999999977 : f32
    %732 = vector.broadcast %cst_430 : f32 to vector<16x1xf32>
    %733 = arith.mulf %731, %732 : vector<16x1xf32>
    %cst_431 = arith.constant 9.99999974E-6 : f32
    %734 = vector.broadcast %cst_431 : f32 to vector<16x1xf32>
    %735 = arith.addf %733, %734 : vector<16x1xf32>
    %736 = math.rsqrt %735 : vector<16x1xf32>
    %737 = vector.broadcast %736 : vector<16x1xf32> to vector<16x128xf32>
    %738 = arith.mulf %728, %737 : vector<16x128xf32>
    %739 = vector.broadcast %718 : vector<1x128xf32> to vector<16x128xf32>
    %740 = arith.mulf %738, %739 : vector<16x128xf32>
    %741 = vector.broadcast %720 : vector<1x128xf32> to vector<16x128xf32>
    %742 = arith.addf %740, %741 : vector<16x128xf32>
    %743 = arith.truncf %742 : vector<16x128xf32> to vector<16x128xbf16>
    %cst_432 = arith.constant dense<0.000000e+00> : vector<16x512xf32>
    %744 = tpu.matmul %743, %575, %cst_432 {dimension_numbers = #tpu.dot_dimension_numbers<[1], [0], [0], [1], [0, 0, 1, 1], [], []>} : vector<16x128xbf16>, vector<128x512xbf16>, vector<16x512xf32> -> vector<16x512xf32>
    %c2_433 = arith.constant 2 : index
    %c0_434 = arith.constant 0 : index
    %c0_435 = arith.constant 0 : index
    %745 = vector.load %arg12[%c2_433, %c0_434, %c0_435] : memref<4x1x512xf32, #tpu.memory_space<vmem>>, vector<1x1x512xf32>
    %746 = vector.shape_cast %745 : vector<1x1x512xf32> to vector<1x512xf32>
    %747 = vector.broadcast %746 : vector<1x512xf32> to vector<16x512xf32>
    %748 = arith.addf %744, %747 : vector<16x512xf32>
    %cst_436 = arith.constant 0.000000e+00 : f32
    %749 = vector.broadcast %cst_436 : f32 to vector<16x512xf32>
    %750 = arith.maximumf %748, %749 : vector<16x512xf32>
    %751 = arith.truncf %750 : vector<16x512xf32> to vector<16x512xbf16>
    %cst_437 = arith.constant dense<0.000000e+00> : vector<16x128xf32>
    %752 = tpu.matmul %751, %577, %cst_437 {dimension_numbers = #tpu.dot_dimension_numbers<[1], [0], [0], [1], [0, 0, 1, 1], [], []>} : vector<16x512xbf16>, vector<512x128xbf16>, vector<16x128xf32> -> vector<16x128xf32>
    %753 = arith.addf %716, %752 : vector<16x128xf32>
    %c2_438 = arith.constant 2 : index
    %c0_439 = arith.constant 0 : index
    %c0_440 = arith.constant 0 : index
    %754 = vector.load %arg13[%c2_438, %c0_439, %c0_440] : memref<4x1x128xf32, #tpu.memory_space<vmem>>, vector<1x1x128xf32>
    %755 = vector.shape_cast %754 : vector<1x1x128xf32> to vector<1x128xf32>
    %756 = vector.broadcast %755 : vector<1x128xf32> to vector<16x128xf32>
    %757 = arith.addf %753, %756 : vector<16x128xf32>
    %c3_i32_441 = arith.constant 3 : i32
    %c3_i32_442 = arith.constant 3 : i32
    %c3_i32_443 = arith.constant 3 : i32
    %c0_i32_444 = arith.constant 0 : i32
    %c0_i32_445 = arith.constant 0 : i32
    %c0_i32_446 = arith.constant 0 : i32
    %758 = tpu.memref_slice %arg3[%c3_i32_441, %c0_i32_445, %c0_i32_446] : memref<4x128x384xbf16, #tpu.memory_space<any>> -> memref<1x128x384xbf16, #tpu.memory_space<any>>
    %759 = tpu.memref_squeeze %758 : memref<1x128x384xbf16, #tpu.memory_space<any>> -> memref<128x384xbf16, #tpu.memory_space<any>>
    %c0_i32_447 = arith.constant 0 : i32
    %c0_i32_448 = arith.constant 0 : i32
    %760 = tpu.memref_slice %arg19[%c3_i32_442, %c0_i32_447, %c0_i32_448] : memref<4x128x384xbf16, #tpu.memory_space<vmem>> -> memref<1x128x384xbf16, #tpu.memory_space<vmem>>
    %761 = tpu.memref_squeeze %760 : memref<1x128x384xbf16, #tpu.memory_space<vmem>> -> memref<128x384xbf16, #tpu.memory_space<vmem>>
    %762 = tpu.memref_slice %arg23[%c3_i32_443, %c0_i32_444] : memref<4x4x!tpu.dma_semaphore, #tpu.memory_space<semaphore_mem>> -> memref<1x1x!tpu.dma_semaphore, #tpu.memory_space<semaphore_mem>>
    %763 = tpu.memref_squeeze %762 : memref<1x1x!tpu.dma_semaphore, #tpu.memory_space<semaphore_mem>> -> memref<!tpu.dma_semaphore, #tpu.memory_space<semaphore_mem>>
    tpu.wait_dma2 semaphore(%763 : memref<!tpu.dma_semaphore, #tpu.memory_space<semaphore_mem>>) src(%759 : memref<128x384xbf16, #tpu.memory_space<any>>) dst(%761 : memref<128x384xbf16, #tpu.memory_space<vmem>>)
    %c3_i32_449 = arith.constant 3 : i32
    %c3_i32_450 = arith.constant 3 : i32
    %c3_i32_451 = arith.constant 3 : i32
    %c1_i32_452 = arith.constant 1 : i32
    %c0_i32_453 = arith.constant 0 : i32
    %c0_i32_454 = arith.constant 0 : i32
    %764 = tpu.memref_slice %arg4[%c3_i32_449, %c0_i32_453, %c0_i32_454] : memref<4x128x128xbf16, #tpu.memory_space<any>> -> memref<1x128x128xbf16, #tpu.memory_space<any>>
    %765 = tpu.memref_squeeze %764 : memref<1x128x128xbf16, #tpu.memory_space<any>> -> memref<128x128xbf16, #tpu.memory_space<any>>
    %c0_i32_455 = arith.constant 0 : i32
    %c0_i32_456 = arith.constant 0 : i32
    %766 = tpu.memref_slice %arg20[%c3_i32_450, %c0_i32_455, %c0_i32_456] : memref<4x128x128xbf16, #tpu.memory_space<vmem>> -> memref<1x128x128xbf16, #tpu.memory_space<vmem>>
    %767 = tpu.memref_squeeze %766 : memref<1x128x128xbf16, #tpu.memory_space<vmem>> -> memref<128x128xbf16, #tpu.memory_space<vmem>>
    %768 = tpu.memref_slice %arg23[%c3_i32_451, %c1_i32_452] : memref<4x4x!tpu.dma_semaphore, #tpu.memory_space<semaphore_mem>> -> memref<1x1x!tpu.dma_semaphore, #tpu.memory_space<semaphore_mem>>
    %769 = tpu.memref_squeeze %768 : memref<1x1x!tpu.dma_semaphore, #tpu.memory_space<semaphore_mem>> -> memref<!tpu.dma_semaphore, #tpu.memory_space<semaphore_mem>>
    tpu.wait_dma2 semaphore(%769 : memref<!tpu.dma_semaphore, #tpu.memory_space<semaphore_mem>>) src(%765 : memref<128x128xbf16, #tpu.memory_space<any>>) dst(%767 : memref<128x128xbf16, #tpu.memory_space<vmem>>)
    %c3_i32_457 = arith.constant 3 : i32
    %c3_i32_458 = arith.constant 3 : i32
    %c3_i32_459 = arith.constant 3 : i32
    %c2_i32_460 = arith.constant 2 : i32
    %c0_i32_461 = arith.constant 0 : i32
    %c0_i32_462 = arith.constant 0 : i32
    %770 = tpu.memref_slice %arg5[%c3_i32_457, %c0_i32_461, %c0_i32_462] : memref<4x128x512xbf16, #tpu.memory_space<any>> -> memref<1x128x512xbf16, #tpu.memory_space<any>>
    %771 = tpu.memref_squeeze %770 : memref<1x128x512xbf16, #tpu.memory_space<any>> -> memref<128x512xbf16, #tpu.memory_space<any>>
    %c0_i32_463 = arith.constant 0 : i32
    %c0_i32_464 = arith.constant 0 : i32
    %772 = tpu.memref_slice %arg21[%c3_i32_458, %c0_i32_463, %c0_i32_464] : memref<4x128x512xbf16, #tpu.memory_space<vmem>> -> memref<1x128x512xbf16, #tpu.memory_space<vmem>>
    %773 = tpu.memref_squeeze %772 : memref<1x128x512xbf16, #tpu.memory_space<vmem>> -> memref<128x512xbf16, #tpu.memory_space<vmem>>
    %774 = tpu.memref_slice %arg23[%c3_i32_459, %c2_i32_460] : memref<4x4x!tpu.dma_semaphore, #tpu.memory_space<semaphore_mem>> -> memref<1x1x!tpu.dma_semaphore, #tpu.memory_space<semaphore_mem>>
    %775 = tpu.memref_squeeze %774 : memref<1x1x!tpu.dma_semaphore, #tpu.memory_space<semaphore_mem>> -> memref<!tpu.dma_semaphore, #tpu.memory_space<semaphore_mem>>
    tpu.wait_dma2 semaphore(%775 : memref<!tpu.dma_semaphore, #tpu.memory_space<semaphore_mem>>) src(%771 : memref<128x512xbf16, #tpu.memory_space<any>>) dst(%773 : memref<128x512xbf16, #tpu.memory_space<vmem>>)
    %c3_i32_465 = arith.constant 3 : i32
    %c3_i32_466 = arith.constant 3 : i32
    %c3_i32_467 = arith.constant 3 : i32
    %c3_i32_468 = arith.constant 3 : i32
    %c0_i32_469 = arith.constant 0 : i32
    %c0_i32_470 = arith.constant 0 : i32
    %776 = tpu.memref_slice %arg6[%c3_i32_465, %c0_i32_469, %c0_i32_470] : memref<4x512x128xbf16, #tpu.memory_space<any>> -> memref<1x512x128xbf16, #tpu.memory_space<any>>
    %777 = tpu.memref_squeeze %776 : memref<1x512x128xbf16, #tpu.memory_space<any>> -> memref<512x128xbf16, #tpu.memory_space<any>>
    %c0_i32_471 = arith.constant 0 : i32
    %c0_i32_472 = arith.constant 0 : i32
    %778 = tpu.memref_slice %arg22[%c3_i32_466, %c0_i32_471, %c0_i32_472] : memref<4x512x128xbf16, #tpu.memory_space<vmem>> -> memref<1x512x128xbf16, #tpu.memory_space<vmem>>
    %779 = tpu.memref_squeeze %778 : memref<1x512x128xbf16, #tpu.memory_space<vmem>> -> memref<512x128xbf16, #tpu.memory_space<vmem>>
    %780 = tpu.memref_slice %arg23[%c3_i32_467, %c3_i32_468] : memref<4x4x!tpu.dma_semaphore, #tpu.memory_space<semaphore_mem>> -> memref<1x1x!tpu.dma_semaphore, #tpu.memory_space<semaphore_mem>>
    %781 = tpu.memref_squeeze %780 : memref<1x1x!tpu.dma_semaphore, #tpu.memory_space<semaphore_mem>> -> memref<!tpu.dma_semaphore, #tpu.memory_space<semaphore_mem>>
    tpu.wait_dma2 semaphore(%781 : memref<!tpu.dma_semaphore, #tpu.memory_space<semaphore_mem>>) src(%777 : memref<512x128xbf16, #tpu.memory_space<any>>) dst(%779 : memref<512x128xbf16, #tpu.memory_space<vmem>>)
    %c3 = arith.constant 3 : index
    %c0_473 = arith.constant 0 : index
    %c0_474 = arith.constant 0 : index
    %782 = vector.load %arg19[%c3, %c0_473, %c0_474] : memref<4x128x384xbf16, #tpu.memory_space<vmem>>, vector<1x128x384xbf16>
    %783 = vector.shape_cast %782 : vector<1x128x384xbf16> to vector<128x384xbf16>
    %c3_475 = arith.constant 3 : index
    %c0_476 = arith.constant 0 : index
    %c0_477 = arith.constant 0 : index
    %784 = vector.load %arg20[%c3_475, %c0_476, %c0_477] : memref<4x128x128xbf16, #tpu.memory_space<vmem>>, vector<1x128x128xbf16>
    %785 = vector.shape_cast %784 : vector<1x128x128xbf16> to vector<128x128xbf16>
    %c3_478 = arith.constant 3 : index
    %c0_479 = arith.constant 0 : index
    %c0_480 = arith.constant 0 : index
    %786 = vector.load %arg21[%c3_478, %c0_479, %c0_480] : memref<4x128x512xbf16, #tpu.memory_space<vmem>>, vector<1x128x512xbf16>
    %787 = vector.shape_cast %786 : vector<1x128x512xbf16> to vector<128x512xbf16>
    %c3_481 = arith.constant 3 : index
    %c0_482 = arith.constant 0 : index
    %c0_483 = arith.constant 0 : index
    %788 = vector.load %arg22[%c3_481, %c0_482, %c0_483] : memref<4x512x128xbf16, #tpu.memory_space<vmem>>, vector<1x512x128xbf16>
    %789 = vector.shape_cast %788 : vector<1x512x128xbf16> to vector<512x128xbf16>
    %c3_484 = arith.constant 3 : index
    %c0_485 = arith.constant 0 : index
    %c0_486 = arith.constant 0 : index
    %790 = vector.load %arg8[%c3_484, %c0_485, %c0_486] : memref<4x1x128xf32, #tpu.memory_space<vmem>>, vector<1x1x128xf32>
    %791 = vector.shape_cast %790 : vector<1x1x128xf32> to vector<1x128xf32>
    %c3_487 = arith.constant 3 : index
    %c0_488 = arith.constant 0 : index
    %c0_489 = arith.constant 0 : index
    %792 = vector.load %arg9[%c3_487, %c0_488, %c0_489] : memref<4x1x128xf32, #tpu.memory_space<vmem>>, vector<1x1x128xf32>
    %793 = vector.shape_cast %792 : vector<1x1x128xf32> to vector<1x128xf32>
    %cst_490 = arith.constant dense<0.000000e+00> : vector<16xf32>
    %794 = vector.multi_reduction <add>, %757, %cst_490 [1] : vector<16x128xf32> to vector<16xf32>
    %795 = vector.shape_cast %794 : vector<16xf32> to vector<16x1xf32>
    %cst_491 = arith.constant 0.00999999977 : f32
    %796 = vector.broadcast %cst_491 : f32 to vector<16x1xf32>
    %797 = arith.mulf %795, %796 : vector<16x1xf32>
    %798 = vector.broadcast %797 : vector<16x1xf32> to vector<16x128xf32>
    %799 = arith.subf %757, %798 : vector<16x128xf32>
    %800 = vector.broadcast %114 : vector<1x128xf32> to vector<16x128xf32>
    %801 = arith.mulf %799, %800 : vector<16x128xf32>
    %802 = arith.mulf %801, %801 : vector<16x128xf32>
    %cst_492 = arith.constant dense<0.000000e+00> : vector<16xf32>
    %803 = vector.multi_reduction <add>, %802, %cst_492 [1] : vector<16x128xf32> to vector<16xf32>
    %804 = vector.shape_cast %803 : vector<16xf32> to vector<16x1xf32>
    %cst_493 = arith.constant 0.00999999977 : f32
    %805 = vector.broadcast %cst_493 : f32 to vector<16x1xf32>
    %806 = arith.mulf %804, %805 : vector<16x1xf32>
    %cst_494 = arith.constant 9.99999974E-6 : f32
    %807 = vector.broadcast %cst_494 : f32 to vector<16x1xf32>
    %808 = arith.addf %806, %807 : vector<16x1xf32>
    %809 = math.rsqrt %808 : vector<16x1xf32>
    %810 = vector.broadcast %809 : vector<16x1xf32> to vector<16x128xf32>
    %811 = arith.mulf %801, %810 : vector<16x128xf32>
    %812 = vector.broadcast %791 : vector<1x128xf32> to vector<16x128xf32>
    %813 = arith.mulf %811, %812 : vector<16x128xf32>
    %814 = vector.broadcast %793 : vector<1x128xf32> to vector<16x128xf32>
    %815 = arith.addf %813, %814 : vector<16x128xf32>
    %816 = arith.truncf %815 : vector<16x128xf32> to vector<16x128xbf16>
    %cst_495 = arith.constant dense<0.000000e+00> : vector<16x384xf32>
    %817 = tpu.matmul %816, %783, %cst_495 {dimension_numbers = #tpu.dot_dimension_numbers<[1], [0], [0], [1], [0, 0, 1, 1], [], []>} : vector<16x128xbf16>, vector<128x384xbf16>, vector<16x384xf32> -> vector<16x384xf32>
    %818 = vector.extract_strided_slice %817 {offsets = [0, 0], sizes = [16, 128], strides = [1, 1]} : vector<16x384xf32> to vector<16x128xf32>
    %819 = arith.truncf %818 : vector<16x128xf32> to vector<16x128xbf16>
    %820 = vector.shape_cast %819 : vector<16x128xbf16> to vector<2x8x128xbf16>
    %821 = vector.extract_strided_slice %817 {offsets = [0, 128], sizes = [16, 128], strides = [1, 1]} : vector<16x384xf32> to vector<16x128xf32>
    %822 = arith.truncf %821 : vector<16x128xf32> to vector<16x128xbf16>
    %823 = vector.shape_cast %822 : vector<16x128xbf16> to vector<2x8x128xbf16>
    %824 = vector.extract_strided_slice %817 {offsets = [0, 256], sizes = [16, 128], strides = [1, 1]} : vector<16x384xf32> to vector<16x128xf32>
    %825 = arith.truncf %824 : vector<16x128xf32> to vector<16x128xbf16>
    %826 = vector.shape_cast %825 : vector<16x128xbf16> to vector<2x8x128xbf16>
    %cst_496 = arith.constant 0.000000e+00 : f32
    %827 = vector.broadcast %cst_496 : f32 to vector<16x128xf32>
    %828 = vector.extract_strided_slice %820 {offsets = [0, 0, 0], sizes = [2, 8, 32], strides = [1, 1, 1]} : vector<2x8x128xbf16> to vector<2x8x32xbf16>
    %829 = vector.extract_strided_slice %823 {offsets = [0, 0, 0], sizes = [2, 8, 32], strides = [1, 1, 1]} : vector<2x8x128xbf16> to vector<2x8x32xbf16>
    %830 = vector.extract_strided_slice %826 {offsets = [0, 0, 0], sizes = [2, 8, 32], strides = [1, 1, 1]} : vector<2x8x128xbf16> to vector<2x8x32xbf16>
    "tpu.trace_start"() <{level = 10 : i32, message = "btd,bsd->bts"}> : () -> ()
    %cst_497 = arith.constant dense<0.000000e+00> : vector<2x8x8xf32>
    %831 = tpu.matmul %828, %829, %cst_497 {dimension_numbers = #tpu.dot_dimension_numbers<[2], [2], [1], [1], [0, 0, 0, 1, 1, 1], [0], [0]>} : vector<2x8x32xbf16>, vector<2x8x32xbf16>, vector<2x8x8xf32> -> vector<2x8x8xf32>
    "tpu.trace_stop"() : () -> ()
    %cst_498 = arith.constant 2.000000e-01 : f32
    %832 = vector.broadcast %cst_498 : f32 to vector<2x8x8xf32>
    %833 = arith.mulf %831, %832 : vector<2x8x8xf32>
    %834 = vector.broadcast %121 : vector<1x8x8xf32> to vector<2x8x8xf32>
    %835 = arith.addf %833, %834 : vector<2x8x8xf32>
    %cst_499 = arith.constant dense<0xFF800000> : vector<2x8xf32>
    %836 = vector.multi_reduction <maximumf>, %835, %cst_499 [2] : vector<2x8x8xf32> to vector<2x8xf32>
    %837 = vector.shape_cast %836 : vector<2x8xf32> to vector<2x8x1xf32>
    %838 = vector.broadcast %837 : vector<2x8x1xf32> to vector<2x8x8xf32>
    %839 = arith.subf %835, %838 : vector<2x8x8xf32>
    %840 = math.exp %839 : vector<2x8x8xf32>
    %cst_500 = arith.constant dense<0.000000e+00> : vector<2x8xf32>
    %841 = vector.multi_reduction <add>, %840, %cst_500 [2] : vector<2x8x8xf32> to vector<2x8xf32>
    %842 = vector.shape_cast %841 : vector<2x8xf32> to vector<2x8x1xf32>
    %843 = vector.broadcast %842 : vector<2x8x1xf32> to vector<2x8x8xf32>
    %844 = arith.divf %840, %843 : vector<2x8x8xf32>
    %845 = arith.truncf %844 : vector<2x8x8xf32> to vector<2x8x8xbf16>
    "tpu.trace_start"() <{level = 10 : i32, message = "bts,bsd->btd"}> : () -> ()
    %cst_501 = arith.constant dense<0.000000e+00> : vector<2x8x32xf32>
    %846 = tpu.matmul %845, %830, %cst_501 {dimension_numbers = #tpu.dot_dimension_numbers<[2], [1], [1], [2], [0, 0, 0, 1, 1, 2], [0], [0]>} : vector<2x8x8xbf16>, vector<2x8x32xbf16>, vector<2x8x32xf32> -> vector<2x8x32xf32>
    "tpu.trace_stop"() : () -> ()
    %847 = vector.shape_cast %846 : vector<2x8x32xf32> to vector<16x32xf32>
    %848 = arith.truncf %847 : vector<16x32xf32> to vector<16x32xbf16>
    %849 = vector.extract_strided_slice %785 {offsets = [0, 0], sizes = [32, 128], strides = [1, 1]} : vector<128x128xbf16> to vector<32x128xbf16>
    %cst_502 = arith.constant dense<0.000000e+00> : vector<16x128xf32>
    %850 = tpu.matmul %848, %849, %cst_502 {dimension_numbers = #tpu.dot_dimension_numbers<[1], [0], [0], [1], [0, 0, 1, 1], [], []>} : vector<16x32xbf16>, vector<32x128xbf16>, vector<16x128xf32> -> vector<16x128xf32>
    %851 = arith.addf %827, %850 : vector<16x128xf32>
    %852 = vector.extract_strided_slice %820 {offsets = [0, 0, 32], sizes = [2, 8, 32], strides = [1, 1, 1]} : vector<2x8x128xbf16> to vector<2x8x32xbf16>
    %853 = vector.extract_strided_slice %823 {offsets = [0, 0, 32], sizes = [2, 8, 32], strides = [1, 1, 1]} : vector<2x8x128xbf16> to vector<2x8x32xbf16>
    %854 = vector.extract_strided_slice %826 {offsets = [0, 0, 32], sizes = [2, 8, 32], strides = [1, 1, 1]} : vector<2x8x128xbf16> to vector<2x8x32xbf16>
    "tpu.trace_start"() <{level = 10 : i32, message = "btd,bsd->bts"}> : () -> ()
    %cst_503 = arith.constant dense<0.000000e+00> : vector<2x8x8xf32>
    %855 = tpu.matmul %852, %853, %cst_503 {dimension_numbers = #tpu.dot_dimension_numbers<[2], [2], [1], [1], [0, 0, 0, 1, 1, 1], [0], [0]>} : vector<2x8x32xbf16>, vector<2x8x32xbf16>, vector<2x8x8xf32> -> vector<2x8x8xf32>
    "tpu.trace_stop"() : () -> ()
    %cst_504 = arith.constant 2.000000e-01 : f32
    %856 = vector.broadcast %cst_504 : f32 to vector<2x8x8xf32>
    %857 = arith.mulf %855, %856 : vector<2x8x8xf32>
    %858 = vector.broadcast %121 : vector<1x8x8xf32> to vector<2x8x8xf32>
    %859 = arith.addf %857, %858 : vector<2x8x8xf32>
    %cst_505 = arith.constant dense<0xFF800000> : vector<2x8xf32>
    %860 = vector.multi_reduction <maximumf>, %859, %cst_505 [2] : vector<2x8x8xf32> to vector<2x8xf32>
    %861 = vector.shape_cast %860 : vector<2x8xf32> to vector<2x8x1xf32>
    %862 = vector.broadcast %861 : vector<2x8x1xf32> to vector<2x8x8xf32>
    %863 = arith.subf %859, %862 : vector<2x8x8xf32>
    %864 = math.exp %863 : vector<2x8x8xf32>
    %cst_506 = arith.constant dense<0.000000e+00> : vector<2x8xf32>
    %865 = vector.multi_reduction <add>, %864, %cst_506 [2] : vector<2x8x8xf32> to vector<2x8xf32>
    %866 = vector.shape_cast %865 : vector<2x8xf32> to vector<2x8x1xf32>
    %867 = vector.broadcast %866 : vector<2x8x1xf32> to vector<2x8x8xf32>
    %868 = arith.divf %864, %867 : vector<2x8x8xf32>
    %869 = arith.truncf %868 : vector<2x8x8xf32> to vector<2x8x8xbf16>
    "tpu.trace_start"() <{level = 10 : i32, message = "bts,bsd->btd"}> : () -> ()
    %cst_507 = arith.constant dense<0.000000e+00> : vector<2x8x32xf32>
    %870 = tpu.matmul %869, %854, %cst_507 {dimension_numbers = #tpu.dot_dimension_numbers<[2], [1], [1], [2], [0, 0, 0, 1, 1, 2], [0], [0]>} : vector<2x8x8xbf16>, vector<2x8x32xbf16>, vector<2x8x32xf32> -> vector<2x8x32xf32>
    "tpu.trace_stop"() : () -> ()
    %871 = vector.shape_cast %870 : vector<2x8x32xf32> to vector<16x32xf32>
    %872 = arith.truncf %871 : vector<16x32xf32> to vector<16x32xbf16>
    %873 = vector.extract_strided_slice %785 {offsets = [32, 0], sizes = [32, 128], strides = [1, 1]} : vector<128x128xbf16> to vector<32x128xbf16>
    %cst_508 = arith.constant dense<0.000000e+00> : vector<16x128xf32>
    %874 = tpu.matmul %872, %873, %cst_508 {dimension_numbers = #tpu.dot_dimension_numbers<[1], [0], [0], [1], [0, 0, 1, 1], [], []>} : vector<16x32xbf16>, vector<32x128xbf16>, vector<16x128xf32> -> vector<16x128xf32>
    %875 = arith.addf %851, %874 : vector<16x128xf32>
    %876 = vector.extract_strided_slice %820 {offsets = [0, 0, 64], sizes = [2, 8, 32], strides = [1, 1, 1]} : vector<2x8x128xbf16> to vector<2x8x32xbf16>
    %877 = vector.extract_strided_slice %823 {offsets = [0, 0, 64], sizes = [2, 8, 32], strides = [1, 1, 1]} : vector<2x8x128xbf16> to vector<2x8x32xbf16>
    %878 = vector.extract_strided_slice %826 {offsets = [0, 0, 64], sizes = [2, 8, 32], strides = [1, 1, 1]} : vector<2x8x128xbf16> to vector<2x8x32xbf16>
    "tpu.trace_start"() <{level = 10 : i32, message = "btd,bsd->bts"}> : () -> ()
    %cst_509 = arith.constant dense<0.000000e+00> : vector<2x8x8xf32>
    %879 = tpu.matmul %876, %877, %cst_509 {dimension_numbers = #tpu.dot_dimension_numbers<[2], [2], [1], [1], [0, 0, 0, 1, 1, 1], [0], [0]>} : vector<2x8x32xbf16>, vector<2x8x32xbf16>, vector<2x8x8xf32> -> vector<2x8x8xf32>
    "tpu.trace_stop"() : () -> ()
    %cst_510 = arith.constant 2.000000e-01 : f32
    %880 = vector.broadcast %cst_510 : f32 to vector<2x8x8xf32>
    %881 = arith.mulf %879, %880 : vector<2x8x8xf32>
    %882 = vector.broadcast %121 : vector<1x8x8xf32> to vector<2x8x8xf32>
    %883 = arith.addf %881, %882 : vector<2x8x8xf32>
    %cst_511 = arith.constant dense<0xFF800000> : vector<2x8xf32>
    %884 = vector.multi_reduction <maximumf>, %883, %cst_511 [2] : vector<2x8x8xf32> to vector<2x8xf32>
    %885 = vector.shape_cast %884 : vector<2x8xf32> to vector<2x8x1xf32>
    %886 = vector.broadcast %885 : vector<2x8x1xf32> to vector<2x8x8xf32>
    %887 = arith.subf %883, %886 : vector<2x8x8xf32>
    %888 = math.exp %887 : vector<2x8x8xf32>
    %cst_512 = arith.constant dense<0.000000e+00> : vector<2x8xf32>
    %889 = vector.multi_reduction <add>, %888, %cst_512 [2] : vector<2x8x8xf32> to vector<2x8xf32>
    %890 = vector.shape_cast %889 : vector<2x8xf32> to vector<2x8x1xf32>
    %891 = vector.broadcast %890 : vector<2x8x1xf32> to vector<2x8x8xf32>
    %892 = arith.divf %888, %891 : vector<2x8x8xf32>
    %893 = arith.truncf %892 : vector<2x8x8xf32> to vector<2x8x8xbf16>
    "tpu.trace_start"() <{level = 10 : i32, message = "bts,bsd->btd"}> : () -> ()
    %cst_513 = arith.constant dense<0.000000e+00> : vector<2x8x32xf32>
    %894 = tpu.matmul %893, %878, %cst_513 {dimension_numbers = #tpu.dot_dimension_numbers<[2], [1], [1], [2], [0, 0, 0, 1, 1, 2], [0], [0]>} : vector<2x8x8xbf16>, vector<2x8x32xbf16>, vector<2x8x32xf32> -> vector<2x8x32xf32>
    "tpu.trace_stop"() : () -> ()
    %895 = vector.shape_cast %894 : vector<2x8x32xf32> to vector<16x32xf32>
    %896 = arith.truncf %895 : vector<16x32xf32> to vector<16x32xbf16>
    %897 = vector.extract_strided_slice %785 {offsets = [64, 0], sizes = [32, 128], strides = [1, 1]} : vector<128x128xbf16> to vector<32x128xbf16>
    %cst_514 = arith.constant dense<0.000000e+00> : vector<16x128xf32>
    %898 = tpu.matmul %896, %897, %cst_514 {dimension_numbers = #tpu.dot_dimension_numbers<[1], [0], [0], [1], [0, 0, 1, 1], [], []>} : vector<16x32xbf16>, vector<32x128xbf16>, vector<16x128xf32> -> vector<16x128xf32>
    %899 = arith.addf %875, %898 : vector<16x128xf32>
    %900 = vector.extract_strided_slice %820 {offsets = [0, 0, 96], sizes = [2, 8, 32], strides = [1, 1, 1]} : vector<2x8x128xbf16> to vector<2x8x32xbf16>
    %901 = vector.extract_strided_slice %823 {offsets = [0, 0, 96], sizes = [2, 8, 32], strides = [1, 1, 1]} : vector<2x8x128xbf16> to vector<2x8x32xbf16>
    %902 = vector.extract_strided_slice %826 {offsets = [0, 0, 96], sizes = [2, 8, 32], strides = [1, 1, 1]} : vector<2x8x128xbf16> to vector<2x8x32xbf16>
    "tpu.trace_start"() <{level = 10 : i32, message = "btd,bsd->bts"}> : () -> ()
    %cst_515 = arith.constant dense<0.000000e+00> : vector<2x8x8xf32>
    %903 = tpu.matmul %900, %901, %cst_515 {dimension_numbers = #tpu.dot_dimension_numbers<[2], [2], [1], [1], [0, 0, 0, 1, 1, 1], [0], [0]>} : vector<2x8x32xbf16>, vector<2x8x32xbf16>, vector<2x8x8xf32> -> vector<2x8x8xf32>
    "tpu.trace_stop"() : () -> ()
    %cst_516 = arith.constant 2.000000e-01 : f32
    %904 = vector.broadcast %cst_516 : f32 to vector<2x8x8xf32>
    %905 = arith.mulf %903, %904 : vector<2x8x8xf32>
    %906 = vector.broadcast %121 : vector<1x8x8xf32> to vector<2x8x8xf32>
    %907 = arith.addf %905, %906 : vector<2x8x8xf32>
    %cst_517 = arith.constant dense<0xFF800000> : vector<2x8xf32>
    %908 = vector.multi_reduction <maximumf>, %907, %cst_517 [2] : vector<2x8x8xf32> to vector<2x8xf32>
    %909 = vector.shape_cast %908 : vector<2x8xf32> to vector<2x8x1xf32>
    %910 = vector.broadcast %909 : vector<2x8x1xf32> to vector<2x8x8xf32>
    %911 = arith.subf %907, %910 : vector<2x8x8xf32>
    %912 = math.exp %911 : vector<2x8x8xf32>
    %cst_518 = arith.constant dense<0.000000e+00> : vector<2x8xf32>
    %913 = vector.multi_reduction <add>, %912, %cst_518 [2] : vector<2x8x8xf32> to vector<2x8xf32>
    %914 = vector.shape_cast %913 : vector<2x8xf32> to vector<2x8x1xf32>
    %915 = vector.broadcast %914 : vector<2x8x1xf32> to vector<2x8x8xf32>
    %916 = arith.divf %912, %915 : vector<2x8x8xf32>
    %917 = arith.truncf %916 : vector<2x8x8xf32> to vector<2x8x8xbf16>
    "tpu.trace_start"() <{level = 10 : i32, message = "bts,bsd->btd"}> : () -> ()
    %cst_519 = arith.constant dense<0.000000e+00> : vector<2x8x32xf32>
    %918 = tpu.matmul %917, %902, %cst_519 {dimension_numbers = #tpu.dot_dimension_numbers<[2], [1], [1], [2], [0, 0, 0, 1, 1, 2], [0], [0]>} : vector<2x8x8xbf16>, vector<2x8x32xbf16>, vector<2x8x32xf32> -> vector<2x8x32xf32>
    "tpu.trace_stop"() : () -> ()
    %919 = vector.shape_cast %918 : vector<2x8x32xf32> to vector<16x32xf32>
    %920 = arith.truncf %919 : vector<16x32xf32> to vector<16x32xbf16>
    %921 = vector.extract_strided_slice %785 {offsets = [96, 0], sizes = [32, 128], strides = [1, 1]} : vector<128x128xbf16> to vector<32x128xbf16>
    %cst_520 = arith.constant dense<0.000000e+00> : vector<16x128xf32>
    %922 = tpu.matmul %920, %921, %cst_520 {dimension_numbers = #tpu.dot_dimension_numbers<[1], [0], [0], [1], [0, 0, 1, 1], [], []>} : vector<16x32xbf16>, vector<32x128xbf16>, vector<16x128xf32> -> vector<16x128xf32>
    %923 = arith.addf %899, %922 : vector<16x128xf32>
    %924 = arith.addf %757, %923 : vector<16x128xf32>
    %c3_521 = arith.constant 3 : index
    %c0_522 = arith.constant 0 : index
    %c0_523 = arith.constant 0 : index
    %925 = vector.load %arg7[%c3_521, %c0_522, %c0_523] : memref<4x1x128xf32, #tpu.memory_space<vmem>>, vector<1x1x128xf32>
    %926 = vector.shape_cast %925 : vector<1x1x128xf32> to vector<1x128xf32>
    %927 = vector.broadcast %926 : vector<1x128xf32> to vector<16x128xf32>
    %928 = arith.addf %924, %927 : vector<16x128xf32>
    %c3_524 = arith.constant 3 : index
    %c0_525 = arith.constant 0 : index
    %c0_526 = arith.constant 0 : index
    %929 = vector.load %arg10[%c3_524, %c0_525, %c0_526] : memref<4x1x128xf32, #tpu.memory_space<vmem>>, vector<1x1x128xf32>
    %930 = vector.shape_cast %929 : vector<1x1x128xf32> to vector<1x128xf32>
    %c3_527 = arith.constant 3 : index
    %c0_528 = arith.constant 0 : index
    %c0_529 = arith.constant 0 : index
    %931 = vector.load %arg11[%c3_527, %c0_528, %c0_529] : memref<4x1x128xf32, #tpu.memory_space<vmem>>, vector<1x1x128xf32>
    %932 = vector.shape_cast %931 : vector<1x1x128xf32> to vector<1x128xf32>
    %cst_530 = arith.constant dense<0.000000e+00> : vector<16xf32>
    %933 = vector.multi_reduction <add>, %928, %cst_530 [1] : vector<16x128xf32> to vector<16xf32>
    %934 = vector.shape_cast %933 : vector<16xf32> to vector<16x1xf32>
    %cst_531 = arith.constant 0.00999999977 : f32
    %935 = vector.broadcast %cst_531 : f32 to vector<16x1xf32>
    %936 = arith.mulf %934, %935 : vector<16x1xf32>
    %937 = vector.broadcast %936 : vector<16x1xf32> to vector<16x128xf32>
    %938 = arith.subf %928, %937 : vector<16x128xf32>
    %939 = vector.broadcast %114 : vector<1x128xf32> to vector<16x128xf32>
    %940 = arith.mulf %938, %939 : vector<16x128xf32>
    %941 = arith.mulf %940, %940 : vector<16x128xf32>
    %cst_532 = arith.constant dense<0.000000e+00> : vector<16xf32>
    %942 = vector.multi_reduction <add>, %941, %cst_532 [1] : vector<16x128xf32> to vector<16xf32>
    %943 = vector.shape_cast %942 : vector<16xf32> to vector<16x1xf32>
    %cst_533 = arith.constant 0.00999999977 : f32
    %944 = vector.broadcast %cst_533 : f32 to vector<16x1xf32>
    %945 = arith.mulf %943, %944 : vector<16x1xf32>
    %cst_534 = arith.constant 9.99999974E-6 : f32
    %946 = vector.broadcast %cst_534 : f32 to vector<16x1xf32>
    %947 = arith.addf %945, %946 : vector<16x1xf32>
    %948 = math.rsqrt %947 : vector<16x1xf32>
    %949 = vector.broadcast %948 : vector<16x1xf32> to vector<16x128xf32>
    %950 = arith.mulf %940, %949 : vector<16x128xf32>
    %951 = vector.broadcast %930 : vector<1x128xf32> to vector<16x128xf32>
    %952 = arith.mulf %950, %951 : vector<16x128xf32>
    %953 = vector.broadcast %932 : vector<1x128xf32> to vector<16x128xf32>
    %954 = arith.addf %952, %953 : vector<16x128xf32>
    %955 = arith.truncf %954 : vector<16x128xf32> to vector<16x128xbf16>
    %cst_535 = arith.constant dense<0.000000e+00> : vector<16x512xf32>
    %956 = tpu.matmul %955, %787, %cst_535 {dimension_numbers = #tpu.dot_dimension_numbers<[1], [0], [0], [1], [0, 0, 1, 1], [], []>} : vector<16x128xbf16>, vector<128x512xbf16>, vector<16x512xf32> -> vector<16x512xf32>
    %c3_536 = arith.constant 3 : index
    %c0_537 = arith.constant 0 : index
    %c0_538 = arith.constant 0 : index
    %957 = vector.load %arg12[%c3_536, %c0_537, %c0_538] : memref<4x1x512xf32, #tpu.memory_space<vmem>>, vector<1x1x512xf32>
    %958 = vector.shape_cast %957 : vector<1x1x512xf32> to vector<1x512xf32>
    %959 = vector.broadcast %958 : vector<1x512xf32> to vector<16x512xf32>
    %960 = arith.addf %956, %959 : vector<16x512xf32>
    %cst_539 = arith.constant 0.000000e+00 : f32
    %961 = vector.broadcast %cst_539 : f32 to vector<16x512xf32>
    %962 = arith.maximumf %960, %961 : vector<16x512xf32>
    %963 = arith.truncf %962 : vector<16x512xf32> to vector<16x512xbf16>
    %cst_540 = arith.constant dense<0.000000e+00> : vector<16x128xf32>
    %964 = tpu.matmul %963, %789, %cst_540 {dimension_numbers = #tpu.dot_dimension_numbers<[1], [0], [0], [1], [0, 0, 1, 1], [], []>} : vector<16x512xbf16>, vector<512x128xbf16>, vector<16x128xf32> -> vector<16x128xf32>
    %965 = arith.addf %928, %964 : vector<16x128xf32>
    %c3_541 = arith.constant 3 : index
    %c0_542 = arith.constant 0 : index
    %c0_543 = arith.constant 0 : index
    %966 = vector.load %arg13[%c3_541, %c0_542, %c0_543] : memref<4x1x128xf32, #tpu.memory_space<vmem>>, vector<1x1x128xf32>
    %967 = vector.shape_cast %966 : vector<1x1x128xf32> to vector<1x128xf32>
    %968 = vector.broadcast %967 : vector<1x128xf32> to vector<16x128xf32>
    %969 = arith.addf %965, %968 : vector<16x128xf32>
    %c0_544 = arith.constant 0 : index
    %c0_545 = arith.constant 0 : index
    %970 = vector.load %arg14[%c0_544, %c0_545] : memref<1x128xf32, #tpu.memory_space<vmem>>, vector<1x128xf32>
    %c0_546 = arith.constant 0 : index
    %c0_547 = arith.constant 0 : index
    %971 = vector.load %arg15[%c0_546, %c0_547] : memref<1x128xf32, #tpu.memory_space<vmem>>, vector<1x128xf32>
    %cst_548 = arith.constant dense<0.000000e+00> : vector<16xf32>
    %972 = vector.multi_reduction <add>, %969, %cst_548 [1] : vector<16x128xf32> to vector<16xf32>
    %973 = vector.shape_cast %972 : vector<16xf32> to vector<16x1xf32>
    %cst_549 = arith.constant 0.00999999977 : f32
    %974 = vector.broadcast %cst_549 : f32 to vector<16x1xf32>
    %975 = arith.mulf %973, %974 : vector<16x1xf32>
    %976 = vector.broadcast %975 : vector<16x1xf32> to vector<16x128xf32>
    %977 = arith.subf %969, %976 : vector<16x128xf32>
    %978 = vector.broadcast %114 : vector<1x128xf32> to vector<16x128xf32>
    %979 = arith.mulf %977, %978 : vector<16x128xf32>
    %980 = arith.mulf %979, %979 : vector<16x128xf32>
    %cst_550 = arith.constant dense<0.000000e+00> : vector<16xf32>
    %981 = vector.multi_reduction <add>, %980, %cst_550 [1] : vector<16x128xf32> to vector<16xf32>
    %982 = vector.shape_cast %981 : vector<16xf32> to vector<16x1xf32>
    %cst_551 = arith.constant 0.00999999977 : f32
    %983 = vector.broadcast %cst_551 : f32 to vector<16x1xf32>
    %984 = arith.mulf %982, %983 : vector<16x1xf32>
    %cst_552 = arith.constant 9.99999974E-6 : f32
    %985 = vector.broadcast %cst_552 : f32 to vector<16x1xf32>
    %986 = arith.addf %984, %985 : vector<16x1xf32>
    %987 = math.rsqrt %986 : vector<16x1xf32>
    %988 = vector.broadcast %987 : vector<16x1xf32> to vector<16x128xf32>
    %989 = arith.mulf %979, %988 : vector<16x128xf32>
    %990 = vector.broadcast %970 : vector<1x128xf32> to vector<16x128xf32>
    %991 = arith.mulf %989, %990 : vector<16x128xf32>
    %992 = vector.broadcast %971 : vector<1x128xf32> to vector<16x128xf32>
    %993 = arith.addf %991, %992 : vector<16x128xf32>
    %c0_553 = arith.constant 0 : index
    %c0_554 = arith.constant 0 : index
    %994 = vector.load %arg16[%c0_553, %c0_554] : memref<128x128xbf16, #tpu.memory_space<vmem>>, vector<128x128xbf16>
    %995 = arith.truncf %993 : vector<16x128xf32> to vector<16x128xbf16>
    %cst_555 = arith.constant dense<0.000000e+00> : vector<16x128xf32>
    %996 = tpu.matmul %995, %994, %cst_555 {dimension_numbers = #tpu.dot_dimension_numbers<[1], [0], [0], [1], [0, 0, 1, 1], [], []>} : vector<16x128xbf16>, vector<128x128xbf16>, vector<16x128xf32> -> vector<16x128xf32>
    %c0_556 = arith.constant 0 : index
    %c0_557 = arith.constant 0 : index
    %997 = vector.load %arg17[%c0_556, %c0_557] : memref<1x128xf32, #tpu.memory_space<vmem>>, vector<1x128xf32>
    %998 = vector.broadcast %997 : vector<1x128xf32> to vector<16x128xf32>
    %999 = arith.addf %996, %998 : vector<16x128xf32>
    %c0_558 = arith.constant 0 : index
    %c0_559 = arith.constant 0 : index
    %1000 = vector.load %arg18[%c0_558, %c0_559] : memref<16x128xf32, #tpu.memory_space<vmem>>, vector<16x128xf32>
    tpu.vector_store %arg18[%c0_558, %c0_559], %999 {strides = array<i32>} : memref<16x128xf32, #tpu.memory_space<vmem>>, vector<16x128xf32>,
    return
  }
}

</mosaic_0001>

<bundles_post_ra>
// kernel: bigram_forward.1
= control target key start
LH: loop header
LB: loop body
LE: loop exit
PB: predicated region body
PF: predicated region fallthrough
CT: control target
= control target key end

     0   :  { %s11012_s0 = inlined_call_operand.vmem [shape: s32[16,1], index: 0, kind: input, shape index: {}]   ;;  %s11013_s1 = inlined_call_operand.hbm [shape: f32[128,128], index: 1, kind: input, shape index: {}]   ;;  %s11014_s2 = inlined_call_operand.hbm [shape: f32[16,128], index: 2, kind: input, shape index: {}]   ;;  %s11015_s3 = inlined_call_operand.hbm [shape: bf16[4,128,384], index: 3, kind: input, shape index: {}]   ;;  %s11016_s4 = inlined_call_operand.hbm [shape: bf16[4,128,128], index: 4, kind: input, shape index: {}]   ;;  %s11017_s5 = inlined_call_operand.hbm [shape: bf16[4,128,512], index: 5, kind: input, shape index: {}]   ;;  %s11018_s6 = inlined_call_operand.hbm [shape: bf16[4,512,128], index: 6, kind: input, shape index: {}]   ;;  %s11019_s7 = inlined_call_operand.vmem [shape: f32[4,1,128], index: 7, kind: input, shape index: {}]   ;;  %s11020_s8 = inlined_call_operand.vmem [shape: f32[4,1,128], index: 8, kind: input, shape index: {}]   ;;  %s11021_s9 = inlined_call_operand.hbm [shape: f32[4,1,128], index: 9, kind: input, shape index: {}]   ;;  %s11022_s10 = inlined_call_operand.hbm [shape: f32[4,1,128], index: 10, kind: input, shape index: {}]   ;;  %s11023_s11 = inlined_call_operand.hbm [shape: f32[4,1,128], index: 11, kind: input, shape index: {}]   ;;  %s11024_s12 = inlined_call_operand.hbm [shape: f32[4,1,512], index: 12, kind: input, shape index: {}]   ;;  %s11025_s13 = inlined_call_operand.hbm [shape: f32[4,1,128], index: 13, kind: input, shape index: {}]   ;;  %s11026_s14 = inlined_call_operand.vmem [shape: f32[1,128], index: 14, kind: input, shape index: {}]   ;;  %s11027_s15 = inlined_call_operand.vmem [shape: f32[1,128], index: 15, kind: input, shape index: {}]   ;;  %s11028_s16 = inlined_call_operand.vmem [shape: bf16[128,128], index: 16, kind: input, shape index: {}]   ;;  %s11029_s17 = inlined_call_operand.hbm [shape: f32[1,128], index: 17, kind: input, shape index: {}]   ;;  %s11030_s18 = inlined_call_operand.hbm [shape: f32[16,128], index: 18, kind: output, shape index: {}]  }
   0x1   :  { %11063 = sst [smem:[#allocation79_spill]] %s11012_s0 }
   0x2   :  { %11064 = sst [smem:[#allocation80_spill]] %s11013_s1 }
   0x3   :  { %11065 = sst [smem:[#allocation81_spill]] %s11014_s2 }
   0x4   :  { %11066 = sst [smem:[#allocation82_spill]] %s11019_s7 }
   0x5   :  { %11067 = sst [smem:[#allocation83_spill]] %s11020_s8 }
   0x6   :  { %11068 = sst [smem:[#allocation84_spill]] %s11026_s14 }
   0x7   :  { %11069 = sst [smem:[#allocation85_spill]] %s11027_s15 }
   0x8   :  { %11070 = sst [smem:[#allocation86_spill]] %s11028_s16 }
   0x9   :  { %11071 = sst [smem:[#allocation87_spill]] %s11030_s18 }
   0xa   :  { %23 = vsyncpa [#allocation8], 0 }
   0xb   :  { %24 = vsyncpa [#allocation11], 0 }
   0xc   :  { %25 = vsyncpa [#allocation14], 0 }
   0xd   :  { %26 = vsyncpa [#allocation17], 0 }
   0xe   :  { %27 = vsyncpa [#allocation20], 0 }
   0xf   :  { %28 = vsyncpa [#allocation9], 0  ;;  %s9301_s27 = smov [#allocation10]   ;;  %s11072_s0 = sld [smem:[#allocation81_spill]] }
  0x10   :  { %s48_s28 = sshll.u32 %s9301_s27, 4  ;;  %s49_s28 = int_to_ptr.vmem [resolvable:$true] %s48_s28 }
  0x15   :  { %s8865_s19 = scalar_lea.hbm %s11072_s0, 256 }
  0x16   :  { %p8866_p0 = scmp.ne.s32.totalorder %s11072_s0, %s8865_s19  ;;  %p8869_p1 = scmp.lt.u32.totalorder %s8865_s19, %s11072_s0 }
  0x18   :  { %p8871_p2 = pnand %p8869_p1, %p8866_p0 }
  0x1a   :  { %8874 = shalt.err (!%p8871_p2)
}
  0x1b   :  { %s8875_s2 = scalar_lea.vmem %s49_s28, 256  ;;  %p8880_p4 = scmp.lt.s32.totalorder %s49_s28, %s49_s28 }
  0x1c   :  { %p8876_p3 = scmp.ne.s32.totalorder %s49_s28, %s8875_s2  ;;  %p8881_p5 = scmp.lt.s32.totalorder %s8875_s2, %s8875_s2 }
  0x1e   :  { %p8882_p6 = por %p8881_p5, %p8880_p4 }
  0x20   :  { %p8883_p7 = pnand %p8882_p6, %p8876_p3 }
  0x22   :  { %8886 = shalt.err (!%p8883_p7)
}
  0x23   :  { %s11039_s23 = smov 128   ;;  %s11041_s24 = smov 8  }
  0x24   :  { %54 = dma.hbm_to_vmem [thread:$0]  %s11072_s0, 256, %s49_s28, [#allocation11], %s11039_s23, %s11039_s23, %s11041_s24  }
  0x25   :  { %s9304_s27 = smov [#allocation13]   ;;  %s9305_s30 = smov [#allocation16]  }
  0x26   :  { %s76_s29 = sshll.u32 %s9304_s27, 4  ;;  %s100_s19 = sshll.u32 %s9305_s30, 4  ;;  %s77_s29 = int_to_ptr.vmem [resolvable:$true] %s76_s29  ;;  %s101_s19 = int_to_ptr.vmem [resolvable:$true] %s100_s19 }
  0x27   :  { %s8887_s21 = scalar_lea.hbm %s11022_s10, 64 }
  0x28   :  { %p8888_p8 = scmp.ne.s32.totalorder %s11022_s10, %s8887_s21  ;;  %p8891_p9 = scmp.lt.u32.totalorder %s8887_s21, %s11022_s10 }
  0x2a   :  { %p8893_p10 = pnand %p8891_p9, %p8888_p8 }
  0x2c   :  { %8896 = shalt.err (!%p8893_p10)
}
  0x2d   :  { %s8897_s28 = scalar_lea.vmem %s77_s29, 64  ;;  %p8902_p12 = scmp.lt.s32.totalorder %s77_s29, %s77_s29 }
  0x2e   :  { %p8898_p11 = scmp.ne.s32.totalorder %s77_s29, %s8897_s28  ;;  %p8903_p13 = scmp.lt.s32.totalorder %s8897_s28, %s8897_s28 }
  0x30   :  { %p8904_p0 = por %p8903_p13, %p8902_p12 }
  0x32   :  { %p8905_p1 = pnand %p8904_p0, %p8898_p11 }
  0x34   :  { %8908 = shalt.err (!%p8905_p1)
}
  0x35   :  { %s11035_s0 = smov 16   ;;  %s11037_s25 = smov 1  }
  0x36   :  { %82 = dma.hbm_to_vmem [thread:$0]  %s11022_s10, 64, %s77_s29, [#allocation14], %s11035_s0, %s11035_s0, %s11037_s25  }
  0x37   :  { %s8909_s30 = scalar_lea.hbm %s11024_s12, 256 }
  0x38   :  { %p8910_p2 = scmp.ne.s32.totalorder %s11024_s12, %s8909_s30  ;;  %p8913_p3 = scmp.lt.u32.totalorder %s8909_s30, %s11024_s12 }
  0x3a   :  { %p8915_p4 = pnand %p8913_p3, %p8910_p2 }
  0x3c   :  { %8918 = shalt.err (!%p8915_p4)
}
  0x3d   :  { %s8919_s2 = scalar_lea.vmem %s101_s19, 256  ;;  %p8924_p6 = scmp.lt.s32.totalorder %s101_s19, %s101_s19 }
  0x3e   :  { %p8920_p5 = scmp.ne.s32.totalorder %s101_s19, %s8919_s2  ;;  %p8925_p7 = scmp.lt.s32.totalorder %s8919_s2, %s8919_s2 }
  0x40   :  { %p8926_p8 = por %p8925_p7, %p8924_p6 }
  0x42   :  { %p8927_p9 = pnand %p8926_p8, %p8920_p5 }
  0x44   :  { %8930 = shalt.err (!%p8927_p9)
}
  0x45   :  { %s11056_s10 = smov 64   ;;  %s11052_s29 = smov 4  }
  0x46   :  { %106 = dma.hbm_to_vmem [thread:$0]  %s11024_s12, 256, %s101_s19, [#allocation17], %s11056_s10, %s11056_s10, %s11052_s29  }
  0x47   :  { %s9310_s27 = smov [#allocation7]   ;;  %s9311_s18 = smov [#allocation12]  }
  0x48   :  { %s36_s15 = sshll.u32 %s9310_s27, 4  ;;  %s64_s30 = sshll.u32 %s9311_s18, 4  ;;  %s37_s15 = int_to_ptr.vmem [resolvable:$true] %s36_s15  ;;  %s65_s30 = int_to_ptr.vmem [resolvable:$true] %s64_s30 }
  0x49   :  { %s11073_s21 = sld [smem:[#allocation80_spill]] }
  0x4f   :  { %s8931_s22 = scalar_lea.hbm %s11073_s21, 2048 }
  0x50   :  { %p8932_p10 = scmp.ne.s32.totalorder %s11073_s21, %s8931_s22  ;;  %p8935_p11 = scmp.lt.u32.totalorder %s8931_s22, %s11073_s21 }
  0x52   :  { %p8937_p12 = pnand %p8935_p11, %p8932_p10 }
  0x54   :  { %8940 = shalt.err (!%p8937_p12)
}
  0x55   :  { %s8941_s12 = scalar_lea.vmem %s37_s15, 2048  ;;  %p8946_p0 = scmp.lt.s32.totalorder %s37_s15, %s37_s15 }
  0x56   :  { %p8942_p13 = scmp.ne.s32.totalorder %s37_s15, %s8941_s12  ;;  %p8947_p1 = scmp.lt.s32.totalorder %s8941_s12, %s8941_s12 }
  0x58   :  { %p8948_p2 = por %p8947_p1, %p8946_p0 }
  0x5a   :  { %p8949_p3 = pnand %p8948_p2, %p8942_p13 }
  0x5c   :  { %8952 = shalt.err (!%p8949_p3)
}
  0x5d   :  { %s11074_s19 = smov 128   ;;  %s8953_s25 = scalar_lea.hbm %s11021_s9, 64 }
  0x5e   :  { %42 = dma.hbm_to_vmem [thread:$0]  %s11073_s21, 2048, %s37_s15, [#allocation8], %s11074_s19, %s11074_s19, %s11041_s24  }
  0x5f   :  { %p8954_p4 = scmp.ne.s32.totalorder %s11021_s9, %s8953_s25  ;;  %p8957_p5 = scmp.lt.u32.totalorder %s8953_s25, %s11021_s9 }
  0x61   :  { %p8959_p6 = pnand %p8957_p5, %p8954_p4 }
  0x63   :  { %8962 = shalt.err (!%p8959_p6)
}
  0x64   :  { %s8963_s22 = scalar_lea.vmem %s65_s30, 64  ;;  %p8968_p8 = scmp.lt.s32.totalorder %s65_s30, %s65_s30 }
  0x65   :  { %p8964_p7 = scmp.ne.s32.totalorder %s65_s30, %s8963_s22  ;;  %p8969_p9 = scmp.lt.s32.totalorder %s8963_s22, %s8963_s22 }
  0x67   :  { %p8970_p10 = por %p8969_p9, %p8968_p8 }
  0x69   :  { %p8971_p11 = pnand %p8970_p10, %p8964_p7 }
  0x6b   :  { %8974 = shalt.err (!%p8971_p11)
}
  0x6c   :  { %s11075_s15 = smov 1   ;;  %s11076_s21 = smov 16  }
  0x6d   :  { %70 = dma.hbm_to_vmem [thread:$0]  %s11021_s9, 64, %s65_s30, [#allocation11], %s11076_s21, %s11076_s21, %s11075_s15  }
  0x6e   :  { %s9312_s28 = smov [#allocation15]   ;;  %s9313_s0 = smov [#allocation18]  }
  0x6f   :  { %s88_s26 = sshll.u32 %s9312_s28, 4  ;;  %s112_s23 = sshll.u32 %s9313_s0, 4  ;;  %s89_s26 = int_to_ptr.vmem [resolvable:$true] %s88_s26  ;;  %s113_s23 = int_to_ptr.vmem [resolvable:$true] %s112_s23 }
  0x70   :  { %s8975_s18 = scalar_lea.hbm %s11023_s11, 64 }
  0x71   :  { %p8976_p12 = scmp.ne.s32.totalorder %s11023_s11, %s8975_s18  ;;  %p8979_p13 = scmp.lt.u32.totalorder %s8975_s18, %s11023_s11 }
  0x73   :  { %p8981_p0 = pnand %p8979_p13, %p8976_p12 }
  0x75   :  { %8984 = shalt.err (!%p8981_p0)
}
  0x76   :  { %s8985_s9 = scalar_lea.vmem %s89_s26, 64  ;;  %p8990_p2 = scmp.lt.s32.totalorder %s89_s26, %s89_s26 }
  0x77   :  { %p8986_p1 = scmp.ne.s32.totalorder %s89_s26, %s8985_s9  ;;  %p8991_p3 = scmp.lt.s32.totalorder %s8985_s9, %s8985_s9 }
  0x79   :  { %p8992_p4 = por %p8991_p3, %p8990_p2 }
  0x7b   :  { %p8993_p5 = pnand %p8992_p4, %p8986_p1 }
  0x7d   :  { %8996 = shalt.err (!%p8993_p5)
}
  0x7e   :  { %94 = dma.hbm_to_vmem [thread:$0]  %s11023_s11, 64, %s89_s26, [#allocation14], %s11076_s21, %s11076_s21, %s11075_s15  }
  0x7f   :  { %s8997_s28 = scalar_lea.hbm %s11025_s13, 64 }
  0x80   :  { %p8998_p6 = scmp.ne.s32.totalorder %s11025_s13, %s8997_s28  ;;  %p9001_p7 = scmp.lt.u32.totalorder %s8997_s28, %s11025_s13 }
  0x82   :  { %p9003_p8 = pnand %p9001_p7, %p8998_p6 }
  0x84   :  { %9006 = shalt.err (!%p9003_p8)
}
  0x85   :  { %s9007_s1 = scalar_lea.vmem %s113_s23, 64  ;;  %p9012_p10 = scmp.lt.s32.totalorder %s113_s23, %s113_s23 }
  0x86   :  { %p9008_p9 = scmp.ne.s32.totalorder %s113_s23, %s9007_s1  ;;  %p9013_p11 = scmp.lt.s32.totalorder %s9007_s1, %s9007_s1 }
  0x88   :  { %p9014_p12 = por %p9013_p11, %p9012_p10 }
  0x8a   :  { %p9015_p13 = pnand %p9014_p12, %p9008_p9 }
  0x8c   :  { %9018 = shalt.err (!%p9015_p13)
}
  0x8d   :  { %118 = dma.hbm_to_vmem [thread:$0]  %s11025_s13, 64, %s113_s23, [#allocation17], %s11076_s21, %s11076_s21, %s11075_s15  }
  0x8e   :  { %s9314_s20 = smov [#allocation19]   ;;  %s9019_s2 = scalar_lea.hbm %s11029_s17, 16 }
  0x8f   :  { %s131_s22 = sshll.u32 %s9314_s20, 4  ;;  %p9020_p0 = scmp.ne.s32.totalorder %s11029_s17, %s9019_s2  ;;  %s132_s22 = int_to_ptr.vmem [resolvable:$true] %s131_s22 }
  0x90   :  { %p9023_p1 = scmp.lt.u32.totalorder %s9019_s2, %s11029_s17 }
  0x92   :  { %p9025_p2 = pnand %p9023_p1, %p9020_p0 }
  0x94   :  { %9028 = shalt.err (!%p9025_p2)
}
  0x95   :  { %s9029_s25 = scalar_lea.vmem %s132_s22, 16  ;;  %s9033_s13 = scalar_lea.vmem %s132_s22, 32 }
  0x96   :  { %p9030_p3 = scmp.ne.s32.totalorder %s132_s22, %s9029_s25  ;;  %p9034_p4 = scmp.lt.s32.totalorder %s132_s22, %s132_s22 }
  0x97   :  { %p9035_p5 = scmp.lt.s32.totalorder %s9033_s13, %s9029_s25 }
  0x99   :  { %p9036_p6 = por %p9035_p5, %p9034_p4 }
  0x9b   :  { %p9037_p7 = pnand %p9036_p6, %p9030_p3 }
  0x9d   :  { %9040 = shalt.err (!%p9037_p7)
}
  0x9e   :  { %134 = dma.hbm_to_vmem [thread:$0]  %s11029_s17, 16, %s132_s22, [#allocation20]  }
  0x9f   :  { %9257 = dma.done.wait [#allocation8], 2048  }
  0xa0   :  { %9258 = vsyncadd [#allocation8], 4294965248 }
  0xa1   :  { %9259 = dma.done.wait [#allocation11], 320  }
  0xa2   :  { %9260 = vsyncadd [#allocation11], 4294966976 }
  0xa3   :  { %9261 = dma.done.wait [#allocation14], 128  }
  0xa4   :  { %9262 = vsyncadd [#allocation14], 4294967168 }
  0xa5   :  { %9263 = dma.done.wait [#allocation17], 320  }
  0xa6   :  { %9264 = vsyncadd [#allocation17], 4294966976 }
  0xa7   :  { %9265 = dma.done.wait [#allocation20], 16  }
  0xa8   :  { %9266 = vsyncadd [#allocation20], 4294967280  ;;  %s164_s23 = sld [smem:[#allocation0]]   ;;  %s11048_s27 = smov 384   ;;  %v9316_v0 = vmov 0  }
  0xa9   :  { %176 = sst [smem:[#allocation23]] %s11048_s27  ;;  %8692 = vset.pattern.permute.xlu0 %v9316_v0  ;;  %s11046_s17 = smov 3  }
  0xaa   :  { %178 = sst [smem:[#allocation23 + $0x1]] %s11048_s27  ;;  %s9318_s18 = smov [#allocation2]  }
  0xab   :  { %180 = sst [smem:[#allocation23 + $0x2]] %s11046_s17  ;;  %s172_s1 = sshll.u32 %s9318_s18, 4  ;;  %s173_s1 = int_to_ptr.vmem [resolvable:$true] %s172_s1 }
  0xac   :  { %182 = sst [smem:[#allocation23 + $0x3]] %s11056_s10  ;;  %s11054_s11 = smov 2  }
  0xad   :  { %184 = sst [smem:[#allocation23 + $0x4]] %s11074_s19  ;;  %s11044_s20 = smov 192  }
  0xae   :  { %186 = sst [smem:[#allocation23 + $0x5]] %s11054_s11  ;;  %s7332_s26 = sshll.u32 %s164_s23, 26 }
  0xaf   :  { %188 = sst [smem:[#allocation23 + $0x6]] %s11044_s20  ;;  %s9581_s22 = sadd.s32 134217728, %s7332_s26 }
  0xb0   :  { %190 = sst [smem:[#allocation23 + $0x7]] %s11056_s10  ;;  %s9321_s9 = smov [#allocation6]  }
  0xb1   :  { %192 = sst [smem:[#allocation23 + $0x8]] %s11052_s29  ;;  %s9322_s30 = smov [#allocation22]  }
  0xb2   :  { %194 = dma.general %s11015_s3, 3072, %s173_s1, %s9321_s9, %s9322_s30, [#allocation23], %s9581_s22, 0  }
  0xb3   :  { %s11050_s24 = smov 512   ;;  %227 = sst [smem:[#allocation29 + $0x2]] %s11052_s29 }
  0xb4   :  { %223 = sst [smem:[#allocation29]] %s11050_s24  ;;  %s9324_s28 = smov [#allocation3]  }
  0xb5   :  { %225 = sst [smem:[#allocation29 + $0x1]] %s11050_s24  ;;  %s203_s0 = sshll.u32 %s9324_s28, 4  ;;  %s9593_s0 = int_to_ptr.vmem [resolvable:$true] %s203_s0 }
  0xb6   :  { %229 = sst [smem:[#allocation29 + $0x3]] %s11056_s10  ;;  %s9325_s25 = smov [#allocation4]  }
  0xb7   :  { %231 = sst [smem:[#allocation29 + $0x4]] %s11074_s19  ;;  %s9597_s13 = sshll.u32 %s9325_s25, 4  ;;  %s220_s13 = int_to_ptr.vmem [resolvable:$true] %s9597_s13 }
  0xb8   :  { %233 = sst [smem:[#allocation29 + $0x5]] %s11054_s11  ;;  %s11042_s15 = smov 256  }
  0xb9   :  { %235 = sst [smem:[#allocation29 + $0x6]] %s11042_s15  ;;  %s9606_s18 = scalar_lea.hbm %s11016_s4, 1024 }
  0xba   :  { %237 = sst [smem:[#allocation29 + $0x7]] %s11056_s10  ;;  %p9042_p8 = scmp.ne.s32.totalorder %s11016_s4, %s9606_s18 }
  0xbb   :  { %239 = sst [smem:[#allocation29 + $0x8]] %s11052_s29  ;;  %s9615_s2 = scalar_lea.hbm %s11016_s4, 4096 }
  0xbc   :  { %p9044_p9 = scmp.lt.u32.totalorder %s9615_s2, %s9606_s18  ;;  %p9045_p10 = scmp.lt.u32.totalorder %s9606_s18, %s11016_s4 }
  0xbe   :  { %p9046_p11 = por %p9045_p10, %p9044_p9 }
  0xc0   :  { %p9047_p12 = pnand %p9046_p11, %p9042_p8 }
  0xc2   :  { %9050 = shalt.err (!%p9047_p12)  }
  0xc3   :  { %s9051_s23 = scalar_lea.vmem %s9593_s0, 1024  ;;  %s9631_s1 = scalar_lea.vmem %s9593_s0, 4096 }
  0xc4   :  { %p9052_p13 = scmp.ne.s32.totalorder %s9593_s0, %s9051_s23  ;;  %p9056_p0 = scmp.lt.s32.totalorder %s9593_s0, %s9593_s0 }
  0xc5   :  { %p9057_p1 = scmp.lt.s32.totalorder %s9631_s1, %s9051_s23 }
  0xc7   :  { %p9058_p2 = por %p9057_p1, %p9056_p0 }
  0xc9   :  { %p9059_p3 = pnand %p9058_p2, %p9052_p13 }
  0xcb   :  { %9062 = shalt.err (!%p9059_p3)  }
  0xcc   :  { %206 = dma.hbm_to_vmem [thread:$0]  %s11016_s4, 1024, %s9593_s0, [#allocation6 + $0x1] }
  0xcd   :  { %s9327_s30 = smov [#allocation6 + $0x2]   ;;  %s9328_s12 = smov [#allocation28]  }
  0xce   :  { %241 = dma.general %s11017_s5, 4096, %s220_s13, %s9327_s30, %s9328_s12, [#allocation29], %s9581_s22, 0  }
  0xcf   :  { %272 = sst [smem:[#allocation33]] %s11048_s27  ;;  %s9329_s21 = smov [#allocation5]  }
  0xd0   :  { %274 = sst [smem:[#allocation33 + $0x1]] %s11048_s27  ;;  %s250_s23 = sshll.u32 %s9329_s21, 4  ;;  %s9647_s23 = int_to_ptr.vmem [resolvable:$true] %s250_s23 }
  0xd1   :  { %276 = sst [smem:[#allocation33 + $0x2]] %s11046_s17  ;;  %s254_s15 = scalar_lea.hbm %s11015_s3, 3072 }
  0xd2   :  { %278 = sst [smem:[#allocation33 + $0x3]] %s11056_s10  ;;  %s9330_s13 = smov [#allocation2 + $0xc0]  }
  0xd3   :  { %280 = sst [smem:[#allocation33 + $0x4]] %s11074_s19  ;;  %s268_s30 = sshll.u32 %s9330_s13, 4  ;;  %s269_s30 = int_to_ptr.vmem [resolvable:$true] %s268_s30 }
  0xd4   :  { %282 = sst [smem:[#allocation33 + $0x5]] %s11054_s11  ;;  %s9661_s25 = scalar_lea.hbm %s11018_s6, 4096 }
  0xd5   :  { %284 = sst [smem:[#allocation33 + $0x6]] %s11044_s20  ;;  %p9064_p4 = scmp.ne.s32.totalorder %s11018_s6, %s9661_s25 }
  0xd6   :  { %286 = sst [smem:[#allocation33 + $0x7]] %s11056_s10  ;;  %s9670_s20 = scalar_lea.hbm %s11018_s6, 16384 }
  0xd7   :  { %288 = sst [smem:[#allocation33 + $0x8]] %s11052_s29  ;;  %p9066_p5 = scmp.lt.u32.totalorder %s9670_s20, %s9661_s25 }
  0xd8   :  { %p9067_p6 = scmp.lt.u32.totalorder %s9661_s25, %s11018_s6 }
  0xda   :  { %p9068_p7 = por %p9067_p6, %p9066_p5 }
  0xdc   :  { %p9069_p8 = pnand %p9068_p7, %p9064_p4 }
  0xde   :  { %9072 = shalt.err (!%p9069_p8)  }
  0xdf   :  { %s9073_s21 = scalar_lea.vmem %s9647_s23, 4096  ;;  %s9686_s26 = scalar_lea.vmem %s9647_s23, 16384 }
  0xe0   :  { %p9074_p9 = scmp.ne.s32.totalorder %s9647_s23, %s9073_s21  ;;  %11077 = sst [smem:[#allocation78_spill]] %s9686_s26 }
  0xe1   :  { %p9078_p11 = scmp.lt.s32.totalorder %s9647_s23, %s9647_s23  ;;  %p9079_p12 = scmp.lt.s32.totalorder %s9686_s26, %s9073_s21 }
  0xe3   :  { %p9080_p13 = por %p9079_p12, %p9078_p11 }
  0xe5   :  { %p9081_p0 = pnand %p9080_p13, %p9074_p9 }
  0xe7   :  { %9084 = shalt.err (!%p9081_p0)  }
  0xe8   :  { %253 = dma.hbm_to_vmem [thread:$0]  %s11018_s6, 4096, %s9647_s23, [#allocation6 + $0x3] }
  0xe9   :  { %s9331_s9 = smov [#allocation6 + $0x4]   ;;  %s9332_s13 = smov [#allocation32]  }
  0xea   :  { %290 = dma.general %s254_s15, 3072, %s269_s30, %s9331_s9, %s9332_s13, [#allocation33], %s9581_s22, 0  }
  0xeb   :  { %323 = sst [smem:[#allocation37]] %s11050_s24  ;;  %s9333_s21 = smov [#allocation3 + $0x40]  }
  0xec   :  { %325 = sst [smem:[#allocation37 + $0x1]] %s11050_s24  ;;  %s301_s27 = sshll.u32 %s9333_s21, 4  ;;  %s302_s27 = int_to_ptr.vmem [resolvable:$true] %s301_s27 }
  0xed   :  { %327 = sst [smem:[#allocation37 + $0x2]] %s11052_s29  ;;  %s305_s15 = scalar_lea.hbm %s11017_s5, 4096 }
  0xee   :  { %329 = sst [smem:[#allocation37 + $0x3]] %s11056_s10  ;;  %s11078_s30 = smov 256  }
  0xef   :  { %331 = sst [smem:[#allocation37 + $0x4]] %s11074_s19  ;;  %s9334_s9 = smov [#allocation4 + $0x100]  }
  0xf0   :  { %333 = sst [smem:[#allocation37 + $0x5]] %s11054_s11  ;;  %s319_s13 = sshll.u32 %s9334_s9, 4  ;;  %s320_s13 = int_to_ptr.vmem [resolvable:$true] %s319_s13 }
  0xf1   :  { %335 = sst [smem:[#allocation37 + $0x6]] %s11078_s30  ;;  %s9715_s24 = scalar_lea.hbm %s11016_s4, 2048 }
  0xf2   :  { %337 = sst [smem:[#allocation37 + $0x7]] %s11056_s10  ;;  %p9086_p1 = scmp.ne.s32.totalorder %s9606_s18, %s9715_s24 }
  0xf3   :  { %339 = sst [smem:[#allocation37 + $0x8]] %s11052_s29  ;;  %p9089_p2 = scmp.lt.u32.totalorder %s9615_s2, %s9715_s24 }
  0xf4   :  { %p9091_p4 = scmp.lt.u32.totalorder %s9715_s24, %s9606_s18 }
  0xf5   :  { %p9090_p3 = por %p9089_p2, %p9045_p10 }
  0xf7   :  { %p9092_p5 = por %p9091_p4, %p9090_p3 }
  0xf9   :  { %p9093_p7 = pnand %p9092_p5, %p9086_p1 }
  0xfb   :  { %9096 = shalt.err (!%p9093_p7)  }
  0xfc   :  { %s9097_s9 = scalar_lea.vmem %s302_s27, 1024  ;;  %p9102_p9 = scmp.lt.s32.totalorder %s302_s27, %s9593_s0 }
  0xfd   :  { %p9098_p8 = scmp.ne.s32.totalorder %s302_s27, %s9097_s9  ;;  %p9103_p11 = scmp.lt.s32.totalorder %s9631_s1, %s9097_s9 }
  0xff   :  { %p9104_p12 = por %p9103_p11, %p9102_p9 }
 0x101   :  { %p9105_p13 = pnand %p9104_p12, %p9098_p8 }
 0x103   :  { %9108 = shalt.err (!%p9105_p13)  }
 0x104   :  { %304 = dma.hbm_to_vmem [thread:$0]  %s9606_s18, 1024, %s302_s27, [#allocation6 + $0x5] }
 0x105   :  { %s9335_s28 = smov [#allocation6 + $0x6]   ;;  %s9336_s21 = smov [#allocation36]  }
 0x106   :  { %341 = dma.general %s305_s15, 4096, %s320_s13, %s9335_s28, %s9336_s21, [#allocation37], %s9581_s22, 0  }
 0x107   :  { %s11079_s29 = smov 384   ;;  %s9337_s11 = smov [#allocation5 + $0x100]  }
 0x108   :  { %374 = sst [smem:[#allocation41]] %s11079_s29  ;;  %s352_s9 = sshll.u32 %s9337_s11, 4  ;;  %s353_s9 = int_to_ptr.vmem [resolvable:$true] %s352_s9 }
 0x109   :  { %376 = sst [smem:[#allocation41 + $0x1]] %s11079_s29  ;;  %s11080_s10 = smov 3  }
 0x10a   :  { %378 = sst [smem:[#allocation41 + $0x2]] %s11080_s10  ;;  %s11081_s18 = smov 64  }
 0x10b   :  { %380 = sst [smem:[#allocation41 + $0x3]] %s11081_s18  ;;  %s356_s17 = scalar_lea.hbm %s11015_s3, 6144 }
 0x10c   :  { %382 = sst [smem:[#allocation41 + $0x4]] %s11074_s19  ;;  %s11082_s15 = smov 2  }
 0x10d   :  { %384 = sst [smem:[#allocation41 + $0x5]] %s11082_s15  ;;  %s9338_s13 = smov [#allocation2 + $0x180]  }
 0x10e   :  { %s370_s28 = sshll.u32 %s9338_s13, 4  ;;  %s11083_s21 = smov 192   ;;  %s371_s28 = int_to_ptr.vmem [resolvable:$true] %s370_s28 }
 0x10f   :  { %386 = sst [smem:[#allocation41 + $0x6]] %s11083_s21  ;;  %s11084_s11 = smov 4  }
 0x110   :  { %388 = sst [smem:[#allocation41 + $0x7]] %s11081_s18  ;;  %s9751_s7 = scalar_lea.hbm %s11018_s6, 8192 }
 0x111   :  { %390 = sst [smem:[#allocation41 + $0x8]] %s11084_s11  ;;  %p9111_p10 = scmp.ne.s32.totalorder %s9661_s25, %s9751_s7 }
 0x112   :  { %p9114_p0 = scmp.lt.u32.totalorder %s9670_s20, %s9751_s7  ;;  %p9116_p2 = scmp.lt.u32.totalorder %s9751_s7, %s9661_s25 }
 0x114   :  { %p9115_p1 = por %p9114_p0, %p9067_p6 }
 0x116   :  { %p9117_p3 = por %p9116_p2, %p9115_p1 }
 0x118   :  { %p9118_p4 = pnand %p9117_p3, %p9111_p10 }
 0x11a   :  { %9121 = shalt.err (!%p9118_p4)  }
 0x11b   :  { %s9122_s13 = scalar_lea.vmem %s353_s9, 4096  ;;  %p9127_p7 = scmp.lt.s32.totalorder %s353_s9, %s9647_s23 }
 0x11c   :  { %p9123_p5 = scmp.ne.s32.totalorder %s353_s9, %s9122_s13  ;;  %p9128_p8 = scmp.lt.s32.totalorder %s9686_s26, %s9122_s13 }
 0x11e   :  { %p9129_p9 = por %p9128_p8, %p9127_p7 }
 0x120   :  { %p9130_p11 = pnand %p9129_p9, %p9123_p5 }
 0x122   :  { %9133 = shalt.err (!%p9130_p11)  }
 0x123   :  { %355 = dma.hbm_to_vmem [thread:$0]  %s9661_s25, 4096, %s353_s9, [#allocation6 + $0x7] }
 0x124   :  { %s9339_s16 = smov [#allocation6 + $0x8]   ;;  %s9340_s12 = smov [#allocation40]  }
 0x125   :  { %392 = dma.general %s356_s17, 3072, %s371_s28, %s9339_s16, %s9340_s12, [#allocation41], %s9581_s22, 0  }
 0x126   :  { %s11085_s8 = smov 512   ;;  %429 = sst [smem:[#allocation45 + $0x2]] %s11084_s11 }
 0x127   :  { %425 = sst [smem:[#allocation45]] %s11085_s8  ;;  %s9341_s13 = smov [#allocation3 + $0x80]  }
 0x128   :  { %427 = sst [smem:[#allocation45 + $0x1]] %s11085_s8  ;;  %s403_s26 = sshll.u32 %s9341_s13, 4  ;;  %s404_s26 = int_to_ptr.vmem [resolvable:$true] %s403_s26 }
 0x129   :  { %431 = sst [smem:[#allocation45 + $0x3]] %s11081_s18  ;;  %s407_s17 = scalar_lea.hbm %s11017_s5, 8192 }
 0x12a   :  { %433 = sst [smem:[#allocation45 + $0x4]] %s11074_s19  ;;  %s9342_s28 = smov [#allocation4 + $0x200]  }
 0x12b   :  { %435 = sst [smem:[#allocation45 + $0x5]] %s11082_s15  ;;  %s421_s16 = sshll.u32 %s9342_s28, 4  ;;  %s422_s16 = int_to_ptr.vmem [resolvable:$true] %s421_s16 }
 0x12c   :  { %437 = sst [smem:[#allocation45 + $0x6]] %s11078_s30  ;;  %s9787_s27 = scalar_lea.hbm %s11016_s4, 3072 }
 0x12d   :  { %439 = sst [smem:[#allocation45 + $0x7]] %s11081_s18  ;;  %p9136_p6 = scmp.ne.s32.totalorder %s9715_s24, %s9787_s27 }
 0x12e   :  { %441 = sst [smem:[#allocation45 + $0x8]] %s11084_s11  ;;  %p9138_p12 = scmp.lt.u32.totalorder %s9715_s24, %s11016_s4 }
 0x12f   :  { %p9139_p13 = scmp.lt.u32.totalorder %s9615_s2, %s9787_s27  ;;  %p9141_p0 = scmp.lt.u32.totalorder %s9787_s27, %s9715_s24 }
 0x131   :  { %p9140_p10 = por %p9139_p13, %p9138_p12 }
 0x133   :  { %p9142_p1 = por %p9141_p0, %p9140_p10 }
 0x135   :  { %p9143_p2 = pnand %p9142_p1, %p9136_p6 }
 0x137   :  { %9146 = shalt.err (!%p9143_p2)  }
 0x138   :  { %s9147_s9 = scalar_lea.vmem %s404_s26, 1024  ;;  %p9152_p4 = scmp.lt.s32.totalorder %s404_s26, %s9593_s0 }
 0x139   :  { %p9148_p3 = scmp.ne.s32.totalorder %s404_s26, %s9147_s9  ;;  %p9153_p5 = scmp.lt.s32.totalorder %s9631_s1, %s9147_s9 }
 0x13b   :  { %p9154_p7 = por %p9153_p5, %p9152_p4 }
 0x13d   :  { %p9155_p8 = pnand %p9154_p7, %p9148_p3 }
 0x13f   :  { %9158 = shalt.err (!%p9155_p8)  }
 0x140   :  { %406 = dma.hbm_to_vmem [thread:$0]  %s9715_s24, 1024, %s404_s26, [#allocation6 + $0x9] }
 0x141   :  { %s9343_s28 = smov [#allocation6 + $0xa]   ;;  %s9344_s12 = smov [#allocation44]  }
 0x142   :  { %443 = dma.general %s407_s17, 4096, %s422_s16, %s9343_s28, %s9344_s12, [#allocation45], %s9581_s22, 0  }
 0x143   :  { %476 = sst [smem:[#allocation49]] %s11079_s29  ;;  %s9345_s25 = smov [#allocation5 + $0x200]  }
 0x144   :  { %478 = sst [smem:[#allocation49 + $0x1]] %s11079_s29  ;;  %s454_s9 = sshll.u32 %s9345_s25, 4  ;;  %s455_s9 = int_to_ptr.vmem [resolvable:$true] %s454_s9 }
 0x145   :  { %480 = sst [smem:[#allocation49 + $0x2]] %s11080_s10  ;;  %s458_s17 = scalar_lea.hbm %s11015_s3, 9216 }
 0x146   :  { %482 = sst [smem:[#allocation49 + $0x3]] %s11081_s18  ;;  %s9346_s29 = smov [#allocation2 + $0x240]  }
 0x147   :  { %484 = sst [smem:[#allocation49 + $0x4]] %s11074_s19  ;;  %s472_s16 = sshll.u32 %s9346_s29, 4  ;;  %s473_s16 = int_to_ptr.vmem [resolvable:$true] %s472_s16 }
 0x148   :  { %486 = sst [smem:[#allocation49 + $0x5]] %s11082_s15  ;;  %s9825_s12 = scalar_lea.hbm %s11018_s6, 12288 }
 0x149   :  { %488 = sst [smem:[#allocation49 + $0x6]] %s11083_s21  ;;  %p9161_p9 = scmp.ne.s32.totalorder %s9751_s7, %s9825_s12 }
 0x14a   :  { %490 = sst [smem:[#allocation49 + $0x7]] %s11081_s18  ;;  %p9163_p11 = scmp.lt.u32.totalorder %s9751_s7, %s11018_s6 }
 0x14b   :  { %492 = sst [smem:[#allocation49 + $0x8]] %s11084_s11  ;;  %p9164_p6 = scmp.lt.u32.totalorder %s9670_s20, %s9825_s12 }
 0x14c   :  { %p9166_p10 = scmp.lt.u32.totalorder %s9825_s12, %s9751_s7 }
 0x14d   :  { %p9165_p12 = por %p9164_p6, %p9163_p11 }
 0x14f   :  { %p9167_p0 = por %p9166_p10, %p9165_p12 }
 0x151   :  { %p9168_p1 = pnand %p9167_p0, %p9161_p9 }
 0x153   :  { %9171 = shalt.err (!%p9168_p1)  }
 0x154   :  { %s9172_s21 = scalar_lea.vmem %s455_s9, 4096  ;;  %s11086_s25 = sld [smem:[#allocation78_spill]] }
 0x155   :  { %p9173_p2 = scmp.ne.s32.totalorder %s455_s9, %s9172_s21  ;;  %p9177_p3 = scmp.lt.s32.totalorder %s455_s9, %s9647_s23 }
 0x15a   :  { %p9178_p4 = scmp.lt.s32.totalorder %s11086_s25, %s9172_s21 }
 0x15c   :  { %p9179_p5 = por %p9178_p4, %p9177_p3 }
 0x15e   :  { %p9180_p7 = pnand %p9179_p5, %p9173_p2 }
 0x160   :  { %9183 = shalt.err (!%p9180_p7)  }
 0x161   :  { %457 = dma.hbm_to_vmem [thread:$0]  %s9751_s7, 4096, %s455_s9, [#allocation6 + $0xb] }
 0x162   :  { %s9347_s24 = smov [#allocation6 + $0xc]   ;;  %s9348_s26 = smov [#allocation48]  }
 0x163   :  { %494 = dma.general %s458_s17, 3072, %s473_s16, %s9347_s24, %s9348_s26, [#allocation49], %s9581_s22, 0  }
 0x164   :  { %527 = sst [smem:[#allocation53]] %s11085_s8  ;;  %s9349_s28 = smov [#allocation3 + $0xc0]  }
 0x165   :  { %529 = sst [smem:[#allocation53 + $0x1]] %s11085_s8  ;;  %s505_s14 = sshll.u32 %s9349_s28, 4  ;;  %s506_s14 = int_to_ptr.vmem [resolvable:$true] %s505_s14 }
 0x166   :  { %531 = sst [smem:[#allocation53 + $0x2]] %s11084_s11  ;;  %s509_s9 = scalar_lea.hbm %s11017_s5, 12288 }
 0x167   :  { %533 = sst [smem:[#allocation53 + $0x3]] %s11081_s18  ;;  %s9350_s8 = smov [#allocation4 + $0x300]  }
 0x168   :  { %535 = sst [smem:[#allocation53 + $0x4]] %s11074_s19  ;;  %s523_s17 = sshll.u32 %s9350_s8, 4  ;;  %s524_s17 = int_to_ptr.vmem [resolvable:$true] %s523_s17 }
 0x169   :  { %537 = sst [smem:[#allocation53 + $0x5]] %s11082_s15  ;;  %p9186_p8 = scmp.ne.s32.totalorder %s9787_s27, %s9615_s2 }
 0x16a   :  { %539 = sst [smem:[#allocation53 + $0x6]] %s11078_s30  ;;  %p9188_p9 = scmp.lt.u32.totalorder %s9787_s27, %s11016_s4 }
 0x16b   :  { %541 = sst [smem:[#allocation53 + $0x7]] %s11081_s18  ;;  %p9189_p11 = scmp.lt.u32.totalorder %s9615_s2, %s9615_s2 }
 0x16c   :  { %543 = sst [smem:[#allocation53 + $0x8]] %s11084_s11 }
 0x16d   :  { %p9190_p12 = por %p9189_p11, %p9188_p9 }
 0x16f   :  { %p9192_p10 = por %p9190_p12, %p9139_p13 }
 0x171   :  { %p9193_p0 = pnand %p9192_p10, %p9186_p8 }
 0x173   :  { %9196 = shalt.err (!%p9193_p0)  }
 0x174   :  { %s9197_s5 = scalar_lea.vmem %s506_s14, 1024  ;;  %p9202_p2 = scmp.lt.s32.totalorder %s506_s14, %s9593_s0 }
 0x175   :  { %p9198_p1 = scmp.ne.s32.totalorder %s506_s14, %s9197_s5  ;;  %p9203_p3 = scmp.lt.s32.totalorder %s9631_s1, %s9197_s5 }
 0x177   :  { %p9204_p4 = por %p9203_p3, %p9202_p2 }
 0x179   :  { %p9205_p5 = pnand %p9204_p4, %p9198_p1 }
 0x17b   :  { %9208 = shalt.err (!%p9205_p5)  }
 0x17c   :  { %508 = dma.hbm_to_vmem [thread:$0]  %s9787_s27, 1024, %s506_s14, [#allocation6 + $0xd]  ;;  %v560_v1 = vlaneseq  ;;  %v9353_v13 = vmov 0.0   ;;  %v9354_v17 = vmov -1e+30   ;;  %v9355_v35 = vmov 1.0  }
 0x17d   :  { %s9351_s4 = smov [#allocation6 + $0xe]   ;;  %s9352_s30 = smov [#allocation52]  }
 0x17e   :  { %545 = dma.general %s509_s9, 4096, %s524_s17, %s9351_s4, %s9352_s30, [#allocation53], %s9581_s22, 0   ;;  %v561_v4 = vand.u32 127, %v560_v1  ;;  %v9884_v15 = vshrl.u32 %v560_v1, 7 }
 0x17f   :  { %s11087_s11 = sld [smem:[#allocation79_spill]]  ;;  %v576_v3 = vld [vmem:[#allocation7] sm:$0xff]  ;;  %v577_v5 = vld [vmem:[#allocation7 + $0x8] sm:$0xff]  ;;  %v578_v6 = vld [vmem:[#allocation7 + $0x10] sm:$0xff]  ;;  %s9356_s22 = smov [#allocation5 + $0x300]  }
 0x180   :  { %v579_v7 = vld [vmem:[#allocation7 + $0x18] sm:$0xff]  ;;  %v8600_v9 = vpack.c.bf16 %v577_v5, %v576_v3  ;;  %vm670_vm0 = vcmp.lt.s32.totalorder %v561_v4, 100  ;;  %v580_v11 = vld [vmem:[#allocation7 + $0x20] sm:$0xff]  ;;  %v581_v12 = vld [vmem:[#allocation7 + $0x28] sm:$0xff]  ;;  %vm675_vm1 = vcmp.ge.s32.totalorder %v9884_v15, %v561_v4  ;;  %s556_s27 = sshll.u32 %s9356_s22, 4  ;;  %p9211_p13 = scmp.ne.s32.totalorder %s9825_s12, %s9670_s20  ;;  %s557_s27 = int_to_ptr.vmem [resolvable:$true] %s556_s27 }
 0x181   :  { %v8604_v10 = vpack.c.bf16 %v579_v7, %v578_v6  ;;  %v9882_v14 = vsel %vm670_vm0, 1.0, %v9353_v13  ;;  %v8608_v16 = vpack.c.bf16 %v581_v12, %v580_v11  ;;  %v9887_v18 = vsel %vm675_vm1, 0.0, %v9354_v17  ;;  %v582_v19 = vld [vmem:[#allocation7 + $0x30] sm:$0xff]  ;;  %v583_v20 = vld [vmem:[#allocation7 + $0x38] sm:$0xff]  ;;  %v584_v22 = vld [vmem:[#allocation7 + $0x40] sm:$0xff]  ;;  %p9213_p7 = scmp.lt.u32.totalorder %s9825_s12, %s11018_s6  ;;  %p9214_p8 = scmp.lt.u32.totalorder %s9670_s20, %s9670_s20 }
 0x182   :  { %8601 = vmatprep.subr.bf16.mxu0 %v8600_v9  ;;  %v8612_v21 = vpack.c.bf16 %v583_v20, %v582_v19  ;;  %v585_v23 = vld [vmem:[#allocation7 + $0x48] sm:$0xff]  ;;  %v586_v25 = vld [vmem:[#allocation7 + $0x50] sm:$0xff]  ;;  %v587_v26 = vld [vmem:[#allocation7 + $0x58] sm:$0xff] }
 0x183   :  { %8603 = vmatpush3.bf16.msra.mxu0 %v8600_v9  ;;  %v8616_v24 = vpack.c.bf16 %v585_v23, %v584_v22  ;;  %v8620_v27 = vpack.c.bf16 %v587_v26, %v586_v25  ;;  %v588_v28 = vld [vmem:[#allocation7 + $0x60] sm:$0xff]  ;;  %v589_v29 = vld [vmem:[#allocation7 + $0x68] sm:$0xff]  ;;  %v590_v31 = vld [vmem:[#allocation7 + $0x70] sm:$0xff]  ;;  %p9215_p9 = por %p9214_p8, %p9213_p7 }
 0x184   :  { %8605 = vmatprep.subr.bf16.mxu0 %v8604_v10  ;;  %v8624_v30 = vpack.c.bf16 %v589_v29, %v588_v28  ;;  %v591_v32 = vld [vmem:[#allocation7 + $0x78] sm:$0xff] }
 0x185   :  { %v562_v2 = vld [vmem:[%s11087_s11] sm:$0xff]  ;;  %v563_v8 = vld [vmem:[%s11087_s11 + $0x8] sm:$0xff]  ;;  %v8628_v33 = vpack.c.bf16 %v591_v32, %v590_v31  ;;  %p9217_p11 = por %p9215_p9, %p9164_p6 }
 0x186   :  { %565 = vperm.xlu0 %8692, %v562_v2  }
 0x187   :  { %8607 = vmatpush3.bf16.msra.mxu0 %v8604_v10  ;;  %p9218_p12 = pnand %p9217_p11, %p9211_p13 }
 0x188   :  { %8609 = vmatprep.subr.bf16.mxu0 %v8608_v16 }
 0x18a   :  { %568 = vperm.xlu0 %8692, %v563_v8  }
 0x18b   :  { %8611 = vmatpush3.bf16.msra.mxu0 %v8608_v16 }
 0x18c   :  { %8613 = vmatprep.subr.bf16.mxu0 %v8612_v21 }
 0x18f   :  { %8615 = vmatpush3.bf16.msra.mxu0 %v8612_v21 }
 0x190   :  { %8617 = vmatprep.subr.bf16.mxu0 %v8616_v24 }
 0x193   :  { %8619 = vmatpush3.bf16.msra.mxu0 %v8616_v24 }
 0x194   :  { %8621 = vmatprep.subr.bf16.mxu0 %v8620_v27 }
 0x197   :  { %8623 = vmatpush3.bf16.msra.mxu0 %v8620_v27 }
 0x198   :  { %8625 = vmatprep.subr.bf16.mxu0 %v8624_v30 }
 0x19b   :  { %8627 = vmatpush3.bf16.msra.mxu0 %v8624_v30 }
 0x19c   :  { %8629 = vmatprep.subr.bf16.mxu0 %v8628_v33 }
 0x19f   :  { %8631 = vmatpush3.bf16.msra.mxu0 %v8628_v33 }
 0x205   :  { %v566_v34 = vpop.permute.xlu0 %565 }
 0x206   :  { %vm570_vm2 = vcmp.eq.s32.totalorder %v561_v4, %v566_v34 }
 0x207   :  { %7985 = vmatprep.mubr.msk.f32.mxu0 %vm570_vm2, %v9355_v35 }
 0x209   :  { %v569_v36 = vpop.permute.xlu0 %568 }
 0x20a   :  { %vm571_vm3 = vcmp.eq.s32.totalorder %v561_v4, %v569_v36 }
 0x20b   :  { %7986 = vmatmul.mubr.msk.f32.vlgmr.msra.gmra.mrb[0].mxu0 %vm571_vm3, %v9355_v35 }
 0x20c   :  { %9221 = shalt.err (!%p9218_p12)  }
 0x20d   :  { %s9222_s26 = scalar_lea.vmem %s557_s27, 4096  ;;  %p9227_p0 = scmp.lt.s32.totalorder %s557_s27, %s9647_s23 }
 0x20e   :  { %p9223_p10 = scmp.ne.s32.totalorder %s557_s27, %s9222_s26  ;;  %p9228_p1 = scmp.lt.s32.totalorder %s11086_s25, %s9222_s26 }
 0x210   :  { %p9229_p2 = por %p9228_p1, %p9227_p0 }
 0x212   :  { %p9230_p3 = pnand %p9229_p2, %p9223_p10 }
 0x214   :  { %9233 = shalt.err (!%p9230_p3)  }
 0x215   :  { %559 = dma.hbm_to_vmem [thread:$0]  %s9825_s12, 4096, %s557_s27, [#allocation6 + $0xf]  ;;  %v667_v37 = vld [vmem:[#allocation10] sm:$0xff] }
 0x2de   :  { %v7987_v38 = vpop.f32.mrb[0].mxu0 }
 0x2df   :  { %v9903_v39 = vadd.f32 %v7987_v38, %v667_v37  ;;  %v658_v40 = vpop.f32.mrb[1].mxu0 }
 0x2e0   :  { %v9905_v41 = vadd.f32 %v667_v37, %v658_v40 }
 0x2e1   :  { %9267 = dma.done.wait [#allocation6], 3072 }
 0x2e2   :  { %9268 = vsyncadd [#allocation6], 4294964224 }
 0x2e3   :  { %9269 = dma.done.wait [#allocation6 + $0x1], 1024 }
 0x2e4   :  { %9270 = vsyncadd [#allocation6 + $0x1], 4294966272 }
 0x2e5   :  { %9271 = dma.done.wait [#allocation6 + $0x2], 4096 }
 0x2e6   :  { %9272 = vsyncadd [#allocation6 + $0x2], 4294963200  ;;  %789 = vadd.xlane.f32.xlu0 %v9905_v41 }
 0x2e7   :  { %9273 = dma.done.wait [#allocation6 + $0x3], 4096 }
 0x2e8   :  { %9274 = vsyncadd [#allocation6 + $0x3], 4294963200  ;;  %7988 = vmatprep.subr.bf16.mxu0 %v9353_v13  ;;  %862 = vmatprep.mubr.bf16.mxu1 %v9316_v0  ;;  %v692_v42 = vld [vmem:[#allocation2 + $0x8] sm:$0xff]  ;;  %v691_v43 = vld [vmem:[#allocation2] sm:$0xff]  ;;  %vm9357_vm4 = vmmov 0   ;;  %s11088_s23 = sld [smem:[#allocation83_spill]] }
 0x2e9   :  { %v693_v44 = vld [vmem:[#allocation2 + $0x10] sm:$0xff]  ;;  %830 = vmatprep.subr.bf16.mxu1 %v692_v42  ;;  %v695_v55 = vld [vmem:[#allocation2 + $0x20] sm:$0xff]  ;;  %v694_v56 = vld [vmem:[#allocation2 + $0x18] sm:$0xff]  ;;  %8004 = vmatprep.mubr.msk.bf16.mxu0 %vm9357_vm4, %v9353_v13  ;;  %vm932_vm5 = vcmask 261120   ;;  %vm1057_vm6 = vcmask 1043456   ;;  %vm1029_vm7 = vcmask 64512  }
 0x2ea   :  { %791 = vadd.xlane.f32.xlu0 %v9903_v39  ;;  %7989 = vmatpush3.bf16.msra.mxu0 %v693_v44  ;;  %v696_v57 = vld [vmem:[#allocation2 + $0x28] sm:$0xff]  ;;  %v698_v58 = vld [vmem:[#allocation2 + $0x38] sm:$0xff]  ;;  %v697_v59 = vld [vmem:[#allocation2 + $0x30] sm:$0xff]  ;;  %s9358_s12 = smov 96   ;;  %s9359_s25 = smov 32  }
 0x2eb   :  { %831 = vmatpush1.bf16.msra.mxu1 %v691_v43  ;;  %7990 = vmatprep.subr.bf16.mxu0 %v9353_v13  ;;  %v699_v60 = vld [vmem:[#allocation2 + $0x40] sm:$0xff]  ;;  %v701_v61 = vld [vmem:[#allocation2 + $0x50] sm:$0xff]  ;;  %v700_v62 = vld [vmem:[#allocation2 + $0x48] sm:$0xff]  ;;  %s11089_s28 = sld [smem:[#allocation82_spill]] }
 0x2ec   :  { %832 = vmatprep.subr.bf16.mxu1 %v695_v55  ;;  %v702_v63 = vld [vmem:[#allocation2 + $0x58] sm:$0xff]  ;;  %v704_v1 = vld [vmem:[#allocation2 + $0x68] sm:$0xff]  ;;  %v703_v2 = vld [vmem:[#allocation2 + $0x60] sm:$0xff] }
 0x2ed   :  { %v705_v3 = vld [vmem:[#allocation2 + $0x70] sm:$0xff]  ;;  %v707_v4 = vld [vmem:[#allocation2 + $0x80] sm:$0xff]  ;;  %v706_v5 = vld [vmem:[#allocation2 + $0x78] sm:$0xff] }
 0x2ee   :  { %7991 = vmatpush3.bf16.msra.mxu0 %v696_v57  ;;  %v708_v6 = vld [vmem:[#allocation2 + $0x88] sm:$0xff]  ;;  %v710_v7 = vld [vmem:[#allocation2 + $0x98] sm:$0xff]  ;;  %v709_v8 = vld [vmem:[#allocation2 + $0x90] sm:$0xff] }
 0x2ef   :  { %833 = vmatpush1.bf16.msra.mxu1 %v694_v56  ;;  %7992 = vmatprep.subr.bf16.mxu0 %v9353_v13  ;;  %v711_v9 = vld [vmem:[#allocation2 + $0xa0] sm:$0xff]  ;;  %v713_v10 = vld [vmem:[#allocation2 + $0xb0] sm:$0xff]  ;;  %v712_v11 = vld [vmem:[#allocation2 + $0xa8] sm:$0xff] }
 0x2f0   :  { %834 = vmatprep.subr.bf16.mxu1 %v698_v58  ;;  %v714_v12 = vld [vmem:[#allocation2 + $0xb8] sm:$0xff]  ;;  %v7353_v25 = vld [vmem:[%s11088_s23] ss:$0 sm:$0xff]  ;;  %v7354_v29 = vld [vmem:[#allocation12] ss:$0 sm:$0xff] }
 0x2f2   :  { %7993 = vmatpush3.bf16.msra.mxu0 %v699_v60 }
 0x2f3   :  { %835 = vmatpush1.bf16.msra.mxu1 %v697_v59  ;;  %7994 = vmatprep.subr.bf16.mxu0 %v9353_v13 }
 0x2f4   :  { %836 = vmatprep.subr.bf16.mxu1 %v701_v61 }
 0x2f6   :  { %7995 = vmatpush3.bf16.msra.mxu0 %v702_v63 }
 0x2f7   :  { %837 = vmatpush1.bf16.msra.mxu1 %v700_v62  ;;  %7996 = vmatprep.subr.bf16.mxu0 %v9353_v13 }
 0x2f8   :  { %838 = vmatprep.subr.bf16.mxu1 %v704_v1 }
 0x2fa   :  { %7997 = vmatpush3.bf16.msra.mxu0 %v705_v3 }
 0x2fb   :  { %839 = vmatpush1.bf16.msra.mxu1 %v703_v2  ;;  %7998 = vmatprep.subr.bf16.mxu0 %v9353_v13 }
 0x2fc   :  { %840 = vmatprep.subr.bf16.mxu1 %v707_v4 }
 0x2fe   :  { %7999 = vmatpush3.bf16.msra.mxu0 %v708_v6 }
 0x2ff   :  { %841 = vmatpush1.bf16.msra.mxu1 %v706_v5  ;;  %8000 = vmatprep.subr.bf16.mxu0 %v9353_v13 }
 0x300   :  { %842 = vmatprep.subr.bf16.mxu1 %v710_v7 }
 0x302   :  { %8001 = vmatpush3.bf16.msra.mxu0 %v711_v9 }
 0x303   :  { %843 = vmatpush1.bf16.msra.mxu1 %v709_v8  ;;  %8002 = vmatprep.subr.bf16.mxu0 %v9353_v13 }
 0x304   :  { %844 = vmatprep.subr.bf16.mxu1 %v713_v10 }
 0x306   :  { %8003 = vmatpush3.bf16.msra.mxu0 %v714_v12 }
 0x307   :  { %845 = vmatpush1.bf16.msra.mxu1 %v712_v11  ;;  %8056 = vmatprep.subr.bf16.mxu0 %v9353_v13 }
 0x308   :  { %8008 = vmatprep.subr.bf16.mxu1 %v9353_v13 }
 0x373   :  { %v790_v45 = vpop.xlane.xlu0 %789 }
 0x374   :  { %v793_v46 = vmul.f32 0.01, %v790_v45 }
 0x376   :  { %v795_v47 = vsub.f32 %v9905_v41, %v793_v46 }
 0x377   :  { %v792_v48 = vpop.xlane.xlu0 %791 }
 0x378   :  { %v9914_v49 = vmul.f32 %v9882_v14, %v795_v47  ;;  %v794_v50 = vmul.f32 0.01, %v792_v48 }
 0x37a   :  { %v796_v51 = vsub.f32 %v9903_v39, %v794_v50  ;;  %v799_v52 = vmul.f32 %v9914_v49, %v9914_v49 }
 0x37c   :  { %v9920_v53 = vmul.f32 %v9882_v14, %v796_v51  ;;  %801 = vadd.xlane.f32.xlu1 %v799_v52 }
 0x37e   :  { %v800_v54 = vmul.f32 %v9920_v53, %v9920_v53 }
 0x380   :  { %803 = vadd.xlane.f32.xlu1 %v800_v54 }
 0x409   :  { %v802_v16 = vpop.xlane.xlu1 %801 }
 0x40a   :  { %v805_v17 = vmul.f32 0.01, %v802_v16 }
 0x40c   :  { %v807_v19 = vadd.f32 1e-05, %v805_v17 }
 0x40d   :  { %v804_v20 = vpop.xlane.xlu1 %803 }
 0x40e   :  { %8693 = vrsqrt.f32 %v807_v19  ;;  %v806_v21 = vmul.f32 0.01, %v804_v20 }
 0x410   :  { %v808_v22 = vadd.f32 1e-05, %v806_v21 }
 0x412   :  { %8695 = vrsqrt.f32 %v808_v22 }
 0x418   :  { %v8694_v23 = vpop.eup %8693 }
 0x419   :  { %v811_v24 = vmul.f32 %v8694_v23, %v9914_v49 }
 0x41b   :  { %v819_v28 = vmul.f32 %v7353_v25, %v811_v24 }
 0x41c   :  { %v8696_v26 = vpop.eup %8695 }
 0x41d   :  { %v812_v27 = vmul.f32 %v8696_v26, %v9920_v53  ;;  %v827_v31 = vadd.f32 %v7354_v29, %v819_v28 }
 0x41f   :  { %v820_v30 = vmul.f32 %v7353_v25, %v812_v27 }
 0x421   :  { %v828_v32 = vadd.f32 %v7354_v29, %v820_v30 }
 0x423   :  { %v829_v33 = vpack.c.bf16 %v828_v32, %v827_v31 }
 0x425   :  { %863 = vmatmul.mubr.bf16.vlgmr.msra.gmra.mrb[0].mxu1 %v829_v33  ;;  %8005 = vmatmul.mubr.bf16.vlgmr.msra.gmra.mrb[4].mxu0 %v829_v33 }
 0x426   :  { %8010 = vmatprep.mubr.msk.bf16.mxu1 %vm9357_vm4, %v9353_v13  ;;  %8060 = vmatprep.mubr.msk.bf16.mxu0 %vm9357_vm4, %v9353_v13 }
 0x4f8   :  { %v864_v34 = vpop.f32.mrb[0].mxu1  ;;  %v907_v35 = vpop.f32.mrb[4].mxu0 }
 0x4f9   :  { %v866_v36 = vpop.f32.mrb[1].mxu1  ;;  %v8006_v37 = vpop.f32.mrb[5].mxu0  ;;  %v9950_v47 = vpack.c.bf16 %v864_v34, %v864_v34  ;;  %v9959_v49 = vpack.c.bf16 %v907_v35, %v907_v35 }
 0x4fa   :  { %v9943_v38 = vpack.c.bf16 %v866_v36, %v866_v36  ;;  %v868_v40 = vpop.f32.mrb[2].mxu1  ;;  %v910_v42 = vpop.f32.mrb[6].mxu0 }
 0x4fb   :  { %v870_v43 = vpop.f32.mrb[3].mxu1  ;;  %v8007_v44 = vpop.f32.mrb[7].mxu0  ;;  %v9961_v50 = vpack.c.bf16 %v868_v40, %v868_v40  ;;  %v1059_v51 = vsel %vm1057_vm6, %v9959_v49, 0  ;;  %v9984_v20 = vpack.c.bf16 %v910_v42, %v910_v42 }
 0x4fc   :  { %v937_v45 = vsel %vm932_vm5, %v9943_v38, 0  ;;  %v9948_v46 = vpack.c.bf16 %v870_v43, %v870_v43 }
 0x4fd   :  { %8009 = vmatpush3.bf16.xpose.msra.mxu1 %v937_v45  ;;  %v1105_v23 = vsel %vm1057_vm6, %v9984_v20, 0 }
 0x4fe   :  { %8014 = vmatprep.subr.bf16.mxu1 %v9353_v13  ;;  %v983_v48 = vsel %vm932_vm5, %v9948_v46, 0 }
 0x504   :  { %8011 = vmatmul.mubr.msk.bf16.vlgmr.msra.gmra.mrb[4].mxu1 %vm932_vm5, %v9950_v47 }
 0x505   :  { %8015 = vmatpush3.bf16.xpose.msra.mxu1 %v983_v48  ;;  %8016 = vmatprep.mubr.msk.bf16.mxu1 %vm9357_vm4, %v9353_v13 }
 0x506   :  { %8020 = vmatprep.subr.bf16.mxu1 %v9353_v13 }
 0x50c   :  { %8017 = vmatmul.mubr.msk.bf16.vlgmr.msra.gmra.mrb[8].mxu1 %vm932_vm5, %v9961_v50 }
 0x50d   :  { %8021 = vmatpush3.bf16.msra.mxu1 %v1059_v51  ;;  %8022 = vmatprep.mubr.msk.bf16.mxu1 %vm9357_vm4, %v9353_v13 }
 0x50e   :  { %8026 = vmatprep.subr.bf16.mxu1 %v9353_v13 }
 0x5d7   :  { %v973_v52 = vpop.f32.mrb[4].mxu1 }
 0x5d8   :  { %v1025_v53 = vmul.f32 0.2, %v973_v52  ;;  %v8012_v54 = vpop.f32.mrb[5].mxu1 }
 0x5d9   :  { %v976_v55 = vpop.f32.mrb[6].mxu1 }
 0x5da   :  { %v1027_v56 = vadd.f32 %v1025_v53, %v9887_v18  ;;  %v8013_v57 = vpop.f32.mrb[7].mxu1 }
 0x5dc   :  { %v1030_v58 = vsel %vm1029_vm7, %v1027_v56, -inf }
 0x5dd   :  { %1031 = vmax.xlane.f32.xlu0 %v1030_v58 }
 0x5df   :  { %v1019_v59 = vpop.f32.mrb[8].mxu1 }
 0x5e0   :  { %v1026_v60 = vmul.f32 0.2, %v1019_v59  ;;  %v8018_v61 = vpop.f32.mrb[9].mxu1 }
 0x5e1   :  { %v1022_v62 = vpop.f32.mrb[10].mxu1 }
 0x5e2   :  { %v1028_v63 = vadd.f32 %v1026_v60, %v9887_v18  ;;  %v8019_v1 = vpop.f32.mrb[11].mxu1 }
 0x5e4   :  { %v1033_v2 = vsel %vm1029_vm7, %v1028_v63, -inf }
 0x5e5   :  { %1034 = vmax.xlane.f32.xlu1 %v1033_v2 }
 0x66a   :  { %v1032_v3 = vpop.xlane.xlu0 %1031 }
 0x66b   :  { %v1036_v4 = vsub.f32 %v1027_v56, %v1032_v3 }
 0x66d   :  { %v1038_v5 = vmul.f32 1.442695, %v1036_v4 }
 0x66f   :  { %8697 = vpow2.f32 %v1038_v5 }
 0x672   :  { %v1035_v6 = vpop.xlane.xlu1 %1034 }
 0x673   :  { %v1037_v7 = vsub.f32 %v1028_v63, %v1035_v6 }
 0x675   :  { %v1040_v8 = vmul.f32 1.442695, %v1037_v7 }
 0x677   :  { %8699 = vpow2.f32 %v1040_v8 }
 0x679   :  { %v8698_v9 = vpop.eup %8697 }
 0x67a   :  { %v1042_v10 = vsel %vm1029_vm7, %v8698_v9, 0.0 }
 0x67b   :  { %1043 = vadd.xlane.f32.xlu0 %v1042_v10  ;;  %v717_v10 = vld [vmem:[#allocation3 + $0x10] sm:$0xff] }
 0x67c   :  { %8057 = vmatpush3.bf16.msra.mxu0 %v717_v10 }
 0x67d   :  { %8058 = vmatprep.subr.bf16.mxu0 %v9353_v13 }
 0x681   :  { %v8700_v11 = vpop.eup %8699 }
 0x682   :  { %v1045_v12 = vsel %vm1029_vm7, %v8700_v11, 0.0 }
 0x683   :  { %1046 = vadd.xlane.f32.xlu1 %v1045_v12 }
 0x691   :  { %1150 = vrot.lane.b32.xlu0 %v9943_v38, %s9358_s12 }
 0x694   :  { %1148 = vrot.lane.b32.xlu1 %v9950_v47, %s9358_s12 }
 0x698   :  { %1200 = vrot.lane.b32.xlu1 %v9948_v46, %s9358_s12 }
 0x69c   :  { %1198 = vrot.lane.b32.xlu1 %v9961_v50, %s9358_s12 }
 0x708   :  { %v1044_v16 = vpop.xlane.xlu0 %1043 }
 0x709   :  { %8701 = vrcp.f32 %v1044_v16 }
 0x70c   :  { %v1151_v26 = vpop.permute.xlu0 %1150 }
 0x70d   :  { %v1156_v29 = vsel %vm932_vm5, %v1151_v26, 0 }
 0x710   :  { %v1047_v17 = vpop.xlane.xlu1 %1046 }
 0x711   :  { %8703 = vrcp.f32 %v1047_v17 }
 0x713   :  { %v8702_v19 = vpop.eup %8701 }
 0x714   :  { %v1049_v21 = vmul.f32 %v8702_v19, %v8698_v9  ;;  %v1149_v28 = vpop.permute.xlu1 %1148 }
 0x716   :  { %v1052_v22 = vpack.c.bf16 %v1049_v21, %v1049_v21 }
 0x718   :  { %8023 = vmatmul.mubr.msk.bf16.vlgmr.msra.gmra.mrb[12].mxu1 %vm1029_vm7, %v1052_v22  ;;  %v1201_v30 = vpop.permute.xlu1 %1200 }
 0x719   :  { %8027 = vmatpush3.bf16.msra.mxu1 %v1105_v23  ;;  %8028 = vmatprep.mubr.msk.bf16.mxu1 %vm9357_vm4, %v9353_v13  ;;  %v1206_v31 = vsel %vm932_vm5, %v1201_v30, 0 }
 0x71a   :  { %8032 = vmatprep.subr.bf16.mxu1 %v9353_v13 }
 0x71b   :  { %v8704_v24 = vpop.eup %8703 }
 0x71c   :  { %v1051_v25 = vmul.f32 %v8704_v24, %v8700_v11  ;;  %v1199_v32 = vpop.permute.xlu1 %1198 }
 0x71e   :  { %v1053_v27 = vpack.c.bf16 %v1051_v25, %v1051_v25 }
 0x720   :  { %8029 = vmatmul.mubr.msk.bf16.vlgmr.msra.gmra.mrb[16].mxu1 %vm1029_vm7, %v1053_v27 }
 0x721   :  { %8034 = vmatprep.mubr.msk.bf16.mxu1 %vm9357_vm4, %v9353_v13 }
 0x722   :  { %8033 = vmatpush3.bf16.xpose.msra.mxu1 %v1156_v29  ;;  %v716_v29 = vld [vmem:[#allocation3 + $0x8] sm:$0xff] }
 0x723   :  { %8038 = vmatprep.subr.bf16.mxu1 %v9353_v13 }
 0x729   :  { %8035 = vmatmul.mubr.msk.bf16.vlgmr.msra.gmra.mrb[20].mxu1 %vm932_vm5, %v1149_v28  ;;  %v715_v28 = vld [vmem:[#allocation3] sm:$0xff] }
 0x72a   :  { %8039 = vmatpush3.bf16.xpose.msra.mxu1 %v1206_v31  ;;  %8040 = vmatprep.mubr.msk.bf16.mxu1 %vm9357_vm4, %v9353_v13 }
 0x72b   :  { %8044 = vmatprep.subr.bf16.mxu1 %v9353_v13 }
 0x731   :  { %8041 = vmatmul.mubr.msk.bf16.vlgmr.msra.gmra.mrb[24].mxu1 %vm932_vm5, %v1199_v32 }
 0x732   :  { %8046 = vmatprep.mubr.msk.bf16.mxu1 %vm9357_vm4, %v9353_v13 }
 0x7eb   :  { %v10005_v33 = vpop.f32.mrb[12].mxu1 }
 0x7ec   :  { %v8024_v34 = vpop.f32.mrb[13].mxu1 }
 0x7ed   :  { %v1098_v35 = vpop.f32.mrb[14].mxu1 }
 0x7ee   :  { %v8025_v36 = vpop.f32.mrb[15].mxu1  ;;  %v718_v35 = vld [vmem:[#allocation3 + $0x18] sm:$0xff] }
 0x7ef   :  { %8059 = vmatpush3.bf16.msra.mxu0 %v718_v35 }
 0x7f0   :  { %8072 = vmatprep.subr.bf16.mxu0 %v9353_v13 }
 0x7f3   :  { %v10007_v37 = vpop.f32.mrb[16].mxu1 }
 0x7f4   :  { %v1147_v40 = vpack.c.bf16 %v10007_v37, %v10005_v33  ;;  %v8030_v42 = vpop.f32.mrb[17].mxu1 }
 0x7f5   :  { %v1144_v43 = vpop.f32.mrb[18].mxu1 }
 0x7f6   :  { %v8031_v44 = vpop.f32.mrb[19].mxu1 }
 0x7fc   :  { %v1192_v45 = vpop.f32.mrb[20].mxu1 }
 0x7fd   :  { %v1248_v48 = vmul.f32 0.2, %v1192_v45  ;;  %v8036_v51 = vpop.f32.mrb[21].mxu1 }
 0x7fe   :  { %v1195_v52 = vpop.f32.mrb[22].mxu1 }
 0x7ff   :  { %v1250_v53 = vadd.f32 %v1248_v48, %v9887_v18  ;;  %v8037_v54 = vpop.f32.mrb[23].mxu1 }
 0x801   :  { %v1252_v55 = vsel %vm1029_vm7, %v1250_v53, -inf }
 0x802   :  { %1253 = vmax.xlane.f32.xlu0 %v1252_v55 }
 0x804   :  { %v1242_v56 = vpop.f32.mrb[24].mxu1 }
 0x805   :  { %v1249_v57 = vmul.f32 0.2, %v1242_v56  ;;  %v8042_v58 = vpop.f32.mrb[25].mxu1 }
 0x806   :  { %v1245_v59 = vpop.f32.mrb[26].mxu1 }
 0x807   :  { %v1251_v60 = vadd.f32 %v1249_v57, %v9887_v18  ;;  %v8043_v61 = vpop.f32.mrb[27].mxu1 }
 0x809   :  { %v1255_v62 = vsel %vm1029_vm7, %v1251_v60, -inf }
 0x80a   :  { %1256 = vmax.xlane.f32.xlu1 %v1255_v62 }
 0x81b   :  { %1324 = vrot.lane.b32.xlu1 %v9984_v20, %s9358_s12 }
 0x81f   :  { %1463 = vrot.lane.b32.xlu1 %v9943_v38, %s11081_s18 }
 0x823   :  { %1513 = vrot.lane.b32.xlu1 %v9948_v46, %s11081_s18 }
 0x827   :  { %1511 = vrot.lane.b32.xlu1 %v9961_v50, %s11081_s18 }
 0x88f   :  { %v1254_v63 = vpop.xlane.xlu0 %1253 }
 0x890   :  { %v1258_v1 = vsub.f32 %v1250_v53, %v1254_v63 }
 0x892   :  { %v1260_v2 = vmul.f32 1.442695, %v1258_v1 }
 0x894   :  { %8705 = vpow2.f32 %v1260_v2 }
 0x897   :  { %v1257_v3 = vpop.xlane.xlu1 %1256 }
 0x898   :  { %v1259_v4 = vsub.f32 %v1251_v60, %v1257_v3 }
 0x89a   :  { %v1262_v5 = vmul.f32 1.442695, %v1259_v4 }
 0x89b   :  { %v1325_v22 = vpop.permute.xlu1 %1324 }
 0x89c   :  { %8707 = vpow2.f32 %v1262_v5  ;;  %v1330_v24 = vsel %vm1057_vm6, %v1325_v22, 0 }
 0x89e   :  { %v8706_v6 = vpop.eup %8705 }
 0x89f   :  { %v1264_v7 = vsel %vm1029_vm7, %v8706_v6, 0.0  ;;  %v1464_v30 = vpop.permute.xlu1 %1463 }
 0x8a0   :  { %1265 = vadd.xlane.f32.xlu0 %v1264_v7  ;;  %v1469_v48 = vsel %vm932_vm5, %v1464_v30, 0 }
 0x8a3   :  { %v1514_v31 = vpop.permute.xlu1 %1513 }
 0x8a4   :  { %v1519_v32 = vsel %vm932_vm5, %v1514_v31, 0 }
 0x8a6   :  { %v8708_v8 = vpop.eup %8707 }
 0x8a7   :  { %v1267_v9 = vsel %vm1029_vm7, %v8708_v8, 0.0  ;;  %v1512_v34 = vpop.permute.xlu1 %1511 }
 0x8a8   :  { %1268 = vadd.xlane.f32.xlu0 %v1267_v9 }
 0x8be   :  { %1276 = vrot.lane.b32.xlu0 %v9959_v49, %s9358_s12 }
 0x8c2   :  { %1461 = vrot.lane.b32.xlu0 %v9950_v47, %s11081_s18 }
 0x92d   :  { %v1266_v11 = vpop.xlane.xlu0 %1265 }
 0x92e   :  { %8709 = vrcp.f32 %v1266_v11 }
 0x935   :  { %v1269_v12 = vpop.xlane.xlu0 %1268 }
 0x936   :  { %8711 = vrcp.f32 %v1269_v12 }
 0x938   :  { %v8710_v16 = vpop.eup %8709 }
 0x939   :  { %v1271_v17 = vmul.f32 %v8710_v16, %v8706_v6  ;;  %v1277_v19 = vpop.permute.xlu0 %1276 }
 0x93a   :  { %v1282_v21 = vsel %vm1057_vm6, %v1277_v19, 0 }
 0x93b   :  { %8045 = vmatpush3.bf16.msra.mxu1 %v1282_v21  ;;  %v1274_v23 = vpack.c.bf16 %v1271_v17, %v1271_v17 }
 0x93c   :  { %8050 = vmatprep.subr.bf16.mxu1 %v9353_v13 }
 0x93d   :  { %v1462_v54 = vpop.permute.xlu0 %1461 }
 0x93e   :  { %8047 = vmatmul.mubr.msk.bf16.vlgmr.msra.gmra.mrb[28].mxu1 %vm1029_vm7, %v1274_v23 }
 0x93f   :  { %8051 = vmatpush3.bf16.msra.mxu1 %v1330_v24  ;;  %8052 = vmatprep.mubr.msk.bf16.mxu1 %vm9357_vm4, %v9353_v13 }
 0x940   :  { %v8712_v25 = vpop.eup %8711  ;;  %8064 = vmatprep.subr.bf16.mxu1 %v9353_v13 }
 0x941   :  { %v1273_v26 = vmul.f32 %v8712_v25, %v8708_v8 }
 0x943   :  { %v1275_v27 = vpack.c.bf16 %v1273_v26, %v1273_v26 }
 0x946   :  { %8053 = vmatmul.mubr.msk.bf16.vlgmr.msra.gmra.mrb[32].mxu1 %vm1029_vm7, %v1275_v27 }
 0x947   :  { %8065 = vmatpush3.bf16.msra.mxu1 %v715_v28  ;;  %8068 = vmatprep.mubr.msk.bf16.mxu1 %vm9357_vm4, %v9353_v13 }
 0x948   :  { %8066 = vmatprep.subr.bf16.mxu1 %v9353_v13 }
 0x94b   :  { %8067 = vmatpush3.bf16.msra.mxu1 %v716_v29 }
 0x94c   :  { %8078 = vmatprep.subr.bf16.mxu1 %v9353_v13 }
 0x94e   :  { %8069 = vmatmul.mubr.msk.bf16.vlgmr.msra.gmra.mrb[36].mxu1 %vm932_vm5, %v1147_v40 }
 0x94f   :  { %8080 = vmatprep.mubr.msk.bf16.mxu1 %vm9357_vm4, %v9353_v13 }
 0x954   :  { %8079 = vmatpush3.bf16.xpose.msra.mxu1 %v1519_v32 }
 0x955   :  { %8090 = vmatprep.subr.bf16.mxu1 %v9353_v13 }
 0x95b   :  { %8081 = vmatmul.mubr.msk.bf16.vlgmr.msra.gmra.mrb[40].mxu1 %vm932_vm5, %v1512_v34 }
 0x95c   :  { %8092 = vmatprep.mubr.msk.bf16.mxu1 %vm9357_vm4, %v9353_v13 }
 0xa11   :  { %v1318_v33 = vpop.f32.mrb[28].mxu1 }
 0xa12   :  { %v8048_v36 = vpop.f32.mrb[29].mxu1 }
 0xa13   :  { %v1321_v37 = vpop.f32.mrb[30].mxu1 }
 0xa14   :  { %v8049_v40 = vpop.f32.mrb[31].mxu1 }
 0xa19   :  { %v1366_v42 = vpop.f32.mrb[32].mxu1 }
 0xa1a   :  { %v1372_v43 = vpack.c.bf16 %v1366_v42, %v1318_v33  ;;  %v8054_v44 = vpop.f32.mrb[33].mxu1 }
 0xa1b   :  { %v1369_v45 = vpop.f32.mrb[34].mxu1  ;;  %v719_v44 = vld [vmem:[#allocation3 + $0x20] sm:$0xff] }
 0xa1c   :  { %v8055_v51 = vpop.f32.mrb[35].mxu1  ;;  %8061 = vmatmul.mubr.msk.bf16.vlgmr.msra.gmra.mrb[8].mxu0 %vm932_vm5, %v1372_v43 }
 0xa1d   :  { %8073 = vmatpush3.bf16.xpose.msra.mxu0 %v1469_v48  ;;  %8074 = vmatprep.mubr.msk.bf16.mxu0 %vm9357_vm4, %v9353_v13 }
 0xa1e   :  { %8084 = vmatprep.subr.bf16.mxu0 %v9353_v13 }
 0xa21   :  { %v1454_v52 = vpop.f32.mrb[36].mxu1 }
 0xa22   :  { %v8070_v53 = vpop.f32.mrb[37].mxu1 }
 0xa23   :  { %v1457_v55 = vpop.f32.mrb[38].mxu1 }
 0xa24   :  { %v8071_v56 = vpop.f32.mrb[39].mxu1  ;;  %8075 = vmatmul.mubr.msk.bf16.vlgmr.msra.gmra.mrb[12].mxu0 %vm932_vm5, %v1462_v54 }
 0xa25   :  { %8086 = vmatprep.mubr.msk.bf16.mxu0 %vm9357_vm4, %v9353_v13 }
 0xa2e   :  { %v1555_v57 = vpop.f32.mrb[40].mxu1 }
 0xa2f   :  { %v1562_v58 = vmul.f32 0.2, %v1555_v57  ;;  %v8082_v59 = vpop.f32.mrb[41].mxu1 }
 0xa30   :  { %v1558_v60 = vpop.f32.mrb[42].mxu1 }
 0xa31   :  { %v1564_v61 = vadd.f32 %v1562_v58, %v9887_v18  ;;  %v8083_v62 = vpop.f32.mrb[43].mxu1 }
 0xa33   :  { %v1568_v63 = vsel %vm1029_vm7, %v1564_v61, -inf }
 0xa34   :  { %1569 = vmax.xlane.f32.xlu1 %v1568_v63 }
 0xa45   :  { %1637 = vrot.lane.b32.xlu1 %v9984_v20, %s11081_s18 }
 0xa49   :  { %1734 = vrot.lane.b32.xlu1 %v9943_v38, %s9359_s25 }
 0xa4d   :  { %1784 = vrot.lane.b32.xlu1 %v9948_v46, %s9359_s25 }
 0xa51   :  { %1782 = vrot.lane.b32.xlu1 %v9961_v50, %s9359_s25 }
 0xac1   :  { %v1570_v1 = vpop.xlane.xlu1 %1569 }
 0xac2   :  { %v1572_v4 = vsub.f32 %v1564_v61, %v1570_v1 }
 0xac4   :  { %v1575_v5 = vmul.f32 1.442695, %v1572_v4 }
 0xac5   :  { %v1638_v2 = vpop.permute.xlu1 %1637 }
 0xac6   :  { %v1643_v3 = vsel %vm1057_vm6, %v1638_v2, 0  ;;  %8713 = vpow2.f32 %v1575_v5 }
 0xac7   :  { %8091 = vmatpush3.bf16.msra.mxu1 %v1643_v3 }
 0xac8   :  { %8104 = vmatprep.subr.bf16.mxu1 %v9353_v13 }
 0xac9   :  { %v1735_v31 = vpop.permute.xlu1 %1734 }
 0xaca   :  { %v1740_v34 = vsel %vm932_vm5, %v1735_v31, 0 }
 0xacd   :  { %v1785_v60 = vpop.permute.xlu1 %1784 }
 0xace   :  { %v1790_v2 = vsel %vm932_vm5, %v1785_v60, 0  ;;  %v7381_v60 = vld [vmem:[%s11089_s28] ss:$0 sm:$0xff] }
 0xad0   :  { %v8714_v21 = vpop.eup %8713 }
 0xad1   :  { %v1580_v22 = vsel %vm1029_vm7, %v8714_v21, 0.0  ;;  %v1783_v4 = vpop.permute.xlu1 %1782 }
 0xaef   :  { %v1410_v6 = vpop.f32.mrb[8].mxu0 }
 0xaf0   :  { %v10074_v7 = vadd.f32 %v1454_v52, %v1410_v6  ;;  %v8062_v8 = vpop.f32.mrb[9].mxu0  ;;  %v720_v52 = vld [vmem:[#allocation3 + $0x28] sm:$0xff] }
 0xaf1   :  { %v1413_v38 = vpop.f32.mrb[10].mxu0 }
 0xaf2   :  { %v10076_v9 = vadd.f32 %v1457_v55, %v1413_v38  ;;  %v8063_v46 = vpop.f32.mrb[11].mxu0 }
 0xaf7   :  { %v1505_v10 = vpop.f32.mrb[12].mxu0 }
 0xaf8   :  { %v1561_v50 = vmul.f32 0.2, %v1505_v10  ;;  %v8076_v11 = vpop.f32.mrb[13].mxu0 }
 0xaf9   :  { %v1508_v12 = vpop.f32.mrb[14].mxu0 }
 0xafa   :  { %v1563_v16 = vadd.f32 %v1561_v50, %v9887_v18  ;;  %v8077_v17 = vpop.f32.mrb[15].mxu0 }
 0xafc   :  { %v1565_v19 = vsel %vm1029_vm7, %v1563_v16, -inf }
 0xafd   :  { %1566 = vmax.xlane.f32.xlu0 %v1565_v19 }
 0xb01   :  { %1581 = vadd.xlane.f32.xlu0 %v1580_v22 }
 0xb8a   :  { %v1567_v23 = vpop.xlane.xlu0 %1566 }
 0xb8b   :  { %v1571_v24 = vsub.f32 %v1563_v16, %v1567_v23 }
 0xb8d   :  { %v1573_v25 = vmul.f32 1.442695, %v1571_v24 }
 0xb8e   :  { %v1582_v26 = vpop.xlane.xlu0 %1581 }
 0xb8f   :  { %8715 = vpow2.f32 %v1573_v25 }
 0xb90   :  { %8717 = vrcp.f32 %v1582_v26 }
 0xb99   :  { %v8716_v27 = vpop.eup %8715 }
 0xb9a   :  { %v8718_v28 = vpop.eup %8717  ;;  %v1577_v29 = vsel %vm1029_vm7, %v8716_v27, 0.0 }
 0xb9b   :  { %v1586_v30 = vmul.f32 %v8718_v28, %v8714_v21  ;;  %1578 = vadd.xlane.f32.xlu0 %v1577_v29 }
 0xb9d   :  { %v1588_v32 = vpack.c.bf16 %v1586_v30, %v1586_v30 }
 0xb9f   :  { %8093 = vmatmul.mubr.msk.bf16.vlgmr.msra.gmra.mrb[44].mxu1 %vm1029_vm7, %v1588_v32 }
 0xba0   :  { %8105 = vmatpush3.bf16.xpose.msra.mxu1 %v1740_v34  ;;  %8106 = vmatprep.mubr.msk.bf16.mxu1 %vm9357_vm4, %v9353_v13 }
 0xba1   :  { %8116 = vmatprep.subr.bf16.mxu1 %v9353_v13 }
 0xbb1   :  { %1589 = vrot.lane.b32.xlu0 %v9959_v49, %s11081_s18 }
 0xbb5   :  { %1732 = vrot.lane.b32.xlu0 %v9950_v47, %s9359_s25 }
 0xc28   :  { %v1579_v35 = vpop.xlane.xlu0 %1578 }
 0xc29   :  { %8719 = vrcp.f32 %v1579_v35 }
 0xc2c   :  { %v1590_v33 = vpop.permute.xlu0 %1589 }
 0xc2d   :  { %v1595_v36 = vsel %vm1057_vm6, %v1590_v33, 0 }
 0xc2e   :  { %8085 = vmatpush3.bf16.msra.mxu0 %v1595_v36 }
 0xc2f   :  { %8096 = vmatprep.subr.bf16.mxu0 %v9353_v13 }
 0xc30   :  { %v1733_v37 = vpop.permute.xlu0 %1732 }
 0xc31   :  { %8107 = vmatmul.mubr.msk.bf16.vlgmr.msra.gmra.mrb[48].mxu1 %vm932_vm5, %v1733_v37 }
 0xc32   :  { %8118 = vmatprep.mubr.msk.bf16.mxu1 %vm9357_vm4, %v9353_v13 }
 0xc33   :  { %v8720_v40 = vpop.eup %8719 }
 0xc34   :  { %v1584_v42 = vmul.f32 %v8720_v40, %v8716_v27 }
 0xc36   :  { %v1587_v43 = vpack.c.bf16 %v1584_v42, %v1584_v42 }
 0xc38   :  { %8087 = vmatmul.mubr.msk.bf16.vlgmr.msra.gmra.mrb[16].mxu0 %vm1029_vm7, %v1587_v43  ;;  %v721_v43 = vld [vmem:[#allocation3 + $0x30] sm:$0xff] }
 0xc39   :  { %8097 = vmatpush3.bf16.msra.mxu0 %v719_v44  ;;  %8100 = vmatprep.mubr.msk.bf16.mxu0 %vm9357_vm4, %v9353_v13  ;;  %v722_v44 = vld [vmem:[#allocation3 + $0x38] sm:$0xff] }
 0xc3a   :  { %8098 = vmatprep.subr.bf16.mxu0 %v9353_v13 }
 0xc3d   :  { %8099 = vmatpush3.bf16.msra.mxu0 %v720_v52 }
 0xc3e   :  { %8110 = vmatprep.subr.bf16.mxu0 %v9353_v13 }
 0xc72   :  { %v1679_v47 = vpop.f32.mrb[44].mxu1 }
 0xc73   :  { %v8094_v45 = vpop.f32.mrb[45].mxu1 }
 0xc74   :  { %v1682_v48 = vpop.f32.mrb[46].mxu1 }
 0xc75   :  { %v8095_v51 = vpop.f32.mrb[47].mxu1 }
 0xd04   :  { %v1776_v53 = vpop.f32.mrb[48].mxu1 }
 0xd05   :  { %v1832_v54 = vmul.f32 0.2, %v1776_v53  ;;  %v8108_v55 = vpop.f32.mrb[49].mxu1 }
 0xd06   :  { %v1779_v56 = vpop.f32.mrb[50].mxu1 }
 0xd07   :  { %v1834_v57 = vadd.f32 %v1832_v54, %v9887_v18  ;;  %v8109_v58 = vpop.f32.mrb[51].mxu1 }
 0xd09   :  { %v1836_v59 = vsel %vm1029_vm7, %v1834_v57, -inf }
 0xd0a   :  { %1837 = vmax.xlane.f32.xlu0 %v1836_v59 }
 0xd0b   :  { %v1631_v61 = vpop.f32.mrb[16].mxu0 }
 0xd0c   :  { %v1685_v62 = vpack.c.bf16 %v1679_v47, %v1631_v61  ;;  %v8088_v63 = vpop.f32.mrb[17].mxu0 }
 0xd0d   :  { %v1634_v1 = vpop.f32.mrb[18].mxu0 }
 0xd0e   :  { %v8089_v3 = vpop.f32.mrb[19].mxu0  ;;  %8101 = vmatmul.mubr.msk.bf16.vlgmr.msra.gmra.mrb[20].mxu0 %vm932_vm5, %v1685_v62 }
 0xd0f   :  { %8111 = vmatpush3.bf16.xpose.msra.mxu0 %v1790_v2  ;;  %8112 = vmatprep.mubr.msk.bf16.mxu0 %vm9357_vm4, %v9353_v13 }
 0xd10   :  { %8122 = vmatprep.subr.bf16.mxu0 %v9353_v13 }
 0xd16   :  { %8113 = vmatmul.mubr.msk.bf16.vlgmr.msra.gmra.mrb[24].mxu0 %vm932_vm5, %v1783_v4 }
 0xd17   :  { %8124 = vmatprep.mubr.msk.bf16.mxu0 %vm9357_vm4, %v9353_v13 }
 0xd97   :  { %v1838_v5 = vpop.xlane.xlu0 %1837 }
 0xd98   :  { %v1842_v6 = vsub.f32 %v1834_v57, %v1838_v5  ;;  %v724_v5 = vld [vmem:[#allocation4 + $0x8] sm:$0xff] }
 0xd9a   :  { %v1844_v8 = vmul.f32 1.442695, %v1842_v6  ;;  %v726_v6 = vld [vmem:[#allocation4 + $0x18] sm:$0xff] }
 0xd9c   :  { %8721 = vpow2.f32 %v1844_v8  ;;  %v723_v8 = vld [vmem:[#allocation4] sm:$0xff] }
 0xda6   :  { %v8722_v38 = vpop.eup %8721 }
 0xda7   :  { %v1848_v46 = vsel %vm1029_vm7, %v8722_v38, 0.0 }
 0xda8   :  { %1849 = vadd.xlane.f32.xlu0 %v1848_v46  ;;  %v728_v46 = vld [vmem:[#allocation4 + $0x28] sm:$0xff] }
 0xde1   :  { %v1723_v10 = vpop.f32.mrb[20].mxu0 }
 0xde2   :  { %v1730_v50 = vadd.f32 %v1723_v10, %v10074_v7  ;;  %v8102_v11 = vpop.f32.mrb[21].mxu0  ;;  %v727_v10 = vld [vmem:[#allocation4 + $0x20] sm:$0xff] }
 0xde3   :  { %v1726_v12 = vpop.f32.mrb[22].mxu0 }
 0xde4   :  { %v1731_v16 = vadd.f32 %v1726_v12, %v10076_v9  ;;  %v8103_v17 = vpop.f32.mrb[23].mxu0 }
 0xde9   :  { %v1826_v19 = vpop.f32.mrb[24].mxu0 }
 0xdea   :  { %v1833_v21 = vmul.f32 0.2, %v1826_v19  ;;  %v8114_v22 = vpop.f32.mrb[25].mxu0 }
 0xdeb   :  { %v1829_v23 = vpop.f32.mrb[26].mxu0 }
 0xdec   :  { %v1835_v24 = vadd.f32 %v1833_v21, %v9887_v18  ;;  %v8115_v25 = vpop.f32.mrb[27].mxu0 }
 0xded   :  { %v732_v25 = vld [vmem:[#allocation4 + $0x48] sm:$0xff] }
 0xdee   :  { %v1839_v26 = vsel %vm1029_vm7, %v1835_v24, -inf }
 0xdef   :  { %1840 = vmax.xlane.f32.xlu1 %v1839_v26  ;;  %v734_v26 = vld [vmem:[#allocation4 + $0x58] sm:$0xff] }
 0xe00   :  { %1908 = vrot.lane.b32.xlu1 %v9984_v20, %s9359_s25 }
 0xe35   :  { %v1850_v32 = vpop.xlane.xlu0 %1849 }
 0xe7c   :  { %v1841_v27 = vpop.xlane.xlu1 %1840 }
 0xe7d   :  { %v1843_v7 = vsub.f32 %v1835_v24, %v1841_v27  ;;  %v731_v27 = vld [vmem:[#allocation4 + $0x40] sm:$0xff] }
 0xe7f   :  { %v1846_v28 = vmul.f32 1.442695, %v1843_v7  ;;  %v733_v7 = vld [vmem:[#allocation4 + $0x50] sm:$0xff] }
 0xe80   :  { %v1909_v29 = vpop.permute.xlu1 %1908 }
 0xe81   :  { %8723 = vpow2.f32 %v1846_v28  ;;  %v1914_v9 = vsel %vm1057_vm6, %v1909_v29, 0  ;;  %v736_v28 = vld [vmem:[#allocation4 + $0x68] sm:$0xff]  ;;  %v738_v29 = vld [vmem:[#allocation4 + $0x78] sm:$0xff] }
 0xe82   :  { %8123 = vmatpush3.bf16.msra.mxu0 %v1914_v9  ;;  %8725 = vrcp.f32 %v1850_v32  ;;  %v735_v9 = vld [vmem:[#allocation4 + $0x60] sm:$0xff]  ;;  %v742_v32 = vld [vmem:[#allocation4 + $0x98] sm:$0xff] }
 0xe83   :  { %2079 = vmatprep.subr.bf16.mxu0 %v724_v5 }
 0xe8b   :  { %v8724_v30 = vpop.eup %8723 }
 0xe8c   :  { %v1851_v31 = vsel %vm1029_vm7, %v8724_v30, 0.0  ;;  %v8726_v34 = vpop.eup %8725 }
 0xe8d   :  { %1852 = vadd.xlane.f32.xlu0 %v1851_v31  ;;  %v1855_v20 = vmul.f32 %v8726_v34, %v8722_v38  ;;  %v725_v38 = vld [vmem:[#allocation4 + $0x10] sm:$0xff]  ;;  %v740_v31 = vld [vmem:[#allocation4 + $0x88] sm:$0xff]  ;;  %v739_v34 = vld [vmem:[#allocation4 + $0x80] sm:$0xff] }
 0xe8f   :  { %v1858_v37 = vpack.c.bf16 %v1855_v20, %v1855_v20  ;;  %v744_v20 = vld [vmem:[#allocation4 + $0xa8] sm:$0xff] }
 0xea3   :  { %1860 = vrot.lane.b32.xlu0 %v9959_v49, %s9359_s25 }
 0xf1a   :  { %v1853_v35 = vpop.xlane.xlu0 %1852 }
 0xf1b   :  { %8727 = vrcp.f32 %v1853_v35  ;;  %v741_v35 = vld [vmem:[#allocation4 + $0x90] sm:$0xff] }
 0xf1e   :  { %v1861_v33 = vpop.permute.xlu0 %1860 }
 0xf1f   :  { %v1866_v36 = vsel %vm1057_vm6, %v1861_v33, 0  ;;  %v746_v33 = vld [vmem:[#allocation4 + $0xb8] sm:$0xff] }
 0xf20   :  { %8117 = vmatpush3.bf16.msra.mxu1 %v1866_v36  ;;  %v743_v36 = vld [vmem:[#allocation4 + $0xa0] sm:$0xff] }
 0xf21   :  { %8128 = vmatprep.subr.bf16.mxu1 %v9353_v13 }
 0xf23   :  { %8119 = vmatmul.mubr.msk.bf16.vlgmr.msra.gmra.mrb[52].mxu1 %vm1029_vm7, %v1858_v37  ;;  %v745_v37 = vld [vmem:[#allocation4 + $0xb0] sm:$0xff] }
 0xf24   :  { %8132 = vmatprep.mubr.msk.bf16.mxu1 %vm9357_vm4, %v9353_v13  ;;  %8129 = vmatpush3.bf16.msra.mxu1 %v721_v43  ;;  %v749_v43 = vld [vmem:[#allocation4 + $0xd0] sm:$0xff] }
 0xf25   :  { %v8728_v40 = vpop.eup %8727  ;;  %8130 = vmatprep.subr.bf16.mxu1 %v9353_v13 }
 0xf26   :  { %v1857_v49 = vmul.f32 %v8728_v40, %v8724_v30  ;;  %v737_v30 = vld [vmem:[#allocation4 + $0x70] sm:$0xff]  ;;  %v748_v40 = vld [vmem:[#allocation4 + $0xc8] sm:$0xff] }
 0xf28   :  { %v1859_v42 = vpack.c.bf16 %v1857_v49, %v1857_v49  ;;  %8131 = vmatpush3.bf16.msra.mxu1 %v722_v44  ;;  %v750_v49 = vld [vmem:[#allocation4 + $0xd8] sm:$0xff]  ;;  %v752_v44 = vld [vmem:[#allocation4 + $0xe8] sm:$0xff] }
 0xf29   :  { %2122 = vmatprep.subr.bf16.mxu1 %v726_v6 }
 0xf2a   :  { %8125 = vmatmul.mubr.msk.bf16.vlgmr.msra.gmra.mrb[28].mxu0 %vm1029_vm7, %v1859_v42  ;;  %v747_v42 = vld [vmem:[#allocation4 + $0xc0] sm:$0xff] }
 0xf2b   :  { %2111 = vmatprep.mubr.bf16.mxu0 %v9316_v0  ;;  %2080 = vmatpush1.bf16.msra.mxu0 %v723_v8 }
 0xf2c   :  { %2081 = vmatprep.subr.bf16.mxu0 %v728_v46  ;;  %v755_v46 = vld [vmem:[#allocation5] sm:$0xff] }
 0xf2f   :  { %2082 = vmatpush1.bf16.msra.mxu0 %v727_v10  ;;  %v764_v10 = vld [vmem:[#allocation5 + $0x48] sm:$0xff] }
 0xf30   :  { %2083 = vmatprep.subr.bf16.mxu0 %v732_v25  ;;  %v767_v25 = vld [vmem:[#allocation5 + $0x60] sm:$0xff] }
 0xf33   :  { %2084 = vmatpush1.bf16.msra.mxu0 %v731_v27  ;;  %v759_v27 = vld [vmem:[#allocation5 + $0x20] sm:$0xff] }
 0xf34   :  { %2085 = vmatprep.subr.bf16.mxu0 %v736_v28  ;;  %v768_v28 = vld [vmem:[#allocation5 + $0x68] sm:$0xff] }
 0xf37   :  { %2086 = vmatpush1.bf16.msra.mxu0 %v735_v9  ;;  %v760_v9 = vld [vmem:[#allocation5 + $0x28] sm:$0xff] }
 0xf38   :  { %2087 = vmatprep.subr.bf16.mxu0 %v740_v31  ;;  %v769_v31 = vld [vmem:[#allocation5 + $0x70] sm:$0xff] }
 0xf3b   :  { %2088 = vmatpush1.bf16.msra.mxu0 %v739_v34  ;;  %v761_v34 = vld [vmem:[#allocation5 + $0x30] sm:$0xff] }
 0xf3c   :  { %2089 = vmatprep.subr.bf16.mxu0 %v744_v20  ;;  %v770_v20 = vld [vmem:[#allocation5 + $0x78] sm:$0xff] }
 0xf3f   :  { %2090 = vmatpush1.bf16.msra.mxu0 %v743_v36  ;;  %v762_v36 = vld [vmem:[#allocation5 + $0x38] sm:$0xff] }
 0xf40   :  { %2091 = vmatprep.subr.bf16.mxu0 %v748_v40  ;;  %v10158_v40 = vsub.s32 0, %v9884_v15 }
 0xf43   :  { %2092 = vmatpush1.bf16.msra.mxu0 %v747_v42  ;;  %v2057_v42 = vld [vmem:[#allocation16] sm:$0xf] }
 0xf44   :  { %2093 = vmatprep.subr.bf16.mxu0 %v752_v44  ;;  %v10167_v44 = vsub.s32 3, %v9884_v15 }
 0xff6   :  { %v1902_v47 = vpop.f32.mrb[52].mxu1 }
 0xff7   :  { %v8120_v45 = vpop.f32.mrb[53].mxu1 }
 0xff8   :  { %v1905_v48 = vpop.f32.mrb[54].mxu1  ;;  %v751_v45 = vld [vmem:[#allocation4 + $0xe0] sm:$0xff] }
 0xff9   :  { %v8121_v51 = vpop.f32.mrb[55].mxu1  ;;  %v753_v48 = vld [vmem:[#allocation4 + $0xf0] sm:$0xff]  ;;  %2094 = vmatpush1.bf16.msra.mxu0 %v751_v45 }
 0xffa   :  { %v763_v51 = vld [vmem:[#allocation5 + $0x40] sm:$0xff] }
 0xffb   :  { %7609 = vmatprep.subr.bf16.mxu0 %v763_v51  ;;  %v2074_v51 = vrot.slane %v2057_v42, %v10167_v44 }
 0xffd   :  { %v1950_v52 = vpop.f32.mrb[28].mxu0 }
 0xffe   :  { %v1956_v53 = vpack.c.bf16 %v1950_v52, %v1902_v47  ;;  %v8126_v54 = vpop.f32.mrb[29].mxu0  ;;  %v754_v47 = vld [vmem:[#allocation4 + $0xf8] sm:$0xff]  ;;  %v779_v52 = vld [vmem:[#allocation5 + $0xc0] sm:$0xff] }
 0xfff   :  { %v1953_v55 = vpop.f32.mrb[30].mxu0 }
0x1000   :  { %v8127_v56 = vpop.f32.mrb[31].mxu0  ;;  %8133 = vmatmul.mubr.msk.bf16.vlgmr.msra.gmra.mrb[56].mxu1 %vm932_vm5, %v1956_v53 }
0x1001   :  { %2154 = vmatprep.mubr.bf16.mxu1 %v9316_v0  ;;  %2123 = vmatpush1.bf16.msra.mxu1 %v725_v38 }
0x10d3   :  { %v1994_v57 = vpop.f32.mrb[56].mxu1 }
0x10d4   :  { %v2001_v58 = vadd.f32 %v1994_v57, %v1730_v50  ;;  %v8134_v59 = vpop.f32.mrb[57].mxu1 }
0x10d5   :  { %v1997_v61 = vpop.f32.mrb[58].mxu1 }
0x10d6   :  { %v2003_v62 = vadd.f32 %v2001_v58, %v9905_v41  ;;  %v2002_v63 = vadd.f32 %v1997_v61, %v1731_v16  ;;  %v8135_v1 = vpop.f32.mrb[59].mxu1  ;;  %v730_v41 = vld [vmem:[#allocation4 + $0x38] sm:$0xff] }
0x10d7   :  { %2124 = vmatprep.subr.bf16.mxu1 %v730_v41  ;;  %v771_v41 = vld [vmem:[#allocation5 + $0x80] sm:$0xff] }
0x10d8   :  { %v10136_v2 = vadd.f32 %v7381_v60, %v2003_v62  ;;  %v2004_v3 = vadd.f32 %v2002_v63, %v9903_v39  ;;  %v729_v39 = vld [vmem:[#allocation4 + $0x30] sm:$0xff] }
0x10d9   :  { %2125 = vmatpush1.bf16.msra.mxu1 %v729_v39  ;;  %v780_v39 = vld [vmem:[#allocation5 + $0xc8] sm:$0xff] }
0x10da   :  { %v10139_v4 = vadd.f32 %v7381_v60, %v2004_v3  ;;  %2016 = vadd.xlane.f32.xlu1 %v10136_v2  ;;  %2126 = vmatprep.subr.bf16.mxu1 %v734_v26  ;;  %v7382_v60 = vld [vmem:[#allocation13] ss:$0 sm:$0xff]  ;;  %v7383_v3 = vld [vmem:[#allocation15] ss:$0 sm:$0xff]  ;;  %v783_v26 = vld [vmem:[#allocation5 + $0xe0] sm:$0xff] }
0x10dc   :  { %2018 = vadd.xlane.f32.xlu0 %v10139_v4 }
0x10dd   :  { %2127 = vmatpush1.bf16.msra.mxu1 %v733_v7  ;;  %v775_v7 = vld [vmem:[#allocation5 + $0xa0] sm:$0xff] }
0x10de   :  { %2128 = vmatprep.subr.bf16.mxu1 %v738_v29  ;;  %v784_v29 = vld [vmem:[#allocation5 + $0xe8] sm:$0xff] }
0x10e1   :  { %2129 = vmatpush1.bf16.msra.mxu1 %v737_v30  ;;  %v776_v30 = vld [vmem:[#allocation5 + $0xa8] sm:$0xff] }
0x10e2   :  { %2130 = vmatprep.subr.bf16.mxu1 %v742_v32  ;;  %v785_v32 = vld [vmem:[#allocation5 + $0xf0] sm:$0xff] }
0x10e5   :  { %2131 = vmatpush1.bf16.msra.mxu1 %v741_v35  ;;  %v777_v35 = vld [vmem:[#allocation5 + $0xb0] sm:$0xff] }
0x10e6   :  { %2132 = vmatprep.subr.bf16.mxu1 %v746_v33  ;;  %v786_v33 = vld [vmem:[#allocation5 + $0xf8] sm:$0xff] }
0x10e9   :  { %2133 = vmatpush1.bf16.msra.mxu1 %v745_v37  ;;  %v778_v37 = vld [vmem:[#allocation5 + $0xb8] sm:$0xff] }
0x10ea   :  { %2134 = vmatprep.subr.bf16.mxu1 %v750_v49  ;;  %v10161_v49 = vsub.s32 2, %v9884_v15 }
0x10ec   :  { %v2070_v45 = vrot.slane %v2057_v42, %v10161_v49 }
0x10ed   :  { %2135 = vmatpush1.bf16.msra.mxu1 %v749_v43  ;;  %v10164_v43 = vsub.s32 1, %v9884_v15 }
0x10ee   :  { %2136 = vmatprep.subr.bf16.mxu1 %v754_v47  ;;  %v2062_v47 = vrot.slane %v2057_v42, %v10158_v40 }
0x10f1   :  { %2137 = vmatpush1.bf16.msra.mxu1 %v753_v48  ;;  %v2066_v48 = vrot.slane %v2057_v42, %v10164_v43 }
0x10f2   :  { %7631 = vmatprep.subr.bf16.mxu1 %v779_v52 }
0x1167   :  { %v2017_v50 = vpop.xlane.xlu1 %2016 }
0x1168   :  { %v2020_v11 = vmul.f32 0.01, %v2017_v50  ;;  %v756_v50 = vld [vmem:[#allocation5 + $0x8] sm:$0xff] }
0x1169   :  { %v2019_v12 = vpop.xlane.xlu0 %2018 }
0x116a   :  { %v2022_v16 = vsub.f32 %v10136_v2, %v2020_v11  ;;  %v2021_v17 = vmul.f32 0.01, %v2019_v12  ;;  %v772_v11 = vld [vmem:[#allocation5 + $0x88] sm:$0xff]  ;;  %v765_v12 = vld [vmem:[#allocation5 + $0x50] sm:$0xff] }
0x116c   :  { %v10145_v19 = vmul.f32 %v9882_v14, %v2022_v16  ;;  %v2023_v21 = vsub.f32 %v10139_v4, %v2021_v17  ;;  %v781_v16 = vld [vmem:[#allocation5 + $0xd0] sm:$0xff] }
0x116d   :  { %v757_v17 = vld [vmem:[#allocation5 + $0x10] sm:$0xff] }
0x116e   :  { %v10149_v22 = vmul.f32 %v9882_v14, %v2023_v21  ;;  %v2026_v23 = vmul.f32 %v10145_v19, %v10145_v19  ;;  %v766_v21 = vld [vmem:[#allocation5 + $0x58] sm:$0xff] }
0x1170   :  { %2028 = vadd.xlane.f32.xlu0 %v2026_v23  ;;  %v2027_v24 = vmul.f32 %v10149_v22, %v10149_v22  ;;  %v758_v23 = vld [vmem:[#allocation5 + $0x18] sm:$0xff] }
0x1172   :  { %2030 = vadd.xlane.f32.xlu1 %v2027_v24  ;;  %v774_v24 = vld [vmem:[#allocation5 + $0x98] sm:$0xff] }
0x11fd   :  { %v2029_v53 = vpop.xlane.xlu0 %2028 }
0x11fe   :  { %v2032_v54 = vmul.f32 0.01, %v2029_v53 }
0x11ff   :  { %v2031_v55 = vpop.xlane.xlu1 %2030 }
0x1200   :  { %v2034_v56 = vadd.f32 1e-05, %v2032_v54  ;;  %v2033_v57 = vmul.f32 0.01, %v2031_v55 }
0x1202   :  { %8729 = vrsqrt.f32 %v2034_v56  ;;  %v2035_v58 = vadd.f32 1e-05, %v2033_v57 }
0x1204   :  { %8731 = vrsqrt.f32 %v2035_v58 }
0x120c   :  { %v8730_v59 = vpop.eup %8729 }
0x120d   :  { %v2038_v61 = vmul.f32 %v8730_v59, %v10145_v19  ;;  %v773_v19 = vld [vmem:[#allocation5 + $0x90] sm:$0xff] }
0x120e   :  { %v8732_v62 = vpop.eup %8731 }
0x120f   :  { %v2039_v63 = vmul.f32 %v8732_v62, %v10149_v22  ;;  %v2046_v1 = vmul.f32 %v7382_v60, %v2038_v61  ;;  %v782_v22 = vld [vmem:[#allocation5 + $0xd8] sm:$0xff] }
0x1211   :  { %v2047_v5 = vmul.f32 %v7382_v60, %v2039_v63  ;;  %v2054_v6 = vadd.f32 %v7383_v3, %v2046_v1 }
0x1213   :  { %v2055_v8 = vadd.f32 %v7383_v3, %v2047_v5 }
0x1215   :  { %v2056_v38 = vpack.c.bf16 %v2055_v8, %v2054_v6 }
0x1217   :  { %2112 = vmatmul.mubr.bf16.vlgmr.msra.gmra.mrb[32].mxu0 %v2056_v38  ;;  %2155 = vmatmul.mubr.bf16.vlgmr.msra.gmra.mrb[60].mxu1 %v2056_v38 }
0x1218   :  { %7610 = vmatpush3.bf16.msra.mxu0 %v755_v46  ;;  %7632 = vmatpush3.bf16.msra.mxu1 %v771_v41 }
0x1219   :  { %7611 = vmatprep.subr.bf16.mxu0 %v764_v10  ;;  %7633 = vmatprep.subr.bf16.mxu1 %v780_v39 }
0x121c   :  { %7612 = vmatpush3.bf16.msra.mxu0 %v756_v50  ;;  %7634 = vmatpush3.bf16.msra.mxu1 %v772_v11 }
0x121d   :  { %7613 = vmatprep.subr.bf16.mxu0 %v765_v12  ;;  %7635 = vmatprep.subr.bf16.mxu1 %v781_v16 }
0x1220   :  { %7614 = vmatpush3.bf16.msra.mxu0 %v757_v17  ;;  %7636 = vmatpush3.bf16.msra.mxu1 %v773_v19 }
0x1221   :  { %7615 = vmatprep.subr.bf16.mxu0 %v766_v21  ;;  %7637 = vmatprep.subr.bf16.mxu1 %v782_v22 }
0x1224   :  { %7616 = vmatpush3.bf16.msra.mxu0 %v758_v23  ;;  %7638 = vmatpush3.bf16.msra.mxu1 %v774_v24 }
0x1225   :  { %7617 = vmatprep.subr.bf16.mxu0 %v767_v25  ;;  %7639 = vmatprep.subr.bf16.mxu1 %v783_v26 }
0x1228   :  { %7618 = vmatpush3.bf16.msra.mxu0 %v759_v27  ;;  %7640 = vmatpush3.bf16.msra.mxu1 %v775_v7 }
0x1229   :  { %7619 = vmatprep.subr.bf16.mxu0 %v768_v28  ;;  %7641 = vmatprep.subr.bf16.mxu1 %v784_v29 }
0x122c   :  { %7620 = vmatpush3.bf16.msra.mxu0 %v760_v9  ;;  %7642 = vmatpush3.bf16.msra.mxu1 %v776_v30 }
0x122d   :  { %7621 = vmatprep.subr.bf16.mxu0 %v769_v31  ;;  %7643 = vmatprep.subr.bf16.mxu1 %v785_v32  ;;  %v7384_v31 = vld [vmem:[#allocation18] ss:$0 sm:$0xff] }
0x1230   :  { %7622 = vmatpush3.bf16.msra.mxu0 %v761_v34  ;;  %7644 = vmatpush3.bf16.msra.mxu1 %v777_v35 }
0x1231   :  { %7623 = vmatprep.subr.bf16.mxu0 %v770_v20  ;;  %7645 = vmatprep.subr.bf16.mxu1 %v786_v33 }
0x1234   :  { %7624 = vmatpush3.bf16.msra.mxu0 %v762_v36  ;;  %7646 = vmatpush3.bf16.msra.mxu1 %v778_v37 }
0x12ea   :  { %v2113_v52 = vpop.f32.mrb[32].mxu0  ;;  %v2156_v53 = vpop.f32.mrb[60].mxu1 }
0x12eb   :  { %v2114_v54 = vadd.f32 %v2113_v52, %v2062_v47  ;;  %v2157_v55 = vadd.f32 %v2156_v53, %v2070_v45  ;;  %v2115_v56 = vpop.f32.mrb[33].mxu0  ;;  %v2158_v57 = vpop.f32.mrb[61].mxu1 }
0x12ec   :  { %v2116_v58 = vadd.f32 %v2115_v56, %v2066_v48  ;;  %v2159_v59 = vadd.f32 %v2158_v57, %v2074_v51  ;;  %v2117_v60 = vpop.f32.mrb[34].mxu0  ;;  %v2160_v61 = vpop.f32.mrb[62].mxu1 }
0x12ed   :  { %v2118_v15 = vadd.f32 %v2117_v60, %v2062_v47  ;;  %v2161_v62 = vadd.f32 %v2160_v61, %v2070_v45  ;;  %v2119_v63 = vpop.f32.mrb[35].mxu0  ;;  %v2162_v1 = vpop.f32.mrb[63].mxu1  ;;  %v2165_v6 = vmax.f32 %v2114_v54, 0.0  ;;  %v2167_v8 = vmax.f32 %v2157_v55, 0.0 }
0x12ee   :  { %v2120_v3 = vadd.f32 %v2119_v63, %v2066_v48  ;;  %v2163_v5 = vadd.f32 %v2162_v1, %v2074_v51  ;;  %v2166_v41 = vmax.f32 %v2116_v58, 0.0  ;;  %v2168_v10 = vmax.f32 %v2159_v59, 0.0 }
0x12ef   :  { %v2169_v38 = vmax.f32 %v2118_v15, 0.0  ;;  %v2171_v46 = vmax.f32 %v2161_v62, 0.0 }
0x12f0   :  { %v2170_v39 = vmax.f32 %v2120_v3, 0.0  ;;  %v2172_v50 = vmax.f32 %v2163_v5, 0.0 }
0x12f1   :  { %v2173_v11 = vpack.c.bf16 %v2169_v38, %v2165_v6  ;;  %v2175_v12 = vpack.c.bf16 %v2171_v46, %v2167_v8 }
0x12f2   :  { %v2174_v16 = vpack.c.bf16 %v2170_v39, %v2166_v41  ;;  %v2176_v17 = vpack.c.bf16 %v2172_v50, %v2168_v10 }
0x12f4   :  { %2209 = vmatprep.mubr.bf16.mxu0 %v2174_v16  ;;  %2250 = vmatprep.mubr.bf16.mxu1 %v2176_v17 }
0x12f5   :  { %2210 = vmatmul.mubr.bf16.vlgmr.msra.gmra.mrb[36].mxu0 %v2173_v11  ;;  %2251 = vmatmul.mubr.bf16.vlgmr.msra.gmra.mrb[64].mxu1 %v2175_v12 }
0x13c8   :  { %v7625_v19 = vpop.f32.mrb[36].mxu0  ;;  %v7647_v21 = vpop.f32.mrb[64].mxu1 }
0x13c9   :  { %v7626_v22 = vpop.f32.mrb[37].mxu0  ;;  %v7648_v23 = vpop.f32.mrb[65].mxu1 }
0x13ca   :  { %v7627_v24 = vadd.f32 %v7626_v22, %v7625_v19  ;;  %v7649_v25 = vadd.f32 %v7648_v23, %v7647_v21  ;;  %v7628_v26 = vpop.f32.mrb[38].mxu0  ;;  %v7650_v27 = vpop.f32.mrb[66].mxu1 }
0x13cb   :  { %v7629_v7 = vpop.f32.mrb[39].mxu0  ;;  %v7651_v28 = vpop.f32.mrb[67].mxu1 }
0x13cc   :  { %v2253_v29 = vadd.f32 %v7649_v25, %v7627_v24  ;;  %v7630_v9 = vadd.f32 %v7629_v7, %v7628_v26  ;;  %v7652_v30 = vadd.f32 %v7651_v28, %v7650_v27 }
0x13ce   :  { %v2259_v32 = vadd.f32 %v2253_v29, %v10136_v2  ;;  %v2256_v34 = vadd.f32 %v7652_v30, %v7630_v9 }
0x13d0   :  { %v10174_v35 = vadd.f32 %v7384_v31, %v2259_v32  ;;  %v2260_v20 = vadd.f32 %v2256_v34, %v10139_v4 }
0x13d2   :  { %v10177_v33 = vadd.f32 %v7384_v31, %v2260_v20 }
0x13d3   :  { %9275 = dma.done.wait [#allocation6 + $0x4], 3072 }
0x13d4   :  { %9276 = vsyncadd [#allocation6 + $0x4], 4294964224 }
0x13d5   :  { %9277 = dma.done.wait [#allocation6 + $0x5], 1024 }
0x13d6   :  { %9278 = vsyncadd [#allocation6 + $0x5], 4294966272 }
0x13d7   :  { %9279 = dma.done.wait [#allocation6 + $0x6], 4096 }
0x13d8   :  { %9280 = vsyncadd [#allocation6 + $0x6], 4294963200  ;;  %2378 = vadd.xlane.f32.xlu0 %v10174_v35 }
0x13d9   :  { %9281 = dma.done.wait [#allocation6 + $0x7], 4096 }
0x13da   :  { %9282 = vsyncadd [#allocation6 + $0x7], 4294963200  ;;  %8136 = vmatprep.subr.bf16.mxu1 %v9353_v13  ;;  %2451 = vmatprep.mubr.bf16.mxu0 %v9316_v0  ;;  %v2279_v2 = vld [vmem:[#allocation2 + $0xc8] sm:$0xff]  ;;  %v2278_v4 = vld [vmem:[#allocation2 + $0xc0] sm:$0xff] }
0x13db   :  { %8152 = vmatprep.mubr.msk.bf16.mxu1 %vm9357_vm4, %v9353_v13  ;;  %v2280_v36 = vld [vmem:[#allocation2 + $0xd0] sm:$0xff]  ;;  %2419 = vmatprep.subr.bf16.mxu0 %v2279_v2  ;;  %v2282_v56 = vld [vmem:[#allocation2 + $0xe0] sm:$0xff]  ;;  %v2281_v57 = vld [vmem:[#allocation2 + $0xd8] sm:$0xff] }
0x13dc   :  { %2380 = vadd.xlane.f32.xlu0 %v10177_v33  ;;  %8137 = vmatpush3.bf16.msra.mxu1 %v2280_v36  ;;  %v2283_v58 = vld [vmem:[#allocation2 + $0xe8] sm:$0xff]  ;;  %v2285_v59 = vld [vmem:[#allocation2 + $0xf8] sm:$0xff]  ;;  %v2284_v60 = vld [vmem:[#allocation2 + $0xf0] sm:$0xff] }
0x13dd   :  { %2420 = vmatpush1.bf16.msra.mxu0 %v2278_v4  ;;  %8138 = vmatprep.subr.bf16.mxu1 %v9353_v13  ;;  %v2286_v61 = vld [vmem:[#allocation2 + $0x100] sm:$0xff]  ;;  %v2288_v15 = vld [vmem:[#allocation2 + $0x110] sm:$0xff]  ;;  %v2287_v62 = vld [vmem:[#allocation2 + $0x108] sm:$0xff] }
0x13de   :  { %2421 = vmatprep.subr.bf16.mxu0 %v2282_v56  ;;  %v2289_v63 = vld [vmem:[#allocation2 + $0x118] sm:$0xff]  ;;  %v2291_v1 = vld [vmem:[#allocation2 + $0x128] sm:$0xff]  ;;  %v2290_v3 = vld [vmem:[#allocation2 + $0x120] sm:$0xff] }
0x13df   :  { %v2292_v5 = vld [vmem:[#allocation2 + $0x130] sm:$0xff]  ;;  %v2294_v6 = vld [vmem:[#allocation2 + $0x140] sm:$0xff]  ;;  %v2293_v8 = vld [vmem:[#allocation2 + $0x138] sm:$0xff] }
0x13e0   :  { %8139 = vmatpush3.bf16.msra.mxu1 %v2283_v58  ;;  %v2295_v38 = vld [vmem:[#allocation2 + $0x148] sm:$0xff]  ;;  %v2297_v46 = vld [vmem:[#allocation2 + $0x158] sm:$0xff]  ;;  %v2296_v41 = vld [vmem:[#allocation2 + $0x150] sm:$0xff] }
0x13e1   :  { %2422 = vmatpush1.bf16.msra.mxu0 %v2281_v57  ;;  %8140 = vmatprep.subr.bf16.mxu1 %v9353_v13  ;;  %v2298_v10 = vld [vmem:[#allocation2 + $0x160] sm:$0xff]  ;;  %v2300_v39 = vld [vmem:[#allocation2 + $0x170] sm:$0xff]  ;;  %v2299_v50 = vld [vmem:[#allocation2 + $0x168] sm:$0xff] }
0x13e2   :  { %2423 = vmatprep.subr.bf16.mxu0 %v2285_v59  ;;  %v2301_v11 = vld [vmem:[#allocation2 + $0x178] sm:$0xff]  ;;  %v7386_v25 = vld [vmem:[%s11088_s23 + $0x1] ss:$0 sm:$0xff]  ;;  %v7387_v28 = vld [vmem:[#allocation12 + $0x1] ss:$0 sm:$0xff] }
0x13e4   :  { %8141 = vmatpush3.bf16.msra.mxu1 %v2286_v61 }
0x13e5   :  { %2424 = vmatpush1.bf16.msra.mxu0 %v2284_v60  ;;  %8142 = vmatprep.subr.bf16.mxu1 %v9353_v13 }
0x13e6   :  { %2425 = vmatprep.subr.bf16.mxu0 %v2288_v15 }
0x13e8   :  { %8143 = vmatpush3.bf16.msra.mxu1 %v2289_v63 }
0x13e9   :  { %2426 = vmatpush1.bf16.msra.mxu0 %v2287_v62  ;;  %8144 = vmatprep.subr.bf16.mxu1 %v9353_v13 }
0x13ea   :  { %2427 = vmatprep.subr.bf16.mxu0 %v2291_v1 }
0x13ec   :  { %8145 = vmatpush3.bf16.msra.mxu1 %v2292_v5 }
0x13ed   :  { %2428 = vmatpush1.bf16.msra.mxu0 %v2290_v3  ;;  %8146 = vmatprep.subr.bf16.mxu1 %v9353_v13 }
0x13ee   :  { %2429 = vmatprep.subr.bf16.mxu0 %v2294_v6 }
0x13f0   :  { %8147 = vmatpush3.bf16.msra.mxu1 %v2295_v38 }
0x13f1   :  { %2430 = vmatpush1.bf16.msra.mxu0 %v2293_v8  ;;  %8148 = vmatprep.subr.bf16.mxu1 %v9353_v13 }
0x13f2   :  { %2431 = vmatprep.subr.bf16.mxu0 %v2297_v46 }
0x13f4   :  { %8149 = vmatpush3.bf16.msra.mxu1 %v2298_v10 }
0x13f5   :  { %2432 = vmatpush1.bf16.msra.mxu0 %v2296_v41  ;;  %8150 = vmatprep.subr.bf16.mxu1 %v9353_v13 }
0x13f6   :  { %2433 = vmatprep.subr.bf16.mxu0 %v2300_v39 }
0x13f8   :  { %8151 = vmatpush3.bf16.msra.mxu1 %v2301_v11 }
0x13f9   :  { %2434 = vmatpush1.bf16.msra.mxu0 %v2299_v50  ;;  %8162 = vmatprep.subr.bf16.mxu1 %v9353_v13 }
0x13fa   :  { %8156 = vmatprep.subr.bf16.mxu0 %v9353_v13 }
0x1465   :  { %v2379_v37 = vpop.xlane.xlu0 %2378 }
0x1466   :  { %v2382_v42 = vmul.f32 0.01, %v2379_v37 }
0x1468   :  { %v2384_v47 = vsub.f32 %v10174_v35, %v2382_v42 }
0x1469   :  { %v2381_v45 = vpop.xlane.xlu0 %2380 }
0x146a   :  { %v10188_v48 = vmul.f32 %v9882_v14, %v2384_v47  ;;  %v2383_v51 = vmul.f32 0.01, %v2381_v45 }
0x146c   :  { %v2385_v52 = vsub.f32 %v10177_v33, %v2383_v51  ;;  %v2388_v53 = vmul.f32 %v10188_v48, %v10188_v48 }
0x146e   :  { %v10194_v54 = vmul.f32 %v9882_v14, %v2385_v52  ;;  %2390 = vadd.xlane.f32.xlu1 %v2388_v53 }
0x1470   :  { %v2389_v55 = vmul.f32 %v10194_v54, %v10194_v54 }
0x1472   :  { %2392 = vadd.xlane.f32.xlu1 %v2389_v55 }
0x14fb   :  { %v2391_v12 = vpop.xlane.xlu1 %2390 }
0x14fc   :  { %v2394_v16 = vmul.f32 0.01, %v2391_v12 }
0x14fe   :  { %v2396_v17 = vadd.f32 1e-05, %v2394_v16 }
0x14ff   :  { %v2393_v19 = vpop.xlane.xlu1 %2392 }
0x1500   :  { %8733 = vrsqrt.f32 %v2396_v17  ;;  %v2395_v21 = vmul.f32 0.01, %v2393_v19 }
0x1502   :  { %v2397_v22 = vadd.f32 1e-05, %v2395_v21 }
0x1504   :  { %8735 = vrsqrt.f32 %v2397_v22 }
0x150a   :  { %v8734_v23 = vpop.eup %8733 }
0x150b   :  { %v2400_v24 = vmul.f32 %v8734_v23, %v10188_v48 }
0x150d   :  { %v2408_v7 = vmul.f32 %v7386_v25, %v2400_v24 }
0x150e   :  { %v8736_v26 = vpop.eup %8735 }
0x150f   :  { %v2401_v27 = vmul.f32 %v8736_v26, %v10194_v54  ;;  %v2416_v9 = vadd.f32 %v7387_v28, %v2408_v7 }
0x1511   :  { %v2409_v29 = vmul.f32 %v7386_v25, %v2401_v27 }
0x1513   :  { %v2417_v30 = vadd.f32 %v7387_v28, %v2409_v29 }
0x1515   :  { %v2418_v31 = vpack.c.bf16 %v2417_v30, %v2416_v9 }
0x1517   :  { %2452 = vmatmul.mubr.bf16.vlgmr.msra.gmra.mrb[40].mxu0 %v2418_v31  ;;  %8153 = vmatmul.mubr.bf16.vlgmr.msra.gmra.mrb[68].mxu1 %v2418_v31 }
0x1518   :  { %8158 = vmatprep.mubr.msk.bf16.mxu0 %vm9357_vm4, %v9353_v13  ;;  %8164 = vmatprep.mubr.msk.bf16.mxu1 %vm9357_vm4, %v9353_v13 }
0x15ea   :  { %v2453_v32 = vpop.f32.mrb[40].mxu0  ;;  %v2496_v34 = vpop.f32.mrb[68].mxu1 }
0x15eb   :  { %v2455_v20 = vpop.f32.mrb[41].mxu0  ;;  %v8154_v2 = vpop.f32.mrb[69].mxu1  ;;  %v10224_v52 = vpack.c.bf16 %v2496_v34, %v2496_v34  ;;  %v10227_v53 = vpack.c.bf16 %v2453_v32, %v2453_v32 }
0x15ec   :  { %v10215_v4 = vpack.c.bf16 %v2455_v20, %v2455_v20  ;;  %v2457_v36 = vpop.f32.mrb[42].mxu0  ;;  %v2499_v37 = vpop.f32.mrb[70].mxu1 }
0x15ed   :  { %v2459_v42 = vpop.f32.mrb[43].mxu0  ;;  %v8155_v47 = vpop.f32.mrb[71].mxu1  ;;  %v10229_v54 = vpack.c.bf16 %v2499_v37, %v2499_v37  ;;  %v10231_v55 = vpack.c.bf16 %v2457_v36, %v2457_v36  ;;  %v2645_v56 = vsel %vm1057_vm6, %v10224_v52, 0 }
0x15ee   :  { %v10217_v45 = vpack.c.bf16 %v2459_v42, %v2459_v42  ;;  %v2525_v48 = vsel %vm932_vm5, %v10215_v4, 0 }
0x15ef   :  { %8157 = vmatpush3.bf16.xpose.msra.mxu0 %v2525_v48  ;;  %v2691_v57 = vsel %vm1057_vm6, %v10229_v54, 0 }
0x15f0   :  { %v2571_v51 = vsel %vm932_vm5, %v10217_v45, 0  ;;  %8168 = vmatprep.subr.bf16.mxu0 %v9353_v13 }
0x15f1   :  { %8163 = vmatpush3.bf16.xpose.msra.mxu1 %v2571_v51 }
0x15f2   :  { %8174 = vmatprep.subr.bf16.mxu1 %v9353_v13 }
0x15f6   :  { %8159 = vmatmul.mubr.msk.bf16.vlgmr.msra.gmra.mrb[44].mxu0 %vm932_vm5, %v10227_v53 }
0x15f7   :  { %8169 = vmatpush3.bf16.msra.mxu0 %v2645_v56  ;;  %8170 = vmatprep.mubr.msk.bf16.mxu0 %vm9357_vm4, %v9353_v13 }
0x15f8   :  { %8165 = vmatmul.mubr.msk.bf16.vlgmr.msra.gmra.mrb[72].mxu1 %vm932_vm5, %v10231_v55  ;;  %8180 = vmatprep.subr.bf16.mxu0 %v9353_v13 }
0x15f9   :  { %8175 = vmatpush3.bf16.msra.mxu1 %v2691_v57  ;;  %8176 = vmatprep.mubr.msk.bf16.mxu1 %vm9357_vm4, %v9353_v13 }
0x15fa   :  { %8186 = vmatprep.subr.bf16.mxu1 %v9353_v13 }
0x16c9   :  { %v2561_v58 = vpop.f32.mrb[44].mxu0 }
0x16ca   :  { %v2613_v59 = vmul.f32 0.2, %v2561_v58  ;;  %v8160_v60 = vpop.f32.mrb[45].mxu0 }
0x16cb   :  { %v2564_v61 = vpop.f32.mrb[46].mxu0  ;;  %v2607_v15 = vpop.f32.mrb[72].mxu1 }
0x16cc   :  { %v2615_v62 = vadd.f32 %v2613_v59, %v9887_v18  ;;  %v2614_v63 = vmul.f32 0.2, %v2607_v15  ;;  %v8161_v1 = vpop.f32.mrb[47].mxu0  ;;  %v8166_v3 = vpop.f32.mrb[73].mxu1 }
0x16cd   :  { %v2610_v5 = vpop.f32.mrb[74].mxu1 }
0x16ce   :  { %v2616_v6 = vadd.f32 %v2614_v63, %v9887_v18  ;;  %v8167_v8 = vpop.f32.mrb[75].mxu1  ;;  %v2617_v38 = vsel %vm1029_vm7, %v2615_v62, -inf }
0x16cf   :  { %2618 = vmax.xlane.f32.xlu0 %v2617_v38 }
0x16d0   :  { %v2620_v46 = vsel %vm1029_vm7, %v2616_v6, -inf }
0x16d1   :  { %2621 = vmax.xlane.f32.xlu1 %v2620_v46 }
0x16e2   :  { %2786 = vrot.lane.b32.xlu1 %v10217_v45, %s9358_s12 }
0x175c   :  { %v2619_v41 = vpop.xlane.xlu0 %2618 }
0x175d   :  { %v2623_v10 = vsub.f32 %v2615_v62, %v2619_v41 }
0x175e   :  { %v2622_v39 = vpop.xlane.xlu1 %2621 }
0x175f   :  { %v2625_v50 = vmul.f32 1.442695, %v2623_v10  ;;  %v2624_v11 = vsub.f32 %v2616_v6, %v2622_v39 }
0x1761   :  { %8737 = vpow2.f32 %v2625_v50  ;;  %v2627_v12 = vmul.f32 1.442695, %v2624_v11 }
0x1762   :  { %v2787_v22 = vpop.permute.xlu1 %2786 }
0x1763   :  { %8739 = vpow2.f32 %v2627_v12  ;;  %v2792_v31 = vsel %vm932_vm5, %v2787_v22, 0 }
0x176b   :  { %v8738_v16 = vpop.eup %8737 }
0x176c   :  { %v2629_v17 = vsel %vm1029_vm7, %v8738_v16, 0.0 }
0x176d   :  { %v8740_v19 = vpop.eup %8739  ;;  %2630 = vadd.xlane.f32.xlu0 %v2629_v17 }
0x176e   :  { %v2632_v21 = vsel %vm1029_vm7, %v8740_v19, 0.0 }
0x176f   :  { %2633 = vadd.xlane.f32.xlu1 %v2632_v21 }
0x1780   :  { %2734 = vrot.lane.b32.xlu1 %v10227_v53, %s9358_s12 }
0x1783   :  { %2736 = vrot.lane.b32.xlu0 %v10215_v4, %s9358_s12 }
0x1784   :  { %2784 = vrot.lane.b32.xlu1 %v10231_v55, %s9358_s12 }
0x17fa   :  { %v2631_v23 = vpop.xlane.xlu0 %2630 }
0x17fb   :  { %8741 = vrcp.f32 %v2631_v23 }
0x17fc   :  { %v2634_v24 = vpop.xlane.xlu1 %2633 }
0x17fd   :  { %8743 = vrcp.f32 %v2634_v24 }
0x17fe   :  { %v2737_v7 = vpop.permute.xlu0 %2736 }
0x17ff   :  { %v2742_v9 = vsel %vm932_vm5, %v2737_v7, 0 }
0x1800   :  { %v2735_v32 = vpop.permute.xlu1 %2734 }
0x1804   :  { %v2785_v34 = vpop.permute.xlu1 %2784 }
0x1805   :  { %v8742_v25 = vpop.eup %8741 }
0x1806   :  { %v2636_v26 = vmul.f32 %v8742_v25, %v8738_v16 }
0x1807   :  { %v8744_v27 = vpop.eup %8743 }
0x1808   :  { %v2639_v28 = vpack.c.bf16 %v2636_v26, %v2636_v26  ;;  %v2638_v29 = vmul.f32 %v8744_v27, %v8740_v19 }
0x180a   :  { %8171 = vmatmul.mubr.msk.bf16.vlgmr.msra.gmra.mrb[48].mxu0 %vm1029_vm7, %v2639_v28  ;;  %v2640_v30 = vpack.c.bf16 %v2638_v29, %v2638_v29  ;;  %v2304_v29 = vld [vmem:[#allocation3 + $0x50] sm:$0xff] }
0x180b   :  { %8181 = vmatpush3.bf16.xpose.msra.mxu0 %v2742_v9  ;;  %8182 = vmatprep.mubr.msk.bf16.mxu0 %vm9357_vm4, %v9353_v13 }
0x180c   :  { %8177 = vmatmul.mubr.msk.bf16.vlgmr.msra.gmra.mrb[76].mxu1 %vm1029_vm7, %v2640_v30  ;;  %8192 = vmatprep.subr.bf16.mxu0 %v9353_v13 }
0x180d   :  { %8187 = vmatpush3.bf16.xpose.msra.mxu1 %v2792_v31  ;;  %8188 = vmatprep.mubr.msk.bf16.mxu1 %vm9357_vm4, %v9353_v13 }
0x180e   :  { %8198 = vmatprep.subr.bf16.mxu1 %v9353_v13 }
0x1812   :  { %8183 = vmatmul.mubr.msk.bf16.vlgmr.msra.gmra.mrb[52].mxu0 %vm932_vm5, %v2735_v32  ;;  %v2302_v32 = vld [vmem:[#allocation3 + $0x40] sm:$0xff] }
0x1813   :  { %8194 = vmatprep.mubr.msk.bf16.mxu0 %vm9357_vm4, %v9353_v13 }
0x1814   :  { %8189 = vmatmul.mubr.msk.bf16.vlgmr.msra.gmra.mrb[80].mxu1 %vm932_vm5, %v2785_v34  ;;  %v2305_v34 = vld [vmem:[#allocation3 + $0x58] sm:$0xff] }
0x1815   :  { %8200 = vmatprep.mubr.msk.bf16.mxu1 %vm9357_vm4, %v9353_v13 }
0x18dd   :  { %v10277_v20 = vpop.f32.mrb[48].mxu0 }
0x18de   :  { %v8172_v2 = vpop.f32.mrb[49].mxu0 }
0x18df   :  { %v2684_v36 = vpop.f32.mrb[50].mxu0  ;;  %v10279_v37 = vpop.f32.mrb[76].mxu1  ;;  %v2303_v2 = vld [vmem:[#allocation3 + $0x48] sm:$0xff] }
0x18e0   :  { %v2733_v42 = vpack.c.bf16 %v10279_v37, %v10277_v20  ;;  %v8173_v47 = vpop.f32.mrb[51].mxu0  ;;  %v8178_v48 = vpop.f32.mrb[77].mxu1 }
0x18e1   :  { %v2730_v51 = vpop.f32.mrb[78].mxu1 }
0x18e2   :  { %v8179_v56 = vpop.f32.mrb[79].mxu1 }
0x18e5   :  { %v2778_v57 = vpop.f32.mrb[52].mxu0 }
0x18e6   :  { %v2834_v58 = vmul.f32 0.2, %v2778_v57  ;;  %v8184_v59 = vpop.f32.mrb[53].mxu0 }
0x18e7   :  { %v2781_v60 = vpop.f32.mrb[54].mxu0  ;;  %v2828_v61 = vpop.f32.mrb[80].mxu1 }
0x18e8   :  { %v2836_v15 = vadd.f32 %v2834_v58, %v9887_v18  ;;  %v2835_v62 = vmul.f32 0.2, %v2828_v61  ;;  %v8185_v63 = vpop.f32.mrb[55].mxu0  ;;  %v8190_v1 = vpop.f32.mrb[81].mxu1 }
0x18e9   :  { %v2831_v3 = vpop.f32.mrb[82].mxu1 }
0x18ea   :  { %v2837_v5 = vadd.f32 %v2835_v62, %v9887_v18  ;;  %v8191_v6 = vpop.f32.mrb[83].mxu1  ;;  %v2838_v8 = vsel %vm1029_vm7, %v2836_v15, -inf }
0x18eb   :  { %2839 = vmax.xlane.f32.xlu0 %v2838_v8 }
0x18ec   :  { %v2841_v38 = vsel %vm1029_vm7, %v2837_v5, -inf }
0x18ed   :  { %2842 = vmax.xlane.f32.xlu1 %v2841_v38 }
0x18fe   :  { %2910 = vrot.lane.b32.xlu1 %v10229_v54, %s9358_s12 }
0x1902   :  { %3049 = vrot.lane.b32.xlu1 %v10215_v4, %s11081_s18 }
0x1906   :  { %3099 = vrot.lane.b32.xlu1 %v10217_v45, %s11081_s18 }
0x190a   :  { %3097 = vrot.lane.b32.xlu1 %v10231_v55, %s11081_s18 }
0x1978   :  { %v2840_v46 = vpop.xlane.xlu0 %2839 }
0x1979   :  { %v2844_v41 = vsub.f32 %v2836_v15, %v2840_v46 }
0x197a   :  { %v2843_v10 = vpop.xlane.xlu1 %2842 }
0x197b   :  { %v2846_v39 = vmul.f32 1.442695, %v2844_v41  ;;  %v2845_v50 = vsub.f32 %v2837_v5, %v2843_v10 }
0x197d   :  { %8745 = vpow2.f32 %v2846_v39  ;;  %v2848_v11 = vmul.f32 1.442695, %v2845_v50 }
0x197e   :  { %v2911_v12 = vpop.permute.xlu1 %2910 }
0x197f   :  { %8747 = vpow2.f32 %v2848_v11  ;;  %v2916_v16 = vsel %vm1057_vm6, %v2911_v12, 0 }
0x1980   :  { %8199 = vmatpush3.bf16.msra.mxu1 %v2916_v16 }
0x1981   :  { %8212 = vmatprep.subr.bf16.mxu1 %v9353_v13 }
0x1982   :  { %v3050_v36 = vpop.permute.xlu1 %3049 }
0x1983   :  { %v3055_v61 = vsel %vm932_vm5, %v3050_v36, 0 }
0x1986   :  { %v3100_v47 = vpop.permute.xlu1 %3099 }
0x1987   :  { %v8746_v17 = vpop.eup %8745  ;;  %v3105_v48 = vsel %vm932_vm5, %v3100_v47, 0 }
0x1988   :  { %v2850_v19 = vsel %vm1029_vm7, %v8746_v17, 0.0 }
0x1989   :  { %v8748_v21 = vpop.eup %8747  ;;  %2851 = vadd.xlane.f32.xlu0 %v2850_v19 }
0x198a   :  { %v2853_v22 = vsel %vm1029_vm7, %v8748_v21, 0.0  ;;  %v3098_v51 = vpop.permute.xlu1 %3097 }
0x198d   :  { %2854 = vadd.xlane.f32.xlu0 %v2853_v22 }
0x19a3   :  { %2862 = vrot.lane.b32.xlu0 %v10224_v52, %s9358_s12 }
0x19a7   :  { %3047 = vrot.lane.b32.xlu0 %v10227_v53, %s11081_s18 }
0x1a16   :  { %v2852_v23 = vpop.xlane.xlu0 %2851 }
0x1a17   :  { %8749 = vrcp.f32 %v2852_v23 }
0x1a1a   :  { %v2855_v24 = vpop.xlane.xlu0 %2854 }
0x1a1b   :  { %8751 = vrcp.f32 %v2855_v24 }
0x1a1e   :  { %v2863_v25 = vpop.permute.xlu0 %2862 }
0x1a1f   :  { %v2868_v26 = vsel %vm1057_vm6, %v2863_v25, 0 }
0x1a20   :  { %8193 = vmatpush3.bf16.msra.mxu0 %v2868_v26 }
0x1a21   :  { %v8750_v27 = vpop.eup %8749  ;;  %8204 = vmatprep.subr.bf16.mxu0 %v9353_v13 }
0x1a22   :  { %v2857_v7 = vmul.f32 %v8750_v27, %v8746_v17  ;;  %v3048_v1 = vpop.permute.xlu0 %3047 }
0x1a24   :  { %v2860_v28 = vpack.c.bf16 %v2857_v7, %v2857_v7 }
0x1a25   :  { %v8752_v9 = vpop.eup %8751 }
0x1a26   :  { %8195 = vmatmul.mubr.msk.bf16.vlgmr.msra.gmra.mrb[56].mxu0 %vm1029_vm7, %v2860_v28  ;;  %v2859_v30 = vmul.f32 %v8752_v9, %v8748_v21 }
0x1a27   :  { %8205 = vmatpush3.bf16.msra.mxu0 %v2304_v29  ;;  %8208 = vmatprep.mubr.msk.bf16.mxu0 %vm9357_vm4, %v9353_v13 }
0x1a28   :  { %v2861_v31 = vpack.c.bf16 %v2859_v30, %v2859_v30  ;;  %8206 = vmatprep.subr.bf16.mxu0 %v9353_v13 }
0x1a2a   :  { %8201 = vmatmul.mubr.msk.bf16.vlgmr.msra.gmra.mrb[84].mxu1 %vm1029_vm7, %v2861_v31 }
0x1a2b   :  { %8213 = vmatpush3.bf16.msra.mxu1 %v2302_v32  ;;  %8216 = vmatprep.mubr.msk.bf16.mxu1 %vm9357_vm4, %v9353_v13 }
0x1a2c   :  { %8214 = vmatprep.subr.bf16.mxu1 %v9353_v13  ;;  %8207 = vmatpush3.bf16.msra.mxu0 %v2305_v34 }
0x1a2d   :  { %8220 = vmatprep.subr.bf16.mxu0 %v9353_v13 }
0x1a2f   :  { %8215 = vmatpush3.bf16.msra.mxu1 %v2303_v2 }
0x1a30   :  { %8226 = vmatprep.subr.bf16.mxu1 %v9353_v13 }
0x1a32   :  { %8217 = vmatmul.mubr.msk.bf16.vlgmr.msra.gmra.mrb[88].mxu1 %vm932_vm5, %v2733_v42 }
0x1a33   :  { %8228 = vmatprep.mubr.msk.bf16.mxu1 %vm9357_vm4, %v9353_v13 }
0x1a38   :  { %8227 = vmatpush3.bf16.xpose.msra.mxu1 %v3105_v48 }
0x1a39   :  { %8238 = vmatprep.subr.bf16.mxu1 %v9353_v13 }
0x1a3f   :  { %8229 = vmatmul.mubr.msk.bf16.vlgmr.msra.gmra.mrb[92].mxu1 %vm932_vm5, %v3098_v51 }
0x1a40   :  { %8240 = vmatprep.mubr.msk.bf16.mxu1 %vm9357_vm4, %v9353_v13 }
0x1af9   :  { %v2904_v56 = vpop.f32.mrb[56].mxu0 }
0x1afa   :  { %v8196_v57 = vpop.f32.mrb[57].mxu0 }
0x1afb   :  { %v2907_v20 = vpop.f32.mrb[58].mxu0 }
0x1afc   :  { %v8197_v37 = vpop.f32.mrb[59].mxu0 }
0x1afd   :  { %v2952_v42 = vpop.f32.mrb[84].mxu1 }
0x1afe   :  { %v2958_v58 = vpack.c.bf16 %v2952_v42, %v2904_v56  ;;  %v8202_v59 = vpop.f32.mrb[85].mxu1 }
0x1aff   :  { %v2955_v60 = vpop.f32.mrb[86].mxu1 }
0x1b00   :  { %v8203_v15 = vpop.f32.mrb[87].mxu1  ;;  %8209 = vmatmul.mubr.msk.bf16.vlgmr.msra.gmra.mrb[60].mxu0 %vm932_vm5, %v2958_v58 }
0x1b01   :  { %8221 = vmatpush3.bf16.xpose.msra.mxu0 %v3055_v61  ;;  %8222 = vmatprep.mubr.msk.bf16.mxu0 %vm9357_vm4, %v9353_v13  ;;  %v2306_v15 = vld [vmem:[#allocation3 + $0x60] sm:$0xff] }
0x1b02   :  { %8232 = vmatprep.subr.bf16.mxu0 %v9353_v13 }
0x1b05   :  { %v3040_v62 = vpop.f32.mrb[88].mxu1 }
0x1b06   :  { %v8218_v63 = vpop.f32.mrb[89].mxu1 }
0x1b07   :  { %v3043_v3 = vpop.f32.mrb[90].mxu1 }
0x1b08   :  { %v8219_v5 = vpop.f32.mrb[91].mxu1  ;;  %8223 = vmatmul.mubr.msk.bf16.vlgmr.msra.gmra.mrb[64].mxu0 %vm932_vm5, %v3048_v1 }
0x1b09   :  { %8234 = vmatprep.mubr.msk.bf16.mxu0 %vm9357_vm4, %v9353_v13 }
0x1b12   :  { %v3141_v6 = vpop.f32.mrb[92].mxu1 }
0x1b13   :  { %v3148_v8 = vmul.f32 0.2, %v3141_v6  ;;  %v8230_v38 = vpop.f32.mrb[93].mxu1 }
0x1b14   :  { %v3144_v46 = vpop.f32.mrb[94].mxu1 }
0x1b15   :  { %v3150_v41 = vadd.f32 %v3148_v8, %v9887_v18  ;;  %v8231_v10 = vpop.f32.mrb[95].mxu1 }
0x1b17   :  { %v3154_v39 = vsel %vm1029_vm7, %v3150_v41, -inf }
0x1b18   :  { %3155 = vmax.xlane.f32.xlu1 %v3154_v39 }
0x1b29   :  { %3223 = vrot.lane.b32.xlu1 %v10229_v54, %s11081_s18 }
0x1b2d   :  { %3320 = vrot.lane.b32.xlu1 %v10215_v4, %s9359_s25 }
0x1b31   :  { %3370 = vrot.lane.b32.xlu1 %v10217_v45, %s9359_s25 }
0x1b35   :  { %3368 = vrot.lane.b32.xlu1 %v10231_v55, %s9359_s25 }
0x1ba5   :  { %v3156_v50 = vpop.xlane.xlu1 %3155 }
0x1ba6   :  { %v3158_v16 = vsub.f32 %v3150_v41, %v3156_v50 }
0x1ba8   :  { %v3161_v17 = vmul.f32 1.442695, %v3158_v16 }
0x1ba9   :  { %v3224_v11 = vpop.permute.xlu1 %3223 }
0x1baa   :  { %v3229_v12 = vsel %vm1057_vm6, %v3224_v11, 0  ;;  %8753 = vpow2.f32 %v3161_v17 }
0x1bab   :  { %8239 = vmatpush3.bf16.msra.mxu1 %v3229_v12 }
0x1bac   :  { %8252 = vmatprep.subr.bf16.mxu1 %v9353_v13 }
0x1bad   :  { %v3321_v51 = vpop.permute.xlu1 %3320 }
0x1bae   :  { %v3326_v57 = vsel %vm932_vm5, %v3321_v51, 0 }
0x1bb1   :  { %v3371_v39 = vpop.permute.xlu1 %3370 }
0x1bb2   :  { %v3376_v17 = vsel %vm932_vm5, %v3371_v39, 0 }
0x1bb4   :  { %v8754_v29 = vpop.eup %8753 }
0x1bb5   :  { %v3166_v9 = vsel %vm1029_vm7, %v8754_v29, 0.0 }
0x1bd3   :  { %v2996_v19 = vpop.f32.mrb[60].mxu0 }
0x1bd4   :  { %v10346_v21 = vadd.f32 %v3040_v62, %v2996_v19  ;;  %v8210_v22 = vpop.f32.mrb[61].mxu0 }
0x1bd5   :  { %v2999_v4 = vpop.f32.mrb[62].mxu0  ;;  %v3369_v22 = vpop.permute.xlu1 %3368 }
0x1bd6   :  { %v10348_v23 = vadd.f32 %v3043_v3, %v2999_v4  ;;  %v8211_v45 = vpop.f32.mrb[63].mxu0  ;;  %v2307_v3 = vld [vmem:[#allocation3 + $0x68] sm:$0xff] }
0x1bdb   :  { %v3091_v24 = vpop.f32.mrb[64].mxu0 }
0x1bdc   :  { %v3147_v55 = vmul.f32 0.2, %v3091_v24  ;;  %v8224_v25 = vpop.f32.mrb[65].mxu0 }
0x1bdd   :  { %v3094_v26 = vpop.f32.mrb[66].mxu0 }
0x1bde   :  { %v3149_v27 = vadd.f32 %v3147_v55, %v9887_v18  ;;  %v8225_v7 = vpop.f32.mrb[67].mxu0 }
0x1be0   :  { %v3151_v28 = vsel %vm1029_vm7, %v3149_v27, -inf }
0x1be1   :  { %3152 = vmax.xlane.f32.xlu0 %v3151_v28 }
0x1be5   :  { %3167 = vadd.xlane.f32.xlu0 %v3166_v9 }
0x1c6e   :  { %v3153_v30 = vpop.xlane.xlu0 %3152 }
0x1c6f   :  { %v3157_v31 = vsub.f32 %v3149_v27, %v3153_v30 }
0x1c71   :  { %v3159_v32 = vmul.f32 1.442695, %v3157_v31 }
0x1c72   :  { %v3168_v34 = vpop.xlane.xlu0 %3167 }
0x1c73   :  { %8755 = vpow2.f32 %v3159_v32 }
0x1c74   :  { %8757 = vrcp.f32 %v3168_v34 }
0x1c7d   :  { %v8756_v2 = vpop.eup %8755 }
0x1c7e   :  { %v8758_v36 = vpop.eup %8757  ;;  %v3163_v47 = vsel %vm1029_vm7, %v8756_v2, 0.0 }
0x1c7f   :  { %3164 = vadd.xlane.f32.xlu0 %v3163_v47  ;;  %v3172_v48 = vmul.f32 %v8758_v36, %v8754_v29 }
0x1c81   :  { %v3174_v56 = vpack.c.bf16 %v3172_v48, %v3172_v48 }
0x1c83   :  { %8241 = vmatmul.mubr.msk.bf16.vlgmr.msra.gmra.mrb[96].mxu1 %vm1029_vm7, %v3174_v56 }
0x1c84   :  { %8253 = vmatpush3.bf16.xpose.msra.mxu1 %v3326_v57  ;;  %8254 = vmatprep.mubr.msk.bf16.mxu1 %vm9357_vm4, %v9353_v13 }
0x1c85   :  { %8264 = vmatprep.subr.bf16.mxu1 %v9353_v13 }
0x1c95   :  { %3175 = vrot.lane.b32.xlu0 %v10224_v52, %s11081_s18 }
0x1c99   :  { %3318 = vrot.lane.b32.xlu0 %v10227_v53, %s9359_s25 }
0x1d0c   :  { %v3165_v20 = vpop.xlane.xlu0 %3164 }
0x1d0d   :  { %8759 = vrcp.f32 %v3165_v20 }
0x1d10   :  { %v3176_v37 = vpop.permute.xlu0 %3175 }
0x1d11   :  { %v3181_v42 = vsel %vm1057_vm6, %v3176_v37, 0 }
0x1d12   :  { %8233 = vmatpush3.bf16.msra.mxu0 %v3181_v42 }
0x1d13   :  { %8244 = vmatprep.subr.bf16.mxu0 %v9353_v13 }
0x1d14   :  { %v3319_v58 = vpop.permute.xlu0 %3318 }
0x1d15   :  { %8255 = vmatmul.mubr.msk.bf16.vlgmr.msra.gmra.mrb[100].mxu1 %vm932_vm5, %v3319_v58 }
0x1d16   :  { %8266 = vmatprep.mubr.msk.bf16.mxu1 %vm9357_vm4, %v9353_v13 }
0x1d17   :  { %v8760_v59 = vpop.eup %8759 }
0x1d18   :  { %v3170_v60 = vmul.f32 %v8760_v59, %v8756_v2 }
0x1d1a   :  { %v3173_v61 = vpack.c.bf16 %v3170_v60, %v3170_v60 }
0x1d1c   :  { %8235 = vmatmul.mubr.msk.bf16.vlgmr.msra.gmra.mrb[68].mxu0 %vm1029_vm7, %v3173_v61 }
0x1d1d   :  { %8245 = vmatpush3.bf16.msra.mxu0 %v2306_v15  ;;  %8248 = vmatprep.mubr.msk.bf16.mxu0 %vm9357_vm4, %v9353_v13 }
0x1d1e   :  { %8246 = vmatprep.subr.bf16.mxu0 %v9353_v13 }
0x1d21   :  { %8247 = vmatpush3.bf16.msra.mxu0 %v2307_v3 }
0x1d22   :  { %8258 = vmatprep.subr.bf16.mxu0 %v9353_v13 }
0x1d56   :  { %v3265_v53 = vpop.f32.mrb[96].mxu1 }
0x1d57   :  { %v8242_v62 = vpop.f32.mrb[97].mxu1 }
0x1d58   :  { %v3268_v63 = vpop.f32.mrb[98].mxu1  ;;  %v2308_v62 = vld [vmem:[#allocation3 + $0x70] sm:$0xff] }
0x1d59   :  { %v8243_v1 = vpop.f32.mrb[99].mxu1  ;;  %v2309_v63 = vld [vmem:[#allocation3 + $0x78] sm:$0xff] }
0x1de8   :  { %v3362_v5 = vpop.f32.mrb[100].mxu1 }
0x1de9   :  { %v3418_v6 = vmul.f32 0.2, %v3362_v5  ;;  %v8256_v8 = vpop.f32.mrb[101].mxu1 }
0x1dea   :  { %v3365_v38 = vpop.f32.mrb[102].mxu1 }
0x1deb   :  { %v3420_v46 = vadd.f32 %v3418_v6, %v9887_v18  ;;  %v8257_v41 = vpop.f32.mrb[103].mxu1 }
0x1ded   :  { %v3422_v10 = vsel %vm1029_vm7, %v3420_v46, -inf }
0x1dee   :  { %3423 = vmax.xlane.f32.xlu0 %v3422_v10 }
0x1def   :  { %v3217_v50 = vpop.f32.mrb[68].mxu0 }
0x1df0   :  { %v3271_v11 = vpack.c.bf16 %v3265_v53, %v3217_v50  ;;  %v8236_v12 = vpop.f32.mrb[69].mxu0 }
0x1df1   :  { %v3220_v16 = vpop.f32.mrb[70].mxu0  ;;  %v7415_v12 = vld [vmem:[%s11089_s28 + $0x1] ss:$0 sm:$0xff] }
0x1df2   :  { %v8237_v19 = vpop.f32.mrb[71].mxu0  ;;  %8249 = vmatmul.mubr.msk.bf16.vlgmr.msra.gmra.mrb[72].mxu0 %vm932_vm5, %v3271_v11 }
0x1df3   :  { %8259 = vmatpush3.bf16.xpose.msra.mxu0 %v3376_v17  ;;  %8260 = vmatprep.mubr.msk.bf16.mxu0 %vm9357_vm4, %v9353_v13 }
0x1df4   :  { %8270 = vmatprep.subr.bf16.mxu0 %v9353_v13 }
0x1dfa   :  { %8261 = vmatmul.mubr.msk.bf16.vlgmr.msra.gmra.mrb[76].mxu0 %vm932_vm5, %v3369_v22 }
0x1dfb   :  { %8272 = vmatprep.mubr.msk.bf16.mxu0 %vm9357_vm4, %v9353_v13 }
0x1e7b   :  { %v3424_v4 = vpop.xlane.xlu0 %3423 }
0x1e7c   :  { %v3428_v45 = vsub.f32 %v3420_v46, %v3424_v4 }
0x1e7e   :  { %v3430_v24 = vmul.f32 1.442695, %v3428_v45 }
0x1e80   :  { %8761 = vpow2.f32 %v3430_v24 }
0x1e8a   :  { %v8762_v55 = vpop.eup %8761 }
0x1e8b   :  { %v3434_v25 = vsel %vm1029_vm7, %v8762_v55, 0.0 }
0x1e8c   :  { %3435 = vadd.xlane.f32.xlu0 %v3434_v25  ;;  %v2313_v25 = vld [vmem:[#allocation4 + $0x118] sm:$0xff] }
0x1ec5   :  { %v3309_v26 = vpop.f32.mrb[72].mxu0 }
0x1ec6   :  { %v3316_v27 = vadd.f32 %v3309_v26, %v10346_v21  ;;  %v8250_v7 = vpop.f32.mrb[73].mxu0  ;;  %v2310_v26 = vld [vmem:[#allocation4 + $0x100] sm:$0xff] }
0x1ec7   :  { %v3312_v28 = vpop.f32.mrb[74].mxu0  ;;  %v2315_v7 = vld [vmem:[#allocation4 + $0x128] sm:$0xff] }
0x1ec8   :  { %v3317_v29 = vadd.f32 %v3312_v28, %v10348_v23  ;;  %v8251_v9 = vpop.f32.mrb[75].mxu0  ;;  %v2314_v28 = vld [vmem:[#allocation4 + $0x120] sm:$0xff] }
0x1ecd   :  { %v3412_v30 = vpop.f32.mrb[76].mxu0 }
0x1ece   :  { %v3419_v31 = vmul.f32 0.2, %v3412_v30  ;;  %v8262_v32 = vpop.f32.mrb[77].mxu0 }
0x1ecf   :  { %v3415_v34 = vpop.f32.mrb[78].mxu0 }
0x1ed0   :  { %v3421_v2 = vadd.f32 %v3419_v31, %v9887_v18  ;;  %v8263_v36 = vpop.f32.mrb[79].mxu0 }
0x1ed2   :  { %v3425_v47 = vsel %vm1029_vm7, %v3421_v2, -inf }
0x1ed3   :  { %3426 = vmax.xlane.f32.xlu1 %v3425_v47 }
0x1ee4   :  { %3494 = vrot.lane.b32.xlu1 %v10229_v54, %s9359_s25 }
0x1f19   :  { %v3436_v37 = vpop.xlane.xlu0 %3435 }
0x1f60   :  { %v3427_v48 = vpop.xlane.xlu1 %3426 }
0x1f61   :  { %v3429_v21 = vsub.f32 %v3421_v2, %v3427_v48 }
0x1f63   :  { %v3432_v51 = vmul.f32 1.442695, %v3429_v21  ;;  %v2319_v21 = vld [vmem:[#allocation4 + $0x148] sm:$0xff] }
0x1f64   :  { %v3495_v56 = vpop.permute.xlu1 %3494 }
0x1f65   :  { %8763 = vpow2.f32 %v3432_v51  ;;  %v3500_v23 = vsel %vm1057_vm6, %v3495_v56, 0  ;;  %v2321_v51 = vld [vmem:[#allocation4 + $0x158] sm:$0xff]  ;;  %v2318_v56 = vld [vmem:[#allocation4 + $0x140] sm:$0xff] }
0x1f66   :  { %8271 = vmatpush3.bf16.msra.mxu0 %v3500_v23  ;;  %8765 = vrcp.f32 %v3436_v37  ;;  %v2320_v23 = vld [vmem:[#allocation4 + $0x150] sm:$0xff]  ;;  %v2322_v37 = vld [vmem:[#allocation4 + $0x160] sm:$0xff] }
0x1f6f   :  { %v8764_v57 = vpop.eup %8763 }
0x1f70   :  { %v3437_v20 = vsel %vm1029_vm7, %v8764_v57, 0.0  ;;  %v8766_v42 = vpop.eup %8765 }
0x1f71   :  { %3438 = vadd.xlane.f32.xlu0 %v3437_v20  ;;  %v3441_v54 = vmul.f32 %v8766_v42, %v8762_v55  ;;  %v2311_v55 = vld [vmem:[#allocation4 + $0x108] sm:$0xff]  ;;  %v2325_v20 = vld [vmem:[#allocation4 + $0x178] sm:$0xff]  ;;  %v2324_v42 = vld [vmem:[#allocation4 + $0x170] sm:$0xff] }
0x1f72   :  { %3669 = vmatprep.subr.bf16.mxu0 %v2311_v55 }
0x1f73   :  { %v3444_v61 = vpack.c.bf16 %v3441_v54, %v3441_v54  ;;  %v2329_v54 = vld [vmem:[#allocation4 + $0x198] sm:$0xff] }
0x1f87   :  { %3446 = vrot.lane.b32.xlu0 %v10224_v52, %s9359_s25 }
0x1ffe   :  { %v3439_v58 = vpop.xlane.xlu0 %3438 }
0x1fff   :  { %8767 = vrcp.f32 %v3439_v58  ;;  %v2327_v58 = vld [vmem:[#allocation4 + $0x188] sm:$0xff] }
0x2002   :  { %v3447_v59 = vpop.permute.xlu0 %3446 }
0x2003   :  { %v3452_v60 = vsel %vm1057_vm6, %v3447_v59, 0  ;;  %v2326_v59 = vld [vmem:[#allocation4 + $0x180] sm:$0xff] }
0x2004   :  { %8265 = vmatpush3.bf16.msra.mxu1 %v3452_v60  ;;  %v2328_v60 = vld [vmem:[#allocation4 + $0x190] sm:$0xff] }
0x2005   :  { %8276 = vmatprep.subr.bf16.mxu1 %v9353_v13 }
0x2007   :  { %8267 = vmatmul.mubr.msk.bf16.vlgmr.msra.gmra.mrb[104].mxu1 %vm1029_vm7, %v3444_v61  ;;  %v2331_v61 = vld [vmem:[#allocation4 + $0x1a8] sm:$0xff] }
0x2008   :  { %8280 = vmatprep.mubr.msk.bf16.mxu1 %vm9357_vm4, %v9353_v13  ;;  %8277 = vmatpush3.bf16.msra.mxu1 %v2308_v62  ;;  %v2335_v62 = vld [vmem:[#allocation4 + $0x1c8] sm:$0xff] }
0x2009   :  { %v8768_v15 = vpop.eup %8767  ;;  %8278 = vmatprep.subr.bf16.mxu1 %v9353_v13 }
0x200a   :  { %v3443_v52 = vmul.f32 %v8768_v15, %v8764_v57  ;;  %v2323_v57 = vld [vmem:[#allocation4 + $0x168] sm:$0xff]  ;;  %v2333_v15 = vld [vmem:[#allocation4 + $0x1b8] sm:$0xff] }
0x200c   :  { %v3445_v53 = vpack.c.bf16 %v3443_v52, %v3443_v52  ;;  %8279 = vmatpush3.bf16.msra.mxu1 %v2309_v63  ;;  %v2330_v52 = vld [vmem:[#allocation4 + $0x1a0] sm:$0xff]  ;;  %v2337_v63 = vld [vmem:[#allocation4 + $0x1d8] sm:$0xff] }
0x200d   :  { %3712 = vmatprep.subr.bf16.mxu1 %v2313_v25 }
0x200e   :  { %8273 = vmatmul.mubr.msk.bf16.vlgmr.msra.gmra.mrb[80].mxu0 %vm1029_vm7, %v3445_v53  ;;  %v2332_v53 = vld [vmem:[#allocation4 + $0x1b0] sm:$0xff] }
0x200f   :  { %3701 = vmatprep.mubr.bf16.mxu0 %v9316_v0  ;;  %3670 = vmatpush1.bf16.msra.mxu0 %v2310_v26  ;;  %v7417_v26 = vld [vmem:[#allocation15 + $0x1] ss:$0 sm:$0xff] }
0x2010   :  { %3671 = vmatprep.subr.bf16.mxu0 %v2315_v7 }
0x2013   :  { %3672 = vmatpush1.bf16.msra.mxu0 %v2314_v28 }
0x2014   :  { %3673 = vmatprep.subr.bf16.mxu0 %v2319_v21  ;;  %v2369_v21 = vld [vmem:[#allocation5 + $0x1d8] sm:$0xff] }
0x2017   :  { %3674 = vmatpush1.bf16.msra.mxu0 %v2318_v56  ;;  %v2361_v56 = vld [vmem:[#allocation5 + $0x198] sm:$0xff] }
0x2018   :  { %3675 = vmatprep.subr.bf16.mxu0 %v2323_v57  ;;  %v2370_v57 = vld [vmem:[#allocation5 + $0x1e0] sm:$0xff] }
0x201b   :  { %3676 = vmatpush1.bf16.msra.mxu0 %v2322_v37  ;;  %v2362_v37 = vld [vmem:[#allocation5 + $0x1a0] sm:$0xff] }
0x201c   :  { %3677 = vmatprep.subr.bf16.mxu0 %v2327_v58  ;;  %v2371_v58 = vld [vmem:[#allocation5 + $0x1e8] sm:$0xff] }
0x201f   :  { %3678 = vmatpush1.bf16.msra.mxu0 %v2326_v59  ;;  %v2363_v59 = vld [vmem:[#allocation5 + $0x1a8] sm:$0xff] }
0x2020   :  { %3679 = vmatprep.subr.bf16.mxu0 %v2331_v61  ;;  %v2372_v61 = vld [vmem:[#allocation5 + $0x1f0] sm:$0xff] }
0x2023   :  { %3680 = vmatpush1.bf16.msra.mxu0 %v2330_v52  ;;  %v2364_v52 = vld [vmem:[#allocation5 + $0x1b0] sm:$0xff] }
0x2024   :  { %3681 = vmatprep.subr.bf16.mxu0 %v2335_v62  ;;  %v2373_v62 = vld [vmem:[#allocation5 + $0x1f8] sm:$0xff] }
0x20da   :  { %v3488_v1 = vpop.f32.mrb[104].mxu1 }
0x20db   :  { %v8268_v3 = vpop.f32.mrb[105].mxu1 }
0x20dc   :  { %v3491_v5 = vpop.f32.mrb[106].mxu1  ;;  %v2336_v3 = vld [vmem:[#allocation4 + $0x1d0] sm:$0xff] }
0x20dd   :  { %v8269_v6 = vpop.f32.mrb[107].mxu1  ;;  %v2339_v5 = vld [vmem:[#allocation4 + $0x1e8] sm:$0xff] }
0x20de   :  { %v2341_v6 = vld [vmem:[#allocation4 + $0x1f8] sm:$0xff] }
0x20e1   :  { %v3536_v8 = vpop.f32.mrb[80].mxu0 }
0x20e2   :  { %v3542_v38 = vpack.c.bf16 %v3536_v8, %v3488_v1  ;;  %v8274_v46 = vpop.f32.mrb[81].mxu0  ;;  %v2334_v1 = vld [vmem:[#allocation4 + $0x1c0] sm:$0xff] }
0x20e3   :  { %v3539_v41 = vpop.f32.mrb[82].mxu0  ;;  %3682 = vmatpush1.bf16.msra.mxu0 %v2334_v1  ;;  %v2338_v8 = vld [vmem:[#allocation4 + $0x1e0] sm:$0xff]  ;;  %v2365_v1 = vld [vmem:[#allocation5 + $0x1b8] sm:$0xff] }
0x20e4   :  { %v8275_v10 = vpop.f32.mrb[83].mxu0  ;;  %8281 = vmatmul.mubr.msk.bf16.vlgmr.msra.gmra.mrb[108].mxu1 %vm932_vm5, %v3542_v38  ;;  %3683 = vmatprep.subr.bf16.mxu0 %v2339_v5  ;;  %v2340_v38 = vld [vmem:[#allocation4 + $0x1f0] sm:$0xff]  ;;  %v2350_v46 = vld [vmem:[#allocation5 + $0x140] sm:$0xff] }
0x20e5   :  { %3744 = vmatprep.mubr.bf16.mxu1 %v9316_v0  ;;  %v2366_v41 = vld [vmem:[#allocation5 + $0x1c0] sm:$0xff] }
0x20e7   :  { %3684 = vmatpush1.bf16.msra.mxu0 %v2338_v8 }
0x20e8   :  { %7706 = vmatprep.subr.bf16.mxu0 %v2350_v46 }
0x21b7   :  { %v3580_v39 = vpop.f32.mrb[108].mxu1 }
0x21b8   :  { %v3587_v50 = vadd.f32 %v3580_v39, %v3316_v27  ;;  %v8282_v11 = vpop.f32.mrb[109].mxu1  ;;  %v2312_v27 = vld [vmem:[#allocation4 + $0x110] sm:$0xff] }
0x21b9   :  { %v3583_v16 = vpop.f32.mrb[110].mxu1  ;;  %3713 = vmatpush1.bf16.msra.mxu1 %v2312_v27 }
0x21ba   :  { %v3589_v17 = vadd.f32 %v3587_v50, %v10174_v35  ;;  %v3588_v19 = vadd.f32 %v3583_v16, %v3317_v29  ;;  %v8283_v22 = vpop.f32.mrb[111].mxu1  ;;  %v2317_v35 = vld [vmem:[#allocation4 + $0x138] sm:$0xff] }
0x21bb   :  { %3714 = vmatprep.subr.bf16.mxu1 %v2317_v35 }
0x21bc   :  { %v10408_v4 = vadd.f32 %v7415_v12, %v3589_v17  ;;  %v3590_v45 = vadd.f32 %v3588_v19, %v10177_v33  ;;  %v2316_v33 = vld [vmem:[#allocation4 + $0x130] sm:$0xff] }
0x21bd   :  { %3715 = vmatpush1.bf16.msra.mxu1 %v2316_v33  ;;  %v7416_v19 = vld [vmem:[#allocation13 + $0x1] ss:$0 sm:$0xff]  ;;  %v2342_v33 = vld [vmem:[#allocation5 + $0x100] sm:$0xff] }
0x21be   :  { %v10411_v24 = vadd.f32 %v7415_v12, %v3590_v45  ;;  %3605 = vadd.xlane.f32.xlu1 %v10408_v4  ;;  %3716 = vmatprep.subr.bf16.mxu1 %v2321_v51  ;;  %v2345_v51 = vld [vmem:[#allocation5 + $0x118] sm:$0xff] }
0x21c0   :  { %3607 = vadd.xlane.f32.xlu0 %v10411_v24 }
0x21c1   :  { %3717 = vmatpush1.bf16.msra.mxu1 %v2320_v23  ;;  %v2354_v23 = vld [vmem:[#allocation5 + $0x160] sm:$0xff] }
0x21c2   :  { %3718 = vmatprep.subr.bf16.mxu1 %v2325_v20  ;;  %v2346_v20 = vld [vmem:[#allocation5 + $0x120] sm:$0xff] }
0x21c5   :  { %3719 = vmatpush1.bf16.msra.mxu1 %v2324_v42  ;;  %v2355_v42 = vld [vmem:[#allocation5 + $0x168] sm:$0xff] }
0x21c6   :  { %3720 = vmatprep.subr.bf16.mxu1 %v2329_v54  ;;  %v2347_v54 = vld [vmem:[#allocation5 + $0x128] sm:$0xff] }
0x21c9   :  { %3721 = vmatpush1.bf16.msra.mxu1 %v2328_v60  ;;  %v2356_v60 = vld [vmem:[#allocation5 + $0x170] sm:$0xff] }
0x21ca   :  { %3722 = vmatprep.subr.bf16.mxu1 %v2333_v15  ;;  %v2348_v15 = vld [vmem:[#allocation5 + $0x130] sm:$0xff] }
0x21cd   :  { %3723 = vmatpush1.bf16.msra.mxu1 %v2332_v53  ;;  %v2357_v53 = vld [vmem:[#allocation5 + $0x178] sm:$0xff] }
0x21ce   :  { %3724 = vmatprep.subr.bf16.mxu1 %v2337_v63  ;;  %v2349_v63 = vld [vmem:[#allocation5 + $0x138] sm:$0xff] }
0x21d1   :  { %3725 = vmatpush1.bf16.msra.mxu1 %v2336_v3  ;;  %v3647_v3 = vld [vmem:[#allocation16 + $0x4] sm:$0xf] }
0x21d2   :  { %3726 = vmatprep.subr.bf16.mxu1 %v2341_v6  ;;  %v3652_v5 = vrot.slane %v3647_v3, %v10158_v40  ;;  %v3660_v6 = vrot.slane %v3647_v3, %v10161_v49  ;;  %v3656_v8 = vrot.slane %v3647_v3, %v10164_v43 }
0x21d5   :  { %3727 = vmatpush1.bf16.msra.mxu1 %v2340_v38  ;;  %v3664_v38 = vrot.slane %v3647_v3, %v10167_v44 }
0x21d6   :  { %7728 = vmatprep.subr.bf16.mxu1 %v2366_v41 }
0x224b   :  { %v3606_v29 = vpop.xlane.xlu1 %3605 }
0x224c   :  { %v3609_v9 = vmul.f32 0.01, %v3606_v29  ;;  %v2358_v29 = vld [vmem:[#allocation5 + $0x180] sm:$0xff] }
0x224d   :  { %v3608_v30 = vpop.xlane.xlu0 %3607 }
0x224e   :  { %v3611_v31 = vsub.f32 %v10408_v4, %v3609_v9  ;;  %v3610_v32 = vmul.f32 0.01, %v3608_v30  ;;  %v2351_v9 = vld [vmem:[#allocation5 + $0x148] sm:$0xff] }
0x224f   :  { %v2367_v30 = vld [vmem:[#allocation5 + $0x1c8] sm:$0xff] }
0x2250   :  { %v10417_v34 = vmul.f32 %v9882_v14, %v3611_v31  ;;  %v3612_v2 = vsub.f32 %v10411_v24, %v3610_v32  ;;  %v2343_v31 = vld [vmem:[#allocation5 + $0x108] sm:$0xff] }
0x2251   :  { %v2359_v32 = vld [vmem:[#allocation5 + $0x188] sm:$0xff] }
0x2252   :  { %v10421_v36 = vmul.f32 %v9882_v14, %v3612_v2  ;;  %v3615_v47 = vmul.f32 %v10417_v34, %v10417_v34  ;;  %v2368_v2 = vld [vmem:[#allocation5 + $0x1d0] sm:$0xff] }
0x2254   :  { %3617 = vadd.xlane.f32.xlu0 %v3615_v47  ;;  %v3616_v48 = vmul.f32 %v10421_v36, %v10421_v36  ;;  %v2360_v47 = vld [vmem:[#allocation5 + $0x190] sm:$0xff] }
0x2256   :  { %3619 = vadd.xlane.f32.xlu1 %v3616_v48  ;;  %v2353_v48 = vld [vmem:[#allocation5 + $0x158] sm:$0xff] }
0x22e1   :  { %v3618_v10 = vpop.xlane.xlu0 %3617 }
0x22e2   :  { %v3621_v39 = vmul.f32 0.01, %v3618_v10 }
0x22e3   :  { %v3620_v50 = vpop.xlane.xlu1 %3619 }
0x22e4   :  { %v3623_v11 = vadd.f32 1e-05, %v3621_v39  ;;  %v3622_v12 = vmul.f32 0.01, %v3620_v50 }
0x22e6   :  { %8769 = vrsqrt.f32 %v3623_v11  ;;  %v3624_v16 = vadd.f32 1e-05, %v3622_v12 }
0x22e8   :  { %8771 = vrsqrt.f32 %v3624_v16 }
0x22f0   :  { %v8770_v17 = vpop.eup %8769 }
0x22f1   :  { %v3627_v22 = vmul.f32 %v8770_v17, %v10417_v34  ;;  %v2352_v34 = vld [vmem:[#allocation5 + $0x150] sm:$0xff] }
0x22f2   :  { %v8772_v45 = vpop.eup %8771 }
0x22f3   :  { %v3628_v55 = vmul.f32 %v8772_v45, %v10421_v36  ;;  %v3635_v25 = vmul.f32 %v7416_v19, %v3627_v22  ;;  %v2344_v36 = vld [vmem:[#allocation5 + $0x110] sm:$0xff] }
0x22f5   :  { %v3636_v27 = vmul.f32 %v7416_v19, %v3628_v55  ;;  %v3643_v7 = vadd.f32 %v7417_v26, %v3635_v25 }
0x22f7   :  { %v3644_v35 = vadd.f32 %v7417_v26, %v3636_v27 }
0x22f9   :  { %v3645_v28 = vpack.c.bf16 %v3644_v35, %v3643_v7 }
0x22fb   :  { %3702 = vmatmul.mubr.bf16.vlgmr.msra.gmra.mrb[84].mxu0 %v3645_v28  ;;  %3745 = vmatmul.mubr.bf16.vlgmr.msra.gmra.mrb[112].mxu1 %v3645_v28 }
0x22fc   :  { %7707 = vmatpush3.bf16.msra.mxu0 %v2342_v33  ;;  %7729 = vmatpush3.bf16.msra.mxu1 %v2358_v29 }
0x22fd   :  { %7708 = vmatprep.subr.bf16.mxu0 %v2351_v9  ;;  %7730 = vmatprep.subr.bf16.mxu1 %v2367_v30 }
0x2300   :  { %7709 = vmatpush3.bf16.msra.mxu0 %v2343_v31  ;;  %7731 = vmatpush3.bf16.msra.mxu1 %v2359_v32 }
0x2301   :  { %7710 = vmatprep.subr.bf16.mxu0 %v2352_v34  ;;  %7732 = vmatprep.subr.bf16.mxu1 %v2368_v2 }
0x2304   :  { %7711 = vmatpush3.bf16.msra.mxu0 %v2344_v36  ;;  %7733 = vmatpush3.bf16.msra.mxu1 %v2360_v47 }
0x2305   :  { %7712 = vmatprep.subr.bf16.mxu0 %v2353_v48  ;;  %7734 = vmatprep.subr.bf16.mxu1 %v2369_v21 }
0x2308   :  { %7713 = vmatpush3.bf16.msra.mxu0 %v2345_v51  ;;  %7735 = vmatpush3.bf16.msra.mxu1 %v2361_v56 }
0x2309   :  { %7714 = vmatprep.subr.bf16.mxu0 %v2354_v23  ;;  %7736 = vmatprep.subr.bf16.mxu1 %v2370_v57 }
0x230c   :  { %7715 = vmatpush3.bf16.msra.mxu0 %v2346_v20  ;;  %7737 = vmatpush3.bf16.msra.mxu1 %v2362_v37 }
0x230d   :  { %7716 = vmatprep.subr.bf16.mxu0 %v2355_v42  ;;  %7738 = vmatprep.subr.bf16.mxu1 %v2371_v58 }
0x2310   :  { %7717 = vmatpush3.bf16.msra.mxu0 %v2347_v54  ;;  %7739 = vmatpush3.bf16.msra.mxu1 %v2363_v59 }
0x2311   :  { %7718 = vmatprep.subr.bf16.mxu0 %v2356_v60  ;;  %7740 = vmatprep.subr.bf16.mxu1 %v2372_v61  ;;  %v7418_v60 = vld [vmem:[#allocation18 + $0x1] ss:$0 sm:$0xff] }
0x2314   :  { %7719 = vmatpush3.bf16.msra.mxu0 %v2348_v15  ;;  %7741 = vmatpush3.bf16.msra.mxu1 %v2364_v52 }
0x2315   :  { %7720 = vmatprep.subr.bf16.mxu0 %v2357_v53  ;;  %7742 = vmatprep.subr.bf16.mxu1 %v2373_v62 }
0x2318   :  { %7721 = vmatpush3.bf16.msra.mxu0 %v2349_v63  ;;  %7743 = vmatpush3.bf16.msra.mxu1 %v2365_v1 }
0x23ce   :  { %v3703_v46 = vpop.f32.mrb[84].mxu0  ;;  %v3746_v41 = vpop.f32.mrb[112].mxu1 }
0x23cf   :  { %v3704_v10 = vadd.f32 %v3703_v46, %v3652_v5  ;;  %v3747_v39 = vadd.f32 %v3746_v41, %v3660_v6  ;;  %v3705_v50 = vpop.f32.mrb[85].mxu0  ;;  %v3748_v11 = vpop.f32.mrb[113].mxu1 }
0x23d0   :  { %v3706_v12 = vadd.f32 %v3705_v50, %v3656_v8  ;;  %v3749_v16 = vadd.f32 %v3748_v11, %v3664_v38  ;;  %v3707_v17 = vpop.f32.mrb[86].mxu0  ;;  %v3750_v19 = vpop.f32.mrb[114].mxu1 }
0x23d1   :  { %v3708_v22 = vadd.f32 %v3707_v17, %v3652_v5  ;;  %v3751_v45 = vadd.f32 %v3750_v19, %v3660_v6  ;;  %v3709_v55 = vpop.f32.mrb[87].mxu0  ;;  %v3752_v25 = vpop.f32.mrb[115].mxu1  ;;  %v3755_v7 = vmax.f32 %v3704_v10, 0.0  ;;  %v3757_v35 = vmax.f32 %v3747_v39, 0.0 }
0x23d2   :  { %v3710_v26 = vadd.f32 %v3709_v55, %v3656_v8  ;;  %v3753_v27 = vadd.f32 %v3752_v25, %v3664_v38  ;;  %v3756_v29 = vmax.f32 %v3706_v12, 0.0  ;;  %v3758_v9 = vmax.f32 %v3749_v16, 0.0 }
0x23d3   :  { %v3759_v28 = vmax.f32 %v3708_v22, 0.0  ;;  %v3761_v33 = vmax.f32 %v3751_v45, 0.0 }
0x23d4   :  { %v3760_v30 = vmax.f32 %v3710_v26, 0.0  ;;  %v3762_v31 = vmax.f32 %v3753_v27, 0.0 }
0x23d5   :  { %v3763_v32 = vpack.c.bf16 %v3759_v28, %v3755_v7  ;;  %v3765_v34 = vpack.c.bf16 %v3761_v33, %v3757_v35 }
0x23d6   :  { %v3764_v2 = vpack.c.bf16 %v3760_v30, %v3756_v29  ;;  %v3766_v36 = vpack.c.bf16 %v3762_v31, %v3758_v9 }
0x23d8   :  { %3799 = vmatprep.mubr.bf16.mxu0 %v3764_v2  ;;  %3840 = vmatprep.mubr.bf16.mxu1 %v3766_v36 }
0x23d9   :  { %3800 = vmatmul.mubr.bf16.vlgmr.msra.gmra.mrb[88].mxu0 %v3763_v32  ;;  %3841 = vmatmul.mubr.bf16.vlgmr.msra.gmra.mrb[116].mxu1 %v3765_v34 }
0x24ac   :  { %v7722_v47 = vpop.f32.mrb[88].mxu0  ;;  %v7744_v48 = vpop.f32.mrb[116].mxu1 }
0x24ad   :  { %v7723_v21 = vpop.f32.mrb[89].mxu0  ;;  %v7745_v51 = vpop.f32.mrb[117].mxu1 }
0x24ae   :  { %v7724_v56 = vadd.f32 %v7723_v21, %v7722_v47  ;;  %v7746_v23 = vadd.f32 %v7745_v51, %v7744_v48  ;;  %v7725_v57 = vpop.f32.mrb[90].mxu0  ;;  %v7747_v20 = vpop.f32.mrb[118].mxu1 }
0x24af   :  { %v7726_v37 = vpop.f32.mrb[91].mxu0  ;;  %v7748_v42 = vpop.f32.mrb[119].mxu1 }
0x24b0   :  { %v3843_v58 = vadd.f32 %v7746_v23, %v7724_v56  ;;  %v7727_v54 = vadd.f32 %v7726_v37, %v7725_v57  ;;  %v7749_v59 = vadd.f32 %v7748_v42, %v7747_v20 }
0x24b2   :  { %v3849_v61 = vadd.f32 %v3843_v58, %v10408_v4  ;;  %v3846_v15 = vadd.f32 %v7749_v59, %v7727_v54 }
0x24b4   :  { %v10434_v52 = vadd.f32 %v7418_v60, %v3849_v61  ;;  %v3850_v53 = vadd.f32 %v3846_v15, %v10411_v24 }
0x24b6   :  { %v10437_v62 = vadd.f32 %v7418_v60, %v3850_v53 }
0x24b7   :  { %9283 = dma.done.wait [#allocation6 + $0x8], 3072 }
0x24b8   :  { %9284 = vsyncadd [#allocation6 + $0x8], 4294964224 }
0x24b9   :  { %9285 = dma.done.wait [#allocation6 + $0x9], 1024 }
0x24ba   :  { %9286 = vsyncadd [#allocation6 + $0x9], 4294966272 }
0x24bb   :  { %9287 = dma.done.wait [#allocation6 + $0xa], 4096 }
0x24bc   :  { %9288 = vsyncadd [#allocation6 + $0xa], 4294963200  ;;  %3969 = vadd.xlane.f32.xlu0 %v10434_v52 }
0x24bd   :  { %9289 = dma.done.wait [#allocation6 + $0xb], 4096 }
0x24be   :  { %9290 = vsyncadd [#allocation6 + $0xb], 4294963200  ;;  %8284 = vmatprep.subr.bf16.mxu1 %v9353_v13  ;;  %4042 = vmatprep.mubr.bf16.mxu0 %v9316_v0  ;;  %v3870_v4 = vld [vmem:[#allocation2 + $0x188] sm:$0xff]  ;;  %v3869_v24 = vld [vmem:[#allocation2 + $0x180] sm:$0xff] }
0x24bf   :  { %8300 = vmatprep.mubr.msk.bf16.mxu1 %vm9357_vm4, %v9353_v13  ;;  %v3871_v63 = vld [vmem:[#allocation2 + $0x190] sm:$0xff]  ;;  %4010 = vmatprep.subr.bf16.mxu0 %v3870_v4  ;;  %v3873_v50 = vld [vmem:[#allocation2 + $0x1a0] sm:$0xff]  ;;  %v3872_v11 = vld [vmem:[#allocation2 + $0x198] sm:$0xff] }
0x24c0   :  { %3971 = vadd.xlane.f32.xlu0 %v10437_v62  ;;  %8285 = vmatpush3.bf16.msra.mxu1 %v3871_v63  ;;  %v3874_v12 = vld [vmem:[#allocation2 + $0x1a8] sm:$0xff]  ;;  %v3876_v16 = vld [vmem:[#allocation2 + $0x1b8] sm:$0xff]  ;;  %v3875_v17 = vld [vmem:[#allocation2 + $0x1b0] sm:$0xff] }
0x24c1   :  { %4011 = vmatpush1.bf16.msra.mxu0 %v3869_v24  ;;  %8286 = vmatprep.subr.bf16.mxu1 %v9353_v13  ;;  %v3877_v19 = vld [vmem:[#allocation2 + $0x1c0] sm:$0xff]  ;;  %v3879_v22 = vld [vmem:[#allocation2 + $0x1d0] sm:$0xff]  ;;  %v3878_v45 = vld [vmem:[#allocation2 + $0x1c8] sm:$0xff] }
0x24c2   :  { %4012 = vmatprep.subr.bf16.mxu0 %v3873_v50  ;;  %v3880_v55 = vld [vmem:[#allocation2 + $0x1d8] sm:$0xff]  ;;  %v3882_v25 = vld [vmem:[#allocation2 + $0x1e8] sm:$0xff]  ;;  %v3881_v26 = vld [vmem:[#allocation2 + $0x1e0] sm:$0xff] }
0x24c3   :  { %v3883_v27 = vld [vmem:[#allocation2 + $0x1f0] sm:$0xff]  ;;  %v3885_v7 = vld [vmem:[#allocation2 + $0x200] sm:$0xff]  ;;  %v3884_v35 = vld [vmem:[#allocation2 + $0x1f8] sm:$0xff] }
0x24c4   :  { %8287 = vmatpush3.bf16.msra.mxu1 %v3874_v12  ;;  %v3886_v28 = vld [vmem:[#allocation2 + $0x208] sm:$0xff]  ;;  %v3888_v33 = vld [vmem:[#allocation2 + $0x218] sm:$0xff]  ;;  %v3887_v29 = vld [vmem:[#allocation2 + $0x210] sm:$0xff] }
0x24c5   :  { %4013 = vmatpush1.bf16.msra.mxu0 %v3872_v11  ;;  %8288 = vmatprep.subr.bf16.mxu1 %v9353_v13  ;;  %v3889_v9 = vld [vmem:[#allocation2 + $0x220] sm:$0xff]  ;;  %v3891_v30 = vld [vmem:[#allocation2 + $0x230] sm:$0xff]  ;;  %v3890_v31 = vld [vmem:[#allocation2 + $0x228] sm:$0xff] }
0x24c6   :  { %4014 = vmatprep.subr.bf16.mxu0 %v3876_v16  ;;  %v3892_v32 = vld [vmem:[#allocation2 + $0x238] sm:$0xff]  ;;  %v7420_v23 = vld [vmem:[%s11088_s23 + $0x2] ss:$0 sm:$0xff]  ;;  %v7421_v42 = vld [vmem:[#allocation12 + $0x2] ss:$0 sm:$0xff] }
0x24c8   :  { %8289 = vmatpush3.bf16.msra.mxu1 %v3877_v19 }
0x24c9   :  { %4015 = vmatpush1.bf16.msra.mxu0 %v3875_v17  ;;  %8290 = vmatprep.subr.bf16.mxu1 %v9353_v13 }
0x24ca   :  { %4016 = vmatprep.subr.bf16.mxu0 %v3879_v22 }
0x24cc   :  { %8291 = vmatpush3.bf16.msra.mxu1 %v3880_v55 }
0x24cd   :  { %4017 = vmatpush1.bf16.msra.mxu0 %v3878_v45  ;;  %8292 = vmatprep.subr.bf16.mxu1 %v9353_v13 }
0x24ce   :  { %4018 = vmatprep.subr.bf16.mxu0 %v3882_v25 }
0x24d0   :  { %8293 = vmatpush3.bf16.msra.mxu1 %v3883_v27 }
0x24d1   :  { %4019 = vmatpush1.bf16.msra.mxu0 %v3881_v26  ;;  %8294 = vmatprep.subr.bf16.mxu1 %v9353_v13 }
0x24d2   :  { %4020 = vmatprep.subr.bf16.mxu0 %v3885_v7 }
0x24d4   :  { %8295 = vmatpush3.bf16.msra.mxu1 %v3886_v28 }
0x24d5   :  { %4021 = vmatpush1.bf16.msra.mxu0 %v3884_v35  ;;  %8296 = vmatprep.subr.bf16.mxu1 %v9353_v13 }
0x24d6   :  { %4022 = vmatprep.subr.bf16.mxu0 %v3888_v33 }
0x24d8   :  { %8297 = vmatpush3.bf16.msra.mxu1 %v3889_v9 }
0x24d9   :  { %4023 = vmatpush1.bf16.msra.mxu0 %v3887_v29  ;;  %8298 = vmatprep.subr.bf16.mxu1 %v9353_v13 }
0x24da   :  { %4024 = vmatprep.subr.bf16.mxu0 %v3891_v30 }
0x24dc   :  { %8299 = vmatpush3.bf16.msra.mxu1 %v3892_v32 }
0x24dd   :  { %4025 = vmatpush1.bf16.msra.mxu0 %v3890_v31  ;;  %8310 = vmatprep.subr.bf16.mxu1 %v9353_v13 }
0x24de   :  { %8304 = vmatprep.subr.bf16.mxu0 %v9353_v13 }
0x2549   :  { %v3970_v1 = vpop.xlane.xlu0 %3969 }
0x254a   :  { %v3973_v3 = vmul.f32 0.01, %v3970_v1 }
0x254c   :  { %v3975_v5 = vsub.f32 %v10434_v52, %v3973_v3 }
0x254d   :  { %v3972_v6 = vpop.xlane.xlu0 %3971 }
0x254e   :  { %v10448_v8 = vmul.f32 %v9882_v14, %v3975_v5  ;;  %v3974_v38 = vmul.f32 0.01, %v3972_v6 }
0x2550   :  { %v3976_v46 = vsub.f32 %v10437_v62, %v3974_v38  ;;  %v3979_v41 = vmul.f32 %v10448_v8, %v10448_v8 }
0x2552   :  { %v10454_v10 = vmul.f32 %v9882_v14, %v3976_v46  ;;  %3981 = vadd.xlane.f32.xlu1 %v3979_v41 }
0x2554   :  { %v3980_v39 = vmul.f32 %v10454_v10, %v10454_v10 }
0x2556   :  { %3983 = vadd.xlane.f32.xlu1 %v3980_v39 }
0x25df   :  { %v3982_v34 = vpop.xlane.xlu1 %3981 }
0x25e0   :  { %v3985_v2 = vmul.f32 0.01, %v3982_v34 }
0x25e2   :  { %v3987_v36 = vadd.f32 1e-05, %v3985_v2 }
0x25e3   :  { %v3984_v47 = vpop.xlane.xlu1 %3983 }
0x25e4   :  { %8773 = vrsqrt.f32 %v3987_v36  ;;  %v3986_v48 = vmul.f32 0.01, %v3984_v47 }
0x25e6   :  { %v3988_v21 = vadd.f32 1e-05, %v3986_v48 }
0x25e8   :  { %8775 = vrsqrt.f32 %v3988_v21 }
0x25ee   :  { %v8774_v51 = vpop.eup %8773 }
0x25ef   :  { %v3991_v56 = vmul.f32 %v8774_v51, %v10448_v8 }
0x25f1   :  { %v3999_v37 = vmul.f32 %v7420_v23, %v3991_v56 }
0x25f2   :  { %v8776_v57 = vpop.eup %8775 }
0x25f3   :  { %v3992_v20 = vmul.f32 %v8776_v57, %v10454_v10  ;;  %v4007_v54 = vadd.f32 %v7421_v42, %v3999_v37 }
0x25f5   :  { %v4000_v58 = vmul.f32 %v7420_v23, %v3992_v20 }
0x25f7   :  { %v4008_v59 = vadd.f32 %v7421_v42, %v4000_v58 }
0x25f9   :  { %v4009_v60 = vpack.c.bf16 %v4008_v59, %v4007_v54 }
0x25fb   :  { %4043 = vmatmul.mubr.bf16.vlgmr.msra.gmra.mrb[92].mxu0 %v4009_v60  ;;  %8301 = vmatmul.mubr.bf16.vlgmr.msra.gmra.mrb[120].mxu1 %v4009_v60 }
0x25fc   :  { %8306 = vmatprep.mubr.msk.bf16.mxu0 %vm9357_vm4, %v9353_v13  ;;  %8312 = vmatprep.mubr.msk.bf16.mxu1 %vm9357_vm4, %v9353_v13 }
0x26ce   :  { %v4044_v61 = vpop.f32.mrb[92].mxu0  ;;  %v4087_v15 = vpop.f32.mrb[120].mxu1 }
0x26cf   :  { %v4046_v53 = vpop.f32.mrb[93].mxu0  ;;  %v8302_v4 = vpop.f32.mrb[121].mxu1  ;;  %v10484_v46 = vpack.c.bf16 %v4087_v15, %v4087_v15  ;;  %v10487_v41 = vpack.c.bf16 %v4044_v61, %v4044_v61 }
0x26d0   :  { %v10475_v24 = vpack.c.bf16 %v4046_v53, %v4046_v53  ;;  %v4048_v63 = vpop.f32.mrb[94].mxu0  ;;  %v4090_v1 = vpop.f32.mrb[122].mxu1 }
0x26d1   :  { %v4050_v3 = vpop.f32.mrb[95].mxu0  ;;  %v8303_v5 = vpop.f32.mrb[123].mxu1  ;;  %v10489_v10 = vpack.c.bf16 %v4090_v1, %v4090_v1  ;;  %v10491_v39 = vpack.c.bf16 %v4048_v63, %v4048_v63  ;;  %v4236_v50 = vsel %vm1057_vm6, %v10484_v46, 0 }
0x26d2   :  { %v10477_v6 = vpack.c.bf16 %v4050_v3, %v4050_v3  ;;  %v4116_v8 = vsel %vm932_vm5, %v10475_v24, 0 }
0x26d3   :  { %8305 = vmatpush3.bf16.xpose.msra.mxu0 %v4116_v8  ;;  %v4282_v11 = vsel %vm1057_vm6, %v10489_v10, 0 }
0x26d4   :  { %v4162_v38 = vsel %vm932_vm5, %v10477_v6, 0  ;;  %8316 = vmatprep.subr.bf16.mxu0 %v9353_v13 }
0x26d5   :  { %8311 = vmatpush3.bf16.xpose.msra.mxu1 %v4162_v38 }
0x26d6   :  { %8322 = vmatprep.subr.bf16.mxu1 %v9353_v13 }
0x26da   :  { %8307 = vmatmul.mubr.msk.bf16.vlgmr.msra.gmra.mrb[96].mxu0 %vm932_vm5, %v10487_v41 }
0x26db   :  { %8317 = vmatpush3.bf16.msra.mxu0 %v4236_v50  ;;  %8318 = vmatprep.mubr.msk.bf16.mxu0 %vm9357_vm4, %v9353_v13 }
0x26dc   :  { %8313 = vmatmul.mubr.msk.bf16.vlgmr.msra.gmra.mrb[124].mxu1 %vm932_vm5, %v10491_v39  ;;  %8328 = vmatprep.subr.bf16.mxu0 %v9353_v13 }
0x26dd   :  { %8323 = vmatpush3.bf16.msra.mxu1 %v4282_v11  ;;  %8324 = vmatprep.mubr.msk.bf16.mxu1 %vm9357_vm4, %v9353_v13 }
0x26de   :  { %8334 = vmatprep.subr.bf16.mxu1 %v9353_v13 }
0x27ad   :  { %v4152_v12 = vpop.f32.mrb[96].mxu0 }
0x27ae   :  { %v4204_v16 = vmul.f32 0.2, %v4152_v12  ;;  %v8308_v17 = vpop.f32.mrb[97].mxu0 }
0x27af   :  { %v4155_v19 = vpop.f32.mrb[98].mxu0  ;;  %v4198_v22 = vpop.f32.mrb[124].mxu1 }
0x27b0   :  { %v4206_v45 = vadd.f32 %v4204_v16, %v9887_v18  ;;  %v4205_v55 = vmul.f32 0.2, %v4198_v22  ;;  %v8309_v25 = vpop.f32.mrb[99].mxu0  ;;  %v8314_v26 = vpop.f32.mrb[125].mxu1 }
0x27b1   :  { %v4201_v27 = vpop.f32.mrb[126].mxu1 }
0x27b2   :  { %v4207_v7 = vadd.f32 %v4205_v55, %v9887_v18  ;;  %v8315_v35 = vpop.f32.mrb[127].mxu1  ;;  %v4208_v28 = vsel %vm1029_vm7, %v4206_v45, -inf }
0x27b3   :  { %4209 = vmax.xlane.f32.xlu0 %v4208_v28 }
0x27b4   :  { %v4211_v33 = vsel %vm1029_vm7, %v4207_v7, -inf }
0x27b5   :  { %4212 = vmax.xlane.f32.xlu1 %v4211_v33 }
0x27c6   :  { %4377 = vrot.lane.b32.xlu1 %v10477_v6, %s9358_s12 }
0x2840   :  { %v4210_v29 = vpop.xlane.xlu0 %4209 }
0x2841   :  { %v4214_v9 = vsub.f32 %v4206_v45, %v4210_v29 }
0x2842   :  { %v4213_v30 = vpop.xlane.xlu1 %4212 }
0x2843   :  { %v4216_v31 = vmul.f32 1.442695, %v4214_v9  ;;  %v4215_v32 = vsub.f32 %v4207_v7, %v4213_v30 }
0x2845   :  { %8777 = vpow2.f32 %v4216_v31  ;;  %v4218_v34 = vmul.f32 1.442695, %v4215_v32 }
0x2846   :  { %v4378_v21 = vpop.permute.xlu1 %4377 }
0x2847   :  { %8779 = vpow2.f32 %v4218_v34  ;;  %v4383_v60 = vsel %vm932_vm5, %v4378_v21, 0 }
0x284f   :  { %v8778_v2 = vpop.eup %8777 }
0x2850   :  { %v4220_v36 = vsel %vm1029_vm7, %v8778_v2, 0.0 }
0x2851   :  { %v8780_v47 = vpop.eup %8779  ;;  %4221 = vadd.xlane.f32.xlu0 %v4220_v36 }
0x2852   :  { %v4223_v48 = vsel %vm1029_vm7, %v8780_v47, 0.0 }
0x2853   :  { %4224 = vadd.xlane.f32.xlu1 %v4223_v48 }
0x2864   :  { %4325 = vrot.lane.b32.xlu1 %v10487_v41, %s9358_s12 }
0x2867   :  { %4327 = vrot.lane.b32.xlu0 %v10475_v24, %s9358_s12 }
0x2868   :  { %4375 = vrot.lane.b32.xlu1 %v10491_v39, %s9358_s12 }
0x28de   :  { %v4222_v51 = vpop.xlane.xlu0 %4221 }
0x28df   :  { %8781 = vrcp.f32 %v4222_v51 }
0x28e0   :  { %v4225_v56 = vpop.xlane.xlu1 %4224 }
0x28e1   :  { %8783 = vrcp.f32 %v4225_v56 }
0x28e2   :  { %v4328_v37 = vpop.permute.xlu0 %4327 }
0x28e3   :  { %v4333_v54 = vsel %vm932_vm5, %v4328_v37, 0 }
0x28e4   :  { %v4326_v61 = vpop.permute.xlu1 %4325 }
0x28e8   :  { %v4376_v15 = vpop.permute.xlu1 %4375 }
0x28e9   :  { %v8782_v23 = vpop.eup %8781 }
0x28ea   :  { %v4227_v57 = vmul.f32 %v8782_v23, %v8778_v2 }
0x28eb   :  { %v8784_v20 = vpop.eup %8783 }
0x28ec   :  { %v4230_v42 = vpack.c.bf16 %v4227_v57, %v4227_v57  ;;  %v4229_v58 = vmul.f32 %v8784_v20, %v8780_v47 }
0x28ee   :  { %8319 = vmatmul.mubr.msk.bf16.vlgmr.msra.gmra.mrb[100].mxu0 %vm1029_vm7, %v4230_v42  ;;  %v4231_v59 = vpack.c.bf16 %v4229_v58, %v4229_v58  ;;  %v3895_v58 = vld [vmem:[#allocation3 + $0x90] sm:$0xff] }
0x28ef   :  { %8329 = vmatpush3.bf16.xpose.msra.mxu0 %v4333_v54  ;;  %8330 = vmatprep.mubr.msk.bf16.mxu0 %vm9357_vm4, %v9353_v13 }
0x28f0   :  { %8325 = vmatmul.mubr.msk.bf16.vlgmr.msra.gmra.mrb[128].mxu1 %vm1029_vm7, %v4231_v59  ;;  %8340 = vmatprep.subr.bf16.mxu0 %v9353_v13 }
0x28f1   :  { %8335 = vmatpush3.bf16.xpose.msra.mxu1 %v4383_v60  ;;  %8336 = vmatprep.mubr.msk.bf16.mxu1 %vm9357_vm4, %v9353_v13 }
0x28f2   :  { %8346 = vmatprep.subr.bf16.mxu1 %v9353_v13 }
0x28f6   :  { %8331 = vmatmul.mubr.msk.bf16.vlgmr.msra.gmra.mrb[104].mxu0 %vm932_vm5, %v4326_v61  ;;  %v3893_v61 = vld [vmem:[#allocation3 + $0x80] sm:$0xff] }
0x28f7   :  { %8342 = vmatprep.mubr.msk.bf16.mxu0 %vm9357_vm4, %v9353_v13 }
0x28f8   :  { %8337 = vmatmul.mubr.msk.bf16.vlgmr.msra.gmra.mrb[132].mxu1 %vm932_vm5, %v4376_v15  ;;  %v3896_v15 = vld [vmem:[#allocation3 + $0x98] sm:$0xff] }
0x28f9   :  { %8348 = vmatprep.mubr.msk.bf16.mxu1 %vm9357_vm4, %v9353_v13 }
0x29c1   :  { %v10537_v53 = vpop.f32.mrb[100].mxu0 }
0x29c2   :  { %v8320_v4 = vpop.f32.mrb[101].mxu0 }
0x29c3   :  { %v4275_v63 = vpop.f32.mrb[102].mxu0  ;;  %v10539_v1 = vpop.f32.mrb[128].mxu1  ;;  %v3894_v4 = vld [vmem:[#allocation3 + $0x88] sm:$0xff] }
0x29c4   :  { %v4324_v3 = vpack.c.bf16 %v10539_v1, %v10537_v53  ;;  %v8321_v5 = vpop.f32.mrb[103].mxu0  ;;  %v8326_v8 = vpop.f32.mrb[129].mxu1 }
0x29c5   :  { %v4321_v38 = vpop.f32.mrb[130].mxu1 }
0x29c6   :  { %v8327_v50 = vpop.f32.mrb[131].mxu1 }
0x29c9   :  { %v4369_v11 = vpop.f32.mrb[104].mxu0 }
0x29ca   :  { %v4425_v12 = vmul.f32 0.2, %v4369_v11  ;;  %v8332_v16 = vpop.f32.mrb[105].mxu0 }
0x29cb   :  { %v4372_v17 = vpop.f32.mrb[106].mxu0  ;;  %v4419_v19 = vpop.f32.mrb[132].mxu1 }
0x29cc   :  { %v4427_v22 = vadd.f32 %v4425_v12, %v9887_v18  ;;  %v4426_v45 = vmul.f32 0.2, %v4419_v19  ;;  %v8333_v55 = vpop.f32.mrb[107].mxu0  ;;  %v8338_v25 = vpop.f32.mrb[133].mxu1 }
0x29cd   :  { %v4422_v26 = vpop.f32.mrb[134].mxu1 }
0x29ce   :  { %v4428_v27 = vadd.f32 %v4426_v45, %v9887_v18  ;;  %v8339_v7 = vpop.f32.mrb[135].mxu1  ;;  %v4429_v35 = vsel %vm1029_vm7, %v4427_v22, -inf }
0x29cf   :  { %4430 = vmax.xlane.f32.xlu0 %v4429_v35 }
0x29d0   :  { %v4432_v28 = vsel %vm1029_vm7, %v4428_v27, -inf }
0x29d1   :  { %4433 = vmax.xlane.f32.xlu1 %v4432_v28 }
0x29e2   :  { %4501 = vrot.lane.b32.xlu1 %v10489_v10, %s9358_s12 }
0x29e6   :  { %4640 = vrot.lane.b32.xlu1 %v10475_v24, %s11081_s18 }
0x29ea   :  { %4690 = vrot.lane.b32.xlu1 %v10477_v6, %s11081_s18 }
0x29ee   :  { %4688 = vrot.lane.b32.xlu1 %v10491_v39, %s11081_s18 }
0x2a5c   :  { %v4431_v33 = vpop.xlane.xlu0 %4430 }
0x2a5d   :  { %v4435_v29 = vsub.f32 %v4427_v22, %v4431_v33 }
0x2a5e   :  { %v4434_v9 = vpop.xlane.xlu1 %4433 }
0x2a5f   :  { %v4437_v30 = vmul.f32 1.442695, %v4435_v29  ;;  %v4436_v31 = vsub.f32 %v4428_v27, %v4434_v9 }
0x2a61   :  { %8785 = vpow2.f32 %v4437_v30  ;;  %v4439_v32 = vmul.f32 1.442695, %v4436_v31 }
0x2a62   :  { %v4502_v34 = vpop.permute.xlu1 %4501 }
0x2a63   :  { %8787 = vpow2.f32 %v4439_v32  ;;  %v4507_v2 = vsel %vm1057_vm6, %v4502_v34, 0 }
0x2a64   :  { %8347 = vmatpush3.bf16.msra.mxu1 %v4507_v2 }
0x2a65   :  { %8360 = vmatprep.subr.bf16.mxu1 %v9353_v13 }
0x2a66   :  { %v4641_v63 = vpop.permute.xlu1 %4640 }
0x2a67   :  { %v4646_v19 = vsel %vm932_vm5, %v4641_v63, 0 }
0x2a6a   :  { %v4691_v5 = vpop.permute.xlu1 %4690 }
0x2a6b   :  { %v8786_v36 = vpop.eup %8785  ;;  %v4696_v8 = vsel %vm932_vm5, %v4691_v5, 0 }
0x2a6c   :  { %v4441_v47 = vsel %vm1029_vm7, %v8786_v36, 0.0 }
0x2a6d   :  { %v8788_v48 = vpop.eup %8787  ;;  %4442 = vadd.xlane.f32.xlu0 %v4441_v47 }
0x2a6e   :  { %v4444_v21 = vsel %vm1029_vm7, %v8788_v48, 0.0  ;;  %v4689_v38 = vpop.permute.xlu1 %4688 }
0x2a71   :  { %4445 = vadd.xlane.f32.xlu0 %v4444_v21 }
0x2a87   :  { %4453 = vrot.lane.b32.xlu0 %v10484_v46, %s9358_s12 }
0x2a8b   :  { %4638 = vrot.lane.b32.xlu0 %v10487_v41, %s11081_s18 }
0x2afa   :  { %v4443_v51 = vpop.xlane.xlu0 %4442 }
0x2afb   :  { %8789 = vrcp.f32 %v4443_v51 }
0x2afe   :  { %v4446_v56 = vpop.xlane.xlu0 %4445 }
0x2aff   :  { %8791 = vrcp.f32 %v4446_v56 }
0x2b02   :  { %v4454_v23 = vpop.permute.xlu0 %4453 }
0x2b03   :  { %v4459_v57 = vsel %vm1057_vm6, %v4454_v23, 0 }
0x2b04   :  { %8341 = vmatpush3.bf16.msra.mxu0 %v4459_v57 }
0x2b05   :  { %v8790_v20 = vpop.eup %8789  ;;  %8352 = vmatprep.subr.bf16.mxu0 %v9353_v13 }
0x2b06   :  { %v4448_v37 = vmul.f32 %v8790_v20, %v8786_v36  ;;  %v4639_v25 = vpop.permute.xlu0 %4638 }
0x2b08   :  { %v4451_v42 = vpack.c.bf16 %v4448_v37, %v4448_v37 }
0x2b09   :  { %v8792_v54 = vpop.eup %8791 }
0x2b0a   :  { %8343 = vmatmul.mubr.msk.bf16.vlgmr.msra.gmra.mrb[108].mxu0 %vm1029_vm7, %v4451_v42  ;;  %v4450_v59 = vmul.f32 %v8792_v54, %v8788_v48 }
0x2b0b   :  { %8353 = vmatpush3.bf16.msra.mxu0 %v3895_v58  ;;  %8356 = vmatprep.mubr.msk.bf16.mxu0 %vm9357_vm4, %v9353_v13 }
0x2b0c   :  { %v4452_v60 = vpack.c.bf16 %v4450_v59, %v4450_v59  ;;  %8354 = vmatprep.subr.bf16.mxu0 %v9353_v13 }
0x2b0e   :  { %8349 = vmatmul.mubr.msk.bf16.vlgmr.msra.gmra.mrb[136].mxu1 %vm1029_vm7, %v4452_v60 }
0x2b0f   :  { %8361 = vmatpush3.bf16.msra.mxu1 %v3893_v61  ;;  %8364 = vmatprep.mubr.msk.bf16.mxu1 %vm9357_vm4, %v9353_v13 }
0x2b10   :  { %8362 = vmatprep.subr.bf16.mxu1 %v9353_v13  ;;  %8355 = vmatpush3.bf16.msra.mxu0 %v3896_v15 }
0x2b11   :  { %8368 = vmatprep.subr.bf16.mxu0 %v9353_v13 }
0x2b13   :  { %8363 = vmatpush3.bf16.msra.mxu1 %v3894_v4 }
0x2b14   :  { %8374 = vmatprep.subr.bf16.mxu1 %v9353_v13 }
0x2b16   :  { %8365 = vmatmul.mubr.msk.bf16.vlgmr.msra.gmra.mrb[140].mxu1 %vm932_vm5, %v4324_v3 }
0x2b17   :  { %8376 = vmatprep.mubr.msk.bf16.mxu1 %vm9357_vm4, %v9353_v13 }
0x2b1c   :  { %8375 = vmatpush3.bf16.xpose.msra.mxu1 %v4696_v8 }
0x2b1d   :  { %8386 = vmatprep.subr.bf16.mxu1 %v9353_v13 }
0x2b23   :  { %8377 = vmatmul.mubr.msk.bf16.vlgmr.msra.gmra.mrb[144].mxu1 %vm932_vm5, %v4689_v38 }
0x2b24   :  { %8388 = vmatprep.mubr.msk.bf16.mxu1 %vm9357_vm4, %v9353_v13 }
0x2bdd   :  { %v4495_v50 = vpop.f32.mrb[108].mxu0 }
0x2bde   :  { %v8344_v11 = vpop.f32.mrb[109].mxu0 }
0x2bdf   :  { %v4498_v53 = vpop.f32.mrb[110].mxu0 }
0x2be0   :  { %v8345_v1 = vpop.f32.mrb[111].mxu0 }
0x2be1   :  { %v4543_v3 = vpop.f32.mrb[136].mxu1 }
0x2be2   :  { %v4549_v12 = vpack.c.bf16 %v4543_v3, %v4495_v50  ;;  %v8350_v16 = vpop.f32.mrb[137].mxu1 }
0x2be3   :  { %v4546_v17 = vpop.f32.mrb[138].mxu1 }
0x2be4   :  { %v8351_v22 = vpop.f32.mrb[139].mxu1  ;;  %8357 = vmatmul.mubr.msk.bf16.vlgmr.msra.gmra.mrb[112].mxu0 %vm932_vm5, %v4549_v12 }
0x2be5   :  { %8369 = vmatpush3.bf16.xpose.msra.mxu0 %v4646_v19  ;;  %8370 = vmatprep.mubr.msk.bf16.mxu0 %vm9357_vm4, %v9353_v13  ;;  %v3897_v22 = vld [vmem:[#allocation3 + $0xa0] sm:$0xff] }
0x2be6   :  { %8380 = vmatprep.subr.bf16.mxu0 %v9353_v13 }
0x2be9   :  { %v4631_v45 = vpop.f32.mrb[140].mxu1 }
0x2bea   :  { %v8366_v55 = vpop.f32.mrb[141].mxu1 }
0x2beb   :  { %v4634_v26 = vpop.f32.mrb[142].mxu1 }
0x2bec   :  { %v8367_v27 = vpop.f32.mrb[143].mxu1  ;;  %8371 = vmatmul.mubr.msk.bf16.vlgmr.msra.gmra.mrb[116].mxu0 %vm932_vm5, %v4639_v25 }
0x2bed   :  { %8382 = vmatprep.mubr.msk.bf16.mxu0 %vm9357_vm4, %v9353_v13 }
0x2bf6   :  { %v4732_v7 = vpop.f32.mrb[144].mxu1 }
0x2bf7   :  { %v4739_v35 = vmul.f32 0.2, %v4732_v7  ;;  %v8378_v28 = vpop.f32.mrb[145].mxu1 }
0x2bf8   :  { %v4735_v33 = vpop.f32.mrb[146].mxu1 }
0x2bf9   :  { %v4741_v29 = vadd.f32 %v4739_v35, %v9887_v18  ;;  %v8379_v9 = vpop.f32.mrb[147].mxu1 }
0x2bfb   :  { %v4745_v30 = vsel %vm1029_vm7, %v4741_v29, -inf }
0x2bfc   :  { %4746 = vmax.xlane.f32.xlu1 %v4745_v30 }
0x2c0d   :  { %4814 = vrot.lane.b32.xlu1 %v10489_v10, %s11081_s18 }
0x2c11   :  { %4911 = vrot.lane.b32.xlu1 %v10475_v24, %s9359_s25 }
0x2c15   :  { %4961 = vrot.lane.b32.xlu1 %v10477_v6, %s9359_s25 }
0x2c19   :  { %4959 = vrot.lane.b32.xlu1 %v10491_v39, %s9359_s25 }
0x2c89   :  { %v4747_v31 = vpop.xlane.xlu1 %4746 }
0x2c8a   :  { %v4749_v2 = vsub.f32 %v4741_v29, %v4747_v31 }
0x2c8c   :  { %v4752_v36 = vmul.f32 1.442695, %v4749_v2 }
0x2c8d   :  { %v4815_v32 = vpop.permute.xlu1 %4814 }
0x2c8e   :  { %v4820_v34 = vsel %vm1057_vm6, %v4815_v32, 0  ;;  %8793 = vpow2.f32 %v4752_v36 }
0x2c8f   :  { %8387 = vmatpush3.bf16.msra.mxu1 %v4820_v34 }
0x2c90   :  { %8400 = vmatprep.subr.bf16.mxu1 %v9353_v13 }
0x2c91   :  { %v4912_v38 = vpop.permute.xlu1 %4911 }
0x2c92   :  { %v4917_v11 = vsel %vm932_vm5, %v4912_v38, 0 }
0x2c95   :  { %v4962_v30 = vpop.permute.xlu1 %4961 }
0x2c96   :  { %v4967_v36 = vsel %vm932_vm5, %v4962_v30, 0 }
0x2c98   :  { %v8794_v58 = vpop.eup %8793 }
0x2c99   :  { %v4757_v54 = vsel %vm1029_vm7, %v8794_v58, 0.0 }
0x2cb7   :  { %v4587_v47 = vpop.f32.mrb[112].mxu0 }
0x2cb8   :  { %v10606_v48 = vadd.f32 %v4631_v45, %v4587_v47  ;;  %v8358_v21 = vpop.f32.mrb[113].mxu0 }
0x2cb9   :  { %v4590_v24 = vpop.f32.mrb[114].mxu0  ;;  %v4960_v21 = vpop.permute.xlu1 %4959 }
0x2cba   :  { %v10608_v51 = vadd.f32 %v4634_v26, %v4590_v24  ;;  %v8359_v6 = vpop.f32.mrb[115].mxu0  ;;  %v3898_v26 = vld [vmem:[#allocation3 + $0xa8] sm:$0xff] }
0x2cbf   :  { %v4682_v56 = vpop.f32.mrb[116].mxu0 }
0x2cc0   :  { %v4738_v39 = vmul.f32 0.2, %v4682_v56  ;;  %v8372_v23 = vpop.f32.mrb[117].mxu0 }
0x2cc1   :  { %v4685_v57 = vpop.f32.mrb[118].mxu0 }
0x2cc2   :  { %v4740_v20 = vadd.f32 %v4738_v39, %v9887_v18  ;;  %v8373_v37 = vpop.f32.mrb[119].mxu0 }
0x2cc4   :  { %v4742_v42 = vsel %vm1029_vm7, %v4740_v20, -inf }
0x2cc5   :  { %4743 = vmax.xlane.f32.xlu0 %v4742_v42 }
0x2cc9   :  { %4758 = vadd.xlane.f32.xlu0 %v4757_v54 }
0x2d52   :  { %v4744_v59 = vpop.xlane.xlu0 %4743 }
0x2d53   :  { %v4748_v60 = vsub.f32 %v4740_v20, %v4744_v59 }
0x2d55   :  { %v4750_v61 = vmul.f32 1.442695, %v4748_v60 }
0x2d56   :  { %v4759_v15 = vpop.xlane.xlu0 %4758 }
0x2d57   :  { %8795 = vpow2.f32 %v4750_v61 }
0x2d58   :  { %8797 = vrcp.f32 %v4759_v15 }
0x2d61   :  { %v8796_v4 = vpop.eup %8795 }
0x2d62   :  { %v8798_v63 = vpop.eup %8797  ;;  %v4754_v5 = vsel %vm1029_vm7, %v8796_v4, 0.0 }
0x2d63   :  { %4755 = vadd.xlane.f32.xlu0 %v4754_v5  ;;  %v4763_v8 = vmul.f32 %v8798_v63, %v8794_v58 }
0x2d65   :  { %v4765_v50 = vpack.c.bf16 %v4763_v8, %v4763_v8 }
0x2d67   :  { %8389 = vmatmul.mubr.msk.bf16.vlgmr.msra.gmra.mrb[148].mxu1 %vm1029_vm7, %v4765_v50 }
0x2d68   :  { %8401 = vmatpush3.bf16.xpose.msra.mxu1 %v4917_v11  ;;  %8402 = vmatprep.mubr.msk.bf16.mxu1 %vm9357_vm4, %v9353_v13 }
0x2d69   :  { %8412 = vmatprep.subr.bf16.mxu1 %v9353_v13 }
0x2d79   :  { %4766 = vrot.lane.b32.xlu0 %v10484_v46, %s11081_s18 }
0x2d7d   :  { %4909 = vrot.lane.b32.xlu0 %v10487_v41, %s9359_s25 }
0x2df0   :  { %v4756_v53 = vpop.xlane.xlu0 %4755 }
0x2df1   :  { %8799 = vrcp.f32 %v4756_v53 }
0x2df4   :  { %v4767_v1 = vpop.permute.xlu0 %4766 }
0x2df5   :  { %v4772_v3 = vsel %vm1057_vm6, %v4767_v1, 0 }
0x2df6   :  { %8381 = vmatpush3.bf16.msra.mxu0 %v4772_v3 }
0x2df7   :  { %8392 = vmatprep.subr.bf16.mxu0 %v9353_v13 }
0x2df8   :  { %v4910_v12 = vpop.permute.xlu0 %4909 }
0x2df9   :  { %8403 = vmatmul.mubr.msk.bf16.vlgmr.msra.gmra.mrb[152].mxu1 %vm932_vm5, %v4910_v12 }
0x2dfa   :  { %8414 = vmatprep.mubr.msk.bf16.mxu1 %vm9357_vm4, %v9353_v13 }
0x2dfb   :  { %v8800_v16 = vpop.eup %8799 }
0x2dfc   :  { %v4761_v17 = vmul.f32 %v8800_v16, %v8796_v4 }
0x2dfe   :  { %v4764_v19 = vpack.c.bf16 %v4761_v17, %v4761_v17 }
0x2e00   :  { %8383 = vmatmul.mubr.msk.bf16.vlgmr.msra.gmra.mrb[120].mxu0 %vm1029_vm7, %v4764_v19 }
0x2e01   :  { %8393 = vmatpush3.bf16.msra.mxu0 %v3897_v22  ;;  %8396 = vmatprep.mubr.msk.bf16.mxu0 %vm9357_vm4, %v9353_v13 }
0x2e02   :  { %8394 = vmatprep.subr.bf16.mxu0 %v9353_v13 }
0x2e05   :  { %8395 = vmatpush3.bf16.msra.mxu0 %v3898_v26 }
0x2e06   :  { %8406 = vmatprep.subr.bf16.mxu0 %v9353_v13 }
0x2e3a   :  { %v4856_v41 = vpop.f32.mrb[148].mxu1 }
0x2e3b   :  { %v8390_v45 = vpop.f32.mrb[149].mxu1 }
0x2e3c   :  { %v4859_v55 = vpop.f32.mrb[150].mxu1  ;;  %v3899_v45 = vld [vmem:[#allocation3 + $0xb0] sm:$0xff] }
0x2e3d   :  { %v8391_v25 = vpop.f32.mrb[151].mxu1  ;;  %v3900_v55 = vld [vmem:[#allocation3 + $0xb8] sm:$0xff] }
0x2ecc   :  { %v4953_v27 = vpop.f32.mrb[152].mxu1 }
0x2ecd   :  { %v5009_v7 = vmul.f32 0.2, %v4953_v27  ;;  %v8404_v35 = vpop.f32.mrb[153].mxu1 }
0x2ece   :  { %v4956_v28 = vpop.f32.mrb[154].mxu1 }
0x2ecf   :  { %v5011_v33 = vadd.f32 %v5009_v7, %v9887_v18  ;;  %v8405_v29 = vpop.f32.mrb[155].mxu1 }
0x2ed1   :  { %v5013_v9 = vsel %vm1029_vm7, %v5011_v33, -inf }
0x2ed2   :  { %5014 = vmax.xlane.f32.xlu0 %v5013_v9 }
0x2ed3   :  { %v4808_v31 = vpop.f32.mrb[120].mxu0 }
0x2ed4   :  { %v4862_v32 = vpack.c.bf16 %v4856_v41, %v4808_v31  ;;  %v8384_v34 = vpop.f32.mrb[121].mxu0 }
0x2ed5   :  { %v4811_v2 = vpop.f32.mrb[122].mxu0  ;;  %v7449_v34 = vld [vmem:[%s11089_s28 + $0x2] ss:$0 sm:$0xff] }
0x2ed6   :  { %v8385_v47 = vpop.f32.mrb[123].mxu0  ;;  %8397 = vmatmul.mubr.msk.bf16.vlgmr.msra.gmra.mrb[124].mxu0 %vm932_vm5, %v4862_v32 }
0x2ed7   :  { %8407 = vmatpush3.bf16.xpose.msra.mxu0 %v4967_v36  ;;  %8408 = vmatprep.mubr.msk.bf16.mxu0 %vm9357_vm4, %v9353_v13 }
0x2ed8   :  { %8418 = vmatprep.subr.bf16.mxu0 %v9353_v13 }
0x2ede   :  { %8409 = vmatmul.mubr.msk.bf16.vlgmr.msra.gmra.mrb[128].mxu0 %vm932_vm5, %v4960_v21 }
0x2edf   :  { %8420 = vmatprep.mubr.msk.bf16.mxu0 %vm9357_vm4, %v9353_v13 }
0x2f5f   :  { %v5015_v24 = vpop.xlane.xlu0 %5014 }
0x2f60   :  { %v5019_v6 = vsub.f32 %v5011_v33, %v5015_v24 }
0x2f62   :  { %v5021_v56 = vmul.f32 1.442695, %v5019_v6 }
0x2f64   :  { %8801 = vpow2.f32 %v5021_v56 }
0x2f6e   :  { %v8802_v39 = vpop.eup %8801 }
0x2f6f   :  { %v5025_v23 = vsel %vm1029_vm7, %v8802_v39, 0.0 }
0x2f70   :  { %5026 = vadd.xlane.f32.xlu0 %v5025_v23  ;;  %v3904_v23 = vld [vmem:[#allocation4 + $0x218] sm:$0xff] }
0x2fa9   :  { %v4900_v57 = vpop.f32.mrb[124].mxu0 }
0x2faa   :  { %v4907_v20 = vadd.f32 %v4900_v57, %v10606_v48  ;;  %v8398_v37 = vpop.f32.mrb[125].mxu0  ;;  %v3901_v57 = vld [vmem:[#allocation4 + $0x200] sm:$0xff] }
0x2fab   :  { %v4903_v42 = vpop.f32.mrb[126].mxu0  ;;  %v3906_v37 = vld [vmem:[#allocation4 + $0x228] sm:$0xff] }
0x2fac   :  { %v4908_v58 = vadd.f32 %v4903_v42, %v10608_v51  ;;  %v8399_v54 = vpop.f32.mrb[127].mxu0  ;;  %v3905_v42 = vld [vmem:[#allocation4 + $0x220] sm:$0xff] }
0x2fb1   :  { %v5003_v59 = vpop.f32.mrb[128].mxu0 }
0x2fb2   :  { %v5010_v60 = vmul.f32 0.2, %v5003_v59  ;;  %v8410_v61 = vpop.f32.mrb[129].mxu0 }
0x2fb3   :  { %v5006_v15 = vpop.f32.mrb[130].mxu0 }
0x2fb4   :  { %v5012_v4 = vadd.f32 %v5010_v60, %v9887_v18  ;;  %v8411_v63 = vpop.f32.mrb[131].mxu0 }
0x2fb6   :  { %v5016_v5 = vsel %vm1029_vm7, %v5012_v4, -inf }
0x2fb7   :  { %5017 = vmax.xlane.f32.xlu1 %v5016_v5 }
0x2fc8   :  { %5085 = vrot.lane.b32.xlu1 %v10489_v10, %s9359_s25 }
0x2ffd   :  { %v5027_v1 = vpop.xlane.xlu0 %5026 }
0x3044   :  { %v5018_v8 = vpop.xlane.xlu1 %5017 }
0x3045   :  { %v5020_v48 = vsub.f32 %v5012_v4, %v5018_v8 }
0x3047   :  { %v5023_v38 = vmul.f32 1.442695, %v5020_v48  ;;  %v3910_v48 = vld [vmem:[#allocation4 + $0x248] sm:$0xff] }
0x3048   :  { %v5086_v50 = vpop.permute.xlu1 %5085 }
0x3049   :  { %8803 = vpow2.f32 %v5023_v38  ;;  %v5091_v51 = vsel %vm1057_vm6, %v5086_v50, 0  ;;  %v3912_v38 = vld [vmem:[#allocation4 + $0x258] sm:$0xff]  ;;  %v3909_v50 = vld [vmem:[#allocation4 + $0x240] sm:$0xff] }
0x304a   :  { %8419 = vmatpush3.bf16.msra.mxu0 %v5091_v51  ;;  %8805 = vrcp.f32 %v5027_v1  ;;  %v3911_v51 = vld [vmem:[#allocation4 + $0x250] sm:$0xff]  ;;  %v3913_v1 = vld [vmem:[#allocation4 + $0x260] sm:$0xff] }
0x3053   :  { %v8804_v11 = vpop.eup %8803 }
0x3054   :  { %v5028_v53 = vsel %vm1029_vm7, %v8804_v11, 0.0  ;;  %v8806_v3 = vpop.eup %8805 }
0x3055   :  { %5029 = vadd.xlane.f32.xlu0 %v5028_v53  ;;  %v5032_v10 = vmul.f32 %v8806_v3, %v8802_v39  ;;  %v3902_v39 = vld [vmem:[#allocation4 + $0x208] sm:$0xff]  ;;  %v3916_v53 = vld [vmem:[#allocation4 + $0x278] sm:$0xff]  ;;  %v3915_v3 = vld [vmem:[#allocation4 + $0x270] sm:$0xff] }
0x3056   :  { %5260 = vmatprep.subr.bf16.mxu0 %v3902_v39 }
0x3057   :  { %v5035_v19 = vpack.c.bf16 %v5032_v10, %v5032_v10  ;;  %v3920_v10 = vld [vmem:[#allocation4 + $0x298] sm:$0xff] }
0x306b   :  { %5037 = vrot.lane.b32.xlu0 %v10484_v46, %s9359_s25 }
0x30e2   :  { %v5030_v12 = vpop.xlane.xlu0 %5029 }
0x30e3   :  { %8807 = vrcp.f32 %v5030_v12  ;;  %v3918_v12 = vld [vmem:[#allocation4 + $0x288] sm:$0xff] }
0x30e6   :  { %v5038_v16 = vpop.permute.xlu0 %5037 }
0x30e7   :  { %v5043_v17 = vsel %vm1057_vm6, %v5038_v16, 0  ;;  %v3917_v16 = vld [vmem:[#allocation4 + $0x280] sm:$0xff] }
0x30e8   :  { %8413 = vmatpush3.bf16.msra.mxu1 %v5043_v17  ;;  %v3919_v17 = vld [vmem:[#allocation4 + $0x290] sm:$0xff] }
0x30e9   :  { %8424 = vmatprep.subr.bf16.mxu1 %v9353_v13 }
0x30eb   :  { %8415 = vmatmul.mubr.msk.bf16.vlgmr.msra.gmra.mrb[156].mxu1 %vm1029_vm7, %v5035_v19  ;;  %v3922_v19 = vld [vmem:[#allocation4 + $0x2a8] sm:$0xff] }
0x30ec   :  { %8428 = vmatprep.mubr.msk.bf16.mxu1 %vm9357_vm4, %v9353_v13  ;;  %8425 = vmatpush3.bf16.msra.mxu1 %v3899_v45  ;;  %v3926_v45 = vld [vmem:[#allocation4 + $0x2c8] sm:$0xff] }
0x30ed   :  { %v8808_v22 = vpop.eup %8807  ;;  %8426 = vmatprep.subr.bf16.mxu1 %v9353_v13 }
0x30ee   :  { %v5034_v46 = vmul.f32 %v8808_v22, %v8804_v11  ;;  %v3914_v11 = vld [vmem:[#allocation4 + $0x268] sm:$0xff]  ;;  %v3924_v22 = vld [vmem:[#allocation4 + $0x2b8] sm:$0xff] }
0x30f0   :  { %v5036_v41 = vpack.c.bf16 %v5034_v46, %v5034_v46  ;;  %8427 = vmatpush3.bf16.msra.mxu1 %v3900_v55  ;;  %v3921_v46 = vld [vmem:[#allocation4 + $0x2a0] sm:$0xff]  ;;  %v3928_v55 = vld [vmem:[#allocation4 + $0x2d8] sm:$0xff] }
0x30f1   :  { %5303 = vmatprep.subr.bf16.mxu1 %v3904_v23 }
0x30f2   :  { %8421 = vmatmul.mubr.msk.bf16.vlgmr.msra.gmra.mrb[132].mxu0 %vm1029_vm7, %v5036_v41  ;;  %v3923_v41 = vld [vmem:[#allocation4 + $0x2b0] sm:$0xff] }
0x30f3   :  { %5292 = vmatprep.mubr.bf16.mxu0 %v9316_v0  ;;  %5261 = vmatpush1.bf16.msra.mxu0 %v3901_v57  ;;  %v7451_v57 = vld [vmem:[#allocation15 + $0x2] ss:$0 sm:$0xff] }
0x30f4   :  { %5262 = vmatprep.subr.bf16.mxu0 %v3906_v37 }
0x30f7   :  { %5263 = vmatpush1.bf16.msra.mxu0 %v3905_v42 }
0x30f8   :  { %5264 = vmatprep.subr.bf16.mxu0 %v3910_v48  ;;  %v3960_v48 = vld [vmem:[#allocation5 + $0x2d8] sm:$0xff] }
0x30fb   :  { %5265 = vmatpush1.bf16.msra.mxu0 %v3909_v50  ;;  %v3952_v50 = vld [vmem:[#allocation5 + $0x298] sm:$0xff] }
0x30fc   :  { %5266 = vmatprep.subr.bf16.mxu0 %v3914_v11  ;;  %v3961_v11 = vld [vmem:[#allocation5 + $0x2e0] sm:$0xff] }
0x30ff   :  { %5267 = vmatpush1.bf16.msra.mxu0 %v3913_v1  ;;  %v3953_v1 = vld [vmem:[#allocation5 + $0x2a0] sm:$0xff] }
0x3100   :  { %5268 = vmatprep.subr.bf16.mxu0 %v3918_v12  ;;  %v3962_v12 = vld [vmem:[#allocation5 + $0x2e8] sm:$0xff] }
0x3103   :  { %5269 = vmatpush1.bf16.msra.mxu0 %v3917_v16  ;;  %v3954_v16 = vld [vmem:[#allocation5 + $0x2a8] sm:$0xff] }
0x3104   :  { %5270 = vmatprep.subr.bf16.mxu0 %v3922_v19  ;;  %v3963_v19 = vld [vmem:[#allocation5 + $0x2f0] sm:$0xff] }
0x3107   :  { %5271 = vmatpush1.bf16.msra.mxu0 %v3921_v46  ;;  %v3955_v46 = vld [vmem:[#allocation5 + $0x2b0] sm:$0xff] }
0x3108   :  { %5272 = vmatprep.subr.bf16.mxu0 %v3926_v45  ;;  %v3964_v45 = vld [vmem:[#allocation5 + $0x2f8] sm:$0xff] }
0x31be   :  { %v5079_v25 = vpop.f32.mrb[156].mxu1 }
0x31bf   :  { %v8416_v26 = vpop.f32.mrb[157].mxu1 }
0x31c0   :  { %v5082_v27 = vpop.f32.mrb[158].mxu1  ;;  %v3927_v26 = vld [vmem:[#allocation4 + $0x2d0] sm:$0xff] }
0x31c1   :  { %v8417_v7 = vpop.f32.mrb[159].mxu1  ;;  %v3930_v27 = vld [vmem:[#allocation4 + $0x2e8] sm:$0xff] }
0x31c2   :  { %v3932_v7 = vld [vmem:[#allocation4 + $0x2f8] sm:$0xff] }
0x31c5   :  { %v5127_v35 = vpop.f32.mrb[132].mxu0 }
0x31c6   :  { %v5133_v28 = vpack.c.bf16 %v5127_v35, %v5079_v25  ;;  %v8422_v33 = vpop.f32.mrb[133].mxu0  ;;  %v3925_v25 = vld [vmem:[#allocation4 + $0x2c0] sm:$0xff] }
0x31c7   :  { %v5130_v29 = vpop.f32.mrb[134].mxu0  ;;  %5273 = vmatpush1.bf16.msra.mxu0 %v3925_v25  ;;  %v3929_v35 = vld [vmem:[#allocation4 + $0x2e0] sm:$0xff]  ;;  %v3956_v25 = vld [vmem:[#allocation5 + $0x2b8] sm:$0xff] }
0x31c8   :  { %v8423_v9 = vpop.f32.mrb[135].mxu0  ;;  %8429 = vmatmul.mubr.msk.bf16.vlgmr.msra.gmra.mrb[160].mxu1 %vm932_vm5, %v5133_v28  ;;  %5274 = vmatprep.subr.bf16.mxu0 %v3930_v27  ;;  %v3931_v28 = vld [vmem:[#allocation4 + $0x2f0] sm:$0xff]  ;;  %v3941_v33 = vld [vmem:[#allocation5 + $0x240] sm:$0xff] }
0x31c9   :  { %5335 = vmatprep.mubr.bf16.mxu1 %v9316_v0  ;;  %v3957_v29 = vld [vmem:[#allocation5 + $0x2c0] sm:$0xff] }
0x31cb   :  { %5275 = vmatpush1.bf16.msra.mxu0 %v3929_v35 }
0x31cc   :  { %7803 = vmatprep.subr.bf16.mxu0 %v3941_v33 }
0x329b   :  { %v5171_v30 = vpop.f32.mrb[160].mxu1 }
0x329c   :  { %v5178_v31 = vadd.f32 %v5171_v30, %v4907_v20  ;;  %v8430_v32 = vpop.f32.mrb[161].mxu1  ;;  %v3903_v20 = vld [vmem:[#allocation4 + $0x210] sm:$0xff] }
0x329d   :  { %v5174_v2 = vpop.f32.mrb[162].mxu1  ;;  %5304 = vmatpush1.bf16.msra.mxu1 %v3903_v20 }
0x329e   :  { %v5180_v36 = vadd.f32 %v5178_v31, %v10434_v52  ;;  %v5179_v47 = vadd.f32 %v5174_v2, %v4908_v58  ;;  %v8431_v21 = vpop.f32.mrb[163].mxu1  ;;  %v3908_v52 = vld [vmem:[#allocation4 + $0x238] sm:$0xff] }
0x329f   :  { %5305 = vmatprep.subr.bf16.mxu1 %v3908_v52 }
0x32a0   :  { %v10668_v24 = vadd.f32 %v7449_v34, %v5180_v36  ;;  %v5181_v6 = vadd.f32 %v5179_v47, %v10437_v62  ;;  %v3907_v62 = vld [vmem:[#allocation4 + $0x230] sm:$0xff] }
0x32a1   :  { %5306 = vmatpush1.bf16.msra.mxu1 %v3907_v62  ;;  %v7450_v47 = vld [vmem:[#allocation13 + $0x2] ss:$0 sm:$0xff]  ;;  %v3933_v62 = vld [vmem:[#allocation5 + $0x200] sm:$0xff] }
0x32a2   :  { %v10671_v56 = vadd.f32 %v7449_v34, %v5181_v6  ;;  %5196 = vadd.xlane.f32.xlu1 %v10668_v24  ;;  %5307 = vmatprep.subr.bf16.mxu1 %v3912_v38  ;;  %v3936_v38 = vld [vmem:[#allocation5 + $0x218] sm:$0xff] }
0x32a4   :  { %5198 = vadd.xlane.f32.xlu0 %v10671_v56 }
0x32a5   :  { %5308 = vmatpush1.bf16.msra.mxu1 %v3911_v51  ;;  %v3945_v51 = vld [vmem:[#allocation5 + $0x260] sm:$0xff] }
0x32a6   :  { %5309 = vmatprep.subr.bf16.mxu1 %v3916_v53  ;;  %v3937_v53 = vld [vmem:[#allocation5 + $0x220] sm:$0xff] }
0x32a9   :  { %5310 = vmatpush1.bf16.msra.mxu1 %v3915_v3  ;;  %v3946_v3 = vld [vmem:[#allocation5 + $0x268] sm:$0xff] }
0x32aa   :  { %5311 = vmatprep.subr.bf16.mxu1 %v3920_v10  ;;  %v3938_v10 = vld [vmem:[#allocation5 + $0x228] sm:$0xff] }
0x32ad   :  { %5312 = vmatpush1.bf16.msra.mxu1 %v3919_v17  ;;  %v3947_v17 = vld [vmem:[#allocation5 + $0x270] sm:$0xff] }
0x32ae   :  { %5313 = vmatprep.subr.bf16.mxu1 %v3924_v22  ;;  %v3939_v22 = vld [vmem:[#allocation5 + $0x230] sm:$0xff] }
0x32b1   :  { %5314 = vmatpush1.bf16.msra.mxu1 %v3923_v41  ;;  %v3948_v41 = vld [vmem:[#allocation5 + $0x278] sm:$0xff] }
0x32b2   :  { %5315 = vmatprep.subr.bf16.mxu1 %v3928_v55  ;;  %v3940_v55 = vld [vmem:[#allocation5 + $0x238] sm:$0xff] }
0x32b5   :  { %5316 = vmatpush1.bf16.msra.mxu1 %v3927_v26  ;;  %v5238_v26 = vld [vmem:[#allocation16 + $0x8] sm:$0xf] }
0x32b6   :  { %5317 = vmatprep.subr.bf16.mxu1 %v3932_v7  ;;  %v5243_v27 = vrot.slane %v5238_v26, %v10158_v40  ;;  %v5251_v7 = vrot.slane %v5238_v26, %v10161_v49  ;;  %v5247_v35 = vrot.slane %v5238_v26, %v10164_v43 }
0x32b9   :  { %5318 = vmatpush1.bf16.msra.mxu1 %v3931_v28  ;;  %v5255_v28 = vrot.slane %v5238_v26, %v10167_v44 }
0x32ba   :  { %7825 = vmatprep.subr.bf16.mxu1 %v3957_v29 }
0x332f   :  { %v5197_v58 = vpop.xlane.xlu1 %5196 }
0x3330   :  { %v5200_v54 = vmul.f32 0.01, %v5197_v58  ;;  %v3949_v58 = vld [vmem:[#allocation5 + $0x280] sm:$0xff] }
0x3331   :  { %v5199_v59 = vpop.xlane.xlu0 %5198 }
0x3332   :  { %v5202_v60 = vsub.f32 %v10668_v24, %v5200_v54  ;;  %v5201_v61 = vmul.f32 0.01, %v5199_v59  ;;  %v3942_v54 = vld [vmem:[#allocation5 + $0x248] sm:$0xff] }
0x3333   :  { %v3958_v59 = vld [vmem:[#allocation5 + $0x2c8] sm:$0xff] }
0x3334   :  { %v10677_v15 = vmul.f32 %v9882_v14, %v5202_v60  ;;  %v5203_v4 = vsub.f32 %v10671_v56, %v5201_v61  ;;  %v3934_v60 = vld [vmem:[#allocation5 + $0x208] sm:$0xff] }
0x3335   :  { %v3950_v61 = vld [vmem:[#allocation5 + $0x288] sm:$0xff] }
0x3336   :  { %v10681_v63 = vmul.f32 %v9882_v14, %v5203_v4  ;;  %v5206_v5 = vmul.f32 %v10677_v15, %v10677_v15  ;;  %v3959_v4 = vld [vmem:[#allocation5 + $0x2d0] sm:$0xff] }
0x3338   :  { %5208 = vadd.xlane.f32.xlu0 %v5206_v5  ;;  %v5207_v8 = vmul.f32 %v10681_v63, %v10681_v63  ;;  %v3951_v5 = vld [vmem:[#allocation5 + $0x290] sm:$0xff] }
0x333a   :  { %5210 = vadd.xlane.f32.xlu1 %v5207_v8  ;;  %v3944_v8 = vld [vmem:[#allocation5 + $0x258] sm:$0xff] }
0x33c5   :  { %v5209_v9 = vpop.xlane.xlu0 %5208 }
0x33c6   :  { %v5212_v30 = vmul.f32 0.01, %v5209_v9 }
0x33c7   :  { %v5211_v31 = vpop.xlane.xlu1 %5210 }
0x33c8   :  { %v5214_v32 = vadd.f32 1e-05, %v5212_v30  ;;  %v5213_v34 = vmul.f32 0.01, %v5211_v31 }
0x33ca   :  { %8809 = vrsqrt.f32 %v5214_v32  ;;  %v5215_v2 = vadd.f32 1e-05, %v5213_v34 }
0x33cc   :  { %8811 = vrsqrt.f32 %v5215_v2 }
0x33d4   :  { %v8810_v36 = vpop.eup %8809 }
0x33d5   :  { %v5218_v21 = vmul.f32 %v8810_v36, %v10677_v15  ;;  %v3943_v15 = vld [vmem:[#allocation5 + $0x250] sm:$0xff] }
0x33d6   :  { %v8812_v6 = vpop.eup %8811 }
0x33d7   :  { %v5219_v39 = vmul.f32 %v8812_v6, %v10681_v63  ;;  %v5226_v23 = vmul.f32 %v7450_v47, %v5218_v21  ;;  %v3935_v63 = vld [vmem:[#allocation5 + $0x210] sm:$0xff] }
0x33d9   :  { %v5227_v20 = vmul.f32 %v7450_v47, %v5219_v39  ;;  %v5234_v37 = vadd.f32 %v7451_v57, %v5226_v23 }
0x33db   :  { %v5235_v52 = vadd.f32 %v7451_v57, %v5227_v20 }
0x33dd   :  { %v5236_v42 = vpack.c.bf16 %v5235_v52, %v5234_v37 }
0x33df   :  { %5293 = vmatmul.mubr.bf16.vlgmr.msra.gmra.mrb[136].mxu0 %v5236_v42  ;;  %5336 = vmatmul.mubr.bf16.vlgmr.msra.gmra.mrb[164].mxu1 %v5236_v42 }
0x33e0   :  { %7804 = vmatpush3.bf16.msra.mxu0 %v3933_v62  ;;  %7826 = vmatpush3.bf16.msra.mxu1 %v3949_v58 }
0x33e1   :  { %7805 = vmatprep.subr.bf16.mxu0 %v3942_v54  ;;  %7827 = vmatprep.subr.bf16.mxu1 %v3958_v59 }
0x33e4   :  { %7806 = vmatpush3.bf16.msra.mxu0 %v3934_v60  ;;  %7828 = vmatpush3.bf16.msra.mxu1 %v3950_v61 }
0x33e5   :  { %7807 = vmatprep.subr.bf16.mxu0 %v3943_v15  ;;  %7829 = vmatprep.subr.bf16.mxu1 %v3959_v4 }
0x33e8   :  { %7808 = vmatpush3.bf16.msra.mxu0 %v3935_v63  ;;  %7830 = vmatpush3.bf16.msra.mxu1 %v3951_v5 }
0x33e9   :  { %7809 = vmatprep.subr.bf16.mxu0 %v3944_v8  ;;  %7831 = vmatprep.subr.bf16.mxu1 %v3960_v48 }
0x33ec   :  { %7810 = vmatpush3.bf16.msra.mxu0 %v3936_v38  ;;  %7832 = vmatpush3.bf16.msra.mxu1 %v3952_v50 }
0x33ed   :  { %7811 = vmatprep.subr.bf16.mxu0 %v3945_v51  ;;  %7833 = vmatprep.subr.bf16.mxu1 %v3961_v11 }
0x33f0   :  { %7812 = vmatpush3.bf16.msra.mxu0 %v3937_v53  ;;  %7834 = vmatpush3.bf16.msra.mxu1 %v3953_v1 }
0x33f1   :  { %7813 = vmatprep.subr.bf16.mxu0 %v3946_v3  ;;  %7835 = vmatprep.subr.bf16.mxu1 %v3962_v12 }
0x33f4   :  { %7814 = vmatpush3.bf16.msra.mxu0 %v3938_v10  ;;  %7836 = vmatpush3.bf16.msra.mxu1 %v3954_v16 }
0x33f5   :  { %7815 = vmatprep.subr.bf16.mxu0 %v3947_v17  ;;  %7837 = vmatprep.subr.bf16.mxu1 %v3963_v19  ;;  %v7452_v17 = vld [vmem:[#allocation18 + $0x2] ss:$0 sm:$0xff] }
0x33f8   :  { %7816 = vmatpush3.bf16.msra.mxu0 %v3939_v22  ;;  %7838 = vmatpush3.bf16.msra.mxu1 %v3955_v46 }
0x33f9   :  { %7817 = vmatprep.subr.bf16.mxu0 %v3948_v41  ;;  %7839 = vmatprep.subr.bf16.mxu1 %v3964_v45 }
0x33fc   :  { %7818 = vmatpush3.bf16.msra.mxu0 %v3940_v55  ;;  %7840 = vmatpush3.bf16.msra.mxu1 %v3956_v25 }
0x34b2   :  { %v5294_v33 = vpop.f32.mrb[136].mxu0  ;;  %v5337_v29 = vpop.f32.mrb[164].mxu1 }
0x34b3   :  { %v5295_v9 = vadd.f32 %v5294_v33, %v5243_v27  ;;  %v5338_v30 = vadd.f32 %v5337_v29, %v5251_v7  ;;  %v5296_v31 = vpop.f32.mrb[137].mxu0  ;;  %v5339_v32 = vpop.f32.mrb[165].mxu1 }
0x34b4   :  { %v5297_v34 = vadd.f32 %v5296_v31, %v5247_v35  ;;  %v5340_v2 = vadd.f32 %v5339_v32, %v5255_v28  ;;  %v5298_v36 = vpop.f32.mrb[138].mxu0  ;;  %v5341_v47 = vpop.f32.mrb[166].mxu1 }
0x34b5   :  { %v5299_v21 = vadd.f32 %v5298_v36, %v5243_v27  ;;  %v5342_v6 = vadd.f32 %v5341_v47, %v5251_v7  ;;  %v5300_v39 = vpop.f32.mrb[139].mxu0  ;;  %v5343_v23 = vpop.f32.mrb[167].mxu1  ;;  %v5346_v37 = vmax.f32 %v5295_v9, 0.0  ;;  %v5348_v52 = vmax.f32 %v5338_v30, 0.0 }
0x34b6   :  { %v5301_v57 = vadd.f32 %v5300_v39, %v5247_v35  ;;  %v5344_v20 = vadd.f32 %v5343_v23, %v5255_v28  ;;  %v5347_v58 = vmax.f32 %v5297_v34, 0.0  ;;  %v5349_v54 = vmax.f32 %v5340_v2, 0.0 }
0x34b7   :  { %v5350_v42 = vmax.f32 %v5299_v21, 0.0  ;;  %v5352_v62 = vmax.f32 %v5342_v6, 0.0 }
0x34b8   :  { %v5351_v59 = vmax.f32 %v5301_v57, 0.0  ;;  %v5353_v60 = vmax.f32 %v5344_v20, 0.0 }
0x34b9   :  { %v5354_v61 = vpack.c.bf16 %v5350_v42, %v5346_v37  ;;  %v5356_v15 = vpack.c.bf16 %v5352_v62, %v5348_v52 }
0x34ba   :  { %v5355_v4 = vpack.c.bf16 %v5351_v59, %v5347_v58  ;;  %v5357_v63 = vpack.c.bf16 %v5353_v60, %v5349_v54 }
0x34bc   :  { %5390 = vmatprep.mubr.bf16.mxu0 %v5355_v4  ;;  %5431 = vmatprep.mubr.bf16.mxu1 %v5357_v63 }
0x34bd   :  { %5391 = vmatmul.mubr.bf16.vlgmr.msra.gmra.mrb[140].mxu0 %v5354_v61  ;;  %5432 = vmatmul.mubr.bf16.vlgmr.msra.gmra.mrb[168].mxu1 %v5356_v15 }
0x3590   :  { %v7819_v5 = vpop.f32.mrb[140].mxu0  ;;  %v7841_v8 = vpop.f32.mrb[168].mxu1 }
0x3591   :  { %v7820_v48 = vpop.f32.mrb[141].mxu0  ;;  %v7842_v38 = vpop.f32.mrb[169].mxu1 }
0x3592   :  { %v7821_v50 = vadd.f32 %v7820_v48, %v7819_v5  ;;  %v7843_v51 = vadd.f32 %v7842_v38, %v7841_v8  ;;  %v7822_v11 = vpop.f32.mrb[142].mxu0  ;;  %v7844_v53 = vpop.f32.mrb[170].mxu1 }
0x3593   :  { %v7823_v1 = vpop.f32.mrb[143].mxu0  ;;  %v7845_v3 = vpop.f32.mrb[171].mxu1 }
0x3594   :  { %v5434_v12 = vadd.f32 %v7843_v51, %v7821_v50  ;;  %v7824_v10 = vadd.f32 %v7823_v1, %v7822_v11  ;;  %v7846_v16 = vadd.f32 %v7845_v3, %v7844_v53 }
0x3596   :  { %v5440_v19 = vadd.f32 %v5434_v12, %v10668_v24  ;;  %v5437_v22 = vadd.f32 %v7846_v16, %v7824_v10 }
0x3598   :  { %v10694_v46 = vadd.f32 %v7452_v17, %v5440_v19  ;;  %v5441_v41 = vadd.f32 %v5437_v22, %v10671_v56 }
0x359a   :  { %v10697_v45 = vadd.f32 %v7452_v17, %v5441_v41 }
0x359b   :  { %9291 = dma.done.wait [#allocation6 + $0xc], 3072 }
0x359c   :  { %9292 = vsyncadd [#allocation6 + $0xc], 4294964224 }
0x359d   :  { %9293 = dma.done.wait [#allocation6 + $0xd], 1024 }
0x359e   :  { %9294 = vsyncadd [#allocation6 + $0xd], 4294966272 }
0x359f   :  { %9295 = dma.done.wait [#allocation6 + $0xe], 4096 }
0x35a0   :  { %9296 = vsyncadd [#allocation6 + $0xe], 4294963200  ;;  %5560 = vadd.xlane.f32.xlu0 %v10694_v46 }
0x35a1   :  { %9297 = dma.done.wait [#allocation6 + $0xf], 4096 }
0x35a2   :  { %9298 = vsyncadd [#allocation6 + $0xf], 4294963200  ;;  %8432 = vmatprep.subr.bf16.mxu1 %v9353_v13  ;;  %5633 = vmatprep.mubr.bf16.mxu0 %v9316_v0  ;;  %v5461_v24 = vld [vmem:[#allocation2 + $0x248] sm:$0xff]  ;;  %v5460_v56 = vld [vmem:[#allocation2 + $0x240] sm:$0xff]  ;;  %s11090_s11 = sld [smem:[#allocation86_spill]]  ;;  %s11091_s3 = sld [smem:[#allocation84_spill]] }
0x35a3   :  { %8448 = vmatprep.mubr.msk.bf16.mxu1 %vm9357_vm4, %v9353_v13  ;;  %v5462_v55 = vld [vmem:[#allocation2 + $0x250] sm:$0xff]  ;;  %5601 = vmatprep.subr.bf16.mxu0 %v5461_v24  ;;  %v5464_v31 = vld [vmem:[#allocation2 + $0x260] sm:$0xff]  ;;  %v5463_v32 = vld [vmem:[#allocation2 + $0x258] sm:$0xff]  ;;  %s11092_s8 = sld [smem:[#allocation85_spill]]  ;;  %s9360_s17 = smov [#allocation21]  }
0x35a4   :  { %5562 = vadd.xlane.f32.xlu0 %v10697_v45  ;;  %8433 = vmatpush3.bf16.msra.mxu1 %v5462_v55  ;;  %v5465_v34 = vld [vmem:[#allocation2 + $0x268] sm:$0xff]  ;;  %v5467_v2 = vld [vmem:[#allocation2 + $0x278] sm:$0xff]  ;;  %v5466_v36 = vld [vmem:[#allocation2 + $0x270] sm:$0xff]  ;;  %s7205_s16 = sshll.u32 %s9360_s17, 4  ;;  %s7206_s16 = int_to_ptr.vmem [resolvable:$true] %s7205_s16 }
0x35a5   :  { %5602 = vmatpush1.bf16.msra.mxu0 %v5460_v56  ;;  %8434 = vmatprep.subr.bf16.mxu1 %v9353_v13  ;;  %v5468_v47 = vld [vmem:[#allocation2 + $0x280] sm:$0xff]  ;;  %v5470_v21 = vld [vmem:[#allocation2 + $0x290] sm:$0xff]  ;;  %v5469_v6 = vld [vmem:[#allocation2 + $0x288] sm:$0xff]  ;;  %s9235_s13 = scalar_lea.vmem %s7206_s16, 256  ;;  %p9240_p4 = scmp.lt.s32.totalorder %s7206_s16, %s7206_s16 }
0x35a6   :  { %5603 = vmatprep.subr.bf16.mxu0 %v5464_v31  ;;  %v5471_v39 = vld [vmem:[#allocation2 + $0x298] sm:$0xff]  ;;  %v5473_v23 = vld [vmem:[#allocation2 + $0x2a8] sm:$0xff]  ;;  %v5472_v57 = vld [vmem:[#allocation2 + $0x2a0] sm:$0xff]  ;;  %p9236_p6 = scmp.ne.s32.totalorder %s7206_s16, %s9235_s13  ;;  %p9241_p5 = scmp.lt.s32.totalorder %s9235_s13, %s9235_s13 }
0x35a7   :  { %v5474_v20 = vld [vmem:[#allocation2 + $0x2b0] sm:$0xff]  ;;  %v5476_v37 = vld [vmem:[#allocation2 + $0x2c0] sm:$0xff]  ;;  %v5475_v52 = vld [vmem:[#allocation2 + $0x2b8] sm:$0xff] }
0x35a8   :  { %8435 = vmatpush3.bf16.msra.mxu1 %v5465_v34  ;;  %v5477_v42 = vld [vmem:[#allocation2 + $0x2c8] sm:$0xff]  ;;  %v5479_v62 = vld [vmem:[#allocation2 + $0x2d8] sm:$0xff]  ;;  %v5478_v58 = vld [vmem:[#allocation2 + $0x2d0] sm:$0xff]  ;;  %p9242_p13 = por %p9241_p5, %p9240_p4 }
0x35a9   :  { %5604 = vmatpush1.bf16.msra.mxu0 %v5463_v32  ;;  %8436 = vmatprep.subr.bf16.mxu1 %v9353_v13  ;;  %v5480_v54 = vld [vmem:[#allocation2 + $0x2e0] sm:$0xff]  ;;  %v5482_v59 = vld [vmem:[#allocation2 + $0x2f0] sm:$0xff]  ;;  %v5481_v60 = vld [vmem:[#allocation2 + $0x2e8] sm:$0xff] }
0x35aa   :  { %5605 = vmatprep.subr.bf16.mxu0 %v5467_v2  ;;  %v5483_v61 = vld [vmem:[#allocation2 + $0x2f8] sm:$0xff]  ;;  %v7454_v51 = vld [vmem:[%s11088_s23 + $0x3] ss:$0 sm:$0xff]  ;;  %v7455_v3 = vld [vmem:[#allocation12 + $0x3] ss:$0 sm:$0xff]  ;;  %p9243_p7 = pnand %p9242_p13, %p9236_p6 }
0x35ac   :  { %8437 = vmatpush3.bf16.msra.mxu1 %v5468_v47 }
0x35ad   :  { %5606 = vmatpush1.bf16.msra.mxu0 %v5466_v36  ;;  %8438 = vmatprep.subr.bf16.mxu1 %v9353_v13 }
0x35ae   :  { %5607 = vmatprep.subr.bf16.mxu0 %v5470_v21 }
0x35b0   :  { %8439 = vmatpush3.bf16.msra.mxu1 %v5471_v39 }
0x35b1   :  { %5608 = vmatpush1.bf16.msra.mxu0 %v5469_v6  ;;  %8440 = vmatprep.subr.bf16.mxu1 %v9353_v13 }
0x35b2   :  { %5609 = vmatprep.subr.bf16.mxu0 %v5473_v23 }
0x35b4   :  { %8441 = vmatpush3.bf16.msra.mxu1 %v5474_v20 }
0x35b5   :  { %5610 = vmatpush1.bf16.msra.mxu0 %v5472_v57  ;;  %8442 = vmatprep.subr.bf16.mxu1 %v9353_v13 }
0x35b6   :  { %5611 = vmatprep.subr.bf16.mxu0 %v5476_v37 }
0x35b8   :  { %8443 = vmatpush3.bf16.msra.mxu1 %v5477_v42 }
0x35b9   :  { %5612 = vmatpush1.bf16.msra.mxu0 %v5475_v52  ;;  %8444 = vmatprep.subr.bf16.mxu1 %v9353_v13 }
0x35ba   :  { %5613 = vmatprep.subr.bf16.mxu0 %v5479_v62 }
0x35bc   :  { %8445 = vmatpush3.bf16.msra.mxu1 %v5480_v54 }
0x35bd   :  { %5614 = vmatpush1.bf16.msra.mxu0 %v5478_v58  ;;  %8446 = vmatprep.subr.bf16.mxu1 %v9353_v13 }
0x35be   :  { %5615 = vmatprep.subr.bf16.mxu0 %v5482_v59 }
0x35c0   :  { %8447 = vmatpush3.bf16.msra.mxu1 %v5483_v61 }
0x35c1   :  { %5616 = vmatpush1.bf16.msra.mxu0 %v5481_v60  ;;  %8458 = vmatprep.subr.bf16.mxu1 %v9353_v13 }
0x35c2   :  { %8452 = vmatprep.subr.bf16.mxu0 %v9353_v13 }
0x362d   :  { %v5561_v25 = vpop.xlane.xlu0 %5560 }
0x362e   :  { %v5564_v26 = vmul.f32 0.01, %v5561_v25 }
0x3630   :  { %v5566_v27 = vsub.f32 %v10694_v46, %v5564_v26 }
0x3631   :  { %v5563_v7 = vpop.xlane.xlu0 %5562 }
0x3632   :  { %v10708_v35 = vmul.f32 %v9882_v14, %v5566_v27  ;;  %v5565_v28 = vmul.f32 0.01, %v5563_v7 }
0x3634   :  { %v5567_v33 = vsub.f32 %v10697_v45, %v5565_v28  ;;  %v5570_v29 = vmul.f32 %v10708_v35, %v10708_v35 }
0x3636   :  { %v10714_v9 = vmul.f32 %v9882_v14, %v5567_v33  ;;  %5572 = vadd.xlane.f32.xlu1 %v5570_v29 }
0x3638   :  { %v5571_v30 = vmul.f32 %v10714_v9, %v10714_v9 }
0x363a   :  { %5574 = vadd.xlane.f32.xlu1 %v5571_v30 }
0x36c3   :  { %v5573_v15 = vpop.xlane.xlu1 %5572 }
0x36c4   :  { %v5576_v4 = vmul.f32 0.01, %v5573_v15 }
0x36c6   :  { %v5578_v63 = vadd.f32 1e-05, %v5576_v4 }
0x36c7   :  { %v5575_v5 = vpop.xlane.xlu1 %5574 }
0x36c8   :  { %8821 = vrsqrt.f32 %v5578_v63  ;;  %v5577_v8 = vmul.f32 0.01, %v5575_v5 }
0x36ca   :  { %v5579_v48 = vadd.f32 1e-05, %v5577_v8 }
0x36cc   :  { %8823 = vrsqrt.f32 %v5579_v48 }
0x36d2   :  { %v8822_v38 = vpop.eup %8821 }
0x36d3   :  { %v5582_v50 = vmul.f32 %v8822_v38, %v10708_v35 }
0x36d5   :  { %v5590_v1 = vmul.f32 %v7454_v51, %v5582_v50 }
0x36d6   :  { %v8824_v11 = vpop.eup %8823 }
0x36d7   :  { %v5583_v53 = vmul.f32 %v8824_v11, %v10714_v9  ;;  %v5598_v10 = vadd.f32 %v7455_v3, %v5590_v1 }
0x36d9   :  { %v5591_v12 = vmul.f32 %v7454_v51, %v5583_v53 }
0x36db   :  { %v5599_v16 = vadd.f32 %v7455_v3, %v5591_v12 }
0x36dd   :  { %v5600_v17 = vpack.c.bf16 %v5599_v16, %v5598_v10 }
0x36df   :  { %5634 = vmatmul.mubr.bf16.vlgmr.msra.gmra.mrb[144].mxu0 %v5600_v17  ;;  %8449 = vmatmul.mubr.bf16.vlgmr.msra.gmra.mrb[172].mxu1 %v5600_v17 }
0x36e0   :  { %8454 = vmatprep.mubr.msk.bf16.mxu0 %vm9357_vm4, %v9353_v13  ;;  %8460 = vmatprep.mubr.msk.bf16.mxu1 %vm9357_vm4, %v9353_v13 }
0x37b2   :  { %v5635_v19 = vpop.f32.mrb[144].mxu0  ;;  %v5678_v22 = vpop.f32.mrb[172].mxu1 }
0x37b3   :  { %v5637_v41 = vpop.f32.mrb[145].mxu0  ;;  %v8450_v24 = vpop.f32.mrb[173].mxu1  ;;  %v10744_v33 = vpack.c.bf16 %v5678_v22, %v5678_v22  ;;  %v10747_v29 = vpack.c.bf16 %v5635_v19, %v5635_v19 }
0x37b4   :  { %v10735_v56 = vpack.c.bf16 %v5637_v41, %v5637_v41  ;;  %v5639_v55 = vpop.f32.mrb[146].mxu0  ;;  %v5681_v25 = vpop.f32.mrb[174].mxu1 }
0x37b5   :  { %v5641_v26 = vpop.f32.mrb[147].mxu0  ;;  %v8451_v27 = vpop.f32.mrb[175].mxu1  ;;  %v10749_v9 = vpack.c.bf16 %v5681_v25, %v5681_v25  ;;  %v10751_v30 = vpack.c.bf16 %v5639_v55, %v5639_v55  ;;  %v5827_v31 = vsel %vm1057_vm6, %v10744_v33, 0 }
0x37b6   :  { %v10737_v7 = vpack.c.bf16 %v5641_v26, %v5641_v26  ;;  %v5707_v35 = vsel %vm932_vm5, %v10735_v56, 0 }
0x37b7   :  { %8453 = vmatpush3.bf16.xpose.msra.mxu0 %v5707_v35  ;;  %v5873_v32 = vsel %vm1057_vm6, %v10749_v9, 0 }
0x37b8   :  { %v5753_v28 = vsel %vm932_vm5, %v10737_v7, 0  ;;  %8464 = vmatprep.subr.bf16.mxu0 %v9353_v13 }
0x37b9   :  { %8459 = vmatpush3.bf16.xpose.msra.mxu1 %v5753_v28 }
0x37ba   :  { %8470 = vmatprep.subr.bf16.mxu1 %v9353_v13 }
0x37be   :  { %8455 = vmatmul.mubr.msk.bf16.vlgmr.msra.gmra.mrb[148].mxu0 %vm932_vm5, %v10747_v29 }
0x37bf   :  { %8465 = vmatpush3.bf16.msra.mxu0 %v5827_v31  ;;  %8466 = vmatprep.mubr.msk.bf16.mxu0 %vm9357_vm4, %v9353_v13 }
0x37c0   :  { %8461 = vmatmul.mubr.msk.bf16.vlgmr.msra.gmra.mrb[176].mxu1 %vm932_vm5, %v10751_v30  ;;  %8476 = vmatprep.subr.bf16.mxu0 %v9353_v13 }
0x37c1   :  { %8471 = vmatpush3.bf16.msra.mxu1 %v5873_v32  ;;  %8472 = vmatprep.mubr.msk.bf16.mxu1 %vm9357_vm4, %v9353_v13 }
0x37c2   :  { %8482 = vmatprep.subr.bf16.mxu1 %v9353_v13 }
0x3891   :  { %v5743_v34 = vpop.f32.mrb[148].mxu0 }
0x3892   :  { %v5795_v2 = vmul.f32 0.2, %v5743_v34  ;;  %v8456_v36 = vpop.f32.mrb[149].mxu0 }
0x3893   :  { %v5746_v47 = vpop.f32.mrb[150].mxu0  ;;  %v5789_v21 = vpop.f32.mrb[176].mxu1 }
0x3894   :  { %v5797_v6 = vadd.f32 %v5795_v2, %v9887_v18  ;;  %v5796_v39 = vmul.f32 0.2, %v5789_v21  ;;  %v8457_v23 = vpop.f32.mrb[151].mxu0  ;;  %v8462_v57 = vpop.f32.mrb[177].mxu1 }
0x3895   :  { %v5792_v20 = vpop.f32.mrb[178].mxu1 }
0x3896   :  { %v5798_v37 = vadd.f32 %v5796_v39, %v9887_v18  ;;  %v8463_v52 = vpop.f32.mrb[179].mxu1  ;;  %v5799_v42 = vsel %vm1029_vm7, %v5797_v6, -inf }
0x3897   :  { %5800 = vmax.xlane.f32.xlu0 %v5799_v42 }
0x3898   :  { %v5802_v62 = vsel %vm1029_vm7, %v5798_v37, -inf }
0x3899   :  { %5803 = vmax.xlane.f32.xlu1 %v5802_v62 }
0x38aa   :  { %5968 = vrot.lane.b32.xlu1 %v10737_v7, %s9358_s12 }
0x3924   :  { %v5801_v58 = vpop.xlane.xlu0 %5800 }
0x3925   :  { %v5805_v54 = vsub.f32 %v5797_v6, %v5801_v58 }
0x3926   :  { %v5804_v59 = vpop.xlane.xlu1 %5803 }
0x3927   :  { %v5807_v60 = vmul.f32 1.442695, %v5805_v54  ;;  %v5806_v61 = vsub.f32 %v5798_v37, %v5804_v59 }
0x3929   :  { %8825 = vpow2.f32 %v5807_v60  ;;  %v5809_v15 = vmul.f32 1.442695, %v5806_v61 }
0x392a   :  { %v5969_v48 = vpop.permute.xlu1 %5968 }
0x392b   :  { %8827 = vpow2.f32 %v5809_v15  ;;  %v5974_v17 = vsel %vm932_vm5, %v5969_v48, 0 }
0x3933   :  { %v8826_v4 = vpop.eup %8825 }
0x3934   :  { %v5811_v63 = vsel %vm1029_vm7, %v8826_v4, 0.0 }
0x3935   :  { %v8828_v5 = vpop.eup %8827  ;;  %5812 = vadd.xlane.f32.xlu0 %v5811_v63 }
0x3936   :  { %v5814_v8 = vsel %vm1029_vm7, %v8828_v5, 0.0 }
0x3937   :  { %5815 = vadd.xlane.f32.xlu1 %v5814_v8 }
0x3948   :  { %5916 = vrot.lane.b32.xlu1 %v10747_v29, %s9358_s12 }
0x394b   :  { %5918 = vrot.lane.b32.xlu0 %v10735_v56, %s9358_s12 }
0x394c   :  { %5966 = vrot.lane.b32.xlu1 %v10751_v30, %s9358_s12 }
0x39c2   :  { %v5813_v38 = vpop.xlane.xlu0 %5812 }
0x39c3   :  { %8829 = vrcp.f32 %v5813_v38 }
0x39c4   :  { %v5816_v50 = vpop.xlane.xlu1 %5815 }
0x39c5   :  { %8831 = vrcp.f32 %v5816_v50 }
0x39c6   :  { %v5919_v1 = vpop.permute.xlu0 %5918 }
0x39c7   :  { %v5924_v10 = vsel %vm932_vm5, %v5919_v1, 0 }
0x39c8   :  { %v5917_v19 = vpop.permute.xlu1 %5916 }
0x39cc   :  { %v5967_v22 = vpop.permute.xlu1 %5966 }
0x39cd   :  { %v8830_v51 = vpop.eup %8829 }
0x39ce   :  { %v5818_v11 = vmul.f32 %v8830_v51, %v8826_v4 }
0x39cf   :  { %v8832_v53 = vpop.eup %8831 }
0x39d0   :  { %v5821_v3 = vpack.c.bf16 %v5818_v11, %v5818_v11  ;;  %v5820_v12 = vmul.f32 %v8832_v53, %v8828_v5 }
0x39d2   :  { %8467 = vmatmul.mubr.msk.bf16.vlgmr.msra.gmra.mrb[152].mxu0 %vm1029_vm7, %v5821_v3  ;;  %v5822_v16 = vpack.c.bf16 %v5820_v12, %v5820_v12  ;;  %v5486_v12 = vld [vmem:[#allocation3 + $0xd0] sm:$0xff] }
0x39d3   :  { %8477 = vmatpush3.bf16.xpose.msra.mxu0 %v5924_v10  ;;  %8478 = vmatprep.mubr.msk.bf16.mxu0 %vm9357_vm4, %v9353_v13 }
0x39d4   :  { %8473 = vmatmul.mubr.msk.bf16.vlgmr.msra.gmra.mrb[180].mxu1 %vm1029_vm7, %v5822_v16  ;;  %8488 = vmatprep.subr.bf16.mxu0 %v9353_v13 }
0x39d5   :  { %8483 = vmatpush3.bf16.xpose.msra.mxu1 %v5974_v17  ;;  %8484 = vmatprep.mubr.msk.bf16.mxu1 %vm9357_vm4, %v9353_v13 }
0x39d6   :  { %8494 = vmatprep.subr.bf16.mxu1 %v9353_v13 }
0x39da   :  { %8479 = vmatmul.mubr.msk.bf16.vlgmr.msra.gmra.mrb[156].mxu0 %vm932_vm5, %v5917_v19  ;;  %v5484_v19 = vld [vmem:[#allocation3 + $0xc0] sm:$0xff] }
0x39db   :  { %8490 = vmatprep.mubr.msk.bf16.mxu0 %vm9357_vm4, %v9353_v13 }
0x39dc   :  { %8485 = vmatmul.mubr.msk.bf16.vlgmr.msra.gmra.mrb[184].mxu1 %vm932_vm5, %v5967_v22  ;;  %v5487_v22 = vld [vmem:[#allocation3 + $0xd8] sm:$0xff] }
0x39dd   :  { %8496 = vmatprep.mubr.msk.bf16.mxu1 %vm9357_vm4, %v9353_v13 }
0x3aa5   :  { %v10797_v41 = vpop.f32.mrb[152].mxu0 }
0x3aa6   :  { %v8468_v24 = vpop.f32.mrb[153].mxu0 }
0x3aa7   :  { %v5866_v55 = vpop.f32.mrb[154].mxu0  ;;  %v10799_v25 = vpop.f32.mrb[180].mxu1  ;;  %v5485_v24 = vld [vmem:[#allocation3 + $0xc8] sm:$0xff] }
0x3aa8   :  { %v5915_v26 = vpack.c.bf16 %v10799_v25, %v10797_v41  ;;  %v8469_v27 = vpop.f32.mrb[155].mxu0  ;;  %v8474_v35 = vpop.f32.mrb[181].mxu1 }
0x3aa9   :  { %v5912_v28 = vpop.f32.mrb[182].mxu1 }
0x3aaa   :  { %v8475_v31 = vpop.f32.mrb[183].mxu1 }
0x3aad   :  { %v5960_v32 = vpop.f32.mrb[156].mxu0 }
0x3aae   :  { %v6016_v34 = vmul.f32 0.2, %v5960_v32  ;;  %v8480_v2 = vpop.f32.mrb[157].mxu0 }
0x3aaf   :  { %v5963_v36 = vpop.f32.mrb[158].mxu0  ;;  %v6010_v47 = vpop.f32.mrb[184].mxu1 }
0x3ab0   :  { %v6018_v21 = vadd.f32 %v6016_v34, %v9887_v18  ;;  %v6017_v6 = vmul.f32 0.2, %v6010_v47  ;;  %v8481_v39 = vpop.f32.mrb[159].mxu0  ;;  %v8486_v23 = vpop.f32.mrb[185].mxu1 }
0x3ab1   :  { %v6013_v57 = vpop.f32.mrb[186].mxu1 }
0x3ab2   :  { %v6019_v20 = vadd.f32 %v6017_v6, %v9887_v18  ;;  %v8487_v37 = vpop.f32.mrb[187].mxu1  ;;  %v6020_v52 = vsel %vm1029_vm7, %v6018_v21, -inf }
0x3ab3   :  { %6021 = vmax.xlane.f32.xlu0 %v6020_v52 }
0x3ab4   :  { %v6023_v42 = vsel %vm1029_vm7, %v6019_v20, -inf }
0x3ab5   :  { %6024 = vmax.xlane.f32.xlu1 %v6023_v42 }
0x3ac6   :  { %6092 = vrot.lane.b32.xlu1 %v10749_v9, %s9358_s12 }
0x3aca   :  { %6231 = vrot.lane.b32.xlu1 %v10735_v56, %s11081_s18 }
0x3ace   :  { %6281 = vrot.lane.b32.xlu1 %v10737_v7, %s11081_s18 }
0x3ad2   :  { %6279 = vrot.lane.b32.xlu1 %v10751_v30, %s11081_s18 }
0x3b40   :  { %v6022_v62 = vpop.xlane.xlu0 %6021 }
0x3b41   :  { %v6026_v58 = vsub.f32 %v6018_v21, %v6022_v62 }
0x3b42   :  { %v6025_v54 = vpop.xlane.xlu1 %6024 }
0x3b43   :  { %v6028_v59 = vmul.f32 1.442695, %v6026_v58  ;;  %v6027_v60 = vsub.f32 %v6019_v20, %v6025_v54 }
0x3b45   :  { %8833 = vpow2.f32 %v6028_v59  ;;  %v6030_v61 = vmul.f32 1.442695, %v6027_v60 }
0x3b46   :  { %v6093_v15 = vpop.permute.xlu1 %6092 }
0x3b47   :  { %8835 = vpow2.f32 %v6030_v61  ;;  %v6098_v4 = vsel %vm1057_vm6, %v6093_v15, 0 }
0x3b48   :  { %8495 = vmatpush3.bf16.msra.mxu1 %v6098_v4 }
0x3b49   :  { %8508 = vmatprep.subr.bf16.mxu1 %v9353_v13 }
0x3b4a   :  { %v6232_v55 = vpop.permute.xlu1 %6231 }
0x3b4b   :  { %v6237_v47 = vsel %vm932_vm5, %v6232_v55, 0 }
0x3b4e   :  { %v6282_v27 = vpop.permute.xlu1 %6281 }
0x3b4f   :  { %v8834_v63 = vpop.eup %8833  ;;  %v6287_v35 = vsel %vm932_vm5, %v6282_v27, 0 }
0x3b50   :  { %v6032_v5 = vsel %vm1029_vm7, %v8834_v63, 0.0 }
0x3b51   :  { %v8836_v8 = vpop.eup %8835  ;;  %6033 = vadd.xlane.f32.xlu0 %v6032_v5 }
0x3b52   :  { %v6035_v48 = vsel %vm1029_vm7, %v8836_v8, 0.0  ;;  %v6280_v28 = vpop.permute.xlu1 %6279 }
0x3b55   :  { %6036 = vadd.xlane.f32.xlu0 %v6035_v48 }
0x3b6b   :  { %6044 = vrot.lane.b32.xlu0 %v10744_v33, %s9358_s12 }
0x3b6f   :  { %6229 = vrot.lane.b32.xlu0 %v10747_v29, %s11081_s18 }
0x3bde   :  { %v6034_v38 = vpop.xlane.xlu0 %6033 }
0x3bdf   :  { %8837 = vrcp.f32 %v6034_v38 }
0x3be2   :  { %v6037_v50 = vpop.xlane.xlu0 %6036 }
0x3be3   :  { %8839 = vrcp.f32 %v6037_v50 }
0x3be6   :  { %v6045_v51 = vpop.permute.xlu0 %6044 }
0x3be7   :  { %v6050_v11 = vsel %vm1057_vm6, %v6045_v51, 0 }
0x3be8   :  { %8489 = vmatpush3.bf16.msra.mxu0 %v6050_v11 }
0x3be9   :  { %v8838_v53 = vpop.eup %8837  ;;  %8500 = vmatprep.subr.bf16.mxu0 %v9353_v13 }
0x3bea   :  { %v6039_v1 = vmul.f32 %v8838_v53, %v8834_v63  ;;  %v6230_v23 = vpop.permute.xlu0 %6229 }
0x3bec   :  { %v6042_v3 = vpack.c.bf16 %v6039_v1, %v6039_v1 }
0x3bed   :  { %v8840_v10 = vpop.eup %8839 }
0x3bee   :  { %8491 = vmatmul.mubr.msk.bf16.vlgmr.msra.gmra.mrb[160].mxu0 %vm1029_vm7, %v6042_v3  ;;  %v6041_v16 = vmul.f32 %v8840_v10, %v8836_v8 }
0x3bef   :  { %8501 = vmatpush3.bf16.msra.mxu0 %v5486_v12  ;;  %8504 = vmatprep.mubr.msk.bf16.mxu0 %vm9357_vm4, %v9353_v13 }
0x3bf0   :  { %v6043_v17 = vpack.c.bf16 %v6041_v16, %v6041_v16  ;;  %8502 = vmatprep.subr.bf16.mxu0 %v9353_v13 }
0x3bf2   :  { %8497 = vmatmul.mubr.msk.bf16.vlgmr.msra.gmra.mrb[188].mxu1 %vm1029_vm7, %v6043_v17 }
0x3bf3   :  { %8509 = vmatpush3.bf16.msra.mxu1 %v5484_v19  ;;  %8512 = vmatprep.mubr.msk.bf16.mxu1 %vm9357_vm4, %v9353_v13 }
0x3bf4   :  { %8510 = vmatprep.subr.bf16.mxu1 %v9353_v13  ;;  %8503 = vmatpush3.bf16.msra.mxu0 %v5487_v22 }
0x3bf5   :  { %8516 = vmatprep.subr.bf16.mxu0 %v9353_v13 }
0x3bf7   :  { %8511 = vmatpush3.bf16.msra.mxu1 %v5485_v24 }
0x3bf8   :  { %8522 = vmatprep.subr.bf16.mxu1 %v9353_v13 }
0x3bfa   :  { %8513 = vmatmul.mubr.msk.bf16.vlgmr.msra.gmra.mrb[192].mxu1 %vm932_vm5, %v5915_v26 }
0x3bfb   :  { %8524 = vmatprep.mubr.msk.bf16.mxu1 %vm9357_vm4, %v9353_v13 }
0x3c00   :  { %8523 = vmatpush3.bf16.xpose.msra.mxu1 %v6287_v35 }
0x3c01   :  { %8534 = vmatprep.subr.bf16.mxu1 %v9353_v13 }
0x3c07   :  { %8525 = vmatmul.mubr.msk.bf16.vlgmr.msra.gmra.mrb[196].mxu1 %vm932_vm5, %v6280_v28 }
0x3c08   :  { %8536 = vmatprep.mubr.msk.bf16.mxu1 %vm9357_vm4, %v9353_v13 }
0x3cc1   :  { %v6086_v31 = vpop.f32.mrb[160].mxu0 }
0x3cc2   :  { %v8492_v32 = vpop.f32.mrb[161].mxu0 }
0x3cc3   :  { %v6089_v41 = vpop.f32.mrb[162].mxu0 }
0x3cc4   :  { %v8493_v25 = vpop.f32.mrb[163].mxu0 }
0x3cc5   :  { %v6134_v26 = vpop.f32.mrb[188].mxu1 }
0x3cc6   :  { %v6140_v34 = vpack.c.bf16 %v6134_v26, %v6086_v31  ;;  %v8498_v2 = vpop.f32.mrb[189].mxu1 }
0x3cc7   :  { %v6137_v36 = vpop.f32.mrb[190].mxu1 }
0x3cc8   :  { %v8499_v21 = vpop.f32.mrb[191].mxu1  ;;  %8505 = vmatmul.mubr.msk.bf16.vlgmr.msra.gmra.mrb[164].mxu0 %vm932_vm5, %v6140_v34 }
0x3cc9   :  { %8517 = vmatpush3.bf16.xpose.msra.mxu0 %v6237_v47  ;;  %8518 = vmatprep.mubr.msk.bf16.mxu0 %vm9357_vm4, %v9353_v13  ;;  %v5488_v21 = vld [vmem:[#allocation3 + $0xe0] sm:$0xff] }
0x3cca   :  { %8528 = vmatprep.subr.bf16.mxu0 %v9353_v13 }
0x3ccd   :  { %v6222_v6 = vpop.f32.mrb[192].mxu1 }
0x3cce   :  { %v8514_v39 = vpop.f32.mrb[193].mxu1 }
0x3ccf   :  { %v6225_v57 = vpop.f32.mrb[194].mxu1 }
0x3cd0   :  { %v8515_v20 = vpop.f32.mrb[195].mxu1  ;;  %8519 = vmatmul.mubr.msk.bf16.vlgmr.msra.gmra.mrb[168].mxu0 %vm932_vm5, %v6230_v23 }
0x3cd1   :  { %8530 = vmatprep.mubr.msk.bf16.mxu0 %vm9357_vm4, %v9353_v13 }
0x3cda   :  { %v6323_v37 = vpop.f32.mrb[196].mxu1 }
0x3cdb   :  { %v6330_v52 = vmul.f32 0.2, %v6323_v37  ;;  %v8526_v42 = vpop.f32.mrb[197].mxu1 }
0x3cdc   :  { %v6326_v62 = vpop.f32.mrb[198].mxu1 }
0x3cdd   :  { %v6332_v58 = vadd.f32 %v6330_v52, %v9887_v18  ;;  %v8527_v54 = vpop.f32.mrb[199].mxu1 }
0x3cdf   :  { %v6336_v59 = vsel %vm1029_vm7, %v6332_v58, -inf }
0x3ce0   :  { %6337 = vmax.xlane.f32.xlu1 %v6336_v59 }
0x3cf1   :  { %6405 = vrot.lane.b32.xlu1 %v10749_v9, %s11081_s18 }
0x3cf5   :  { %6502 = vrot.lane.b32.xlu1 %v10735_v56, %s9359_s25 }
0x3cf9   :  { %6552 = vrot.lane.b32.xlu1 %v10737_v7, %s9359_s25 }
0x3cfd   :  { %6550 = vrot.lane.b32.xlu1 %v10751_v30, %s9359_s25 }
0x3d6d   :  { %v6338_v60 = vpop.xlane.xlu1 %6337 }
0x3d6e   :  { %v6340_v4 = vsub.f32 %v6332_v58, %v6338_v60 }
0x3d70   :  { %v6343_v63 = vmul.f32 1.442695, %v6340_v4 }
0x3d71   :  { %v6406_v61 = vpop.permute.xlu1 %6405 }
0x3d72   :  { %v6411_v15 = vsel %vm1057_vm6, %v6406_v61, 0  ;;  %8841 = vpow2.f32 %v6343_v63 }
0x3d73   :  { %8535 = vmatpush3.bf16.msra.mxu1 %v6411_v15 }
0x3d74   :  { %8548 = vmatprep.subr.bf16.mxu1 %v9353_v13 }
0x3d75   :  { %v6503_v28 = vpop.permute.xlu1 %6502 }
0x3d76   :  { %v6508_v32 = vsel %vm932_vm5, %v6503_v28, 0 }
0x3d79   :  { %v6553_v59 = vpop.permute.xlu1 %6552 }
0x3d7a   :  { %v6558_v63 = vsel %vm932_vm5, %v6553_v59, 0 }
0x3d7c   :  { %v8842_v12 = vpop.eup %8841 }
0x3d7d   :  { %v6348_v10 = vsel %vm1029_vm7, %v8842_v12, 0.0 }
0x3d9b   :  { %v6178_v5 = vpop.f32.mrb[164].mxu0 }
0x3d9c   :  { %v10866_v8 = vadd.f32 %v6222_v6, %v6178_v5  ;;  %v8506_v48 = vpop.f32.mrb[165].mxu0 }
0x3d9d   :  { %v6181_v56 = vpop.f32.mrb[166].mxu0  ;;  %v6551_v48 = vpop.permute.xlu1 %6550 }
0x3d9e   :  { %v10868_v38 = vadd.f32 %v6225_v57, %v6181_v56  ;;  %v8507_v7 = vpop.f32.mrb[167].mxu0  ;;  %v5489_v57 = vld [vmem:[#allocation3 + $0xe8] sm:$0xff] }
0x3da3   :  { %v6273_v50 = vpop.f32.mrb[168].mxu0 }
0x3da4   :  { %v6329_v30 = vmul.f32 0.2, %v6273_v50  ;;  %v8520_v51 = vpop.f32.mrb[169].mxu0 }
0x3da5   :  { %v6276_v11 = vpop.f32.mrb[170].mxu0 }
0x3da6   :  { %v6331_v53 = vadd.f32 %v6329_v30, %v9887_v18  ;;  %v8521_v1 = vpop.f32.mrb[171].mxu0 }
0x3da8   :  { %v6333_v3 = vsel %vm1029_vm7, %v6331_v53, -inf }
0x3da9   :  { %6334 = vmax.xlane.f32.xlu0 %v6333_v3 }
0x3dad   :  { %6349 = vadd.xlane.f32.xlu0 %v6348_v10 }
0x3e36   :  { %v6335_v16 = vpop.xlane.xlu0 %6334 }
0x3e37   :  { %v6339_v17 = vsub.f32 %v6331_v53, %v6335_v16 }
0x3e39   :  { %v6341_v19 = vmul.f32 1.442695, %v6339_v17 }
0x3e3a   :  { %v6350_v22 = vpop.xlane.xlu0 %6349 }
0x3e3b   :  { %8843 = vpow2.f32 %v6341_v19 }
0x3e3c   :  { %8845 = vrcp.f32 %v6350_v22 }
0x3e45   :  { %v8844_v24 = vpop.eup %8843 }
0x3e46   :  { %v8846_v55 = vpop.eup %8845  ;;  %v6345_v27 = vsel %vm1029_vm7, %v8844_v24, 0.0 }
0x3e47   :  { %6346 = vadd.xlane.f32.xlu0 %v6345_v27  ;;  %v6354_v35 = vmul.f32 %v8846_v55, %v8842_v12 }
0x3e49   :  { %v6356_v31 = vpack.c.bf16 %v6354_v35, %v6354_v35 }
0x3e4b   :  { %8537 = vmatmul.mubr.msk.bf16.vlgmr.msra.gmra.mrb[200].mxu1 %vm1029_vm7, %v6356_v31 }
0x3e4c   :  { %8549 = vmatpush3.bf16.xpose.msra.mxu1 %v6508_v32  ;;  %8550 = vmatprep.mubr.msk.bf16.mxu1 %vm9357_vm4, %v9353_v13 }
0x3e4d   :  { %8560 = vmatprep.subr.bf16.mxu1 %v9353_v13 }
0x3e5d   :  { %6357 = vrot.lane.b32.xlu0 %v10744_v33, %s11081_s18 }
0x3e61   :  { %6500 = vrot.lane.b32.xlu0 %v10747_v29, %s9359_s25 }
0x3ed4   :  { %v6347_v41 = vpop.xlane.xlu0 %6346 }
0x3ed5   :  { %8847 = vrcp.f32 %v6347_v41 }
0x3ed8   :  { %v6358_v25 = vpop.permute.xlu0 %6357 }
0x3ed9   :  { %v6363_v26 = vsel %vm1057_vm6, %v6358_v25, 0 }
0x3eda   :  { %8529 = vmatpush3.bf16.msra.mxu0 %v6363_v26 }
0x3edb   :  { %8540 = vmatprep.subr.bf16.mxu0 %v9353_v13 }
0x3edc   :  { %v6501_v34 = vpop.permute.xlu0 %6500 }
0x3edd   :  { %8551 = vmatmul.mubr.msk.bf16.vlgmr.msra.gmra.mrb[204].mxu1 %vm932_vm5, %v6501_v34 }
0x3ede   :  { %8562 = vmatprep.mubr.msk.bf16.mxu1 %vm9357_vm4, %v9353_v13 }
0x3edf   :  { %v8848_v2 = vpop.eup %8847 }
0x3ee0   :  { %v6352_v36 = vmul.f32 %v8848_v2, %v8844_v24 }
0x3ee2   :  { %v6355_v47 = vpack.c.bf16 %v6352_v36, %v6352_v36 }
0x3ee4   :  { %8531 = vmatmul.mubr.msk.bf16.vlgmr.msra.gmra.mrb[172].mxu0 %vm1029_vm7, %v6355_v47 }
0x3ee5   :  { %8541 = vmatpush3.bf16.msra.mxu0 %v5488_v21  ;;  %8544 = vmatprep.mubr.msk.bf16.mxu0 %vm9357_vm4, %v9353_v13 }
0x3ee6   :  { %8542 = vmatprep.subr.bf16.mxu0 %v9353_v13 }
0x3ee9   :  { %8543 = vmatpush3.bf16.msra.mxu0 %v5489_v57 }
0x3eea   :  { %8554 = vmatprep.subr.bf16.mxu0 %v9353_v13 }
0x3f1e   :  { %v6447_v29 = vpop.f32.mrb[200].mxu1 }
0x3f1f   :  { %v8538_v6 = vpop.f32.mrb[201].mxu1 }
0x3f20   :  { %v6450_v39 = vpop.f32.mrb[202].mxu1  ;;  %v5491_v6 = vld [vmem:[#allocation3 + $0xf8] sm:$0xff] }
0x3f21   :  { %v8539_v23 = vpop.f32.mrb[203].mxu1 }
0x3fb0   :  { %v6544_v20 = vpop.f32.mrb[204].mxu1 }
0x3fb1   :  { %v6600_v37 = vmul.f32 0.2, %v6544_v20  ;;  %v8552_v52 = vpop.f32.mrb[205].mxu1 }
0x3fb2   :  { %v6547_v42 = vpop.f32.mrb[206].mxu1 }
0x3fb3   :  { %v6602_v62 = vadd.f32 %v6600_v37, %v9887_v18  ;;  %v8553_v58 = vpop.f32.mrb[207].mxu1 }
0x3fb5   :  { %v6604_v54 = vsel %vm1029_vm7, %v6602_v62, -inf }
0x3fb6   :  { %6605 = vmax.xlane.f32.xlu0 %v6604_v54 }
0x3fb7   :  { %v6399_v60 = vpop.f32.mrb[172].mxu0 }
0x3fb8   :  { %v6453_v61 = vpack.c.bf16 %v6447_v29, %v6399_v60  ;;  %v8532_v15 = vpop.f32.mrb[173].mxu0  ;;  %v5490_v29 = vld [vmem:[#allocation3 + $0xf0] sm:$0xff] }
0x3fb9   :  { %v6402_v4 = vpop.f32.mrb[174].mxu0 }
0x3fba   :  { %v8533_v5 = vpop.f32.mrb[175].mxu0  ;;  %8545 = vmatmul.mubr.msk.bf16.vlgmr.msra.gmra.mrb[176].mxu0 %vm932_vm5, %v6453_v61  ;;  %v7483_v61 = vld [vmem:[%s11089_s28 + $0x3] ss:$0 sm:$0xff] }
0x3fbb   :  { %8555 = vmatpush3.bf16.xpose.msra.mxu0 %v6558_v63  ;;  %8556 = vmatprep.mubr.msk.bf16.mxu0 %vm9357_vm4, %v9353_v13 }
0x3fbc   :  { %8566 = vmatprep.subr.bf16.mxu0 %v9353_v13 }
0x3fc2   :  { %8557 = vmatmul.mubr.msk.bf16.vlgmr.msra.gmra.mrb[180].mxu0 %vm932_vm5, %v6551_v48 }
0x3fc3   :  { %8568 = vmatprep.mubr.msk.bf16.mxu0 %vm9357_vm4, %v9353_v13 }
0x4043   :  { %v6606_v56 = vpop.xlane.xlu0 %6605 }
0x4044   :  { %v6610_v7 = vsub.f32 %v6602_v62, %v6606_v56 }
0x4046   :  { %v6612_v50 = vmul.f32 1.442695, %v6610_v7 }
0x4048   :  { %8849 = vpow2.f32 %v6612_v50  ;;  %v5495_v50 = vld [vmem:[#allocation4 + $0x318] sm:$0xff] }
0x4052   :  { %v8850_v30 = vpop.eup %8849 }
0x4053   :  { %v6616_v51 = vsel %vm1029_vm7, %v8850_v30, 0.0 }
0x4054   :  { %6617 = vadd.xlane.f32.xlu0 %v6616_v51  ;;  %v5494_v51 = vld [vmem:[#allocation4 + $0x310] sm:$0xff] }
0x408d   :  { %v6491_v11 = vpop.f32.mrb[176].mxu0 }
0x408e   :  { %v6498_v53 = vadd.f32 %v6491_v11, %v10866_v8  ;;  %v8546_v1 = vpop.f32.mrb[177].mxu0  ;;  %v5497_v11 = vld [vmem:[#allocation4 + $0x328] sm:$0xff] }
0x408f   :  { %v6494_v3 = vpop.f32.mrb[178].mxu0 }
0x4090   :  { %v6499_v12 = vadd.f32 %v6494_v3, %v10868_v38  ;;  %v8547_v10 = vpop.f32.mrb[179].mxu0 }
0x4095   :  { %v6594_v16 = vpop.f32.mrb[180].mxu0 }
0x4096   :  { %v6601_v17 = vmul.f32 0.2, %v6594_v16  ;;  %v8558_v19 = vpop.f32.mrb[181].mxu0 }
0x4097   :  { %v6597_v22 = vpop.f32.mrb[182].mxu0 }
0x4098   :  { %v6603_v24 = vadd.f32 %v6601_v17, %v9887_v18  ;;  %v8559_v55 = vpop.f32.mrb[183].mxu0 }
0x409a   :  { %v6607_v27 = vsel %vm1029_vm7, %v6603_v24, -inf }
0x409b   :  { %6608 = vmax.xlane.f32.xlu1 %v6607_v27  ;;  %v5501_v27 = vld [vmem:[#allocation4 + $0x348] sm:$0xff] }
0x40ac   :  { %6676 = vrot.lane.b32.xlu1 %v10749_v9, %s9359_s25 }
0x40e1   :  { %v6618_v18 = vpop.xlane.xlu0 %6617 }
0x4128   :  { %v6609_v35 = vpop.xlane.xlu1 %6608 }
0x4129   :  { %v6611_v8 = vsub.f32 %v6603_v24, %v6609_v35  ;;  %v5503_v35 = vld [vmem:[#allocation4 + $0x358] sm:$0xff] }
0x412b   :  { %v6614_v28 = vmul.f32 1.442695, %v6611_v8  ;;  %v5500_v8 = vld [vmem:[#allocation4 + $0x340] sm:$0xff] }
0x412c   :  { %v6677_v31 = vpop.permute.xlu1 %6676 }
0x412d   :  { %8851 = vpow2.f32 %v6614_v28  ;;  %v6682_v38 = vsel %vm1057_vm6, %v6677_v31, 0  ;;  %v5502_v28 = vld [vmem:[#allocation4 + $0x350] sm:$0xff]  ;;  %v5505_v31 = vld [vmem:[#allocation4 + $0x368] sm:$0xff] }
0x412e   :  { %8567 = vmatpush3.bf16.msra.mxu0 %v6682_v38  ;;  %8853 = vrcp.f32 %v6618_v18  ;;  %v5507_v38 = vld [vmem:[#allocation4 + $0x378] sm:$0xff]  ;;  %v5509_v18 = vld [vmem:[#allocation4 + $0x388] sm:$0xff] }
0x4137   :  { %v8852_v32 = vpop.eup %8851 }
0x4138   :  { %v6619_v41 = vsel %vm1029_vm7, %v8852_v32, 0.0  ;;  %v8854_v25 = vpop.eup %8853 }
0x4139   :  { %6620 = vadd.xlane.f32.xlu0 %v6619_v41  ;;  %v6623_v9 = vmul.f32 %v8854_v25, %v8850_v30  ;;  %v5492_v30 = vld [vmem:[#allocation4 + $0x300] sm:$0xff]  ;;  %v5506_v41 = vld [vmem:[#allocation4 + $0x370] sm:$0xff]  ;;  %v5511_v25 = vld [vmem:[#allocation4 + $0x398] sm:$0xff] }
0x413b   :  { %v6626_v36 = vpack.c.bf16 %v6623_v9, %v6623_v9  ;;  %v5510_v9 = vld [vmem:[#allocation4 + $0x390] sm:$0xff] }
0x414f   :  { %6628 = vrot.lane.b32.xlu0 %v10744_v33, %s9359_s25 }
0x41c6   :  { %v6621_v26 = vpop.xlane.xlu0 %6620 }
0x41c7   :  { %8855 = vrcp.f32 %v6621_v26  ;;  %v5508_v26 = vld [vmem:[#allocation4 + $0x380] sm:$0xff] }
0x41ca   :  { %v6629_v34 = vpop.permute.xlu0 %6628 }
0x41cb   :  { %v6634_v2 = vsel %vm1057_vm6, %v6629_v34, 0  ;;  %v5513_v34 = vld [vmem:[#allocation4 + $0x3a8] sm:$0xff] }
0x41cc   :  { %8561 = vmatpush3.bf16.msra.mxu1 %v6634_v2  ;;  %v5515_v2 = vld [vmem:[#allocation4 + $0x3b8] sm:$0xff] }
0x41cd   :  { %8572 = vmatprep.subr.bf16.mxu1 %v9353_v13 }
0x41cf   :  { %8563 = vmatmul.mubr.msk.bf16.vlgmr.msra.gmra.mrb[208].mxu1 %vm1029_vm7, %v6626_v36  ;;  %v5512_v36 = vld [vmem:[#allocation4 + $0x3a0] sm:$0xff] }
0x41d0   :  { %8576 = vmatprep.mubr.msk.bf16.mxu1 %vm9357_vm4, %v9353_v13  ;;  %8573 = vmatpush3.bf16.msra.mxu1 %v5490_v29  ;;  %v5516_v29 = vld [vmem:[#allocation4 + $0x3c0] sm:$0xff] }
0x41d1   :  { %v8856_v47 = vpop.eup %8855  ;;  %8574 = vmatprep.subr.bf16.mxu1 %v9353_v13 }
0x41d2   :  { %v6625_v33 = vmul.f32 %v8856_v47, %v8852_v32  ;;  %v5504_v32 = vld [vmem:[#allocation4 + $0x360] sm:$0xff]  ;;  %v5514_v47 = vld [vmem:[#allocation4 + $0x3b0] sm:$0xff] }
0x41d4   :  { %v6627_v21 = vpack.c.bf16 %v6625_v33, %v6625_v33  ;;  %8575 = vmatpush3.bf16.msra.mxu1 %v5491_v6  ;;  %v5517_v33 = vld [vmem:[#allocation4 + $0x3c8] sm:$0xff]  ;;  %v5518_v6 = vld [vmem:[#allocation4 + $0x3d0] sm:$0xff] }
0x41d5   :  { %6894 = vmatprep.subr.bf16.mxu1 %v5495_v50 }
0x41d6   :  { %8569 = vmatmul.mubr.msk.bf16.vlgmr.msra.gmra.mrb[184].mxu0 %vm1029_vm7, %v6627_v21  ;;  %v5519_v21 = vld [vmem:[#allocation4 + $0x3d8] sm:$0xff] }
0x41d7   :  { %6883 = vmatprep.mubr.bf16.mxu0 %v9316_v0 }
0x42a2   :  { %v6670_v39 = vpop.f32.mrb[208].mxu1 }
0x42a3   :  { %v8564_v23 = vpop.f32.mrb[209].mxu1 }
0x42a4   :  { %v6673_v57 = vpop.f32.mrb[210].mxu1  ;;  %v5523_v23 = vld [vmem:[#allocation4 + $0x3f8] sm:$0xff] }
0x42a5   :  { %v8565_v20 = vpop.f32.mrb[211].mxu1  ;;  %v5520_v57 = vld [vmem:[#allocation4 + $0x3e0] sm:$0xff] }
0x42a6   :  { %v5522_v20 = vld [vmem:[#allocation4 + $0x3f0] sm:$0xff] }
0x42a9   :  { %v6718_v37 = vpop.f32.mrb[184].mxu0 }
0x42aa   :  { %v6724_v52 = vpack.c.bf16 %v6718_v37, %v6670_v39  ;;  %v8570_v42 = vpop.f32.mrb[185].mxu0  ;;  %v5521_v39 = vld [vmem:[#allocation4 + $0x3e8] sm:$0xff]  ;;  %v5532_v37 = vld [vmem:[#allocation5 + $0x340] sm:$0xff] }
0x42ab   :  { %v6721_v62 = vpop.f32.mrb[186].mxu0 }
0x42ac   :  { %v8571_v58 = vpop.f32.mrb[187].mxu0  ;;  %8577 = vmatmul.mubr.msk.bf16.vlgmr.msra.gmra.mrb[212].mxu1 %vm932_vm5, %v6724_v52  ;;  %v5548_v52 = vld [vmem:[#allocation5 + $0x3c0] sm:$0xff] }
0x42ad   :  { %6926 = vmatprep.mubr.bf16.mxu1 %v9316_v0  ;;  %v5493_v0 = vld [vmem:[#allocation4 + $0x308] sm:$0xff]  ;;  %6895 = vmatpush1.bf16.msra.mxu1 %v5494_v51 }
0x42ae   :  { %6851 = vmatprep.subr.bf16.mxu0 %v5493_v0  ;;  %v7485_v0 = vld [vmem:[#allocation15 + $0x3] ss:$0 sm:$0xff] }
0x42af   :  { %6852 = vmatpush1.bf16.msra.mxu0 %v5492_v30 }
0x42b0   :  { %6853 = vmatprep.subr.bf16.mxu0 %v5497_v11 }
0x437f   :  { %v6762_v54 = vpop.f32.mrb[212].mxu1 }
0x4380   :  { %v6769_v59 = vadd.f32 %v6762_v54, %v6498_v53  ;;  %v8578_v60 = vpop.f32.mrb[213].mxu1  ;;  %v5496_v53 = vld [vmem:[#allocation4 + $0x320] sm:$0xff] }
0x4381   :  { %v6765_v15 = vpop.f32.mrb[214].mxu1  ;;  %6854 = vmatpush1.bf16.msra.mxu0 %v5496_v53  ;;  %v5540_v53 = vld [vmem:[#allocation5 + $0x380] sm:$0xff] }
0x4382   :  { %v6771_v4 = vadd.f32 %v6769_v59, %v10694_v46  ;;  %v6770_v63 = vadd.f32 %v6765_v15, %v6499_v12  ;;  %v8579_v5 = vpop.f32.mrb[215].mxu1  ;;  %v5499_v46 = vld [vmem:[#allocation4 + $0x338] sm:$0xff]  ;;  %6855 = vmatprep.subr.bf16.mxu0 %v5501_v27  ;;  %v7484_v15 = vld [vmem:[#allocation13 + $0x3] ss:$0 sm:$0xff] }
0x4383   :  { %6896 = vmatprep.subr.bf16.mxu1 %v5499_v46  ;;  %v5524_v46 = vld [vmem:[#allocation5 + $0x300] sm:$0xff]  ;;  %v5543_v27 = vld [vmem:[#allocation5 + $0x398] sm:$0xff] }
0x4384   :  { %v10928_v48 = vadd.f32 %v7483_v61, %v6771_v4  ;;  %v6772_v56 = vadd.f32 %v6770_v63, %v10697_v45  ;;  %v5498_v45 = vld [vmem:[#allocation4 + $0x330] sm:$0xff] }
0x4385   :  { %6897 = vmatpush1.bf16.msra.mxu1 %v5498_v45  ;;  %6856 = vmatpush1.bf16.msra.mxu0 %v5500_v8  ;;  %v5533_v45 = vld [vmem:[#allocation5 + $0x348] sm:$0xff]  ;;  %v5552_v8 = vld [vmem:[#allocation5 + $0x3e0] sm:$0xff] }
0x4386   :  { %v10931_v7 = vadd.f32 %v7483_v61, %v6772_v56  ;;  %6787 = vadd.xlane.f32.xlu1 %v10928_v48  ;;  %6898 = vmatprep.subr.bf16.mxu1 %v5503_v35  ;;  %v5536_v35 = vld [vmem:[#allocation5 + $0x360] sm:$0xff] }
0x4387   :  { %6857 = vmatprep.subr.bf16.mxu0 %v5505_v31  ;;  %v5544_v31 = vld [vmem:[#allocation5 + $0x3a0] sm:$0xff] }
0x4388   :  { %6789 = vadd.xlane.f32.xlu0 %v10931_v7 }
0x4389   :  { %6899 = vmatpush1.bf16.msra.mxu1 %v5502_v28  ;;  %6858 = vmatpush1.bf16.msra.mxu0 %v5504_v32  ;;  %v5528_v28 = vld [vmem:[#allocation5 + $0x320] sm:$0xff]  ;;  %v5553_v32 = vld [vmem:[#allocation5 + $0x3e8] sm:$0xff] }
0x438a   :  { %6900 = vmatprep.subr.bf16.mxu1 %v5507_v38  ;;  %6859 = vmatprep.subr.bf16.mxu0 %v5509_v18  ;;  %v5537_v38 = vld [vmem:[#allocation5 + $0x368] sm:$0xff] }
0x438b   :  { %v5545_v18 = vld [vmem:[#allocation5 + $0x3a8] sm:$0xff] }
0x438d   :  { %6901 = vmatpush1.bf16.msra.mxu1 %v5506_v41  ;;  %6860 = vmatpush1.bf16.msra.mxu0 %v5508_v26  ;;  %v5529_v41 = vld [vmem:[#allocation5 + $0x328] sm:$0xff]  ;;  %v5554_v26 = vld [vmem:[#allocation5 + $0x3f0] sm:$0xff] }
0x438e   :  { %6902 = vmatprep.subr.bf16.mxu1 %v5511_v25  ;;  %6861 = vmatprep.subr.bf16.mxu0 %v5513_v34  ;;  %v5538_v25 = vld [vmem:[#allocation5 + $0x370] sm:$0xff] }
0x438f   :  { %v5546_v34 = vld [vmem:[#allocation5 + $0x3b0] sm:$0xff] }
0x4391   :  { %6903 = vmatpush1.bf16.msra.mxu1 %v5510_v9  ;;  %6862 = vmatpush1.bf16.msra.mxu0 %v5512_v36  ;;  %v5530_v9 = vld [vmem:[#allocation5 + $0x330] sm:$0xff]  ;;  %v5555_v36 = vld [vmem:[#allocation5 + $0x3f8] sm:$0xff] }
0x4392   :  { %6904 = vmatprep.subr.bf16.mxu1 %v5515_v2  ;;  %6863 = vmatprep.subr.bf16.mxu0 %v5517_v33  ;;  %v5539_v2 = vld [vmem:[#allocation5 + $0x378] sm:$0xff] }
0x4393   :  { %v5547_v33 = vld [vmem:[#allocation5 + $0x3b8] sm:$0xff] }
0x4395   :  { %6905 = vmatpush1.bf16.msra.mxu1 %v5514_v47  ;;  %6864 = vmatpush1.bf16.msra.mxu0 %v5516_v29  ;;  %v5531_v47 = vld [vmem:[#allocation5 + $0x338] sm:$0xff] }
0x4396   :  { %6906 = vmatprep.subr.bf16.mxu1 %v5519_v21  ;;  %6865 = vmatprep.subr.bf16.mxu0 %v5521_v39  ;;  %v6829_v21 = vld [vmem:[#allocation16 + $0xc] sm:$0xf] }
0x4397   :  { %v6834_v29 = vrot.slane %v6829_v21, %v10158_v40  ;;  %v6838_v39 = vrot.slane %v6829_v21, %v10164_v43 }
0x4399   :  { %6907 = vmatpush1.bf16.msra.mxu1 %v5518_v6  ;;  %6866 = vmatpush1.bf16.msra.mxu0 %v5520_v57  ;;  %v6842_v6 = vrot.slane %v6829_v21, %v10161_v49 }
0x439a   :  { %6908 = vmatprep.subr.bf16.mxu1 %v5523_v23  ;;  %7900 = vmatprep.subr.bf16.mxu0 %v5532_v37  ;;  %v6846_v23 = vrot.slane %v6829_v21, %v10167_v44 }
0x439d   :  { %6909 = vmatpush1.bf16.msra.mxu1 %v5522_v20 }
0x439e   :  { %7922 = vmatprep.subr.bf16.mxu1 %v5548_v52 }
0x4413   :  { %v6788_v1 = vpop.xlane.xlu1 %6787 }
0x4414   :  { %v6791_v3 = vmul.f32 0.01, %v6788_v1  ;;  %v5549_v1 = vld [vmem:[#allocation5 + $0x3c8] sm:$0xff] }
0x4415   :  { %v6790_v12 = vpop.xlane.xlu0 %6789 }
0x4416   :  { %v6793_v10 = vsub.f32 %v10928_v48, %v6791_v3  ;;  %v6792_v16 = vmul.f32 0.01, %v6790_v12  ;;  %v5525_v3 = vld [vmem:[#allocation5 + $0x308] sm:$0xff] }
0x4417   :  { %v5541_v12 = vld [vmem:[#allocation5 + $0x388] sm:$0xff] }
0x4418   :  { %v10937_v17 = vmul.f32 %v9882_v14, %v6793_v10  ;;  %v6794_v19 = vsub.f32 %v10931_v7, %v6792_v16  ;;  %v5534_v10 = vld [vmem:[#allocation5 + $0x350] sm:$0xff] }
0x4419   :  { %v5550_v16 = vld [vmem:[#allocation5 + $0x3d0] sm:$0xff] }
0x441a   :  { %v10941_v22 = vmul.f32 %v9882_v14, %v6794_v19  ;;  %v6797_v24 = vmul.f32 %v10937_v17, %v10937_v17  ;;  %v5542_v19 = vld [vmem:[#allocation5 + $0x390] sm:$0xff] }
0x441c   :  { %6799 = vadd.xlane.f32.xlu0 %v6797_v24  ;;  %v6798_v55 = vmul.f32 %v10941_v22, %v10941_v22  ;;  %v5551_v24 = vld [vmem:[#allocation5 + $0x3d8] sm:$0xff] }
0x441e   :  { %6801 = vadd.xlane.f32.xlu1 %v6798_v55  ;;  %v5527_v55 = vld [vmem:[#allocation5 + $0x318] sm:$0xff] }
0x44a9   :  { %v6800_v42 = vpop.xlane.xlu0 %6799 }
0x44aa   :  { %v6803_v62 = vmul.f32 0.01, %v6800_v42 }
0x44ab   :  { %v6802_v58 = vpop.xlane.xlu1 %6801 }
0x44ac   :  { %v6805_v54 = vadd.f32 1e-05, %v6803_v62  ;;  %v6804_v59 = vmul.f32 0.01, %v6802_v58 }
0x44ae   :  { %8857 = vrsqrt.f32 %v6805_v54  ;;  %v6806_v60 = vadd.f32 1e-05, %v6804_v59 }
0x44b0   :  { %8859 = vrsqrt.f32 %v6806_v60 }
0x44b8   :  { %v8858_v61 = vpop.eup %8857 }
0x44b9   :  { %v6809_v4 = vmul.f32 %v8858_v61, %v10937_v17  ;;  %v5526_v17 = vld [vmem:[#allocation5 + $0x310] sm:$0xff] }
0x44ba   :  { %v8860_v63 = vpop.eup %8859 }
0x44bb   :  { %v6810_v5 = vmul.f32 %v8860_v63, %v10941_v22  ;;  %v6817_v56 = vmul.f32 %v7484_v15, %v6809_v4  ;;  %v5535_v22 = vld [vmem:[#allocation5 + $0x358] sm:$0xff] }
0x44bd   :  { %v6818_v50 = vmul.f32 %v7484_v15, %v6810_v5  ;;  %v6825_v30 = vadd.f32 %v7485_v0, %v6817_v56 }
0x44bf   :  { %v6826_v51 = vadd.f32 %v7485_v0, %v6818_v50 }
0x44c1   :  { %v6827_v11 = vpack.c.bf16 %v6826_v51, %v6825_v30 }
0x44c3   :  { %6884 = vmatmul.mubr.bf16.vlgmr.msra.gmra.mrb[188].mxu0 %v6827_v11  ;;  %6927 = vmatmul.mubr.bf16.vlgmr.msra.gmra.mrb[216].mxu1 %v6827_v11 }
0x44c4   :  { %7901 = vmatpush3.bf16.msra.mxu0 %v5524_v46  ;;  %7923 = vmatpush3.bf16.msra.mxu1 %v5540_v53 }
0x44c5   :  { %7902 = vmatprep.subr.bf16.mxu0 %v5533_v45  ;;  %7924 = vmatprep.subr.bf16.mxu1 %v5549_v1 }
0x44c8   :  { %7903 = vmatpush3.bf16.msra.mxu0 %v5525_v3  ;;  %7925 = vmatpush3.bf16.msra.mxu1 %v5541_v12 }
0x44c9   :  { %7904 = vmatprep.subr.bf16.mxu0 %v5534_v10  ;;  %7926 = vmatprep.subr.bf16.mxu1 %v5550_v16 }
0x44cc   :  { %7905 = vmatpush3.bf16.msra.mxu0 %v5526_v17  ;;  %7927 = vmatpush3.bf16.msra.mxu1 %v5542_v19 }
0x44cd   :  { %7906 = vmatprep.subr.bf16.mxu0 %v5535_v22  ;;  %7928 = vmatprep.subr.bf16.mxu1 %v5551_v24 }
0x44d0   :  { %7907 = vmatpush3.bf16.msra.mxu0 %v5527_v55  ;;  %7929 = vmatpush3.bf16.msra.mxu1 %v5543_v27 }
0x44d1   :  { %7908 = vmatprep.subr.bf16.mxu0 %v5536_v35  ;;  %7930 = vmatprep.subr.bf16.mxu1 %v5552_v8 }
0x44d4   :  { %7909 = vmatpush3.bf16.msra.mxu0 %v5528_v28  ;;  %7931 = vmatpush3.bf16.msra.mxu1 %v5544_v31  ;;  %v7486_v28 = vld [vmem:[#allocation18 + $0x3] ss:$0 sm:$0xff] }
0x44d5   :  { %7910 = vmatprep.subr.bf16.mxu0 %v5537_v38  ;;  %7932 = vmatprep.subr.bf16.mxu1 %v5553_v32 }
0x44d8   :  { %7911 = vmatpush3.bf16.msra.mxu0 %v5529_v41  ;;  %7933 = vmatpush3.bf16.msra.mxu1 %v5545_v18 }
0x44d9   :  { %7912 = vmatprep.subr.bf16.mxu0 %v5538_v25  ;;  %7934 = vmatprep.subr.bf16.mxu1 %v5554_v26  ;;  %v8813_v25 = vld [vmem:[%s11090_s11] sm:$0xff]   ;;  %v8814_v26 = vld [vmem:[%s11090_s11 + $0x8] sm:$0xff]  }
0x44dc   :  { %7913 = vmatpush3.bf16.msra.mxu0 %v5530_v9  ;;  %7935 = vmatpush3.bf16.msra.mxu1 %v5546_v34 }
0x44dd   :  { %7914 = vmatprep.subr.bf16.mxu0 %v5539_v2  ;;  %7936 = vmatprep.subr.bf16.mxu1 %v5555_v36 }
0x44e0   :  { %7915 = vmatpush3.bf16.msra.mxu0 %v5531_v47  ;;  %7937 = vmatpush3.bf16.msra.mxu1 %v5547_v33 }
0x44e1   :  { %8580 = vmatprep.subr.bf16.mxu0 %v9353_v13 }
0x4596   :  { %v6885_v57 = vpop.f32.mrb[188].mxu0  ;;  %v6928_v20 = vpop.f32.mrb[216].mxu1 }
0x4597   :  { %v6886_v37 = vadd.f32 %v6885_v57, %v6834_v29  ;;  %v6929_v52 = vadd.f32 %v6928_v20, %v6842_v6  ;;  %v6887_v42 = vpop.f32.mrb[189].mxu0  ;;  %v6930_v62 = vpop.f32.mrb[217].mxu1  ;;  %v8819_v57 = vld [vmem:[%s11090_s11 + $0x30] sm:$0xff]   ;;  %v8820_v20 = vld [vmem:[%s11090_s11 + $0x38] sm:$0xff]  }
0x4598   :  { %v6888_v58 = vadd.f32 %v6887_v42, %v6838_v39  ;;  %v6931_v54 = vadd.f32 %v6930_v62, %v6846_v23  ;;  %v6889_v59 = vpop.f32.mrb[190].mxu0  ;;  %v6932_v60 = vpop.f32.mrb[218].mxu1 }
0x4599   :  { %v6890_v61 = vadd.f32 %v6889_v59, %v6834_v29  ;;  %v6933_v15 = vadd.f32 %v6932_v60, %v6842_v6  ;;  %v6891_v4 = vpop.f32.mrb[191].mxu0  ;;  %v6934_v40 = vpop.f32.mrb[219].mxu1  ;;  %v6937_v5 = vmax.f32 %v6886_v37, 0.0  ;;  %v6939_v43 = vmax.f32 %v6929_v52, 0.0  ;;  %v8815_v6 = vld [vmem:[%s11090_s11 + $0x10] sm:$0xff]  }
0x459a   :  { %v6892_v63 = vadd.f32 %v6891_v4, %v6838_v39  ;;  %v6935_v49 = vadd.f32 %v6934_v40, %v6846_v23  ;;  %v6938_v0 = vmax.f32 %v6888_v58, 0.0  ;;  %v6940_v50 = vmax.f32 %v6931_v54, 0.0  ;;  %v8816_v39 = vld [vmem:[%s11090_s11 + $0x18] sm:$0xff]   ;;  %v8818_v23 = vld [vmem:[%s11090_s11 + $0x28] sm:$0xff]   ;;  %v7487_v60 = vld [vmem:[%s11091_s3] ss:$0 sm:$0xff] }
0x459b   :  { %v6941_v56 = vmax.f32 %v6890_v61, 0.0  ;;  %v6943_v44 = vmax.f32 %v6933_v15, 0.0 }
0x459c   :  { %v6942_v30 = vmax.f32 %v6892_v63, 0.0  ;;  %v6944_v51 = vmax.f32 %v6935_v49, 0.0 }
0x459d   :  { %v6945_v11 = vpack.c.bf16 %v6941_v56, %v6937_v5  ;;  %v6947_v46 = vpack.c.bf16 %v6943_v44, %v6939_v43  ;;  %v7489_v56 = vld [vmem:[#allocation19] ss:$0 sm:$0xff] }
0x459e   :  { %v6946_v53 = vpack.c.bf16 %v6942_v30, %v6938_v0  ;;  %v6948_v45 = vpack.c.bf16 %v6944_v51, %v6940_v50 }
0x45a0   :  { %6981 = vmatprep.mubr.bf16.mxu0 %v6946_v53  ;;  %7022 = vmatprep.mubr.bf16.mxu1 %v6948_v45 }
0x45a1   :  { %6982 = vmatmul.mubr.bf16.vlgmr.msra.gmra.mrb[192].mxu0 %v6945_v11  ;;  %7023 = vmatmul.mubr.bf16.vlgmr.msra.gmra.mrb[220].mxu1 %v6947_v46 }
0x45a2   :  { %8596 = vmatprep.mubr.msk.bf16.mxu0 %vm9357_vm4, %v9353_v13  ;;  %8581 = vmatpush3.bf16.msra.mxu0 %v8813_v25 }
0x45a3   :  { %8582 = vmatprep.subr.bf16.mxu0 %v9353_v13 }
0x45a6   :  { %8583 = vmatpush3.bf16.msra.mxu0 %v8814_v26 }
0x45a7   :  { %8584 = vmatprep.subr.bf16.mxu0 %v9353_v13 }
0x45aa   :  { %8585 = vmatpush3.bf16.msra.mxu0 %v8815_v6 }
0x45ab   :  { %8586 = vmatprep.subr.bf16.mxu0 %v9353_v13 }
0x45ae   :  { %8587 = vmatpush3.bf16.msra.mxu0 %v8816_v39 }
0x45af   :  { %8588 = vmatprep.subr.bf16.mxu0 %v9353_v13 }
0x4674   :  { %v7916_v1 = vpop.f32.mrb[192].mxu0  ;;  %v7938_v3 = vpop.f32.mrb[220].mxu1 }
0x4675   :  { %v7917_v12 = vpop.f32.mrb[193].mxu0  ;;  %v7939_v10 = vpop.f32.mrb[221].mxu1 }
0x4676   :  { %v7918_v16 = vadd.f32 %v7917_v12, %v7916_v1  ;;  %v7940_v17 = vadd.f32 %v7939_v10, %v7938_v3  ;;  %v7919_v19 = vpop.f32.mrb[194].mxu0  ;;  %v7941_v22 = vpop.f32.mrb[222].mxu1 }
0x4677   :  { %v7920_v24 = vpop.f32.mrb[195].mxu0  ;;  %v7942_v55 = vpop.f32.mrb[223].mxu1 }
0x4678   :  { %v7025_v27 = vadd.f32 %v7940_v17, %v7918_v16  ;;  %v7921_v35 = vadd.f32 %v7920_v24, %v7919_v19  ;;  %v7943_v8 = vadd.f32 %v7942_v55, %v7941_v22 }
0x467a   :  { %v7028_v31 = vadd.f32 %v7943_v8, %v7921_v35  ;;  %v7031_v38 = vadd.f32 %v7025_v27, %v10928_v48 }
0x467c   :  { %v7041_v32 = vadd.f32 %v7486_v28, %v7031_v38  ;;  %v7032_v41 = vadd.f32 %v7028_v31, %v10931_v7 }
0x467e   :  { %7045 = vadd.xlane.f32.xlu0 %v7041_v32  ;;  %v7042_v18 = vadd.f32 %v7486_v28, %v7032_v41 }
0x4680   :  { %7047 = vadd.xlane.f32.xlu1 %v7042_v18 }
0x470b   :  { %v7046_v48 = vpop.xlane.xlu0 %7045 }
0x470c   :  { %v7049_v9 = vmul.f32 0.01, %v7046_v48 }
0x470d   :  { %v7048_v7 = vpop.xlane.xlu1 %7047 }
0x470e   :  { %v7051_v34 = vsub.f32 %v7041_v32, %v7049_v9  ;;  %v7050_v2 = vmul.f32 0.01, %v7048_v7 }
0x4710   :  { %v7053_v36 = vmul.f32 %v9882_v14, %v7051_v34  ;;  %v7052_v47 = vsub.f32 %v7042_v18, %v7050_v2 }
0x4712   :  { %v7054_v33 = vmul.f32 %v9882_v14, %v7052_v47  ;;  %v7055_v21 = vmul.f32 %v7053_v36, %v7053_v36  ;;  %v8817_v14 = vld [vmem:[%s11090_s11 + $0x20] sm:$0xff]  }
0x4713   :  { %8589 = vmatpush3.bf16.msra.mxu0 %v8817_v14 }
0x4714   :  { %7057 = vadd.xlane.f32.xlu0 %v7055_v21  ;;  %v7056_v29 = vmul.f32 %v7054_v33, %v7054_v33  ;;  %8590 = vmatprep.subr.bf16.mxu0 %v9353_v13 }
0x4716   :  { %7059 = vadd.xlane.f32.xlu1 %v7056_v29 }
0x4717   :  { %8591 = vmatpush3.bf16.msra.mxu0 %v8818_v23 }
0x4718   :  { %8592 = vmatprep.subr.bf16.mxu0 %v9353_v13 }
0x471b   :  { %8593 = vmatpush3.bf16.msra.mxu0 %v8819_v57 }
0x471c   :  { %8594 = vmatprep.subr.bf16.mxu0 %v9353_v13  ;;  %v7488_v13 = vld [vmem:[%s11092_s8] ss:$0 sm:$0xff] }
0x471f   :  { %8595 = vmatpush3.bf16.msra.mxu0 %v8820_v20 }
0x47a1   :  { %v7058_v37 = vpop.xlane.xlu0 %7057 }
0x47a2   :  { %v7061_v52 = vmul.f32 0.01, %v7058_v37 }
0x47a3   :  { %v7060_v42 = vpop.xlane.xlu1 %7059 }
0x47a4   :  { %v7063_v62 = vadd.f32 1e-05, %v7061_v52  ;;  %v7062_v58 = vmul.f32 0.01, %v7060_v42 }
0x47a6   :  { %8861 = vrsqrt.f32 %v7063_v62  ;;  %v7064_v54 = vadd.f32 1e-05, %v7062_v58 }
0x47a8   :  { %8863 = vrsqrt.f32 %v7064_v54 }
0x47b0   :  { %v8862_v59 = vpop.eup %8861 }
0x47b1   :  { %v7067_v61 = vmul.f32 %v8862_v59, %v7053_v36 }
0x47b2   :  { %v8864_v15 = vpop.eup %8863 }
0x47b3   :  { %v7068_v4 = vmul.f32 %v8864_v15, %v7054_v33  ;;  %v7075_v40 = vmul.f32 %v7487_v60, %v7067_v61 }
0x47b5   :  { %v7076_v63 = vmul.f32 %v7487_v60, %v7068_v4  ;;  %v7083_v49 = vadd.f32 %v7488_v13, %v7075_v40 }
0x47b7   :  { %v7084_v5 = vadd.f32 %v7488_v13, %v7076_v63 }
0x47b9   :  { %v7101_v43 = vpack.c.bf16 %v7084_v5, %v7083_v49 }
0x47bb   :  { %8597 = vmatmul.mubr.bf16.vlgmr.msra.gmra.mrb[196].mxu0 %v7101_v43 }
0x488e   :  { %v7191_v44 = vpop.f32.mrb[196].mxu0 }
0x488f   :  { %v7192_v0 = vadd.f32 %v7489_v56, %v7191_v44  ;;  %v8598_v50 = vpop.f32.mrb[197].mxu0 }
0x4890   :  { %v7194_v30 = vpop.f32.mrb[198].mxu0 }
0x4891   :  { %7198 = vst [vmem:[#allocation21] sm:$0xff] %v7192_v0  ;;  %v7195_v51 = vadd.f32 %v7489_v56, %v7194_v30  ;;  %v8599_v11 = vpop.f32.mrb[199].mxu0 }
0x4893   :  { %7199 = vst [vmem:[#allocation21 + $0x8] sm:$0xff] %v7195_v51 }
0x4894   :  { %9246 = shalt.err (!%p9243_p7)
}
0x4895   :  { %s11093_s18 = sld [smem:[#allocation87_spill]] }
0x489b   :  { %s9247_s30 = scalar_lea.hbm %s11093_s18, 256 }
0x489c   :  { %p9248_p8 = scmp.ne.s32.totalorder %s11093_s18, %s9247_s30  ;;  %p9251_p9 = scmp.lt.u32.totalorder %s9247_s30, %s11093_s18 }
0x489e   :  { %p9253_p11 = pnand %p9251_p9, %p9248_p8 }
0x48a0   :  { %9256 = shalt.err (!%p9253_p11)
}
0x48a1   :  { %s11094_s1 = smov 8  }
0x48a2   :  { %7211 = dma.vmem_to_hbm [thread:$0]  %s7206_s16, 256, %s11093_s18, [#allocation9], %s11074_s19, %s11074_s19, %s11094_s1  }
0x48a3   :  { %9299 = dma.done.wait [#allocation9], 256  }
0x48a4   :  { %9300 = vsyncadd [#allocation9], 4294967040 }
0x48a5   :  { %7215 = vsyncpa [#allocation8], 1 }
0x48a6   :  { %7216 = vsyncpa [#allocation11], 1 }
0x48a7   :  { %7217 = vsyncpa [#allocation14], 1 }
0x48a8   :  { %7218 = vsyncpa [#allocation17], 1 }
0x48a9   :  { %7219 = vsyncpa [#allocation20], 1 }
0x48aa   :  { %7220 = vsyncpa [#allocation9], 1 }
0x48ab   :  { %7221 = vsyncmov [#allocation6] }
0x48ae   :  { %s7222_s21 = vpop.sfrf %7221 }
0x48af   :  { %p7498_p12 = scmp.ne.s32.totalorder %s7222_s21, 0 }
0x48b1   :  { %7226 = shalt.err (%p7498_p12)  }
0x48b2   :  { %7228 = vsyncmov [#allocation6 + $0x1] }
0x48b5   :  { %s7229_s24 = vpop.sfrf %7228 }
0x48b6   :  { %p7499_p10 = scmp.ne.s32.totalorder %s7229_s24, 0 }
0x48b8   :  { %7233 = shalt.err (%p7499_p10)  }
0x48b9   :  { %7235 = vsyncmov [#allocation6 + $0x2] }
0x48bc   :  { %s7236_s26 = vpop.sfrf %7235 }
0x48bd   :  { %p7500_p0 = scmp.ne.s32.totalorder %s7236_s26, 0 }
0x48bf   :  { %7240 = shalt.err (%p7500_p0)  }
0x48c0   :  { %7242 = vsyncmov [#allocation6 + $0x3] }
0x48c3   :  { %s7243_s19 = vpop.sfrf %7242 }
0x48c4   :  { %p7501_p1 = scmp.ne.s32.totalorder %s7243_s19, 0 }
0x48c6   :  { %7247 = shalt.err (%p7501_p1)  }
0x48c7   :  { %7249 = vsyncmov [#allocation6 + $0x4] }
0x48ca   :  { %s7250_s6 = vpop.sfrf %7249 }
0x48cb   :  { %p7502_p2 = scmp.ne.s32.totalorder %s7250_s6, 0 }
0x48cd   :  { %7254 = shalt.err (%p7502_p2)  }
0x48ce   :  { %7256 = vsyncmov [#allocation6 + $0x5] }
0x48d1   :  { %s7257_s20 = vpop.sfrf %7256 }
0x48d2   :  { %p7503_p3 = scmp.ne.s32.totalorder %s7257_s20, 0 }
0x48d4   :  { %7261 = shalt.err (%p7503_p3)  }
0x48d5   :  { %7263 = vsyncmov [#allocation6 + $0x6] }
0x48d8   :  { %s7264_s23 = vpop.sfrf %7263 }
0x48d9   :  { %p7504_p6 = scmp.ne.s32.totalorder %s7264_s23, 0 }
0x48db   :  { %7268 = shalt.err (%p7504_p6)  }
0x48dc   :  { %7270 = vsyncmov [#allocation6 + $0x7] }
0x48df   :  { %s7271_s12 = vpop.sfrf %7270 }
0x48e0   :  { %p7505_p4 = scmp.ne.s32.totalorder %s7271_s12, 0 }
0x48e2   :  { %7275 = shalt.err (%p7505_p4)  }
0x48e3   :  { %7277 = vsyncmov [#allocation6 + $0x8] }
0x48e6   :  { %s7278_s25 = vpop.sfrf %7277 }
0x48e7   :  { %p7506_p5 = scmp.ne.s32.totalorder %s7278_s25, 0 }
0x48e9   :  { %7282 = shalt.err (%p7506_p5)  }
0x48ea   :  { %7284 = vsyncmov [#allocation6 + $0x9] }
0x48ed   :  { %s7285_s29 = vpop.sfrf %7284 }
0x48ee   :  { %p7507_p13 = scmp.ne.s32.totalorder %s7285_s29, 0 }
0x48f0   :  { %7289 = shalt.err (%p7507_p13)  }
0x48f1   :  { %7291 = vsyncmov [#allocation6 + $0xa] }
0x48f4   :  { %s7292_s10 = vpop.sfrf %7291 }
0x48f5   :  { %p7508_p7 = scmp.ne.s32.totalorder %s7292_s10, 0 }
0x48f7   :  { %7296 = shalt.err (%p7508_p7)  }
0x48f8   :  { %7298 = vsyncmov [#allocation6 + $0xb] }
0x48fb   :  { %s7299_s28 = vpop.sfrf %7298 }
0x48fc   :  { %p7509_p8 = scmp.ne.s32.totalorder %s7299_s28, 0 }
0x48fe   :  { %7303 = shalt.err (%p7509_p8)  }
0x48ff   :  { %7305 = vsyncmov [#allocation6 + $0xc] }
0x4902   :  { %s7306_s14 = vpop.sfrf %7305 }
0x4903   :  { %p7510_p9 = scmp.ne.s32.totalorder %s7306_s14, 0 }
0x4905   :  { %7310 = shalt.err (%p7510_p9)  }
0x4906   :  { %7312 = vsyncmov [#allocation6 + $0xd] }
0x4909   :  { %s7313_s3 = vpop.sfrf %7312 }
0x490a   :  { %p7511_p11 = scmp.ne.s32.totalorder %s7313_s3, 0 }
0x490c   :  { %7317 = shalt.err (%p7511_p11)  }
0x490d   :  { %7319 = vsyncmov [#allocation6 + $0xe] }
0x4910   :  { %s7320_s7 = vpop.sfrf %7319 }
0x4911   :  { %p7512_p12 = scmp.ne.s32.totalorder %s7320_s7, 0 }
0x4913   :  { %7324 = shalt.err (%p7512_p12)  }
0x4914   :  { %7326 = vsyncmov [#allocation6 + $0xf] }
0x4917   :  { %s7327_s9 = vpop.sfrf %7326 }
0x4918   :  { %p7513_p10 = scmp.ne.s32.totalorder %s7327_s9, 0 }
0x491a   :  { %7331 = shalt.err (%p7513_p10)  }

</bundles_post_ra>
